<compile_context>
chip_gen: v7x
topology: tpu7x:2x2x1
jax: 0.10.0
libtpu: 0.0.40
codegen_flags: <defaults>
</compile_context>

<pallas_src>
import jax
import jax.numpy as jnp
from jax.experimental import pallas as pl
from jax.experimental.pallas import tpu as pltpu


def _round_up(v, m):
    return (v + m - 1) // m * m


# ----------------------------------------------------------------------------
# Pallas kernel: one batch tile per grid step, all weights resident in VMEM.
# ----------------------------------------------------------------------------
def _pyramid_kernel(x_ref,
                    w1_ref, b1_ref,
                    w2_ref, b2_ref,
                    w3_ref, b3_ref,
                    w4_ref, b4_ref,
                    w5_ref, b5_ref,
                    o_ref):
    h = x_ref[...].astype(jnp.bfloat16)

    def layer(h, w_ref, b_ref):
        # bf16 x bf16 -> f32 accumulate on the MXU; bias + ReLU epilogue in f32.
        z = jnp.dot(h, w_ref[...], preferred_element_type=jnp.float32) + b_ref[...]
        return jnp.maximum(z, 0.0).astype(jnp.bfloat16)   # ReLU; Dropout = identity

    h = layer(h, w1_ref, b1_ref)
    h = layer(h, w2_ref, b2_ref)
    h = layer(h, w3_ref, b3_ref)
    h = layer(h, w4_ref, b4_ref)

    z = jnp.dot(h, w5_ref[...], preferred_element_type=jnp.float32) + b5_ref[...]
    o_ref[...] = z.astype(o_ref.dtype)


# ----------------------------------------------------------------------------
# Tiling / VMEM-limit helpers.
# ----------------------------------------------------------------------------
def _choose_tiling(n, tile_m_target):
    """Pick (tile_m, n_pad): 128-granule padding, tile_m divides n_pad exactly,
    >=2 grid steps once n_pad >= 256 (keeps both v7x TensorCores busy)."""
    if n < 128:
        t = _round_up(n, 8)          # single small tile; sublane-aligned
        return t, t
    n_pad = _round_up(n, 128)
    cap = max(128, tile_m_target)
    if n_pad >= 256:                 # guarantee at least two grid steps
        cap = min(cap, max(128, (n_pad // 2) // 128 * 128))
    tile_m = 128
    t = 128
    while t <= cap:
        if n_pad % t == 0:
            tile_m = t
        t += 128
    return tile_m, n_pad


def _vmem_limit_bytes():
    """~3/4 of physical VMEM, capped at 96 MiB (v7x: ~48 MiB, v5e/v6e: ~96 MiB)."""
    cap = 64 * 1024 * 1024           # conservative default (v7x per-core)
    try:
        info = pltpu.get_tpu_info()
        cap = int(getattr(info, "vmem_capacity_bytes", cap))
    except Exception:
        pass
    return min(96 * 1024 * 1024, (cap * 3) // 4)


def _resident_spec(shape):
    """Constant index_map (fetched once) + single pipeline buffer."""
    try:
        return pl.BlockSpec(shape, lambda i: (0, 0), pipeline_mode=pl.Buffered(1))
    except TypeError:                # older Pallas without pipeline_mode kwarg
        return pl.BlockSpec(shape, lambda i: (0, 0))


# ----------------------------------------------------------------------------
# Wrapper.
# ----------------------------------------------------------------------------
def pyramid_forward(x, folded_params, output_dim, *, tile_m=512):
    """x: [N, input_dim] f32.  folded_params: (w1,b1,...,w5,b5) from fold_params."""
    n, in_dim = x.shape
    ws = folded_params[0::2]
    bs = folded_params[1::2]
    out_pad = ws[-1].shape[1]

    tile_m, n_pad = _choose_tiling(n, tile_m)
    if n_pad != n:
        x = jnp.pad(x, ((0, n_pad - n), (0, 0)))
    grid = (n_pad // tile_m,)

    x_spec = pl.BlockSpec((tile_m, in_dim), lambda i: (i, 0))
    out_spec = pl.BlockSpec((tile_m, out_pad), lambda i: (i, 0))
    param_specs = []
    for w, b in zip(ws, bs):
        param_specs.append(_resident_spec(w.shape))
        param_specs.append(_resident_spec(b.shape))

    dims = [in_dim] + [w.shape[1] for w in ws]
    flops = 2 * n_pad * sum(a * b for a, b in zip(dims[:-1], dims[1:]))
    bytes_accessed = (sum(int(w.size) * w.dtype.itemsize for w in ws)
                      + sum(int(b.size) * b.dtype.itemsize for b in bs)
                      + n_pad * (in_dim + out_pad) * 4)

    out = pl.pallas_call(
        _pyramid_kernel,
        out_shape=jax.ShapeDtypeStruct((n_pad, out_pad), jnp.float32),
        grid=grid,
        in_specs=[x_spec] + param_specs,
        out_specs=out_spec,
        compiler_params=pltpu.CompilerParams(
            dimension_semantics=("parallel",),
            vmem_limit_bytes=_vmem_limit_bytes(),
        ),
        cost_estimate=pl.CostEstimate(
            flops=int(flops), transcendentals=0, bytes_accessed=int(bytes_accessed)),
    )(x, *folded_params)

    return out[:n, :output_dim]


# ----------------------------------------------------------------------------
# Parameter construction (mirrors the PyTorch __init__, eval mode) + folding.
# ----------------------------------------------------------------------------
def _xavier_normal(key, fan_in, fan_out):
    std = (2.0 / (fan_in + fan_out)) ** 0.5
    # stored (in, out) so the kernel does h @ W  (== x @ weight.T in PyTorch)
    return std * jax.random.normal(key, (fan_in, fan_out), dtype=jnp.float32)


def _folded_bn(dim, eps=1e-5):
    # fresh BatchNorm1d in eval mode: gamma=1, beta=0, running_mean=0, running_var=1
    gamma = jnp.ones((1, dim), jnp.float32)
    beta = jnp.zeros((1, dim), jnp.float32)
    mean = jnp.zeros((1, dim), jnp.float32)
    var = jnp.ones((1, dim), jnp.float32)
    scale = gamma / jnp.sqrt(var + eps)
    shift = beta - mean * scale
    return scale, shift


def make_params(key, input_dim, output_dim):
    """Raw module parameters: (s0,t0, [w,b,s,t]*4, w5,b5) in f32."""
    dims = [input_dim, 2048, 1024, 512, 256, output_dim]
    keys = jax.random.split(key, 5)
    params = list(_folded_bn(dims[0]))                      # input BN
    for i in range(4):                                      # 4 Linear + BN blocks
        w = _xavier_normal(keys[i], dims[i], dims[i + 1])
        b = jnp.zeros((1, dims[i + 1]), jnp.float32)
        s, t = _folded_bn(dims[i + 1])
        params += [w, b, s, t]
    w5 = _xavier_normal(keys[4], dims[4], dims[5])          # final Linear
    b5 = jnp.zeros((1, dims[5]), jnp.float32)
    params += [w5, b5]
    return tuple(params)


def fold_params(raw, *, lane_pad=128):
    """Fold BN affines into the Linear layers, pad the last layer to a lane-dense
    width, cast weights to bf16 (biases stay f32)."""
    (s0, t0,
     w1, c1, s1, t1,
     w2, c2, s2, t2,
     w3, c3, s3, t3,
     w4, c4, s4, t4,
     w5, c5) = raw

    def fold(w, c, s, t):
        # (h @ w + c) * s + t  ==  h @ (w*s) + (c*s + t)      (s,t are (1, out))
        return w * s, c * s + t

    w1f, b1f = fold(w1, c1, s1, t1)
    # fold the input BN:  (x*s0 + t0) @ W + b  ==  x @ (s0^T * W) + (t0 @ W + b)
    b1f = b1f + t0 @ w1f
    w1f = s0.reshape(-1, 1) * w1f
    w2f, b2f = fold(w2, c2, s2, t2)
    w3f, b3f = fold(w3, c3, s3, t3)
    w4f, b4f = fold(w4, c4, s4, t4)

    # pad the output features up to a multiple of 128 (unmasked lane-dense stores)
    out_dim = w5.shape[1]
    out_pad = _round_up(out_dim, lane_pad)
    w5f = jnp.pad(w5, ((0, 0), (0, out_pad - out_dim)))
    b5f = jnp.pad(c5, ((0, 0), (0, out_pad - out_dim)))

    flat = []
    for w, b in zip((w1f, w2f, w3f, w4f, w5f), (b1f, b2f, b3f, b4f, b5f)):
        flat.append(w.astype(jnp.bfloat16))
        flat.append(b.astype(jnp.float32))
    return tuple(flat)


# ----------------------------------------------------------------------------
# Pure-JAX f32 reference (eval-mode module semantics) for the correctness check.
# ----------------------------------------------------------------------------
def reference_forward(x, raw):
    (s0, t0,
     w1, c1, s1, t1,
     w2, c2, s2, t2,
     w3, c3, s3, t3,
     w4, c4, s4, t4,
     w5, c5) = raw
    h = x * s0 + t0
    for w, c, s, t in ((w1, c1, s1, t1), (w2, c2, s2, t2),
                       (w3, c3, s3, t3), (w4, c4, s4, t4)):
        h = jnp.maximum((h @ w + c) * s + t, 0.0)
    return h @ w5 + c5


if __name__ == "__main__":
    INPUT_DIM, OUTPUT_DIM, BATCH = 32, 16, 8

    key = jax.random.PRNGKey(0)
    kx, kp = jax.random.split(key)
    x = jax.random.normal(kx, (BATCH, INPUT_DIM), dtype=jnp.float32)
    raw = make_params(kp, INPUT_DIM, OUTPUT_DIM)
    folded = fold_params(raw)

    out = pyramid_forward(x, folded, OUTPUT_DIM)
    out = jax.block_until_ready(out)

    ref = reference_forward(x, raw)
    assert out.shape == (BATCH, OUTPUT_DIM)
    # bf16 matmul inputs in the kernel vs pure-f32 reference -> loosened tolerance
    max_err = float(jnp.max(jnp.abs(out - ref)))
    assert jnp.allclose(out, ref, atol=3e-2, rtol=3e-2), \
        f"mismatch vs reference (max abs err {max_err})"

    print("KERNEL_OK")
</pallas_src>

<mosaic_0001>
module attributes {stable_mosaic.version = 11 : i64} {
  func.func @_pyramid_kernel(%arg0: i32, %arg1: memref<8x32xf32, #tpu.memory_space<vmem>>, %arg2: memref<32x2048xbf16, #tpu.memory_space<vmem>>, %arg3: memref<1x2048xf32, #tpu.memory_space<vmem>>, %arg4: memref<2048x1024xbf16, #tpu.memory_space<vmem>>, %arg5: memref<1x1024xf32, #tpu.memory_space<vmem>>, %arg6: memref<1024x512xbf16, #tpu.memory_space<vmem>>, %arg7: memref<1x512xf32, #tpu.memory_space<vmem>>, %arg8: memref<512x256xbf16, #tpu.memory_space<vmem>>, %arg9: memref<1x256xf32, #tpu.memory_space<vmem>>, %arg10: memref<256x128xbf16, #tpu.memory_space<vmem>>, %arg11: memref<1x128xf32, #tpu.memory_space<vmem>>, %arg12: memref<8x128xf32, #tpu.memory_space<vmem>>) attributes {dimension_semantics = [#tpu.dimension_semantics<parallel>], iteration_bounds = array<i64: 1>, scalar_prefetch = 0 : i64, scratch_operands = 0 : i64, tpu.core_type = #tpu.core_type<tc>, window_params = [{transform_indices = @transform_0, window_bounds = array<i64: 8, 32>}, {pipeline_mode = #tpu.pipeline_mode<synchronous>, transform_indices = @transform_1, window_bounds = array<i64: 32, 2048>}, {pipeline_mode = #tpu.pipeline_mode<synchronous>, transform_indices = @transform_2, window_bounds = array<i64: 1, 2048>}, {pipeline_mode = #tpu.pipeline_mode<synchronous>, transform_indices = @transform_3, window_bounds = array<i64: 2048, 1024>}, {pipeline_mode = #tpu.pipeline_mode<synchronous>, transform_indices = @transform_4, window_bounds = array<i64: 1, 1024>}, {pipeline_mode = #tpu.pipeline_mode<synchronous>, transform_indices = @transform_5, window_bounds = array<i64: 1024, 512>}, {pipeline_mode = #tpu.pipeline_mode<synchronous>, transform_indices = @transform_6, window_bounds = array<i64: 1, 512>}, {pipeline_mode = #tpu.pipeline_mode<synchronous>, transform_indices = @transform_7, window_bounds = array<i64: 512, 256>}, {pipeline_mode = #tpu.pipeline_mode<synchronous>, transform_indices = @transform_8, window_bounds = array<i64: 1, 256>}, {pipeline_mode = #tpu.pipeline_mode<synchronous>, transform_indices = @transform_9, window_bounds = array<i64: 256, 128>}, {pipeline_mode = #tpu.pipeline_mode<synchronous>, transform_indices = @transform_10, window_bounds = array<i64: 1, 128>}, {transform_indices = @transform_11, window_bounds = array<i64: 8, 128>}]} {
    %c0 = arith.constant 0 : index
    %c0_0 = arith.constant 0 : index
    %0 = vector.load %arg1[%c0, %c0_0] : memref<8x32xf32, #tpu.memory_space<vmem>>, vector<8x32xf32>
    %1 = arith.truncf %0 : vector<8x32xf32> to vector<8x32xbf16>
    %c0_1 = arith.constant 0 : index
    %c0_2 = arith.constant 0 : index
    %2 = vector.load %arg2[%c0_1, %c0_2] : memref<32x2048xbf16, #tpu.memory_space<vmem>>, vector<32x2048xbf16>
    %cst = arith.constant dense<0.000000e+00> : vector<8x2048xf32>
    %3 = tpu.matmul %1, %2, %cst {dimension_numbers = #tpu.dot_dimension_numbers<[1], [0], [0], [1], [0, 0, 1, 1], [], []>} : vector<8x32xbf16>, vector<32x2048xbf16>, vector<8x2048xf32> -> vector<8x2048xf32>
    %c0_3 = arith.constant 0 : index
    %c0_4 = arith.constant 0 : index
    %4 = vector.load %arg3[%c0_3, %c0_4] : memref<1x2048xf32, #tpu.memory_space<vmem>>, vector<1x2048xf32>
    %5 = vector.broadcast %4 : vector<1x2048xf32> to vector<8x2048xf32>
    %6 = arith.addf %3, %5 : vector<8x2048xf32>
    %cst_5 = arith.constant 0.000000e+00 : f32
    %7 = vector.broadcast %cst_5 : f32 to vector<8x2048xf32>
    %8 = arith.maximumf %6, %7 : vector<8x2048xf32>
    %9 = arith.truncf %8 : vector<8x2048xf32> to vector<8x2048xbf16>
    %c0_6 = arith.constant 0 : index
    %c0_7 = arith.constant 0 : index
    %10 = vector.load %arg4[%c0_6, %c0_7] : memref<2048x1024xbf16, #tpu.memory_space<vmem>>, vector<2048x1024xbf16>
    %cst_8 = arith.constant dense<0.000000e+00> : vector<8x1024xf32>
    %11 = tpu.matmul %9, %10, %cst_8 {dimension_numbers = #tpu.dot_dimension_numbers<[1], [0], [0], [1], [0, 0, 1, 1], [], []>} : vector<8x2048xbf16>, vector<2048x1024xbf16>, vector<8x1024xf32> -> vector<8x1024xf32>
    %c0_9 = arith.constant 0 : index
    %c0_10 = arith.constant 0 : index
    %12 = vector.load %arg5[%c0_9, %c0_10] : memref<1x1024xf32, #tpu.memory_space<vmem>>, vector<1x1024xf32>
    %13 = vector.broadcast %12 : vector<1x1024xf32> to vector<8x1024xf32>
    %14 = arith.addf %11, %13 : vector<8x1024xf32>
    %cst_11 = arith.constant 0.000000e+00 : f32
    %15 = vector.broadcast %cst_11 : f32 to vector<8x1024xf32>
    %16 = arith.maximumf %14, %15 : vector<8x1024xf32>
    %17 = arith.truncf %16 : vector<8x1024xf32> to vector<8x1024xbf16>
    %c0_12 = arith.constant 0 : index
    %c0_13 = arith.constant 0 : index
    %18 = vector.load %arg6[%c0_12, %c0_13] : memref<1024x512xbf16, #tpu.memory_space<vmem>>, vector<1024x512xbf16>
    %cst_14 = arith.constant dense<0.000000e+00> : vector<8x512xf32>
    %19 = tpu.matmul %17, %18, %cst_14 {dimension_numbers = #tpu.dot_dimension_numbers<[1], [0], [0], [1], [0, 0, 1, 1], [], []>} : vector<8x1024xbf16>, vector<1024x512xbf16>, vector<8x512xf32> -> vector<8x512xf32>
    %c0_15 = arith.constant 0 : index
    %c0_16 = arith.constant 0 : index
    %20 = vector.load %arg7[%c0_15, %c0_16] : memref<1x512xf32, #tpu.memory_space<vmem>>, vector<1x512xf32>
    %21 = vector.broadcast %20 : vector<1x512xf32> to vector<8x512xf32>
    %22 = arith.addf %19, %21 : vector<8x512xf32>
    %cst_17 = arith.constant 0.000000e+00 : f32
    %23 = vector.broadcast %cst_17 : f32 to vector<8x512xf32>
    %24 = arith.maximumf %22, %23 : vector<8x512xf32>
    %25 = arith.truncf %24 : vector<8x512xf32> to vector<8x512xbf16>
    %c0_18 = arith.constant 0 : index
    %c0_19 = arith.constant 0 : index
    %26 = vector.load %arg8[%c0_18, %c0_19] : memref<512x256xbf16, #tpu.memory_space<vmem>>, vector<512x256xbf16>
    %cst_20 = arith.constant dense<0.000000e+00> : vector<8x256xf32>
    %27 = tpu.matmul %25, %26, %cst_20 {dimension_numbers = #tpu.dot_dimension_numbers<[1], [0], [0], [1], [0, 0, 1, 1], [], []>} : vector<8x512xbf16>, vector<512x256xbf16>, vector<8x256xf32> -> vector<8x256xf32>
    %c0_21 = arith.constant 0 : index
    %c0_22 = arith.constant 0 : index
    %28 = vector.load %arg9[%c0_21, %c0_22] : memref<1x256xf32, #tpu.memory_space<vmem>>, vector<1x256xf32>
    %29 = vector.broadcast %28 : vector<1x256xf32> to vector<8x256xf32>
    %30 = arith.addf %27, %29 : vector<8x256xf32>
    %cst_23 = arith.constant 0.000000e+00 : f32
    %31 = vector.broadcast %cst_23 : f32 to vector<8x256xf32>
    %32 = arith.maximumf %30, %31 : vector<8x256xf32>
    %33 = arith.truncf %32 : vector<8x256xf32> to vector<8x256xbf16>
    %c0_24 = arith.constant 0 : index
    %c0_25 = arith.constant 0 : index
    %34 = vector.load %arg10[%c0_24, %c0_25] : memref<256x128xbf16, #tpu.memory_space<vmem>>, vector<256x128xbf16>
    %cst_26 = arith.constant dense<0.000000e+00> : vector<8x128xf32>
    %35 = tpu.matmul %33, %34, %cst_26 {dimension_numbers = #tpu.dot_dimension_numbers<[1], [0], [0], [1], [0, 0, 1, 1], [], []>} : vector<8x256xbf16>, vector<256x128xbf16>, vector<8x128xf32> -> vector<8x128xf32>
    %c0_27 = arith.constant 0 : index
    %c0_28 = arith.constant 0 : index
    %36 = vector.load %arg11[%c0_27, %c0_28] : memref<1x128xf32, #tpu.memory_space<vmem>>, vector<1x128xf32>
    %37 = vector.broadcast %36 : vector<1x128xf32> to vector<8x128xf32>
    %38 = arith.addf %35, %37 : vector<8x128xf32>
    %c0_29 = arith.constant 0 : index
    %c0_30 = arith.constant 0 : index
    %39 = vector.load %arg12[%c0_29, %c0_30] : memref<8x128xf32, #tpu.memory_space<vmem>>, vector<8x128xf32>
    tpu.vector_store %arg12[%c0_29, %c0_30], %38 {strides = array<i32>} : memref<8x128xf32, #tpu.memory_space<vmem>>, vector<8x128xf32>,
    return
  }
  func.func @transform_0(%arg0: i32) -> (i32, i32) {
    %c0_i32 = arith.constant 0 : i32
    %c0_i32_0 = arith.constant 0 : i32
    return %arg0, %c0_i32 : i32, i32
  }
  func.func @transform_1(%arg0: i32) -> (i32, i32) {
    %c0_i32 = arith.constant 0 : i32
    %c0_i32_0 = arith.constant 0 : i32
    %c0_i32_1 = arith.constant 0 : i32
    return %c0_i32, %c0_i32_0 : i32, i32
  }
  func.func @transform_2(%arg0: i32) -> (i32, i32) {
    %c0_i32 = arith.constant 0 : i32
    %c0_i32_0 = arith.constant 0 : i32
    %c0_i32_1 = arith.constant 0 : i32
    return %c0_i32, %c0_i32_0 : i32, i32
  }
  func.func @transform_3(%arg0: i32) -> (i32, i32) {
    %c0_i32 = arith.constant 0 : i32
    %c0_i32_0 = arith.constant 0 : i32
    %c0_i32_1 = arith.constant 0 : i32
    return %c0_i32, %c0_i32_0 : i32, i32
  }
  func.func @transform_4(%arg0: i32) -> (i32, i32) {
    %c0_i32 = arith.constant 0 : i32
    %c0_i32_0 = arith.constant 0 : i32
    %c0_i32_1 = arith.constant 0 : i32
    return %c0_i32, %c0_i32_0 : i32, i32
  }
  func.func @transform_5(%arg0: i32) -> (i32, i32) {
    %c0_i32 = arith.constant 0 : i32
    %c0_i32_0 = arith.constant 0 : i32
    %c0_i32_1 = arith.constant 0 : i32
    return %c0_i32, %c0_i32_0 : i32, i32
  }
  func.func @transform_6(%arg0: i32) -> (i32, i32) {
    %c0_i32 = arith.constant 0 : i32
    %c0_i32_0 = arith.constant 0 : i32
    %c0_i32_1 = arith.constant 0 : i32
    return %c0_i32, %c0_i32_0 : i32, i32
  }
  func.func @transform_7(%arg0: i32) -> (i32, i32) {
    %c0_i32 = arith.constant 0 : i32
    %c0_i32_0 = arith.constant 0 : i32
    %c0_i32_1 = arith.constant 0 : i32
    return %c0_i32, %c0_i32_0 : i32, i32
  }
  func.func @transform_8(%arg0: i32) -> (i32, i32) {
    %c0_i32 = arith.constant 0 : i32
    %c0_i32_0 = arith.constant 0 : i32
    %c0_i32_1 = arith.constant 0 : i32
    return %c0_i32, %c0_i32_0 : i32, i32
  }
  func.func @transform_9(%arg0: i32) -> (i32, i32) {
    %c0_i32 = arith.constant 0 : i32
    %c0_i32_0 = arith.constant 0 : i32
    %c0_i32_1 = arith.constant 0 : i32
    return %c0_i32, %c0_i32_0 : i32, i32
  }
  func.func @transform_10(%arg0: i32) -> (i32, i32) {
    %c0_i32 = arith.constant 0 : i32
    %c0_i32_0 = arith.constant 0 : i32
    %c0_i32_1 = arith.constant 0 : i32
    return %c0_i32, %c0_i32_0 : i32, i32
  }
  func.func @transform_11(%arg0: i32) -> (i32, i32) {
    %c0_i32 = arith.constant 0 : i32
    %c0_i32_0 = arith.constant 0 : i32
    return %arg0, %c0_i32 : i32, i32
  }
}

</mosaic_0001>

<bundles_post_ra>
// kernel: tpu_custom_call.1
= control target key start
LH: loop header
LB: loop body
LE: loop exit
PB: predicated region body
PF: predicated region fallthrough
CT: control target
= control target key end

     0   :  { %16 = vsyncpa [#allocation3], 0  ;;  %s13810_s0 = inlined_call_operand.hbm [shape: f32[8,32], index: 0, kind: input, shape index: {}]   ;;  %s13811_s1 = inlined_call_operand.hbm [shape: bf16[32,2048], index: 1, kind: input, shape index: {}]   ;;  %s13812_s2 = inlined_call_operand.hbm [shape: f32[1,2048], index: 2, kind: input, shape index: {}]   ;;  %s13813_s3 = inlined_call_operand.hbm [shape: bf16[2048,1024], index: 3, kind: input, shape index: {}]   ;;  %s13814_s4 = inlined_call_operand.hbm [shape: f32[1,1024], index: 4, kind: input, shape index: {}]   ;;  %s13815_s5 = inlined_call_operand.hbm [shape: bf16[1024,512], index: 5, kind: input, shape index: {}]   ;;  %s13816_s6 = inlined_call_operand.hbm [shape: f32[1,512], index: 6, kind: input, shape index: {}]   ;;  %s13817_s7 = inlined_call_operand.hbm [shape: bf16[512,256], index: 7, kind: input, shape index: {}]   ;;  %s13818_s8 = inlined_call_operand.hbm [shape: f32[1,256], index: 8, kind: input, shape index: {}]   ;;  %s13819_s9 = inlined_call_operand.hbm [shape: bf16[256,128], index: 9, kind: input, shape index: {}]   ;;  %s13820_s10 = inlined_call_operand.hbm [shape: f32[1,128], index: 10, kind: input, shape index: {}]   ;;  %s13821_s11 = inlined_call_operand.hbm [shape: f32[8,128], index: 11, kind: output, shape index: {}]  }
   0x1   :  { %17 = vsyncpa [#allocation6], 0 }
   0x2   :  { %18 = vsyncpa [#allocation9], 0 }
   0x3   :  { %19 = vsyncpa [#allocation12], 0 }
   0x4   :  { %20 = vsyncpa [#allocation15], 0 }
   0x5   :  { %21 = vsyncpa [#allocation18], 0 }
   0x6   :  { %22 = vsyncpa [#allocation4], 0  ;;  %s13279_s17 = smov [#allocation5]   ;;  %s13001_s21 = scalar_lea.hbm %s13811_s1, 4096 }
   0x7   :  { %s38_s18 = sshll.u32 %s13279_s17, 4  ;;  %p13002_p0 = scmp.ne.s32.totalorder %s13811_s1, %s13001_s21  ;;  %s39_s18 = int_to_ptr.vmem [resolvable:$true] %s38_s18 }
   0x8   :  { %p13005_p1 = scmp.lt.u32.totalorder %s13001_s21, %s13811_s1 }
   0xa   :  { %p13007_p2 = pnand %p13005_p1, %p13002_p0 }
   0xc   :  { %13010 = shalt.err (!%p13007_p2)
}
   0xd   :  { %s13011_s26 = scalar_lea.vmem %s39_s18, 4096  ;;  %p13016_p4 = scmp.lt.s32.totalorder %s39_s18, %s39_s18 }
   0xe   :  { %p13012_p3 = scmp.ne.s32.totalorder %s39_s18, %s13011_s26  ;;  %p13017_p5 = scmp.lt.s32.totalorder %s13011_s26, %s13011_s26 }
  0x10   :  { %p13018_p6 = por %p13017_p5, %p13016_p4 }
  0x12   :  { %p13019_p7 = pnand %p13018_p6, %p13012_p3 }
  0x14   :  { %13022 = shalt.err (!%p13019_p7)
}
  0x15   :  { %s13280_s27 = smov 1024   ;;  %s13281_s28 = smov 64  }
  0x16   :  { %44 = dma.hbm_to_vmem [thread:$0]  %s13811_s1, 4096, %s39_s18, [#allocation6], %s13280_s27, %s13280_s27, %s13281_s28  }
  0x17   :  { %s13282_s12 = smov [#allocation8]   ;;  %s13023_s16 = scalar_lea.hbm %s13813_s3, 131072 }
  0x18   :  { %s60_s13 = sshll.u32 %s13282_s12, 4  ;;  %p13024_p8 = scmp.ne.s32.totalorder %s13813_s3, %s13023_s16  ;;  %s61_s13 = int_to_ptr.vmem [resolvable:$true] %s60_s13 }
  0x19   :  { %p13027_p9 = scmp.lt.u32.totalorder %s13023_s16, %s13813_s3 }
  0x1b   :  { %p13029_p10 = pnand %p13027_p9, %p13024_p8 }
  0x1d   :  { %13032 = shalt.err (!%p13029_p10)
}
  0x1e   :  { %s13033_s22 = scalar_lea.vmem %s61_s13, 131072  ;;  %p13038_p12 = scmp.lt.s32.totalorder %s61_s13, %s61_s13 }
  0x1f   :  { %p13034_p11 = scmp.ne.s32.totalorder %s61_s13, %s13033_s22  ;;  %p13039_p13 = scmp.lt.s32.totalorder %s13033_s22, %s13033_s22 }
  0x21   :  { %p13040_p0 = por %p13039_p13, %p13038_p12 }
  0x23   :  { %p13041_p1 = pnand %p13040_p0, %p13034_p11 }
  0x25   :  { %13044 = shalt.err (!%p13041_p1)
}
  0x26   :  { %s13283_s1 = smov 512   ;;  %s13284_s18 = smov 32  }
  0x27   :  { %66 = dma.hbm_to_vmem [thread:$0]  %s13813_s3, 131072, %s61_s13, [#allocation9], %s13283_s1, %s13283_s1, %s13284_s18  }
  0x28   :  { %s13285_s25 = smov [#allocation11]   ;;  %s13045_s30 = scalar_lea.hbm %s13815_s5, 32768 }
  0x29   :  { %s82_s26 = sshll.u32 %s13285_s25, 4  ;;  %p13046_p2 = scmp.ne.s32.totalorder %s13815_s5, %s13045_s30  ;;  %s83_s26 = int_to_ptr.vmem [resolvable:$true] %s82_s26 }
  0x2a   :  { %p13049_p3 = scmp.lt.u32.totalorder %s13045_s30, %s13815_s5 }
  0x2c   :  { %p13051_p4 = pnand %p13049_p3, %p13046_p2 }
  0x2e   :  { %13054 = shalt.err (!%p13051_p4)
}
  0x2f   :  { %s13055_s17 = scalar_lea.vmem %s83_s26, 32768  ;;  %p13060_p6 = scmp.lt.s32.totalorder %s83_s26, %s83_s26 }
  0x30   :  { %p13056_p5 = scmp.ne.s32.totalorder %s83_s26, %s13055_s17  ;;  %p13061_p7 = scmp.lt.s32.totalorder %s13055_s17, %s13055_s17 }
  0x32   :  { %p13062_p8 = por %p13061_p7, %p13060_p6 }
  0x34   :  { %p13063_p9 = pnand %p13062_p8, %p13056_p5 }
  0x36   :  { %13066 = shalt.err (!%p13063_p9)
}
  0x37   :  { %s13286_s3 = smov 256   ;;  %s13287_s13 = smov 16  }
  0x38   :  { %88 = dma.hbm_to_vmem [thread:$0]  %s13815_s5, 32768, %s83_s26, [#allocation12], %s13286_s3, %s13286_s3, %s13287_s13  }
  0x39   :  { %s13288_s21 = smov [#allocation14]   ;;  %s13067_s23 = scalar_lea.hbm %s13817_s7, 8192 }
  0x3a   :  { %s104_s22 = sshll.u32 %s13288_s21, 4  ;;  %p13068_p10 = scmp.ne.s32.totalorder %s13817_s7, %s13067_s23  ;;  %s105_s22 = int_to_ptr.vmem [resolvable:$true] %s104_s22 }
  0x3b   :  { %p13071_p11 = scmp.lt.u32.totalorder %s13067_s23, %s13817_s7 }
  0x3d   :  { %p13073_p12 = pnand %p13071_p11, %p13068_p10 }
  0x3f   :  { %13076 = shalt.err (!%p13073_p12)
}
  0x40   :  { %s13077_s30 = scalar_lea.vmem %s105_s22, 8192  ;;  %p13082_p0 = scmp.lt.s32.totalorder %s105_s22, %s105_s22 }
  0x41   :  { %p13078_p13 = scmp.ne.s32.totalorder %s105_s22, %s13077_s30  ;;  %p13083_p1 = scmp.lt.s32.totalorder %s13077_s30, %s13077_s30 }
  0x43   :  { %p13084_p2 = por %p13083_p1, %p13082_p0 }
  0x45   :  { %p13085_p3 = pnand %p13084_p2, %p13078_p13 }
  0x47   :  { %13088 = shalt.err (!%p13085_p3)
}
  0x48   :  { %s13289_s5 = smov 128   ;;  %s13290_s26 = smov 8  }
  0x49   :  { %110 = dma.hbm_to_vmem [thread:$0]  %s13817_s7, 8192, %s105_s22, [#allocation15], %s13289_s5, %s13289_s5, %s13290_s26  }
  0x4a   :  { %s13291_s15 = smov [#allocation17]   ;;  %s13292_s17 = smov [#allocation2]  }
  0x4b   :  { %s126_s16 = sshll.u32 %s13291_s15, 4  ;;  %s29_s3 = sshll.u32 %s13292_s17, 4  ;;  %s127_s16 = int_to_ptr.vmem [resolvable:$true] %s126_s16  ;;  %s30_s3 = int_to_ptr.vmem [resolvable:$true] %s29_s3 }
  0x4c   :  { %s13089_s20 = scalar_lea.hbm %s13819_s9, 2048 }
  0x4d   :  { %p13090_p4 = scmp.ne.s32.totalorder %s13819_s9, %s13089_s20  ;;  %p13093_p5 = scmp.lt.u32.totalorder %s13089_s20, %s13819_s9 }
  0x4f   :  { %p13095_p6 = pnand %p13093_p5, %p13090_p4 }
  0x51   :  { %13098 = shalt.err (!%p13095_p6)
}
  0x52   :  { %s13099_s7 = scalar_lea.vmem %s127_s16, 2048  ;;  %p13104_p8 = scmp.lt.s32.totalorder %s127_s16, %s127_s16 }
  0x53   :  { %p13100_p7 = scmp.ne.s32.totalorder %s127_s16, %s13099_s7  ;;  %p13105_p9 = scmp.lt.s32.totalorder %s13099_s7, %s13099_s7 }
  0x55   :  { %p13106_p10 = por %p13105_p9, %p13104_p8 }
  0x57   :  { %p13107_p11 = pnand %p13106_p10, %p13100_p7 }
  0x59   :  { %13110 = shalt.err (!%p13107_p11)
}
  0x5a   :  { %s13293_s22 = smov 4   ;;  %s13111_s30 = scalar_lea.hbm %s13810_s0, 128 }
  0x5b   :  { %132 = dma.hbm_to_vmem [thread:$0]  %s13819_s9, 2048, %s127_s16, [#allocation18], %s13281_s28, %s13281_s28, %s13293_s22  }
  0x5c   :  { %p13112_p12 = scmp.ne.s32.totalorder %s13810_s0, %s13111_s30  ;;  %p13115_p13 = scmp.lt.u32.totalorder %s13111_s30, %s13810_s0 }
  0x5e   :  { %p13117_p0 = pnand %p13115_p13, %p13112_p12 }
  0x60   :  { %13120 = shalt.err (!%p13117_p0)
}
  0x61   :  { %s13121_s15 = scalar_lea.vmem %s30_s3, 128  ;;  %p13126_p2 = scmp.lt.s32.totalorder %s30_s3, %s30_s3 }
  0x62   :  { %p13122_p1 = scmp.ne.s32.totalorder %s30_s3, %s13121_s15  ;;  %p13127_p3 = scmp.lt.s32.totalorder %s13121_s15, %s13121_s15 }
  0x64   :  { %p13128_p4 = por %p13127_p3, %p13126_p2 }
  0x66   :  { %p13129_p5 = pnand %p13128_p4, %p13122_p1 }
  0x68   :  { %13132 = shalt.err (!%p13129_p5)
}
  0x69   :  { %32 = dma.hbm_to_vmem [thread:$0]  %s13810_s0, 128, %s30_s3, [#allocation3]  }
  0x6a   :  { %s13294_s16 = smov [#allocation7]   ;;  %s13295_s13 = smov [#allocation10]  }
  0x6b   :  { %s51_s17 = sshll.u32 %s13294_s16, 4  ;;  %s73_s19 = sshll.u32 %s13295_s13, 4  ;;  %s52_s17 = int_to_ptr.vmem [resolvable:$true] %s51_s17  ;;  %s74_s19 = int_to_ptr.vmem [resolvable:$true] %s73_s19 }
  0x6c   :  { %s13133_s1 = scalar_lea.hbm %s13812_s2, 256 }
  0x6d   :  { %p13134_p6 = scmp.ne.s32.totalorder %s13812_s2, %s13133_s1  ;;  %p13137_p7 = scmp.lt.u32.totalorder %s13133_s1, %s13812_s2 }
  0x6f   :  { %p13139_p8 = pnand %p13137_p7, %p13134_p6 }
  0x71   :  { %13142 = shalt.err (!%p13139_p8)
}
  0x72   :  { %s13143_s0 = scalar_lea.vmem %s52_s17, 256  ;;  %p13148_p10 = scmp.lt.s32.totalorder %s52_s17, %s52_s17 }
  0x73   :  { %p13144_p9 = scmp.ne.s32.totalorder %s52_s17, %s13143_s0  ;;  %p13149_p11 = scmp.lt.s32.totalorder %s13143_s0, %s13143_s0 }
  0x75   :  { %p13150_p12 = por %p13149_p11, %p13148_p10 }
  0x77   :  { %p13151_p13 = pnand %p13150_p12, %p13144_p9 }
  0x79   :  { %13154 = shalt.err (!%p13151_p13)
}
  0x7a   :  { %54 = dma.hbm_to_vmem [thread:$0]  %s13812_s2, 256, %s52_s17, [#allocation6]  }
  0x7b   :  { %s13155_s29 = scalar_lea.hbm %s13814_s4, 128 }
  0x7c   :  { %p13156_p0 = scmp.ne.s32.totalorder %s13814_s4, %s13155_s29  ;;  %p13159_p1 = scmp.lt.u32.totalorder %s13155_s29, %s13814_s4 }
  0x7e   :  { %p13161_p2 = pnand %p13159_p1, %p13156_p0 }
  0x80   :  { %13164 = shalt.err (!%p13161_p2)
}
  0x81   :  { %s13165_s14 = scalar_lea.vmem %s74_s19, 128  ;;  %p13170_p4 = scmp.lt.s32.totalorder %s74_s19, %s74_s19 }
  0x82   :  { %p13166_p3 = scmp.ne.s32.totalorder %s74_s19, %s13165_s14  ;;  %p13171_p5 = scmp.lt.s32.totalorder %s13165_s14, %s13165_s14 }
  0x84   :  { %p13172_p6 = por %p13171_p5, %p13170_p4 }
  0x86   :  { %p13173_p7 = pnand %p13172_p6, %p13166_p3 }
  0x88   :  { %13176 = shalt.err (!%p13173_p7)
}
  0x89   :  { %76 = dma.hbm_to_vmem [thread:$0]  %s13814_s4, 128, %s74_s19, [#allocation9]  }
  0x8a   :  { %s13296_s9 = smov [#allocation13]   ;;  %s13297_s16 = smov [#allocation16]  }
  0x8b   :  { %s95_s28 = sshll.u32 %s13296_s9, 4  ;;  %s117_s17 = sshll.u32 %s13297_s16, 4  ;;  %s96_s28 = int_to_ptr.vmem [resolvable:$true] %s95_s28  ;;  %s118_s17 = int_to_ptr.vmem [resolvable:$true] %s117_s17 }
  0x8c   :  { %s13177_s21 = scalar_lea.hbm %s13816_s6, 64 }
  0x8d   :  { %p13178_p8 = scmp.ne.s32.totalorder %s13816_s6, %s13177_s21  ;;  %p13181_p9 = scmp.lt.u32.totalorder %s13177_s21, %s13816_s6 }
  0x8f   :  { %p13183_p10 = pnand %p13181_p9, %p13178_p8 }
  0x91   :  { %13186 = shalt.err (!%p13183_p10)
}
  0x92   :  { %s13187_s4 = scalar_lea.vmem %s96_s28, 64  ;;  %p13192_p12 = scmp.lt.s32.totalorder %s96_s28, %s96_s28 }
  0x93   :  { %p13188_p11 = scmp.ne.s32.totalorder %s96_s28, %s13187_s4  ;;  %p13193_p13 = scmp.lt.s32.totalorder %s13187_s4, %s13187_s4 }
  0x95   :  { %p13194_p0 = por %p13193_p13, %p13192_p12 }
  0x97   :  { %p13195_p1 = pnand %p13194_p0, %p13188_p11 }
  0x99   :  { %13198 = shalt.err (!%p13195_p1)
}
  0x9a   :  { %98 = dma.hbm_to_vmem [thread:$0]  %s13816_s6, 64, %s96_s28, [#allocation12]  }
  0x9b   :  { %s13199_s24 = scalar_lea.hbm %s13818_s8, 32 }
  0x9c   :  { %p13200_p2 = scmp.ne.s32.totalorder %s13818_s8, %s13199_s24  ;;  %p13203_p3 = scmp.lt.u32.totalorder %s13199_s24, %s13818_s8 }
  0x9e   :  { %p13205_p4 = pnand %p13203_p3, %p13200_p2 }
  0xa0   :  { %13208 = shalt.err (!%p13205_p4)
}
  0xa1   :  { %s13209_s5 = scalar_lea.vmem %s118_s17, 32  ;;  %p13214_p6 = scmp.lt.s32.totalorder %s118_s17, %s118_s17 }
  0xa2   :  { %p13210_p5 = scmp.ne.s32.totalorder %s118_s17, %s13209_s5  ;;  %p13215_p7 = scmp.lt.s32.totalorder %s13209_s5, %s13209_s5 }
  0xa4   :  { %p13216_p8 = por %p13215_p7, %p13214_p6 }
  0xa6   :  { %p13217_p9 = pnand %p13216_p8, %p13210_p5 }
  0xa8   :  { %13220 = shalt.err (!%p13217_p9)
}
  0xa9   :  { %120 = dma.hbm_to_vmem [thread:$0]  %s13818_s8, 32, %s118_s17, [#allocation15]  }
  0xaa   :  { %s13298_s12 = smov [#allocation19]   ;;  %s13221_s9 = scalar_lea.hbm %s13820_s10, 16 }
  0xab   :  { %s139_s14 = sshll.u32 %s13298_s12, 4  ;;  %p13222_p10 = scmp.ne.s32.totalorder %s13820_s10, %s13221_s9  ;;  %s140_s14 = int_to_ptr.vmem [resolvable:$true] %s139_s14 }
  0xac   :  { %p13225_p11 = scmp.lt.u32.totalorder %s13221_s9, %s13820_s10 }
  0xae   :  { %p13227_p12 = pnand %p13225_p11, %p13222_p10 }
  0xb0   :  { %13230 = shalt.err (!%p13227_p12)
}
  0xb1   :  { %s13231_s21 = scalar_lea.vmem %s140_s14, 16  ;;  %s13235_s8 = scalar_lea.vmem %s140_s14, 32 }
  0xb2   :  { %p13232_p13 = scmp.ne.s32.totalorder %s140_s14, %s13231_s21  ;;  %p13236_p0 = scmp.lt.s32.totalorder %s140_s14, %s140_s14 }
  0xb3   :  { %p13237_p1 = scmp.lt.s32.totalorder %s13235_s8, %s13231_s21 }
  0xb5   :  { %p13238_p2 = por %p13237_p1, %p13236_p0 }
  0xb7   :  { %p13239_p3 = pnand %p13238_p2, %p13232_p13 }
  0xb9   :  { %13242 = shalt.err (!%p13239_p3)
}
  0xba   :  { %142 = dma.hbm_to_vmem [thread:$0]  %s13820_s10, 16, %s140_s14, [#allocation18]  }
  0xbb   :  { %13265 = dma.done.wait [#allocation3], 128  }
  0xbc   :  { %13266 = vsyncadd [#allocation3], 4294967168 }
  0xbd   :  { %13267 = dma.done.wait [#allocation6], 4352  }
  0xbe   :  { %13268 = vsyncadd [#allocation6], 4294962944 }
  0xbf   :  { %13269 = dma.done.wait [#allocation9], 131200  }
  0xc0   :  { %13270 = vsyncadd [#allocation9], 4294836096 }
  0xc1   :  { %13271 = dma.done.wait [#allocation12], 32832  }
  0xc2   :  { %13272 = vsyncadd [#allocation12], 4294934464 }
  0xc3   :  { %13273 = dma.done.wait [#allocation15], 8224  }
  0xc4   :  { %13274 = vsyncadd [#allocation15], 4294959072 }
  0xc5   :  { %13275 = dma.done.wait [#allocation18], 2064  }
  0xc6   :  { %13276 = vsyncadd [#allocation18], 4294965232  ;;  %v13299_v0 = vmov 0   ;;  %v179_v1 = vld [vmem:[#allocation5] sm:$0xff]  ;;  %v180_v8 = vld [vmem:[#allocation5 + $0x8] sm:$0xff]  ;;  %vm455_vm0 = vcmask 261120  }
  0xc7   :  { %491 = vmatprep.mubr.bf16.mxu0 %v13299_v0  ;;  %696 = vmatprep.mubr.bf16.mxu1 %v13299_v0  ;;  %v187_v2 = vld [vmem:[#allocation5 + $0x40] sm:$0xff]  ;;  %v188_v9 = vld [vmem:[#allocation5 + $0x48] sm:$0xff]  ;;  %v177_v11 = vld [vmem:[#allocation2] sm:$0xff]  ;;  %s13300_s10 = smov [#allocation20]  }
  0xc8   :  { %v195_v3 = vld [vmem:[#allocation5 + $0x80] sm:$0xff]  ;;  %v10906_v4 = vcombine.high %v179_v1, %v187_v2  ;;  %v10905_v5 = vcombine.low %v179_v1, %v187_v2  ;;  %v10908_v12 = vcombine.high %v180_v8, %v188_v9  ;;  %v196_v13 = vld [vmem:[#allocation5 + $0x88] sm:$0xff]  ;;  %v13498_v19 = vpack.c.bf16 %v177_v11, %v177_v11  ;;  %v186_v24 = vld [vmem:[#allocation5 + $0x38] sm:$0xff]  ;;  %s10891_s18 = sshll.u32 %s13300_s10, 4  ;;  %s10892_s18 = int_to_ptr.vmem [resolvable:$true] %s10891_s18 }
  0xc9   :  { %v203_v6 = vld [vmem:[#allocation5 + $0xc0] sm:$0xff]  ;;  %v204_v14 = vld [vmem:[#allocation5 + $0xc8] sm:$0xff]  ;;  %v10907_v23 = vcombine.low %v180_v8, %v188_v9  ;;  %v194_v25 = vld [vmem:[#allocation5 + $0x78] sm:$0xff]  ;;  %s13243_s23 = scalar_lea.vmem %s10892_s18, 128  ;;  %p13248_p5 = scmp.lt.s32.totalorder %s10892_s18, %s10892_s18 }
  0xca   :  { %v10922_v7 = vcombine.high %v195_v3, %v203_v6  ;;  %459 = vmatprep.subr.bf16.mxu0 %v10906_v4  ;;  %v10921_v10 = vcombine.low %v195_v3, %v203_v6  ;;  %v184_v15 = vld [vmem:[#allocation5 + $0x28] sm:$0xff]  ;;  %v10924_v26 = vcombine.high %v196_v13, %v204_v14  ;;  %v181_v27 = vld [vmem:[#allocation5 + $0x10] sm:$0xff]  ;;  %v10920_v30 = vcombine.high %v186_v24, %v194_v25  ;;  %v202_v32 = vld [vmem:[#allocation5 + $0xb8] sm:$0xff]  ;;  %p13244_p4 = scmp.ne.s32.totalorder %s10892_s18, %s13243_s23  ;;  %p13249_p6 = scmp.lt.s32.totalorder %s13243_s23, %s13243_s23 }
  0xcb   :  { %460 = vmatpush1.bf16.msra.mxu0 %v10905_v5  ;;  %v192_v16 = vld [vmem:[#allocation5 + $0x68] sm:$0xff]  ;;  %v189_v28 = vld [vmem:[#allocation5 + $0x50] sm:$0xff]  ;;  %v10923_v31 = vcombine.low %v196_v13, %v204_v14  ;;  %v210_v33 = vld [vmem:[#allocation5 + $0xf8] sm:$0xff]  ;;  %v10919_v37 = vcombine.low %v186_v24, %v194_v25 }
  0xcc   :  { %461 = vmatprep.subr.bf16.mxu0 %v10922_v7  ;;  %v200_v17 = vld [vmem:[#allocation5 + $0xa8] sm:$0xff]  ;;  %v10916_v20 = vcombine.high %v184_v15, %v192_v16  ;;  %v10915_v21 = vcombine.low %v184_v15, %v192_v16  ;;  %v10910_v34 = vcombine.high %v181_v27, %v189_v28  ;;  %v197_v35 = vld [vmem:[#allocation5 + $0x90] sm:$0xff]  ;;  %v10936_v38 = vcombine.high %v202_v32, %v210_v33  ;;  %v182_v43 = vld [vmem:[#allocation5 + $0x18] sm:$0xff]  ;;  %p13250_p7 = por %p13249_p6, %p13248_p5 }
  0xcd   :  { %v208_v18 = vld [vmem:[#allocation5 + $0xe8] sm:$0xff]  ;;  %v205_v36 = vld [vmem:[#allocation5 + $0xd0] sm:$0xff]  ;;  %v10909_v39 = vcombine.low %v181_v27, %v189_v28  ;;  %v190_v44 = vld [vmem:[#allocation5 + $0x58] sm:$0xff]  ;;  %v10935_v45 = vcombine.low %v202_v32, %v210_v33 }
  0xce   :  { %v10932_v22 = vcombine.high %v200_v17, %v208_v18  ;;  %664 = vmatprep.subr.bf16.mxu1 %v10916_v20  ;;  %v10931_v29 = vcombine.low %v200_v17, %v208_v18  ;;  %v819_v40 = vld [vmem:[#allocation8] sm:$0xff]  ;;  %v10926_v42 = vcombine.high %v197_v35, %v205_v36  ;;  %v10925_v47 = vcombine.low %v197_v35, %v205_v36  ;;  %v198_v51 = vld [vmem:[#allocation5 + $0x98] sm:$0xff]  ;;  %v183_v59 = vld [vmem:[#allocation5 + $0x20] sm:$0xff]  ;;  %p13251_p8 = pnand %p13250_p7, %p13244_p4 }
  0xcf   :  { %462 = vmatpush1.bf16.msra.mxu0 %v10921_v10  ;;  %665 = vmatpush1.bf16.msra.mxu1 %v10915_v21  ;;  %v823_v41 = vld [vmem:[#allocation8 + $0x20] sm:$0xff]  ;;  %v10912_v50 = vcombine.high %v182_v43, %v190_v44  ;;  %v206_v52 = vld [vmem:[#allocation5 + $0xd8] sm:$0xff]  ;;  %v10911_v55 = vcombine.low %v182_v43, %v190_v44  ;;  %v191_v60 = vld [vmem:[#allocation5 + $0x60] sm:$0xff] }
  0xd0   :  { %500 = vmatprep.subr.bf16.mxu0 %v10908_v12  ;;  %666 = vmatprep.subr.bf16.mxu1 %v10932_v22  ;;  %v10946_v46 = vcombine.high %v819_v40, %v823_v41  ;;  %v827_v48 = vld [vmem:[#allocation8 + $0x40] sm:$0xff]  ;;  %v10945_v53 = vcombine.low %v819_v40, %v823_v41  ;;  %v10928_v58 = vcombine.high %v198_v51, %v206_v52  ;;  %v199_v1 = vld [vmem:[#allocation5 + $0xa0] sm:$0xff] }
  0xd1   :  { %v831_v49 = vld [vmem:[#allocation8 + $0x60] sm:$0xff]  ;;  %v10927_v63 = vcombine.low %v198_v51, %v206_v52  ;;  %v207_v2 = vld [vmem:[#allocation5 + $0xe0] sm:$0xff]  ;;  %v10914_v5 = vcombine.high %v183_v59, %v191_v60  ;;  %v10913_v10 = vcombine.low %v183_v59, %v191_v60 }
  0xd2   :  { %10937 = vmatmul.mubr.msk.bf16.vlgmr.msra.gmra.mrb[0].mxu0 %vm455_vm0, %v13498_v19  ;;  %v10954_v54 = vcombine.high %v827_v48, %v831_v49  ;;  %v835_v56 = vld [vmem:[#allocation8 + $0x80] sm:$0xff]  ;;  %v10953_v61 = vcombine.low %v827_v48, %v831_v49  ;;  %v10930_v13 = vcombine.high %v199_v1, %v207_v2  ;;  %v10929_v18 = vcombine.low %v199_v1, %v207_v2 }
  0xd3   :  { %501 = vmatpush1.bf16.msra.mxu0 %v10907_v23  ;;  %532 = vmatprep.mubr.bf16.mxu0 %v13299_v0  ;;  %v839_v57 = vld [vmem:[#allocation8 + $0xa0] sm:$0xff] }
  0xd4   :  { %502 = vmatprep.subr.bf16.mxu0 %v10924_v26  ;;  %667 = vmatpush1.bf16.msra.mxu1 %v10931_v29  ;;  %v10962_v62 = vcombine.high %v835_v56, %v839_v57  ;;  %v843_v3 = vld [vmem:[#allocation8 + $0xc0] sm:$0xff]  ;;  %v10961_v6 = vcombine.low %v835_v56, %v839_v57 }
  0xd5   :  { %746 = vmatprep.subr.bf16.mxu1 %v10920_v30  ;;  %v847_v4 = vld [vmem:[#allocation8 + $0xe0] sm:$0xff] }
  0xd6   :  { %v851_v7 = vld [vmem:[#allocation8 + $0x100] sm:$0xff]  ;;  %v10970_v9 = vcombine.high %v843_v3, %v847_v4  ;;  %v10969_v14 = vcombine.low %v843_v3, %v847_v4 }
  0xd7   :  { %503 = vmatpush1.bf16.msra.mxu0 %v10923_v31  ;;  %10942 = vmatmul.mubr.msk.bf16.vlgmr.msra.gmra.mrb[0].mxu1 %vm455_vm0, %v13498_v19  ;;  %v855_v8 = vld [vmem:[#allocation8 + $0x120] sm:$0xff] }
  0xd8   :  { %541 = vmatprep.subr.bf16.mxu0 %v10910_v34  ;;  %747 = vmatpush1.bf16.msra.mxu1 %v10919_v37  ;;  %v185_v11 = vld [vmem:[#allocation5 + $0x30] sm:$0xff]  ;;  %v10978_v17 = vcombine.high %v851_v7, %v855_v8  ;;  %v10977_v23 = vcombine.low %v851_v7, %v855_v8 }
  0xd9   :  { %778 = vmatprep.mubr.bf16.mxu1 %v13299_v0  ;;  %748 = vmatprep.subr.bf16.mxu1 %v10936_v38  ;;  %v193_v12 = vld [vmem:[#allocation5 + $0x70] sm:$0xff] }
  0xda   :  { %10938 = vmatmul.mubr.msk.bf16.vlgmr.msra.gmra.mrb[4].mxu0 %vm455_vm0, %v13498_v19  ;;  %v859_v15 = vld [vmem:[#allocation8 + $0x140] sm:$0xff]  ;;  %v10918_v22 = vcombine.high %v185_v11, %v193_v12  ;;  %v10917_v27 = vcombine.low %v185_v11, %v193_v12 }
  0xdb   :  { %542 = vmatpush1.bf16.msra.mxu0 %v10909_v39  ;;  %573 = vmatprep.mubr.bf16.mxu0 %v13299_v0  ;;  %v863_v16 = vld [vmem:[#allocation8 + $0x160] sm:$0xff] }
  0xdc   :  { %543 = vmatprep.subr.bf16.mxu0 %v10926_v42  ;;  %749 = vmatpush1.bf16.msra.mxu1 %v10935_v45  ;;  %v201_v20 = vld [vmem:[#allocation5 + $0xb0] sm:$0xff]  ;;  %v10986_v26 = vcombine.high %v859_v15, %v863_v16  ;;  %v10985_v31 = vcombine.low %v859_v15, %v863_v16 }
  0xdd   :  { %7005 = vmatprep.subr.bf16.mxu1 %v10946_v46  ;;  %v209_v21 = vld [vmem:[#allocation5 + $0xf0] sm:$0xff] }
  0xde   :  { %v867_v24 = vld [vmem:[#allocation8 + $0x180] sm:$0xff]  ;;  %v10934_v30 = vcombine.high %v201_v20, %v209_v21  ;;  %v10933_v35 = vcombine.low %v201_v20, %v209_v21 }
  0xdf   :  { %544 = vmatpush1.bf16.msra.mxu0 %v10925_v47  ;;  %10944 = vmatmul.mubr.msk.bf16.vlgmr.msra.gmra.mrb[4].mxu1 %vm455_vm0, %v13498_v19  ;;  %v871_v25 = vld [vmem:[#allocation8 + $0x1a0] sm:$0xff] }
  0xe0   :  { %582 = vmatprep.subr.bf16.mxu0 %v10912_v50  ;;  %7006 = vmatpush1.bf16.msra.mxu1 %v10945_v53  ;;  %v947_v28 = vld [vmem:[#allocation8 + $0x400] sm:$0xff]  ;;  %v10994_v34 = vcombine.high %v867_v24, %v871_v25  ;;  %v10993_v39 = vcombine.low %v867_v24, %v871_v25 }
  0xe1   :  { %7007 = vmatprep.subr.bf16.mxu1 %v10954_v54  ;;  %v951_v29 = vld [vmem:[#allocation8 + $0x420] sm:$0xff] }
  0xe2   :  { %10939 = vmatmul.mubr.msk.bf16.vlgmr.msra.gmra.mrb[8].mxu0 %vm455_vm0, %v13498_v19  ;;  %v875_v32 = vld [vmem:[#allocation8 + $0x1c0] sm:$0xff]  ;;  %v11074_v38 = vcombine.high %v947_v28, %v951_v29  ;;  %v11073_v43 = vcombine.low %v947_v28, %v951_v29 }
  0xe3   :  { %583 = vmatpush1.bf16.msra.mxu0 %v10911_v55  ;;  %614 = vmatprep.mubr.bf16.mxu0 %v13299_v0  ;;  %v879_v33 = vld [vmem:[#allocation8 + $0x1e0] sm:$0xff] }
  0xe4   :  { %584 = vmatprep.subr.bf16.mxu0 %v10928_v58  ;;  %7008 = vmatpush1.bf16.msra.mxu1 %v10953_v61  ;;  %v955_v36 = vld [vmem:[#allocation8 + $0x440] sm:$0xff]  ;;  %v11002_v42 = vcombine.high %v875_v32, %v879_v33  ;;  %v11001_v47 = vcombine.low %v875_v32, %v879_v33 }
  0xe5   :  { %7009 = vmatprep.subr.bf16.mxu1 %v10962_v62  ;;  %v959_v37 = vld [vmem:[#allocation8 + $0x460] sm:$0xff] }
  0xe6   :  { %v883_v40 = vld [vmem:[#allocation8 + $0x200] sm:$0xff]  ;;  %v11082_v46 = vcombine.high %v955_v36, %v959_v37  ;;  %v11081_v50 = vcombine.low %v955_v36, %v959_v37 }
  0xe7   :  { %585 = vmatpush1.bf16.msra.mxu0 %v10927_v63  ;;  %v887_v41 = vld [vmem:[#allocation8 + $0x220] sm:$0xff] }
  0xe8   :  { %623 = vmatprep.subr.bf16.mxu0 %v10914_v5  ;;  %7010 = vmatpush1.bf16.msra.mxu1 %v10961_v6  ;;  %v963_v44 = vld [vmem:[#allocation8 + $0x480] sm:$0xff]  ;;  %v11010_v49 = vcombine.high %v883_v40, %v887_v41  ;;  %v11009_v54 = vcombine.low %v883_v40, %v887_v41 }
  0xe9   :  { %7011 = vmatprep.subr.bf16.mxu1 %v10970_v9  ;;  %v967_v45 = vld [vmem:[#allocation8 + $0x4a0] sm:$0xff] }
  0xea   :  { %10940 = vmatmul.mubr.msk.bf16.vlgmr.msra.gmra.mrb[12].mxu0 %vm455_vm0, %v13498_v19  ;;  %v891_v48 = vld [vmem:[#allocation8 + $0x240] sm:$0xff]  ;;  %v11090_v53 = vcombine.high %v963_v44, %v967_v45  ;;  %v11089_v58 = vcombine.low %v963_v44, %v967_v45 }
  0xeb   :  { %624 = vmatpush1.bf16.msra.mxu0 %v10913_v10  ;;  %655 = vmatprep.mubr.bf16.mxu0 %v13299_v0  ;;  %v971_v51 = vld [vmem:[#allocation8 + $0x4c0] sm:$0xff] }
  0xec   :  { %625 = vmatprep.subr.bf16.mxu0 %v10930_v13  ;;  %7012 = vmatpush1.bf16.msra.mxu1 %v10969_v14  ;;  %v975_v52 = vld [vmem:[#allocation8 + $0x4e0] sm:$0xff] }
  0xed   :  { %7013 = vmatprep.subr.bf16.mxu1 %v10978_v17  ;;  %v899_v55 = vld [vmem:[#allocation8 + $0x280] sm:$0xff]  ;;  %v11097_v2 = vcombine.low %v971_v51, %v975_v52 }
  0xee   :  { %v903_v56 = vld [vmem:[#allocation8 + $0x2a0] sm:$0xff] }
  0xef   :  { %626 = vmatpush1.bf16.msra.mxu0 %v10929_v18  ;;  %v979_v59 = vld [vmem:[#allocation8 + $0x500] sm:$0xff]  ;;  %v11026_v1 = vcombine.high %v899_v55, %v903_v56  ;;  %v11025_v6 = vcombine.low %v899_v55, %v903_v56 }
  0xf0   :  { %705 = vmatprep.subr.bf16.mxu0 %v10918_v22  ;;  %7014 = vmatpush1.bf16.msra.mxu1 %v10977_v23  ;;  %v983_v60 = vld [vmem:[#allocation8 + $0x520] sm:$0xff] }
  0xf1   :  { %7015 = vmatprep.subr.bf16.mxu1 %v10986_v26  ;;  %v907_v62 = vld [vmem:[#allocation8 + $0x2c0] sm:$0xff]  ;;  %v11106_v5 = vcombine.high %v979_v59, %v983_v60  ;;  %v11105_v10 = vcombine.low %v979_v59, %v983_v60 }
  0xf2   :  { %10941 = vmatmul.mubr.msk.bf16.vlgmr.msra.gmra.mrb[16].mxu0 %vm455_vm0, %v13498_v19  ;;  %v911_v63 = vld [vmem:[#allocation8 + $0x2e0] sm:$0xff] }
  0xf3   :  { %706 = vmatpush1.bf16.msra.mxu0 %v10917_v27  ;;  %737 = vmatprep.mubr.bf16.mxu0 %v13299_v0  ;;  %v895_v0 = vld [vmem:[#allocation8 + $0x260] sm:$0xff]  ;;  %v11034_v9 = vcombine.high %v907_v62, %v911_v63  ;;  %v11033_v14 = vcombine.low %v907_v62, %v911_v63  ;;  %v824_v62 = vld [vmem:[#allocation8 + $0x28] sm:$0xff] }
  0xf4   :  { %707 = vmatprep.subr.bf16.mxu0 %v10934_v30  ;;  %7016 = vmatpush1.bf16.msra.mxu1 %v10985_v31  ;;  %v11018_v57 = vcombine.high %v891_v48, %v895_v0  ;;  %v11017_v61 = vcombine.low %v891_v48, %v895_v0  ;;  %v987_v3 = vld [vmem:[#allocation8 + $0x540] sm:$0xff] }
  0xf5   :  { %7017 = vmatprep.subr.bf16.mxu1 %v10994_v34  ;;  %v991_v4 = vld [vmem:[#allocation8 + $0x560] sm:$0xff] }
  0xf6   :  { %v915_v7 = vld [vmem:[#allocation8 + $0x300] sm:$0xff]  ;;  %v11114_v13 = vcombine.high %v987_v3, %v991_v4  ;;  %v11113_v18 = vcombine.low %v987_v3, %v991_v4 }
  0xf7   :  { %708 = vmatpush1.bf16.msra.mxu0 %v10933_v35  ;;  %v919_v8 = vld [vmem:[#allocation8 + $0x320] sm:$0xff] }
  0xf8   :  { %7046 = vmatprep.subr.bf16.mxu0 %v11074_v38  ;;  %7018 = vmatpush1.bf16.msra.mxu1 %v10993_v39  ;;  %v995_v11 = vld [vmem:[#allocation8 + $0x580] sm:$0xff]  ;;  %v11042_v17 = vcombine.high %v915_v7, %v919_v8  ;;  %v11041_v23 = vcombine.low %v915_v7, %v919_v8 }
  0xf9   :  { %7019 = vmatprep.subr.bf16.mxu1 %v11002_v42  ;;  %v999_v12 = vld [vmem:[#allocation8 + $0x5a0] sm:$0xff] }
  0xfa   :  { %10943 = vmatmul.mubr.msk.bf16.vlgmr.msra.gmra.mrb[20].mxu0 %vm455_vm0, %v13498_v19  ;;  %v11098_v19 = vcombine.high %v971_v51, %v975_v52  ;;  %v923_v15 = vld [vmem:[#allocation8 + $0x340] sm:$0xff]  ;;  %v11122_v22 = vcombine.high %v995_v11, %v999_v12  ;;  %v11121_v25 = vcombine.low %v995_v11, %v999_v12  ;;  %v215_v12 = vlaneseq }
  0xfb   :  { %7047 = vmatpush1.bf16.msra.mxu0 %v11073_v43  ;;  %v927_v16 = vld [vmem:[#allocation8 + $0x360] sm:$0xff] }
  0xfc   :  { %7048 = vmatprep.subr.bf16.mxu0 %v11082_v46  ;;  %7020 = vmatpush1.bf16.msra.mxu1 %v11001_v47  ;;  %v1003_v20 = vld [vmem:[#allocation8 + $0x5c0] sm:$0xff]  ;;  %v11050_v24 = vcombine.high %v923_v15, %v927_v16  ;;  %v11049_v29 = vcombine.low %v923_v15, %v927_v16  ;;  %v13535_v15 = vld [vmem:[#allocation7] sm:$0xff] }
  0xfd   :  { %7021 = vmatprep.subr.bf16.mxu1 %v11010_v49  ;;  %v1007_v21 = vld [vmem:[#allocation8 + $0x5e0] sm:$0xff] }
  0xfe   :  { %v1011_v26 = vld [vmem:[#allocation8 + $0x600] sm:$0xff]  ;;  %v11130_v28 = vcombine.high %v1003_v20, %v1007_v21  ;;  %v11129_v30 = vcombine.low %v1003_v20, %v1007_v21 }
  0xff   :  { %7049 = vmatpush1.bf16.msra.mxu0 %v11081_v50  ;;  %v1015_v27 = vld [vmem:[#allocation8 + $0x620] sm:$0xff] }
 0x100   :  { %7050 = vmatprep.subr.bf16.mxu0 %v11090_v53  ;;  %7022 = vmatpush1.bf16.msra.mxu1 %v11009_v54  ;;  %v1019_v31 = vld [vmem:[#allocation8 + $0x640] sm:$0xff]  ;;  %v11138_v33 = vcombine.high %v1011_v26, %v1015_v27  ;;  %v11137_v34 = vcombine.low %v1011_v26, %v1015_v27 }
 0x101   :  { %7023 = vmatprep.subr.bf16.mxu1 %v11018_v57  ;;  %v1023_v32 = vld [vmem:[#allocation8 + $0x660] sm:$0xff] }
 0x102   :  { %v1027_v35 = vld [vmem:[#allocation8 + $0x680] sm:$0xff]  ;;  %v11146_v37 = vcombine.high %v1019_v31, %v1023_v32  ;;  %v11145_v38 = vcombine.low %v1019_v31, %v1023_v32  ;;  %v832_v31 = vld [vmem:[#allocation8 + $0x68] sm:$0xff] }
 0x103   :  { %7051 = vmatpush1.bf16.msra.mxu0 %v11089_v58  ;;  %v1031_v36 = vld [vmem:[#allocation8 + $0x6a0] sm:$0xff] }
 0x104   :  { %7052 = vmatprep.subr.bf16.mxu0 %v11098_v19  ;;  %7024 = vmatpush1.bf16.msra.mxu1 %v11017_v61  ;;  %v1035_v39 = vld [vmem:[#allocation8 + $0x6c0] sm:$0xff]  ;;  %v11154_v41 = vcombine.high %v1027_v35, %v1031_v36  ;;  %v11153_v42 = vcombine.low %v1027_v35, %v1031_v36  ;;  %v820_v19 = vld [vmem:[#allocation8 + $0x8] sm:$0xff] }
 0x105   :  { %7025 = vmatprep.subr.bf16.mxu1 %v11026_v1  ;;  %v1039_v40 = vld [vmem:[#allocation8 + $0x6e0] sm:$0xff]  ;;  %v10947_v1 = vcombine.low %v820_v19, %v824_v62 }
 0x106   :  { %v11162_v43 = vcombine.high %v1035_v39, %v1039_v40  ;;  %v931_v44 = vld [vmem:[#allocation8 + $0x380] sm:$0xff]  ;;  %v11161_v47 = vcombine.low %v1035_v39, %v1039_v40  ;;  %v840_v39 = vld [vmem:[#allocation8 + $0xa8] sm:$0xff] }
 0x107   :  { %7053 = vmatpush1.bf16.msra.mxu0 %v11097_v2  ;;  %v935_v45 = vld [vmem:[#allocation8 + $0x3a0] sm:$0xff]  ;;  %v10948_v2 = vcombine.high %v820_v19, %v824_v62  ;;  %v856_v62 = vld [vmem:[#allocation8 + $0x128] sm:$0xff] }
 0x108   :  { %7054 = vmatprep.subr.bf16.mxu0 %v11106_v5  ;;  %7026 = vmatpush1.bf16.msra.mxu1 %v11025_v6  ;;  %v1043_v46 = vld [vmem:[#allocation8 + $0x700] sm:$0xff]  ;;  %v11058_v48 = vcombine.high %v931_v44, %v935_v45  ;;  %v11057_v49 = vcombine.low %v931_v44, %v935_v45 }
 0x109   :  { %7027 = vmatprep.subr.bf16.mxu1 %v11034_v9  ;;  %v1047_v0 = vld [vmem:[#allocation8 + $0x720] sm:$0xff] }
 0x10a   :  { %v11170_v50 = vcombine.high %v1043_v46, %v1047_v0  ;;  %v939_v51 = vld [vmem:[#allocation8 + $0x3c0] sm:$0xff]  ;;  %v11169_v54 = vcombine.low %v1043_v46, %v1047_v0 }
 0x10b   :  { %7055 = vmatpush1.bf16.msra.mxu0 %v11105_v10  ;;  %v943_v52 = vld [vmem:[#allocation8 + $0x3e0] sm:$0xff] }
 0x10c   :  { %7056 = vmatprep.subr.bf16.mxu0 %v11114_v13  ;;  %7028 = vmatpush1.bf16.msra.mxu1 %v11033_v14  ;;  %v1051_v53 = vld [vmem:[#allocation8 + $0x740] sm:$0xff]  ;;  %v11066_v55 = vcombine.high %v939_v51, %v943_v52  ;;  %v11065_v57 = vcombine.low %v939_v51, %v943_v52  ;;  %v13530_v13 = vshrl.u32 %v215_v12, 7  ;;  %v844_v51 = vld [vmem:[#allocation8 + $0xc8] sm:$0xff] }
 0x10d   :  { %7029 = vmatprep.subr.bf16.mxu1 %v11042_v17  ;;  %v1055_v56 = vld [vmem:[#allocation8 + $0x760] sm:$0xff]  ;;  %v848_v52 = vld [vmem:[#allocation8 + $0xe8] sm:$0xff] }
 0x10e   :  { %v11178_v58 = vcombine.high %v1051_v53, %v1055_v56  ;;  %v1059_v59 = vld [vmem:[#allocation8 + $0x780] sm:$0xff]  ;;  %v11177_v61 = vcombine.low %v1051_v53, %v1055_v56  ;;  %v13533_v14 = vsub.s32 0, %v13530_v13  ;;  %v13538_v16 = vsub.s32 1, %v13530_v13 }
 0x10f   :  { %7057 = vmatpush1.bf16.msra.mxu0 %v11113_v18  ;;  %v1063_v60 = vld [vmem:[#allocation8 + $0x7a0] sm:$0xff]  ;;  %v13548_v26 = vsub.s32 3, %v13530_v13  ;;  %v13562_v45 = vsub.s32 5, %v13530_v13 }
 0x110   :  { %7058 = vmatprep.subr.bf16.mxu0 %v11122_v22  ;;  %7030 = vmatpush1.bf16.msra.mxu1 %v11041_v23  ;;  %v11186_v63 = vcombine.high %v1059_v59, %v1063_v60  ;;  %v11185_v3 = vcombine.low %v1059_v59, %v1063_v60  ;;  %v1067_v4 = vld [vmem:[#allocation8 + $0x7c0] sm:$0xff]  ;;  %v218_v17 = vrot.slane %v13535_v15, %v13533_v14  ;;  %v13545_v23 = vsub.s32 2, %v13530_v13 }
 0x111   :  { %7031 = vmatprep.subr.bf16.mxu1 %v11050_v24  ;;  %v1071_v5 = vld [vmem:[#allocation8 + $0x7e0] sm:$0xff]  ;;  %v222_v18 = vrot.slane %v13535_v15, %v13538_v16  ;;  %v238_v56 = vrot.slane %v13535_v15, %v13562_v45 }
 0x112   :  { %v11194_v6 = vcombine.high %v1067_v4, %v1071_v5  ;;  %v11193_v7 = vcombine.low %v1067_v4, %v1071_v5  ;;  %v13522_v8 = vld [vmem:[#allocation8 + $0x800] sm:$0xff]  ;;  %v226_v32 = vrot.slane %v13535_v15, %v13545_v23 }
 0x113   :  { %7059 = vmatpush1.bf16.msra.mxu0 %v11121_v25  ;;  %v13524_v9 = vld [vmem:[#allocation8 + $0x820] sm:$0xff] }
 0x114   :  { %7060 = vmatprep.subr.bf16.mxu0 %v11130_v28  ;;  %7032 = vmatpush1.bf16.msra.mxu1 %v11049_v29  ;;  %v11202_v10 = vcombine.high %v13522_v8, %v13524_v9  ;;  %v11201_v11 = vcombine.low %v13522_v8, %v13524_v9  ;;  %v1091_v59 = vld [vmem:[#allocation8 + $0x880] sm:$0xff] }
 0x115   :  { %7033 = vmatprep.subr.bf16.mxu1 %v11058_v48  ;;  %v1083_v48 = vld [vmem:[#allocation8 + $0x840] sm:$0xff] }
 0x116   :  { %v1095_v19 = vld [vmem:[#allocation8 + $0x8a0] sm:$0xff] }
 0x117   :  { %7061 = vmatpush1.bf16.msra.mxu0 %v11129_v30  ;;  %v828_v30 = vld [vmem:[#allocation8 + $0x48] sm:$0xff]  ;;  %v1099_v12 = vld [vmem:[#allocation8 + $0x8c0] sm:$0xff]  ;;  %v11217_v9 = vcombine.low %v1091_v59, %v1095_v19 }
 0x118   :  { %7062 = vmatprep.subr.bf16.mxu0 %v11138_v33  ;;  %7034 = vmatpush1.bf16.msra.mxu1 %v11057_v49  ;;  %v10956_v36 = vcombine.high %v828_v30, %v832_v31 }
 0x119   :  { %7035 = vmatprep.subr.bf16.mxu1 %v11066_v55 }
 0x11b   :  { %7063 = vmatpush1.bf16.msra.mxu0 %v11137_v34  ;;  %v230_v34 = vrot.slane %v13535_v15, %v13548_v26 }
 0x11c   :  { %7064 = vmatprep.subr.bf16.mxu0 %v11146_v37  ;;  %7036 = vmatpush1.bf16.msra.mxu1 %v11065_v57 }
 0x11d   :  { %7333 = vmatprep.subr.bf16.mxu1 %v10948_v2 }
 0x11f   :  { %7065 = vmatpush1.bf16.msra.mxu0 %v11145_v38  ;;  %v836_v38 = vld [vmem:[#allocation8 + $0x88] sm:$0xff] }
 0x120   :  { %7066 = vmatprep.subr.bf16.mxu0 %v11154_v41  ;;  %v10963_v55 = vcombine.low %v836_v38, %v840_v39 }
 0x123   :  { %7067 = vmatpush1.bf16.msra.mxu0 %v11153_v42 }
 0x124   :  { %7068 = vmatprep.subr.bf16.mxu0 %v11162_v43  ;;  %v10955_v43 = vcombine.low %v828_v30, %v832_v31  ;;  %v1111_v31 = vld [vmem:[#allocation8 + $0x920] sm:$0xff] }
 0x127   :  { %7069 = vmatpush1.bf16.msra.mxu0 %v11161_v47  ;;  %v10964_v47 = vcombine.high %v836_v38, %v840_v39 }
 0x128   :  { %7070 = vmatprep.subr.bf16.mxu0 %v11170_v50  ;;  %v1087_v50 = vld [vmem:[#allocation8 + $0x860] sm:$0xff] }
 0x129   :  { %v11210_v57 = vcombine.high %v1083_v48, %v1087_v50  ;;  %v11209_v2 = vcombine.low %v1083_v48, %v1087_v50  ;;  %v1119_v48 = vld [vmem:[#allocation8 + $0x960] sm:$0xff] }
 0x12b   :  { %7071 = vmatpush1.bf16.msra.mxu0 %v11169_v54 }
 0x12c   :  { %7072 = vmatprep.subr.bf16.mxu0 %v11178_v58  ;;  %v10972_v58 = vcombine.high %v844_v51, %v848_v52 }
 0x12f   :  { %7073 = vmatpush1.bf16.msra.mxu0 %v11177_v61  ;;  %v852_v61 = vld [vmem:[#allocation8 + $0x108] sm:$0xff] }
 0x130   :  { %7074 = vmatprep.subr.bf16.mxu0 %v11186_v63 }
 0x133   :  { %7075 = vmatpush1.bf16.msra.mxu0 %v11185_v3  ;;  %v10971_v3 = vcombine.low %v844_v51, %v848_v52 }
 0x134   :  { %7076 = vmatprep.subr.bf16.mxu0 %v11194_v6 }
 0x137   :  { %7077 = vmatpush1.bf16.msra.mxu0 %v11193_v7  ;;  %v11218_v7 = vcombine.high %v1091_v59, %v1095_v19  ;;  %v884_v59 = vld [vmem:[#allocation8 + $0x208] sm:$0xff] }
 0x138   :  { %7087 = vmatprep.subr.bf16.mxu0 %v11202_v10  ;;  %v10980_v10 = vcombine.high %v852_v61, %v856_v62  ;;  %v888_v19 = vld [vmem:[#allocation8 + $0x228] sm:$0xff] }
 0x1a5   :  { %v493_v20 = vpop.f32.mrb[0].mxu0 }
 0x1a6   :  { %v494_v21 = vadd.f32 %v493_v20, %v218_v17  ;;  %v495_v22 = vpop.f32.mrb[1].mxu0  ;;  %v1103_v20 = vld [vmem:[#allocation8 + $0x8e0] sm:$0xff] }
 0x1a7   :  { %v496_v24 = vadd.f32 %v495_v22, %v222_v18  ;;  %v497_v25 = vpop.f32.mrb[2].mxu0  ;;  %v864_v22 = vld [vmem:[#allocation8 + $0x168] sm:$0xff]  ;;  %v11225_v38 = vcombine.low %v1099_v12, %v1103_v20 }
 0x1a8   :  { %v787_v27 = vmax.f32 %v494_v21, 0.0  ;;  %v498_v28 = vpop.f32.mrb[3].mxu0  ;;  %v860_v21 = vld [vmem:[#allocation8 + $0x148] sm:$0xff] }
 0x1a9   :  { %v788_v29 = vmax.f32 %v496_v24, 0.0  ;;  %v10988_v28 = vcombine.high %v860_v21, %v864_v22  ;;  %v10987_v39 = vcombine.low %v860_v21, %v864_v22  ;;  %v1143_v21 = vld [vmem:[#allocation8 + $0xa20] sm:$0xff]  ;;  %v900_v22 = vld [vmem:[#allocation8 + $0x288] sm:$0xff] }
 0x1aa   :  { %v13556_v35 = vpack.c.bf16 %v787_v27, %v787_v27  ;;  %v13570_v60 = vpop.f32.mrb[0].mxu1  ;;  %v11226_v27 = vcombine.high %v1099_v12, %v1103_v20  ;;  %v11011_v12 = vcombine.low %v884_v59, %v888_v19  ;;  %v1139_v20 = vld [vmem:[#allocation8 + $0xa00] sm:$0xff] }
 0x1ab   :  { %v13552_v33 = vpack.c.bf16 %v788_v29, %v788_v29  ;;  %v13579_v6 = vpop.f32.mrb[1].mxu1  ;;  %v1107_v29 = vld [vmem:[#allocation8 + $0x900] sm:$0xff] }
 0x1ac   :  { %v702_v18 = vpop.f32.mrb[2].mxu1  ;;  %v11233_v51 = vcombine.low %v1107_v29, %v1111_v31 }
 0x1ad   :  { %v534_v37 = vpop.f32.mrb[4].mxu0  ;;  %7037 = vmatprep.mubr.bf16.mxu1 %v13552_v33  ;;  %v703_v8 = vpop.f32.mrb[3].mxu1 }
 0x1ae   :  { %v535_v40 = vadd.f32 %v534_v37, %v226_v32  ;;  %v536_v41 = vpop.f32.mrb[5].mxu0  ;;  %7038 = vmatmul.mubr.bf16.vlgmr.msra.gmra.mrb[8].mxu1 %v13556_v35  ;;  %v868_v32 = vld [vmem:[#allocation8 + $0x188] sm:$0xff] }
 0x1af   :  { %v537_v42 = vadd.f32 %v536_v41, %v230_v34  ;;  %7334 = vmatpush1.bf16.msra.mxu1 %v10947_v1  ;;  %7365 = vmatprep.mubr.bf16.mxu1 %v13552_v33  ;;  %v538_v44 = vpop.f32.mrb[6].mxu0  ;;  %v872_v34 = vld [vmem:[#allocation8 + $0x1a8] sm:$0xff] }
 0x1b0   :  { %v789_v46 = vmax.f32 %v535_v40, 0.0  ;;  %7335 = vmatprep.subr.bf16.mxu1 %v10956_v36  ;;  %v539_v0 = vpop.f32.mrb[7].mxu0  ;;  %v1115_v44 = vld [vmem:[#allocation8 + $0x940] sm:$0xff]  ;;  %v10995_v52 = vcombine.low %v868_v32, %v872_v34 }
 0x1b1   :  { %v790_v49 = vmax.f32 %v537_v42, 0.0  ;;  %v11234_v42 = vcombine.high %v1107_v29, %v1111_v31  ;;  %v876_v0 = vld [vmem:[#allocation8 + $0x1c8] sm:$0xff]  ;;  %v1151_v29 = vld [vmem:[#allocation8 + $0xa60] sm:$0xff] }
 0x1b2   :  { %v13564_v53 = vpack.c.bf16 %v789_v46, %v789_v46  ;;  %v13583_v30 = vpop.f32.mrb[4].mxu1  ;;  %v908_v31 = vld [vmem:[#allocation8 + $0x2c8] sm:$0xff] }
 0x1b3   :  { %v13566_v54 = vpack.c.bf16 %v790_v49, %v790_v49  ;;  %7336 = vmatpush1.bf16.msra.mxu1 %v10955_v43  ;;  %v13590_v40 = vpop.f32.mrb[5].mxu1  ;;  %v10996_v43 = vcombine.high %v868_v32, %v872_v34  ;;  %v880_v49 = vld [vmem:[#allocation8 + $0x1e8] sm:$0xff]  ;;  %v11265_v34 = vcombine.low %v1139_v20, %v1143_v21 }
 0x1b4   :  { %7337 = vmatprep.subr.bf16.mxu1 %v10964_v47  ;;  %v784_v46 = vpop.f32.mrb[6].mxu1  ;;  %v912_v32 = vld [vmem:[#allocation8 + $0x2e8] sm:$0xff] }
 0x1b5   :  { %7078 = vmatprep.mubr.bf16.mxu0 %v13566_v54  ;;  %v13573_v63 = vpop.f32.mrb[8].mxu0  ;;  %v785_v50 = vpop.f32.mrb[7].mxu1  ;;  %v920_v46 = vld [vmem:[#allocation8 + $0x328] sm:$0xff] }
 0x1b6   :  { %7079 = vmatmul.mubr.bf16.vlgmr.msra.gmra.mrb[24].mxu0 %v13564_v53  ;;  %v577_v1 = vpop.f32.mrb[9].mxu0  ;;  %v1163_v50 = vld [vmem:[#allocation8 + $0xac0] sm:$0xff] }
 0x1b7   :  { %7088 = vmatpush1.bf16.msra.mxu0 %v11201_v11  ;;  %7338 = vmatpush1.bf16.msra.mxu1 %v10963_v55  ;;  %v578_v4 = vadd.f32 %v577_v1, %v238_v56  ;;  %v579_v5 = vpop.f32.mrb[10].mxu0  ;;  %v10979_v11 = vcombine.low %v852_v61, %v856_v62  ;;  %v11242_v55 = vcombine.high %v1115_v44, %v1119_v48 }
 0x1b8   :  { %7089 = vmatprep.subr.bf16.mxu0 %v11210_v57  ;;  %7339 = vmatprep.subr.bf16.mxu1 %v10972_v58  ;;  %v580_v17 = vpop.f32.mrb[11].mxu0  ;;  %v11004_v56 = vcombine.high %v876_v0, %v880_v49  ;;  %v1123_v57 = vld [vmem:[#allocation8 + $0x980] sm:$0xff]  ;;  %v11241_v61 = vcombine.low %v1115_v44, %v1119_v48  ;;  %v11003_v62 = vcombine.low %v876_v0, %v880_v49  ;;  %v892_v5 = vld [vmem:[#allocation8 + $0x248] sm:$0xff] }
 0x1b9   :  { %v792_v24 = vmax.f32 %v578_v4, 0.0  ;;  %v1127_v58 = vld [vmem:[#allocation8 + $0x9a0] sm:$0xff]  ;;  %v916_v44 = vld [vmem:[#allocation8 + $0x308] sm:$0xff]  ;;  %v11035_v48 = vcombine.low %v908_v31, %v912_v32 }
 0x1ba   :  { %v11250_v1 = vcombine.high %v1123_v57, %v1127_v58  ;;  %v1135_v4 = vld [vmem:[#allocation8 + $0x9e0] sm:$0xff]  ;;  %v11044_v49 = vcombine.high %v916_v44, %v920_v46 }
 0x1bb   :  { %7090 = vmatpush1.bf16.msra.mxu0 %v11209_v2  ;;  %7340 = vmatpush1.bf16.msra.mxu1 %v10971_v3  ;;  %v13581_v25 = vpack.c.bf16 %v792_v24, %v792_v24  ;;  %v11012_v2 = vcombine.high %v884_v59, %v888_v19  ;;  %v1131_v3 = vld [vmem:[#allocation8 + $0x9c0] sm:$0xff]  ;;  %v904_v24 = vld [vmem:[#allocation8 + $0x2a8] sm:$0xff] }
 0x1bc   :  { %7091 = vmatprep.subr.bf16.mxu0 %v11218_v7  ;;  %7341 = vmatprep.subr.bf16.mxu1 %v10980_v10  ;;  %v896_v7 = vld [vmem:[#allocation8 + $0x268] sm:$0xff]  ;;  %v11249_v10 = vcombine.low %v1123_v57, %v1127_v58  ;;  %v11258_v17 = vcombine.high %v1131_v3, %v1135_v4  ;;  %v11257_v8 = vcombine.low %v1131_v3, %v1135_v4  ;;  %v1171_v19 = vld [vmem:[#allocation8 + $0xb00] sm:$0xff] }
 0x1bd   :  { %7119 = vmatprep.mubr.bf16.mxu0 %v13581_v25  ;;  %v13586_v36 = vpop.f32.mrb[12].mxu0  ;;  %v11020_v18 = vcombine.high %v892_v5, %v896_v7  ;;  %v11043_v57 = vcombine.low %v916_v44, %v920_v46  ;;  %v956_v44 = vld [vmem:[#allocation8 + $0x448] sm:$0xff] }
 0x1be   :  { %v13588_v37 = vpop.f32.mrb[13].mxu0  ;;  %v960_v46 = vld [vmem:[#allocation8 + $0x468] sm:$0xff] }
 0x1bf   :  { %7092 = vmatpush1.bf16.msra.mxu0 %v11217_v9  ;;  %7342 = vmatpush1.bf16.msra.mxu1 %v10979_v11  ;;  %v620_v41 = vpop.f32.mrb[14].mxu0  ;;  %v11019_v9 = vcombine.low %v892_v5, %v896_v7  ;;  %v11266_v11 = vcombine.high %v1139_v20, %v1143_v21  ;;  %v1179_v7 = vld [vmem:[#allocation8 + $0xb40] sm:$0xff] }
 0x1c0   :  { %7093 = vmatprep.subr.bf16.mxu0 %v11226_v27  ;;  %7343 = vmatprep.subr.bf16.mxu1 %v10988_v28  ;;  %v621_v47 = vpop.f32.mrb[15].mxu0  ;;  %v11028_v27 = vcombine.high %v900_v22, %v904_v24  ;;  %v1147_v28 = vld [vmem:[#allocation8 + $0xa40] sm:$0xff]  ;;  %v11036_v41 = vcombine.high %v908_v31, %v912_v32 }
 0x1c1   :  { %v11273_v47 = vcombine.low %v1147_v28, %v1151_v29 }
 0x1c3   :  { %7094 = vmatpush1.bf16.msra.mxu0 %v11225_v38  ;;  %7344 = vmatpush1.bf16.msra.mxu1 %v10987_v39  ;;  %v11027_v38 = vcombine.low %v900_v22, %v904_v24  ;;  %v11274_v39 = vcombine.high %v1147_v28, %v1151_v29  ;;  %v13596_v28 = vsub.s32 7, %v13530_v13 }
 0x1c4   :  { %7095 = vmatprep.subr.bf16.mxu0 %v11234_v42  ;;  %7345 = vmatprep.subr.bf16.mxu1 %v10996_v43  ;;  %v1155_v42 = vld [vmem:[#allocation8 + $0xa80] sm:$0xff] }
 0x1c5   :  { %v1159_v43 = vld [vmem:[#allocation8 + $0xaa0] sm:$0xff] }
 0x1c6   :  { %v11282_v0 = vcombine.high %v1155_v42, %v1159_v43 }
 0x1c7   :  { %7096 = vmatpush1.bf16.msra.mxu0 %v11233_v51  ;;  %7346 = vmatpush1.bf16.msra.mxu1 %v10995_v52  ;;  %v1167_v51 = vld [vmem:[#allocation8 + $0xae0] sm:$0xff]  ;;  %v924_v52 = vld [vmem:[#allocation8 + $0x348] sm:$0xff] }
 0x1c8   :  { %7097 = vmatprep.subr.bf16.mxu0 %v11242_v55  ;;  %7347 = vmatprep.subr.bf16.mxu1 %v11004_v56  ;;  %v928_v55 = vld [vmem:[#allocation8 + $0x368] sm:$0xff]  ;;  %v11281_v56 = vcombine.low %v1155_v42, %v1159_v43  ;;  %v11290_v58 = vcombine.high %v1163_v50, %v1167_v51  ;;  %v246_v42 = vrot.slane %v13535_v15, %v13596_v28 }
 0x1c9   :  { %v11052_v59 = vcombine.high %v924_v52, %v928_v55  ;;  %v11051_v3 = vcombine.low %v924_v52, %v928_v55  ;;  %v11084_v52 = vcombine.high %v956_v44, %v960_v46  ;;  %v1207_v55 = vld [vmem:[#allocation8 + $0xc20] sm:$0xff] }
 0x1cb   :  { %7098 = vmatpush1.bf16.msra.mxu0 %v11241_v61  ;;  %7348 = vmatpush1.bf16.msra.mxu1 %v11003_v62  ;;  %v1175_v61 = vld [vmem:[#allocation8 + $0xb20] sm:$0xff]  ;;  %v932_v62 = vld [vmem:[#allocation8 + $0x388] sm:$0xff] }
 0x1cc   :  { %7099 = vmatprep.subr.bf16.mxu0 %v11250_v1  ;;  %7349 = vmatprep.subr.bf16.mxu1 %v11012_v2  ;;  %v936_v1 = vld [vmem:[#allocation8 + $0x3a8] sm:$0xff]  ;;  %v11289_v2 = vcombine.low %v1163_v50, %v1167_v51  ;;  %v11298_v4 = vcombine.high %v1171_v19, %v1175_v61  ;;  %v11297_v20 = vcombine.low %v1171_v19, %v1175_v61  ;;  %v1203_v50 = vld [vmem:[#allocation8 + $0xc00] sm:$0xff] }
 0x1cd   :  { %v11060_v5 = vcombine.high %v932_v62, %v936_v1  ;;  %v11059_v21 = vcombine.low %v932_v62, %v936_v1  ;;  %v11083_v62 = vcombine.low %v956_v44, %v960_v46  ;;  %v11330_v1 = vcombine.high %v1203_v50, %v1207_v55 }
 0x1cf   :  { %7100 = vmatpush1.bf16.msra.mxu0 %v11249_v10  ;;  %7350 = vmatpush1.bf16.msra.mxu1 %v11011_v12  ;;  %v1183_v10 = vld [vmem:[#allocation8 + $0xb60] sm:$0xff]  ;;  %v940_v12 = vld [vmem:[#allocation8 + $0x3c8] sm:$0xff] }
 0x1d0   :  { %7101 = vmatprep.subr.bf16.mxu0 %v11258_v17  ;;  %7351 = vmatprep.subr.bf16.mxu1 %v11020_v18  ;;  %v944_v17 = vld [vmem:[#allocation8 + $0x3e8] sm:$0xff]  ;;  %v13593_v18 = vsub.s32 4, %v13530_v13  ;;  %v11306_v22 = vcombine.high %v1179_v7, %v1183_v10  ;;  %v11305_v31 = vcombine.low %v1179_v7, %v1183_v10 }
 0x1d1   :  { %v11068_v24 = vcombine.high %v940_v12, %v944_v17  ;;  %v11067_v32 = vcombine.low %v940_v12, %v944_v17  ;;  %v976_v7 = vld [vmem:[#allocation8 + $0x4e8] sm:$0xff]  ;;  %v11329_v12 = vcombine.low %v1203_v50, %v1207_v55 }
 0x1d2   :  { %v234_v29 = vrot.slane %v13535_v15, %v13593_v18  ;;  %v1000_v50 = vld [vmem:[#allocation8 + $0x5a8] sm:$0xff] }
 0x1d3   :  { %7102 = vmatpush1.bf16.msra.mxu0 %v11257_v8  ;;  %7352 = vmatpush1.bf16.msra.mxu1 %v11019_v9  ;;  %v1187_v8 = vld [vmem:[#allocation8 + $0xb80] sm:$0xff] }
 0x1d4   :  { %7103 = vmatprep.subr.bf16.mxu0 %v11266_v11  ;;  %7353 = vmatprep.subr.bf16.mxu1 %v11028_v27  ;;  %v1191_v9 = vld [vmem:[#allocation8 + $0xba0] sm:$0xff]  ;;  %v948_v11 = vld [vmem:[#allocation8 + $0x408] sm:$0xff]  ;;  %v576_v43 = vadd.f32 %v13573_v63, %v234_v29  ;;  %v619_v63 = vadd.f32 %v13588_v37, %v246_v42 }
 0x1d5   :  { %v952_v27 = vld [vmem:[#allocation8 + $0x428] sm:$0xff] }
 0x1d6   :  { %v794_v37 = vmax.f32 %v619_v63, 0.0  ;;  %v1243_v63 = vld [vmem:[#allocation8 + $0xd40] sm:$0xff] }
 0x1d7   :  { %7104 = vmatpush1.bf16.msra.mxu0 %v11265_v34  ;;  %7354 = vmatpush1.bf16.msra.mxu1 %v11027_v38  ;;  %v11314_v34 = vcombine.high %v1187_v8, %v1191_v9  ;;  %v11076_v38 = vcombine.high %v948_v11, %v952_v27 }
 0x1d8   :  { %7105 = vmatprep.subr.bf16.mxu0 %v11274_v39  ;;  %7355 = vmatprep.subr.bf16.mxu1 %v11036_v41  ;;  %v1195_v39 = vld [vmem:[#allocation8 + $0xbc0] sm:$0xff] }
 0x1d9   :  { %v1199_v41 = vld [vmem:[#allocation8 + $0xbe0] sm:$0xff] }
 0x1da   :  { %v11321_v61 = vcombine.low %v1195_v39, %v1199_v41 }
 0x1db   :  { %7106 = vmatpush1.bf16.msra.mxu0 %v11273_v47  ;;  %7356 = vmatpush1.bf16.msra.mxu1 %v11035_v48  ;;  %v11313_v47 = vcombine.low %v1187_v8, %v1191_v9  ;;  %v11075_v48 = vcombine.low %v948_v11, %v952_v27  ;;  %v980_v8 = vld [vmem:[#allocation8 + $0x508] sm:$0xff]  ;;  %v13612_v11 = vpack.c.bf16 %v794_v37, %v794_v37  ;;  %v1251_v37 = vld [vmem:[#allocation8 + $0xd80] sm:$0xff] }
 0x1dc   :  { %7107 = vmatprep.subr.bf16.mxu0 %v11282_v0  ;;  %7357 = vmatprep.subr.bf16.mxu1 %v11044_v49  ;;  %v13603_v0 = vpop.f32.mrb[16].mxu0  ;;  %v11322_v49 = vcombine.high %v1195_v39, %v1199_v41  ;;  %v984_v9 = vld [vmem:[#allocation8 + $0x528] sm:$0xff] }
 0x1dd   :  { %v13605_v51 = vpop.f32.mrb[17].mxu0  ;;  %v988_v39 = vld [vmem:[#allocation8 + $0x548] sm:$0xff] }
 0x1de   :  { %v992_v41 = vld [vmem:[#allocation8 + $0x568] sm:$0xff] }
 0x1df   :  { %7108 = vmatpush1.bf16.msra.mxu0 %v11281_v56  ;;  %7358 = vmatpush1.bf16.msra.mxu1 %v11043_v57  ;;  %v964_v56 = vld [vmem:[#allocation8 + $0x488] sm:$0xff]  ;;  %v11116_v46 = vcombine.high %v988_v39, %v992_v41  ;;  %v11115_v55 = vcombine.low %v988_v39, %v992_v41  ;;  %v1267_v41 = vld [vmem:[#allocation8 + $0xe00] sm:$0xff] }
 0x1e0   :  { %7109 = vmatprep.subr.bf16.mxu0 %v11290_v58  ;;  %7359 = vmatprep.subr.bf16.mxu1 %v11052_v59  ;;  %v968_v57 = vld [vmem:[#allocation8 + $0x4a8] sm:$0xff]  ;;  %v661_v58 = vpop.f32.mrb[18].mxu0  ;;  %v791_v59 = vmax.f32 %v576_v43, 0.0  ;;  %v11107_v43 = vcombine.low %v980_v8, %v984_v9 }
 0x1e1   :  { %v662_v19 = vpop.f32.mrb[19].mxu0  ;;  %v11091_v17 = vcombine.low %v964_v56, %v968_v57 }
 0x1e2   :  { %v13610_v10 = vpack.c.bf16 %v791_v59, %v791_v59  ;;  %v13616_v58 = vpop.f32.mrb[20].mxu0  ;;  %v1247_v59 = vld [vmem:[#allocation8 + $0xd60] sm:$0xff]  ;;  %v1004_v19 = vld [vmem:[#allocation8 + $0x5c8] sm:$0xff] }
 0x1e3   :  { %7110 = vmatpush1.bf16.msra.mxu0 %v11289_v2  ;;  %7360 = vmatpush1.bf16.msra.mxu1 %v11051_v3  ;;  %v11092_v2 = vcombine.high %v964_v56, %v968_v57  ;;  %v1211_v3 = vld [vmem:[#allocation8 + $0xc40] sm:$0xff] }
 0x1e4   :  { %7111 = vmatprep.subr.bf16.mxu0 %v11298_v4  ;;  %7361 = vmatprep.subr.bf16.mxu1 %v11060_v5  ;;  %v1215_v4 = vld [vmem:[#allocation8 + $0xc60] sm:$0xff]  ;;  %v972_v5 = vld [vmem:[#allocation8 + $0x4c8] sm:$0xff] }
 0x1e5   :  { %v11337_v27 = vcombine.low %v1211_v3, %v1215_v4  ;;  %v11099_v29 = vcombine.low %v972_v5, %v976_v7 }
 0x1e7   :  { %7112 = vmatpush1.bf16.msra.mxu0 %v11297_v20  ;;  %7362 = vmatpush1.bf16.msra.mxu1 %v11059_v21  ;;  %v11338_v20 = vcombine.high %v1211_v3, %v1215_v4  ;;  %v11100_v21 = vcombine.high %v972_v5, %v976_v7  ;;  %v11370_v5 = vcombine.high %v1243_v63, %v1247_v59 }
 0x1e8   :  { %7113 = vmatprep.subr.bf16.mxu0 %v11306_v22  ;;  %7363 = vmatprep.subr.bf16.mxu1 %v11068_v24  ;;  %v1219_v22 = vld [vmem:[#allocation8 + $0xc80] sm:$0xff] }
 0x1e9   :  { %v1223_v24 = vld [vmem:[#allocation8 + $0xca0] sm:$0xff] }
 0x1ea   :  { %v11345_v42 = vcombine.low %v1219_v22, %v1223_v24 }
 0x1eb   :  { %7114 = vmatpush1.bf16.msra.mxu0 %v11305_v31  ;;  %7364 = vmatpush1.bf16.msra.mxu1 %v11067_v32  ;;  %v11346_v31 = vcombine.high %v1219_v22, %v1223_v24  ;;  %v11108_v32 = vcombine.high %v980_v8, %v984_v9  ;;  %v1259_v9 = vld [vmem:[#allocation8 + $0xdc0] sm:$0xff] }
 0x1ec   :  { %7115 = vmatprep.subr.bf16.mxu0 %v11314_v34  ;;  %7374 = vmatprep.subr.bf16.mxu1 %v11076_v38  ;;  %v1227_v34 = vld [vmem:[#allocation8 + $0xcc0] sm:$0xff] }
 0x1ed   :  { %v1231_v38 = vld [vmem:[#allocation8 + $0xce0] sm:$0xff] }
 0x1ee   :  { %7366 = vmatmul.mubr.bf16.vlgmr.msra.gmra.mrb[12].mxu1 %v13556_v35  ;;  %v11354_v44 = vcombine.high %v1227_v34, %v1231_v38 }
 0x1ef   :  { %7116 = vmatpush1.bf16.msra.mxu0 %v11313_v47  ;;  %7375 = vmatpush1.bf16.msra.mxu1 %v11075_v48  ;;  %v1235_v47 = vld [vmem:[#allocation8 + $0xd00] sm:$0xff] }
 0x1f0   :  { %7406 = vmatprep.mubr.bf16.mxu1 %v13566_v54  ;;  %7117 = vmatprep.subr.bf16.mxu0 %v11322_v49  ;;  %v1239_v48 = vld [vmem:[#allocation8 + $0xd20] sm:$0xff]  ;;  %v996_v49 = vld [vmem:[#allocation8 + $0x588] sm:$0xff] }
 0x1f1   :  { %7376 = vmatprep.subr.bf16.mxu1 %v11084_v52  ;;  %v11353_v52 = vcombine.low %v1227_v34, %v1231_v38  ;;  %v11362_v56 = vcombine.high %v1235_v47, %v1239_v48  ;;  %v11124_v57 = vcombine.high %v996_v49, %v1000_v50  ;;  %v11123_v3 = vcombine.low %v996_v49, %v1000_v50  ;;  %v1275_v50 = vld [vmem:[#allocation8 + $0xe40] sm:$0xff] }
 0x1f3   :  { %7118 = vmatpush1.bf16.msra.mxu0 %v11321_v61  ;;  %7377 = vmatpush1.bf16.msra.mxu1 %v11083_v62  ;;  %v1008_v61 = vld [vmem:[#allocation8 + $0x5e8] sm:$0xff]  ;;  %v13618_v62 = vpop.f32.mrb[21].mxu0 }
 0x1f4   :  { %7128 = vmatprep.subr.bf16.mxu0 %v11330_v1  ;;  %7378 = vmatprep.subr.bf16.mxu1 %v11092_v2  ;;  %v743_v1 = vpop.f32.mrb[22].mxu0  ;;  %v11361_v2 = vcombine.low %v1235_v47, %v1239_v48  ;;  %v11132_v7 = vcombine.high %v1004_v19, %v1008_v61  ;;  %v11131_v22 = vcombine.low %v1004_v19, %v1008_v61  ;;  %v1283_v61 = vld [vmem:[#allocation8 + $0xe80] sm:$0xff] }
 0x1f5   :  { %v744_v4 = vpop.f32.mrb[23].mxu0  ;;  %v1287_v1 = vld [vmem:[#allocation8 + $0xea0] sm:$0xff] }
 0x1f6   :  { %7120 = vmatmul.mubr.bf16.vlgmr.msra.gmra.mrb[24].mxu0 %v13610_v10 }
 0x1f7   :  { %7129 = vmatpush1.bf16.msra.mxu0 %v11329_v12  ;;  %7379 = vmatpush1.bf16.msra.mxu1 %v11091_v17  ;;  %v1255_v12 = vld [vmem:[#allocation8 + $0xda0] sm:$0xff]  ;;  %v1012_v17 = vld [vmem:[#allocation8 + $0x608] sm:$0xff] }
 0x1f8   :  { %7130 = vmatprep.subr.bf16.mxu0 %v11338_v20  ;;  %7380 = vmatprep.subr.bf16.mxu1 %v11100_v21  ;;  %v1016_v20 = vld [vmem:[#allocation8 + $0x628] sm:$0xff]  ;;  %v11369_v21 = vcombine.low %v1243_v63, %v1247_v59  ;;  %v11378_v24 = vcombine.high %v1251_v37, %v1255_v12 }
 0x1f9   :  { %7160 = vmatprep.mubr.bf16.mxu0 %v13612_v11  ;;  %v11140_v8 = vcombine.high %v1012_v17, %v1016_v20  ;;  %v11139_v34 = vcombine.low %v1012_v17, %v1016_v20  ;;  %v1295_v17 = vld [vmem:[#allocation8 + $0xee0] sm:$0xff]  ;;  %v1052_v20 = vld [vmem:[#allocation8 + $0x748] sm:$0xff] }
 0x1fb   :  { %7131 = vmatpush1.bf16.msra.mxu0 %v11337_v27  ;;  %7381 = vmatpush1.bf16.msra.mxu1 %v11099_v29  ;;  %v1263_v27 = vld [vmem:[#allocation8 + $0xde0] sm:$0xff]  ;;  %v1020_v29 = vld [vmem:[#allocation8 + $0x648] sm:$0xff] }
 0x1fc   :  { %7132 = vmatprep.subr.bf16.mxu0 %v11346_v31  ;;  %7382 = vmatprep.subr.bf16.mxu1 %v11108_v32  ;;  %v1024_v31 = vld [vmem:[#allocation8 + $0x668] sm:$0xff]  ;;  %v11377_v32 = vcombine.low %v1251_v37, %v1255_v12  ;;  %v11386_v38 = vcombine.high %v1259_v9, %v1263_v27  ;;  %v1291_v12 = vld [vmem:[#allocation8 + $0xec0] sm:$0xff] }
 0x1fd   :  { %v11148_v39 = vcombine.high %v1020_v29, %v1024_v31  ;;  %v11147_v47 = vcombine.low %v1020_v29, %v1024_v31  ;;  %v1303_v29 = vld [vmem:[#allocation8 + $0xf20] sm:$0xff]  ;;  %v1060_v31 = vld [vmem:[#allocation8 + $0x788] sm:$0xff] }
 0x1ff   :  { %7133 = vmatpush1.bf16.msra.mxu0 %v11345_v42  ;;  %7383 = vmatpush1.bf16.msra.mxu1 %v11107_v43  ;;  %v1271_v42 = vld [vmem:[#allocation8 + $0xe20] sm:$0xff]  ;;  %v1028_v43 = vld [vmem:[#allocation8 + $0x688] sm:$0xff] }
 0x200   :  { %7134 = vmatprep.subr.bf16.mxu0 %v11354_v44  ;;  %7384 = vmatprep.subr.bf16.mxu1 %v11116_v46  ;;  %v1032_v44 = vld [vmem:[#allocation8 + $0x6a8] sm:$0xff]  ;;  %v11385_v46 = vcombine.low %v1259_v9, %v1263_v27  ;;  %v11394_v48 = vcombine.high %v1267_v41, %v1271_v42  ;;  %v1299_v27 = vld [vmem:[#allocation8 + $0xf00] sm:$0xff] }
 0x201   :  { %v11156_v49 = vcombine.high %v1028_v43, %v1032_v44  ;;  %v11155_v63 = vcombine.low %v1028_v43, %v1032_v44  ;;  %v1311_v43 = vld [vmem:[#allocation8 + $0xf60] sm:$0xff]  ;;  %v1068_v44 = vld [vmem:[#allocation8 + $0x7c8] sm:$0xff] }
 0x203   :  { %7135 = vmatpush1.bf16.msra.mxu0 %v11353_v52  ;;  %7385 = vmatpush1.bf16.msra.mxu1 %v11115_v55  ;;  %v1279_v52 = vld [vmem:[#allocation8 + $0xe60] sm:$0xff]  ;;  %v1036_v55 = vld [vmem:[#allocation8 + $0x6c8] sm:$0xff] }
 0x204   :  { %7136 = vmatprep.subr.bf16.mxu0 %v11362_v56  ;;  %7386 = vmatprep.subr.bf16.mxu1 %v11124_v57  ;;  %v1040_v56 = vld [vmem:[#allocation8 + $0x6e8] sm:$0xff]  ;;  %v11393_v57 = vcombine.low %v1267_v41, %v1271_v42  ;;  %v11402_v59 = vcombine.high %v1275_v50, %v1279_v52  ;;  %v11401_v4 = vcombine.low %v1275_v50, %v1279_v52  ;;  %v1307_v42 = vld [vmem:[#allocation8 + $0xf40] sm:$0xff] }
 0x205   :  { %v11164_v19 = vcombine.high %v1036_v55, %v1040_v56  ;;  %v11434_v50 = vcombine.high %v1307_v42, %v1311_v43 }
 0x207   :  { %7137 = vmatpush1.bf16.msra.mxu0 %v11361_v2  ;;  %7387 = vmatpush1.bf16.msra.mxu1 %v11123_v3  ;;  %v1044_v2 = vld [vmem:[#allocation8 + $0x708] sm:$0xff] }
 0x208   :  { %7138 = vmatprep.subr.bf16.mxu0 %v11370_v5  ;;  %7388 = vmatprep.subr.bf16.mxu1 %v11132_v7  ;;  %v1048_v3 = vld [vmem:[#allocation8 + $0x728] sm:$0xff]  ;;  %v11163_v5 = vcombine.low %v1036_v55, %v1040_v56  ;;  %v11410_v7 = vcombine.high %v1283_v61, %v1287_v1  ;;  %v1315_v55 = vld [vmem:[#allocation8 + $0xf80] sm:$0xff] }
 0x209   :  { %v11172_v37 = vcombine.high %v1044_v2, %v1048_v3  ;;  %v1319_v56 = vld [vmem:[#allocation8 + $0xfa0] sm:$0xff] }
 0x20b   :  { %7139 = vmatpush1.bf16.msra.mxu0 %v11369_v21  ;;  %7389 = vmatpush1.bf16.msra.mxu1 %v11131_v22  ;;  %v1056_v21 = vld [vmem:[#allocation8 + $0x768] sm:$0xff]  ;;  %v11409_v22 = vcombine.low %v1283_v61, %v1287_v1  ;;  %v11442_v61 = vcombine.high %v1315_v55, %v1319_v56 }
 0x20c   :  { %7140 = vmatprep.subr.bf16.mxu0 %v11378_v24  ;;  %7390 = vmatprep.subr.bf16.mxu1 %v11140_v8  ;;  %v11171_v24 = vcombine.low %v1044_v2, %v1048_v3  ;;  %v11418_v8 = vcombine.high %v1291_v12, %v1295_v17  ;;  %v11180_v9 = vcombine.high %v1052_v20, %v1056_v21  ;;  %v13625_v2 = vld [vmem:[#allocation7 + $0x8] sm:$0xff]  ;;  %v1323_v3 = vld [vmem:[#allocation8 + $0xfc0] sm:$0xff] }
 0x20f   :  { %7141 = vmatpush1.bf16.msra.mxu0 %v11377_v32  ;;  %7391 = vmatpush1.bf16.msra.mxu1 %v11139_v34  ;;  %v1064_v32 = vld [vmem:[#allocation8 + $0x7a8] sm:$0xff]  ;;  %v11417_v34 = vcombine.low %v1291_v12, %v1295_v17 }
 0x210   :  { %7142 = vmatprep.subr.bf16.mxu0 %v11386_v38  ;;  %7392 = vmatprep.subr.bf16.mxu1 %v11148_v39  ;;  %v11179_v38 = vcombine.low %v1052_v20, %v1056_v21  ;;  %v11426_v39 = vcombine.high %v1299_v27, %v1303_v29  ;;  %v11188_v41 = vcombine.high %v1060_v31, %v1064_v32  ;;  %v1088_v12 = vld [vmem:[#allocation8 + $0x868] sm:$0xff]  ;;  %v1331_v21 = vld [vmem:[#allocation8 + $0x1000] sm:$0xff] }
 0x213   :  { %7143 = vmatpush1.bf16.msra.mxu0 %v11385_v46  ;;  %7393 = vmatpush1.bf16.msra.mxu1 %v11147_v47  ;;  %v1072_v46 = vld [vmem:[#allocation8 + $0x7e8] sm:$0xff]  ;;  %v13621_v47 = vsub.s32 6, %v13530_v13 }
 0x214   :  { %7144 = vmatprep.subr.bf16.mxu0 %v11394_v48  ;;  %7394 = vmatprep.subr.bf16.mxu1 %v11156_v49  ;;  %v11425_v48 = vcombine.low %v1299_v27, %v1303_v29  ;;  %v11187_v49 = vcombine.low %v1060_v31, %v1064_v32  ;;  %v11196_v52 = vcombine.high %v1068_v44, %v1072_v46 }
 0x215   :  { %v11195_v13 = vcombine.low %v1068_v44, %v1072_v46 }
 0x217   :  { %7145 = vmatpush1.bf16.msra.mxu0 %v11393_v57  ;;  %7395 = vmatpush1.bf16.msra.mxu1 %v11155_v63  ;;  %v1076_v57 = vld [vmem:[#allocation8 + $0x808] sm:$0xff] }
 0x218   :  { %7146 = vmatprep.subr.bf16.mxu0 %v11402_v59  ;;  %7396 = vmatprep.subr.bf16.mxu1 %v11164_v19  ;;  %v1080_v63 = vld [vmem:[#allocation8 + $0x828] sm:$0xff]  ;;  %v242_v59 = vrot.slane %v13535_v15, %v13621_v47  ;;  %v11433_v19 = vcombine.low %v1307_v42, %v1311_v43  ;;  %v11441_v15 = vcombine.low %v1315_v55, %v1319_v56 }
 0x219   :  { %v11204_v1 = vcombine.high %v1076_v57, %v1080_v63  ;;  %v11203_v17 = vcombine.low %v1076_v57, %v1080_v63  ;;  %v1104_v42 = vld [vmem:[#allocation8 + $0x8e8] sm:$0xff] }
 0x21a   :  { %v1108_v55 = vld [vmem:[#allocation8 + $0x908] sm:$0xff] }
 0x21b   :  { %7147 = vmatpush1.bf16.msra.mxu0 %v11401_v4  ;;  %7397 = vmatpush1.bf16.msra.mxu1 %v11163_v5  ;;  %v1327_v4 = vld [vmem:[#allocation8 + $0xfe0] sm:$0xff]  ;;  %v254_v5 = vrot.slane %v13625_v2, %v13538_v16  ;;  %v1112_v56 = vld [vmem:[#allocation8 + $0x928] sm:$0xff] }
 0x21c   :  { %7148 = vmatprep.subr.bf16.mxu0 %v11410_v7  ;;  %7398 = vmatprep.subr.bf16.mxu1 %v11172_v37  ;;  %v617_v7 = vadd.f32 %v13586_v36, %v242_v59  ;;  %v1084_v37 = vld [vmem:[#allocation8 + $0x848] sm:$0xff]  ;;  %v11450_v20 = vcombine.high %v1323_v3, %v1327_v4  ;;  %v11449_v36 = vcombine.low %v1323_v3, %v1327_v4 }
 0x21d   :  { %v660_v27 = vadd.f32 %v13605_v51, %v254_v5  ;;  %v11211_v31 = vcombine.low %v1084_v37, %v1088_v12  ;;  %v1116_v3 = vld [vmem:[#allocation8 + $0x948] sm:$0xff] }
 0x21e   :  { %v793_v29 = vmax.f32 %v617_v7, 0.0  ;;  %v1120_v4 = vld [vmem:[#allocation8 + $0x968] sm:$0xff]  ;;  %v11235_v7 = vcombine.low %v1108_v55, %v1112_v56 }
 0x21f   :  { %7149 = vmatpush1.bf16.msra.mxu0 %v11409_v22  ;;  %7399 = vmatpush1.bf16.msra.mxu1 %v11171_v24  ;;  %v11212_v22 = vcombine.high %v1084_v37, %v1088_v12  ;;  %v1335_v24 = vld [vmem:[#allocation8 + $0x1020] sm:$0xff]  ;;  %v796_v43 = vmax.f32 %v660_v27, 0.0  ;;  %v11244_v12 = vcombine.high %v1116_v3, %v1120_v4 }
 0x220   :  { %7150 = vmatprep.subr.bf16.mxu0 %v11418_v8  ;;  %7400 = vmatprep.subr.bf16.mxu1 %v11180_v9  ;;  %v1092_v8 = vld [vmem:[#allocation8 + $0x888] sm:$0xff]  ;;  %v11458_v32 = vcombine.high %v1331_v21, %v1335_v24  ;;  %v13633_v44 = vpack.c.bf16 %v793_v29, %v793_v29  ;;  %v11457_v51 = vcombine.low %v1331_v21, %v1335_v24  ;;  %v1371_v27 = vld [vmem:[#allocation8 + $0x1140] sm:$0xff] }
 0x221   :  { %v1096_v9 = vld [vmem:[#allocation8 + $0x8a8] sm:$0xff]  ;;  %v13635_v57 = vpack.c.bf16 %v796_v43, %v796_v43  ;;  %v11243_v24 = vcombine.low %v1116_v3, %v1120_v4  ;;  %v1375_v29 = vld [vmem:[#allocation8 + $0x1160] sm:$0xff] }
 0x222   :  { %v11219_v46 = vcombine.low %v1092_v8, %v1096_v9  ;;  %v1128_v21 = vld [vmem:[#allocation8 + $0x9a8] sm:$0xff]  ;;  %v1399_v3 = vld [vmem:[#allocation8 + $0x1220] sm:$0xff] }
 0x223   :  { %7151 = vmatpush1.bf16.msra.mxu0 %v11417_v34  ;;  %7401 = vmatpush1.bf16.msra.mxu1 %v11179_v38  ;;  %v11220_v34 = vcombine.high %v1092_v8, %v1096_v9  ;;  %v1339_v38 = vld [vmem:[#allocation8 + $0x1040] sm:$0xff]  ;;  %v1140_v43 = vld [vmem:[#allocation8 + $0xa08] sm:$0xff] }
 0x224   :  { %7152 = vmatprep.subr.bf16.mxu0 %v11426_v39  ;;  %7402 = vmatprep.subr.bf16.mxu1 %v11188_v41  ;;  %v1343_v39 = vld [vmem:[#allocation8 + $0x1060] sm:$0xff]  ;;  %v1100_v41 = vld [vmem:[#allocation8 + $0x8c8] sm:$0xff] }
 0x225   :  { %v11465_v63 = vcombine.low %v1339_v38, %v1343_v39  ;;  %v11227_v59 = vcombine.low %v1100_v41, %v1104_v42  ;;  %v1156_v4 = vld [vmem:[#allocation8 + $0xa88] sm:$0xff] }
 0x227   :  { %7153 = vmatpush1.bf16.msra.mxu0 %v11425_v48  ;;  %7403 = vmatpush1.bf16.msra.mxu1 %v11187_v49  ;;  %v11466_v48 = vcombine.high %v1339_v38, %v1343_v39  ;;  %v11228_v49 = vcombine.high %v1100_v41, %v1104_v42  ;;  %v11498_v38 = vcombine.high %v1371_v27, %v1375_v29  ;;  %v1379_v41 = vld [vmem:[#allocation8 + $0x1180] sm:$0xff] }
 0x228   :  { %7154 = vmatprep.subr.bf16.mxu0 %v11434_v50  ;;  %7404 = vmatprep.subr.bf16.mxu1 %v11196_v52  ;;  %v1347_v50 = vld [vmem:[#allocation8 + $0x1080] sm:$0xff] }
 0x229   :  { %v1351_v52 = vld [vmem:[#allocation8 + $0x10a0] sm:$0xff] }
 0x22a   :  { %v11473_v5 = vcombine.low %v1347_v50, %v1351_v52  ;;  %v1383_v42 = vld [vmem:[#allocation8 + $0x11a0] sm:$0xff] }
 0x22b   :  { %7155 = vmatpush1.bf16.msra.mxu0 %v11433_v19  ;;  %7405 = vmatpush1.bf16.msra.mxu1 %v11195_v13  ;;  %v11474_v19 = vcombine.high %v1347_v50, %v1351_v52  ;;  %v11236_v13 = vcombine.high %v1108_v55, %v1112_v56  ;;  %v1387_v52 = vld [vmem:[#allocation8 + $0x11c0] sm:$0xff]  ;;  %v1148_v56 = vld [vmem:[#allocation8 + $0xa48] sm:$0xff] }
 0x22c   :  { %7156 = vmatprep.subr.bf16.mxu0 %v11442_v61  ;;  %7415 = vmatprep.subr.bf16.mxu1 %v11204_v1  ;;  %v1355_v61 = vld [vmem:[#allocation8 + $0x10c0] sm:$0xff] }
 0x22d   :  { %v1359_v1 = vld [vmem:[#allocation8 + $0x10e0] sm:$0xff] }
 0x22e   :  { %7407 = vmatmul.mubr.bf16.vlgmr.msra.gmra.mrb[12].mxu1 %v13564_v53  ;;  %v11482_v37 = vcombine.high %v1355_v61, %v1359_v1  ;;  %v1391_v55 = vld [vmem:[#allocation8 + $0x11e0] sm:$0xff] }
 0x22f   :  { %7157 = vmatpush1.bf16.msra.mxu0 %v11441_v15  ;;  %7416 = vmatpush1.bf16.msra.mxu1 %v11203_v17  ;;  %v1363_v15 = vld [vmem:[#allocation8 + $0x1100] sm:$0xff] }
 0x230   :  { %7447 = vmatprep.mubr.bf16.mxu1 %v13581_v25  ;;  %7158 = vmatprep.subr.bf16.mxu0 %v11450_v20  ;;  %v1367_v17 = vld [vmem:[#allocation8 + $0x1120] sm:$0xff]  ;;  %v1124_v20 = vld [vmem:[#allocation8 + $0x988] sm:$0xff] }
 0x231   :  { %7417 = vmatprep.subr.bf16.mxu1 %v11212_v22  ;;  %v11481_v22 = vcombine.low %v1355_v61, %v1359_v1  ;;  %v11490_v8 = vcombine.high %v1363_v15, %v1367_v17  ;;  %v11252_v9 = vcombine.high %v1124_v20, %v1128_v21  ;;  %v1395_v1 = vld [vmem:[#allocation8 + $0x1200] sm:$0xff] }
 0x233   :  { %7159 = vmatpush1.bf16.msra.mxu0 %v11449_v36  ;;  %7418 = vmatpush1.bf16.msra.mxu1 %v11211_v31  ;;  %v1132_v36 = vld [vmem:[#allocation8 + $0x9c8] sm:$0xff] }
 0x234   :  { %7169 = vmatprep.subr.bf16.mxu0 %v11458_v32  ;;  %7419 = vmatprep.subr.bf16.mxu1 %v11220_v34  ;;  %v1136_v31 = vld [vmem:[#allocation8 + $0x9e8] sm:$0xff]  ;;  %v11489_v32 = vcombine.low %v1363_v15, %v1367_v17  ;;  %v11251_v34 = vcombine.low %v1124_v20, %v1128_v21  ;;  %v1403_v17 = vld [vmem:[#allocation8 + $0x1240] sm:$0xff] }
 0x235   :  { %v11260_v39 = vcombine.high %v1132_v36, %v1136_v31  ;;  %v1407_v20 = vld [vmem:[#allocation8 + $0x1260] sm:$0xff]  ;;  %v1164_v21 = vld [vmem:[#allocation8 + $0xac8] sm:$0xff] }
 0x236   :  { %7161 = vmatmul.mubr.bf16.vlgmr.msra.gmra.mrb[24].mxu0 %v13633_v44 }
 0x237   :  { %7170 = vmatpush1.bf16.msra.mxu0 %v11457_v51  ;;  %7420 = vmatpush1.bf16.msra.mxu1 %v11219_v46  ;;  %v1144_v51 = vld [vmem:[#allocation8 + $0xa28] sm:$0xff]  ;;  %v11497_v46 = vcombine.low %v1371_v27, %v1375_v29  ;;  %v1411_v29 = vld [vmem:[#allocation8 + $0x1280] sm:$0xff] }
 0x238   :  { %7171 = vmatprep.subr.bf16.mxu0 %v11466_v48  ;;  %7421 = vmatprep.subr.bf16.mxu1 %v11228_v49  ;;  %v11259_v48 = vcombine.low %v1132_v36, %v1136_v31  ;;  %v11506_v49 = vcombine.high %v1379_v41, %v1383_v42  ;;  %v11268_v50 = vcombine.high %v1140_v43, %v1144_v51  ;;  %v1415_v36 = vld [vmem:[#allocation8 + $0x12a0] sm:$0xff]  ;;  %v1172_v31 = vld [vmem:[#allocation8 + $0xb08] sm:$0xff] }
 0x239   :  { %7201 = vmatprep.mubr.bf16.mxu0 %v13635_v57 }
 0x23b   :  { %7172 = vmatpush1.bf16.msra.mxu0 %v11465_v63  ;;  %7422 = vmatpush1.bf16.msra.mxu1 %v11227_v59  ;;  %v1152_v63 = vld [vmem:[#allocation8 + $0xa68] sm:$0xff]  ;;  %v11505_v59 = vcombine.low %v1379_v41, %v1383_v42  ;;  %v1419_v42 = vld [vmem:[#allocation8 + $0x12c0] sm:$0xff] }
 0x23c   :  { %7173 = vmatprep.subr.bf16.mxu0 %v11474_v19  ;;  %7423 = vmatprep.subr.bf16.mxu1 %v11236_v13  ;;  %v11267_v19 = vcombine.low %v1140_v43, %v1144_v51  ;;  %v11514_v13 = vcombine.high %v1387_v52, %v1391_v55  ;;  %v11276_v61 = vcombine.high %v1148_v56, %v1152_v63  ;;  %v1423_v43 = vld [vmem:[#allocation8 + $0x12e0] sm:$0xff]  ;;  %v1180_v51 = vld [vmem:[#allocation8 + $0xb48] sm:$0xff] }
 0x23f   :  { %7174 = vmatpush1.bf16.msra.mxu0 %v11473_v5  ;;  %7424 = vmatpush1.bf16.msra.mxu1 %v11235_v7  ;;  %v1160_v5 = vld [vmem:[#allocation8 + $0xaa8] sm:$0xff]  ;;  %v11513_v7 = vcombine.low %v1387_v52, %v1391_v55  ;;  %v1427_v55 = vld [vmem:[#allocation8 + $0x1300] sm:$0xff] }
 0x240   :  { %7175 = vmatprep.subr.bf16.mxu0 %v11482_v37  ;;  %7425 = vmatprep.subr.bf16.mxu1 %v11244_v12  ;;  %v11275_v37 = vcombine.low %v1148_v56, %v1152_v63  ;;  %v11522_v12 = vcombine.high %v1395_v1, %v1399_v3  ;;  %v11284_v15 = vcombine.high %v1156_v4, %v1160_v5  ;;  %v1431_v56 = vld [vmem:[#allocation8 + $0x1320] sm:$0xff]  ;;  %v1188_v63 = vld [vmem:[#allocation8 + $0xb88] sm:$0xff] }
 0x243   :  { %7176 = vmatpush1.bf16.msra.mxu0 %v11481_v22  ;;  %7426 = vmatpush1.bf16.msra.mxu1 %v11243_v24  ;;  %v1168_v22 = vld [vmem:[#allocation8 + $0xae8] sm:$0xff]  ;;  %v11521_v24 = vcombine.low %v1395_v1, %v1399_v3  ;;  %v1435_v3 = vld [vmem:[#allocation8 + $0x1340] sm:$0xff] }
 0x244   :  { %7177 = vmatprep.subr.bf16.mxu0 %v11490_v8  ;;  %7427 = vmatprep.subr.bf16.mxu1 %v11252_v9  ;;  %v11283_v8 = vcombine.low %v1156_v4, %v1160_v5  ;;  %v11530_v9 = vcombine.high %v1403_v17, %v1407_v20  ;;  %v11292_v27 = vcombine.high %v1164_v21, %v1168_v22  ;;  %v1439_v4 = vld [vmem:[#allocation8 + $0x1360] sm:$0xff]  ;;  %v1196_v5 = vld [vmem:[#allocation8 + $0xbc8] sm:$0xff] }
 0x247   :  { %7178 = vmatpush1.bf16.msra.mxu0 %v11489_v32  ;;  %7428 = vmatpush1.bf16.msra.mxu1 %v11251_v34  ;;  %v1176_v32 = vld [vmem:[#allocation8 + $0xb28] sm:$0xff]  ;;  %v11529_v34 = vcombine.low %v1403_v17, %v1407_v20  ;;  %v1443_v20 = vld [vmem:[#allocation8 + $0x1380] sm:$0xff] }
 0x248   :  { %7179 = vmatprep.subr.bf16.mxu0 %v11498_v38  ;;  %7429 = vmatprep.subr.bf16.mxu1 %v11260_v39  ;;  %v11291_v38 = vcombine.low %v1164_v21, %v1168_v22  ;;  %v11538_v39 = vcombine.high %v1411_v29, %v1415_v36  ;;  %v11300_v41 = vcombine.high %v1172_v31, %v1176_v32  ;;  %v1447_v21 = vld [vmem:[#allocation8 + $0x13a0] sm:$0xff]  ;;  %v1204_v22 = vld [vmem:[#allocation8 + $0xc08] sm:$0xff] }
 0x24b   :  { %7180 = vmatpush1.bf16.msra.mxu0 %v11497_v46  ;;  %7430 = vmatpush1.bf16.msra.mxu1 %v11259_v48  ;;  %v1184_v46 = vld [vmem:[#allocation8 + $0xb68] sm:$0xff]  ;;  %v11537_v48 = vcombine.low %v1411_v29, %v1415_v36  ;;  %v11570_v29 = vcombine.high %v1443_v20, %v1447_v21 }
 0x24c   :  { %7181 = vmatprep.subr.bf16.mxu0 %v11506_v49  ;;  %7431 = vmatprep.subr.bf16.mxu1 %v11268_v50  ;;  %v11299_v49 = vcombine.low %v1172_v31, %v1176_v32  ;;  %v11546_v50 = vcombine.high %v1419_v42, %v1423_v43  ;;  %v11308_v52 = vcombine.high %v1180_v51, %v1184_v46  ;;  %v1451_v32 = vld [vmem:[#allocation8 + $0x13c0] sm:$0xff] }
 0x24d   :  { %v262_v31 = vrot.slane %v13625_v2, %v13548_v26 }
 0x24f   :  { %7182 = vmatpush1.bf16.msra.mxu0 %v11505_v59  ;;  %7432 = vmatpush1.bf16.msra.mxu1 %v11267_v19  ;;  %v1192_v59 = vld [vmem:[#allocation8 + $0xba8] sm:$0xff]  ;;  %v11545_v19 = vcombine.low %v1419_v42, %v1423_v43  ;;  %v11569_v42 = vcombine.low %v1443_v20, %v1447_v21  ;;  %v1479_v20 = vld [vmem:[#allocation8 + $0x14a0] sm:$0xff] }
 0x250   :  { %7183 = vmatprep.subr.bf16.mxu0 %v11514_v13  ;;  %7433 = vmatprep.subr.bf16.mxu1 %v11276_v61  ;;  %v11307_v13 = vcombine.low %v1180_v51, %v1184_v46  ;;  %v11554_v61 = vcombine.high %v1427_v55, %v1431_v56  ;;  %v11316_v1 = vcombine.high %v1188_v63, %v1192_v59  ;;  %v1459_v46 = vld [vmem:[#allocation8 + $0x1400] sm:$0xff]  ;;  %v1236_v21 = vld [vmem:[#allocation8 + $0xd08] sm:$0xff] }
 0x253   :  { %7184 = vmatpush1.bf16.msra.mxu0 %v11513_v7  ;;  %7434 = vmatpush1.bf16.msra.mxu1 %v11275_v37  ;;  %v1200_v7 = vld [vmem:[#allocation8 + $0xbe8] sm:$0xff]  ;;  %v11553_v37 = vcombine.low %v1427_v55, %v1431_v56 }
 0x254   :  { %7185 = vmatprep.subr.bf16.mxu0 %v11522_v12  ;;  %7435 = vmatprep.subr.bf16.mxu1 %v11284_v15  ;;  %v11315_v12 = vcombine.low %v1188_v63, %v1192_v59  ;;  %v11562_v15 = vcombine.high %v1435_v3, %v1439_v4  ;;  %v11324_v17 = vcombine.high %v1196_v5, %v1200_v7  ;;  %v1224_v55 = vld [vmem:[#allocation8 + $0xca8] sm:$0xff] }
 0x257   :  { %7186 = vmatpush1.bf16.msra.mxu0 %v11521_v24  ;;  %7436 = vmatpush1.bf16.msra.mxu1 %v11283_v8  ;;  %v1208_v24 = vld [vmem:[#allocation8 + $0xc28] sm:$0xff]  ;;  %v250_v8 = vrot.slane %v13625_v2, %v13533_v14 }
 0x258   :  { %7187 = vmatprep.subr.bf16.mxu0 %v11530_v9  ;;  %7437 = vmatprep.subr.bf16.mxu1 %v11292_v27  ;;  %v11561_v9 = vcombine.low %v1435_v3, %v1439_v4  ;;  %v11323_v27 = vcombine.low %v1196_v5, %v1200_v7  ;;  %v11332_v36 = vcombine.high %v1204_v22, %v1208_v24  ;;  %v1228_v3 = vld [vmem:[#allocation8 + $0xcc8] sm:$0xff] }
 0x259   :  { %v11331_v43 = vcombine.low %v1204_v22, %v1208_v24  ;;  %v1232_v4 = vld [vmem:[#allocation8 + $0xce8] sm:$0xff] }
 0x25a   :  { %v1240_v22 = vld [vmem:[#allocation8 + $0xd28] sm:$0xff] }
 0x25b   :  { %7188 = vmatpush1.bf16.msra.mxu0 %v11529_v34  ;;  %7438 = vmatpush1.bf16.msra.mxu1 %v11291_v38  ;;  %v1455_v34 = vld [vmem:[#allocation8 + $0x13e0] sm:$0xff]  ;;  %v658_v38 = vadd.f32 %v13603_v0, %v250_v8  ;;  %v11355_v8 = vcombine.low %v1228_v3, %v1232_v4 }
 0x25c   :  { %7189 = vmatprep.subr.bf16.mxu0 %v11538_v39  ;;  %7439 = vmatprep.subr.bf16.mxu1 %v11300_v41  ;;  %v1212_v39 = vld [vmem:[#allocation8 + $0xc48] sm:$0xff]  ;;  %v11578_v51 = vcombine.high %v1451_v32, %v1455_v34  ;;  %v11577_v0 = vcombine.low %v1451_v32, %v1455_v34 }
 0x25d   :  { %v1216_v41 = vld [vmem:[#allocation8 + $0xc68] sm:$0xff]  ;;  %v795_v56 = vmax.f32 %v658_v38, 0.0  ;;  %v11363_v38 = vcombine.low %v1236_v21, %v1240_v22 }
 0x25e   :  { %v11339_v63 = vcombine.low %v1212_v39, %v1216_v41  ;;  %v1248_v32 = vld [vmem:[#allocation8 + $0xd68] sm:$0xff] }
 0x25f   :  { %7190 = vmatpush1.bf16.msra.mxu0 %v11537_v48  ;;  %7440 = vmatpush1.bf16.msra.mxu1 %v11299_v49  ;;  %v701_v48 = vadd.f32 %v13579_v6, %v262_v31  ;;  %v11340_v49 = vcombine.high %v1212_v39, %v1216_v41  ;;  %v1471_v6 = vld [vmem:[#allocation8 + $0x1460] sm:$0xff]  ;;  %v1244_v31 = vld [vmem:[#allocation8 + $0xd48] sm:$0xff] }
 0x260   :  { %7191 = vmatprep.subr.bf16.mxu0 %v11546_v50  ;;  %7441 = vmatprep.subr.bf16.mxu1 %v11308_v52  ;;  %v1463_v50 = vld [vmem:[#allocation8 + $0x1420] sm:$0xff]  ;;  %v1220_v52 = vld [vmem:[#allocation8 + $0xc88] sm:$0xff]  ;;  %v11372_v41 = vcombine.high %v1244_v31, %v1248_v32 }
 0x261   :  { %v11586_v59 = vcombine.high %v1459_v46, %v1463_v50  ;;  %v11585_v5 = vcombine.low %v1459_v46, %v1463_v50  ;;  %v11347_v7 = vcombine.low %v1220_v52, %v1224_v55  ;;  %v1256_v46 = vld [vmem:[#allocation8 + $0xda8] sm:$0xff] }
 0x263   :  { %7192 = vmatpush1.bf16.msra.mxu0 %v11545_v19  ;;  %7442 = vmatpush1.bf16.msra.mxu1 %v11307_v13  ;;  %v11348_v19 = vcombine.high %v1220_v52, %v1224_v55  ;;  %v798_v13 = vmax.f32 %v701_v48, 0.0 }
 0x264   :  { %7193 = vmatprep.subr.bf16.mxu0 %v11554_v61  ;;  %7443 = vmatprep.subr.bf16.mxu1 %v11316_v1  ;;  %v1467_v61 = vld [vmem:[#allocation8 + $0x1440] sm:$0xff]  ;;  %v13647_v1 = vpack.c.bf16 %v795_v56, %v795_v56 }
 0x265   :  { %v11593_v24 = vcombine.low %v1467_v61, %v1471_v6  ;;  %v1499_v56 = vld [vmem:[#allocation8 + $0x1540] sm:$0xff] }
 0x267   :  { %7194 = vmatpush1.bf16.msra.mxu0 %v11553_v37  ;;  %7444 = vmatpush1.bf16.msra.mxu1 %v11315_v12  ;;  %v11594_v37 = vcombine.high %v1467_v61, %v1471_v6  ;;  %v13649_v12 = vpack.c.bf16 %v798_v13, %v798_v13 }
 0x268   :  { %7195 = vmatprep.subr.bf16.mxu0 %v11562_v15  ;;  %7445 = vmatprep.subr.bf16.mxu1 %v11324_v17  ;;  %v11356_v15 = vcombine.high %v1228_v3, %v1232_v4  ;;  %v1475_v17 = vld [vmem:[#allocation8 + $0x1480] sm:$0xff] }
 0x269   :  { %v11601_v34 = vcombine.low %v1475_v17, %v1479_v20 }
 0x26b   :  { %7196 = vmatpush1.bf16.msra.mxu0 %v11561_v9  ;;  %7446 = vmatpush1.bf16.msra.mxu1 %v11323_v27  ;;  %v11602_v9 = vcombine.high %v1475_v17, %v1479_v20  ;;  %v11364_v27 = vcombine.high %v1236_v21, %v1240_v22  ;;  %v1272_v17 = vld [vmem:[#allocation8 + $0xe28] sm:$0xff] }
 0x26c   :  { %7197 = vmatprep.subr.bf16.mxu0 %v11570_v29  ;;  %7456 = vmatprep.subr.bf16.mxu1 %v11332_v36  ;;  %v1483_v29 = vld [vmem:[#allocation8 + $0x14c0] sm:$0xff] }
 0x26d   :  { %v1487_v36 = vld [vmem:[#allocation8 + $0x14e0] sm:$0xff] }
 0x26e   :  { %7448 = vmatmul.mubr.bf16.vlgmr.msra.gmra.mrb[12].mxu1 %v13610_v10  ;;  %v11610_v39 = vcombine.high %v1483_v29, %v1487_v36  ;;  %v11609_v48 = vcombine.low %v1483_v29, %v1487_v36  ;;  %v1280_v29 = vld [vmem:[#allocation8 + $0xe68] sm:$0xff] }
 0x26f   :  { %7198 = vmatpush1.bf16.msra.mxu0 %v11569_v42  ;;  %7457 = vmatpush1.bf16.msra.mxu1 %v11331_v43  ;;  %v1491_v42 = vld [vmem:[#allocation8 + $0x1500] sm:$0xff] }
 0x270   :  { %7488 = vmatprep.mubr.bf16.mxu1 %v13612_v11  ;;  %7199 = vmatprep.subr.bf16.mxu0 %v11578_v51  ;;  %v1495_v43 = vld [vmem:[#allocation8 + $0x1520] sm:$0xff]  ;;  %v1252_v51 = vld [vmem:[#allocation8 + $0xd88] sm:$0xff] }
 0x271   :  { %7458 = vmatprep.subr.bf16.mxu1 %v11340_v49  ;;  %v11371_v49 = vcombine.low %v1244_v31, %v1248_v32  ;;  %v11618_v50 = vcombine.high %v1491_v42, %v1495_v43  ;;  %v11380_v55 = vcombine.high %v1252_v51, %v1256_v46  ;;  %v11617_v61 = vcombine.low %v1491_v42, %v1495_v43  ;;  %v1288_v42 = vld [vmem:[#allocation8 + $0xea8] sm:$0xff] }
 0x272   :  { %v11379_v3 = vcombine.low %v1252_v51, %v1256_v46 }
 0x273   :  { %7200 = vmatpush1.bf16.msra.mxu0 %v11577_v0  ;;  %7459 = vmatpush1.bf16.msra.mxu1 %v11339_v63  ;;  %v1503_v0 = vld [vmem:[#allocation8 + $0x1560] sm:$0xff] }
 0x274   :  { %7210 = vmatprep.subr.bf16.mxu0 %v11586_v59  ;;  %7460 = vmatprep.subr.bf16.mxu1 %v11348_v19  ;;  %v1260_v59 = vld [vmem:[#allocation8 + $0xdc8] sm:$0xff]  ;;  %v11626_v4 = vcombine.high %v1499_v56, %v1503_v0  ;;  %v11625_v20 = vcombine.low %v1499_v56, %v1503_v0 }
 0x275   :  { %v1264_v19 = vld [vmem:[#allocation8 + $0xde8] sm:$0xff] }
 0x276   :  { %7202 = vmatmul.mubr.bf16.vlgmr.msra.gmra.mrb[24].mxu0 %v13647_v1  ;;  %v11387_v21 = vcombine.low %v1260_v59, %v1264_v19  ;;  %v1296_v56 = vld [vmem:[#allocation8 + $0xee8] sm:$0xff] }
 0x277   :  { %7211 = vmatpush1.bf16.msra.mxu0 %v11585_v5  ;;  %7242 = vmatprep.mubr.bf16.mxu0 %v13649_v12  ;;  %v11388_v5 = vcombine.high %v1260_v59, %v1264_v19 }
 0x278   :  { %7461 = vmatpush1.bf16.msra.mxu1 %v11347_v7  ;;  %7212 = vmatprep.subr.bf16.mxu0 %v11594_v37  ;;  %v1507_v7 = vld [vmem:[#allocation8 + $0x1580] sm:$0xff] }
 0x279   :  { %7462 = vmatprep.subr.bf16.mxu1 %v11356_v15  ;;  %v1511_v37 = vld [vmem:[#allocation8 + $0x15a0] sm:$0xff]  ;;  %v1268_v15 = vld [vmem:[#allocation8 + $0xe08] sm:$0xff] }
 0x27a   :  { %v11634_v22 = vcombine.high %v1507_v7, %v1511_v37  ;;  %v11633_v36 = vcombine.low %v1507_v7, %v1511_v37  ;;  %v11395_v31 = vcombine.low %v1268_v15, %v1272_v17 }
 0x27b   :  { %7213 = vmatpush1.bf16.msra.mxu0 %v11593_v24  ;;  %v11396_v24 = vcombine.high %v1268_v15, %v1272_v17  ;;  %v1547_v17 = vld [vmem:[#allocation8 + $0x16c0] sm:$0xff] }
 0x27c   :  { %7463 = vmatpush1.bf16.msra.mxu1 %v11355_v8  ;;  %7214 = vmatprep.subr.bf16.mxu0 %v11602_v9  ;;  %v1515_v8 = vld [vmem:[#allocation8 + $0x15c0] sm:$0xff] }
 0x27d   :  { %7464 = vmatprep.subr.bf16.mxu1 %v11364_v27  ;;  %v1519_v9 = vld [vmem:[#allocation8 + $0x15e0] sm:$0xff]  ;;  %v1276_v27 = vld [vmem:[#allocation8 + $0xe48] sm:$0xff] }
 0x27e   :  { %v11642_v32 = vcombine.high %v1515_v8, %v1519_v9  ;;  %v11641_v43 = vcombine.low %v1515_v8, %v1519_v9  ;;  %v11403_v51 = vcombine.low %v1276_v27, %v1280_v29 }
 0x27f   :  { %7215 = vmatpush1.bf16.msra.mxu0 %v11601_v34  ;;  %v11404_v34 = vcombine.high %v1276_v27, %v1280_v29  ;;  %v1555_v29 = vld [vmem:[#allocation8 + $0x1700] sm:$0xff] }
 0x280   :  { %7465 = vmatpush1.bf16.msra.mxu1 %v11363_v38  ;;  %7216 = vmatprep.subr.bf16.mxu0 %v11610_v39  ;;  %v1523_v38 = vld [vmem:[#allocation8 + $0x1600] sm:$0xff] }
 0x281   :  { %v13653_v52 = vpop.f32.mrb[8].mxu1  ;;  %7466 = vmatprep.subr.bf16.mxu1 %v11372_v41  ;;  %v1527_v39 = vld [vmem:[#allocation8 + $0x1620] sm:$0xff]  ;;  %v1284_v41 = vld [vmem:[#allocation8 + $0xe88] sm:$0xff] }
 0x282   :  { %v13655_v63 = vpop.f32.mrb[9].mxu1  ;;  %v11650_v46 = vcombine.high %v1523_v38, %v1527_v39  ;;  %v11649_v0 = vcombine.low %v1523_v38, %v1527_v39  ;;  %v11411_v59 = vcombine.low %v1284_v41, %v1288_v42 }
 0x283   :  { %7217 = vmatpush1.bf16.msra.mxu0 %v11609_v48  ;;  %v7043_v13 = vpop.f32.mrb[10].mxu1  ;;  %v11412_v48 = vcombine.high %v1284_v41, %v1288_v42  ;;  %v1563_v42 = vld [vmem:[#allocation8 + $0x1740] sm:$0xff] }
 0x284   :  { %7467 = vmatpush1.bf16.msra.mxu1 %v11371_v49  ;;  %v7044_v6 = vpop.f32.mrb[11].mxu1  ;;  %7218 = vmatprep.subr.bf16.mxu0 %v11618_v50  ;;  %v1531_v49 = vld [vmem:[#allocation8 + $0x1640] sm:$0xff] }
 0x285   :  { %7468 = vmatprep.subr.bf16.mxu1 %v11380_v55  ;;  %v1535_v50 = vld [vmem:[#allocation8 + $0x1660] sm:$0xff]  ;;  %v1292_v55 = vld [vmem:[#allocation8 + $0xec8] sm:$0xff] }
 0x286   :  { %v11658_v19 = vcombine.high %v1531_v49, %v1535_v50  ;;  %v11420_v13 = vcombine.high %v1292_v55, %v1296_v56  ;;  %v1543_v6 = vld [vmem:[#allocation8 + $0x16a0] sm:$0xff]  ;;  %v11419_v7 = vcombine.low %v1292_v55, %v1296_v56 }
 0x287   :  { %7219 = vmatpush1.bf16.msra.mxu0 %v11617_v61  ;;  %v1539_v61 = vld [vmem:[#allocation8 + $0x1680] sm:$0xff] }
 0x288   :  { %7469 = vmatpush1.bf16.msra.mxu1 %v11379_v3  ;;  %7220 = vmatprep.subr.bf16.mxu0 %v11626_v4  ;;  %v1300_v3 = vld [vmem:[#allocation8 + $0xf08] sm:$0xff]  ;;  %v11666_v37 = vcombine.high %v1539_v61, %v1543_v6  ;;  %v1571_v56 = vld [vmem:[#allocation8 + $0x1780] sm:$0xff] }
 0x289   :  { %7470 = vmatprep.subr.bf16.mxu1 %v11388_v5  ;;  %v1304_v4 = vld [vmem:[#allocation8 + $0xf28] sm:$0xff]  ;;  %v11657_v5 = vcombine.low %v1531_v49, %v1535_v50 }
 0x28a   :  { %v11428_v15 = vcombine.high %v1300_v3, %v1304_v4  ;;  %v11427_v8 = vcombine.low %v1300_v3, %v1304_v4  ;;  %v270_v4 = vrot.slane %v13625_v2, %v13562_v45 }
 0x28b   :  { %7221 = vmatpush1.bf16.msra.mxu0 %v11625_v20  ;;  %v1551_v20 = vld [vmem:[#allocation8 + $0x16e0] sm:$0xff] }
 0x28c   :  { %7471 = vmatpush1.bf16.msra.mxu1 %v11387_v21  ;;  %7222 = vmatprep.subr.bf16.mxu0 %v11634_v22  ;;  %v1308_v21 = vld [vmem:[#allocation8 + $0xf48] sm:$0xff]  ;;  %v11674_v9 = vcombine.high %v1547_v17, %v1551_v20 }
 0x28d   :  { %7472 = vmatprep.subr.bf16.mxu1 %v11396_v24  ;;  %v1312_v22 = vld [vmem:[#allocation8 + $0xf68] sm:$0xff]  ;;  %v11665_v24 = vcombine.low %v1539_v61, %v1543_v6  ;;  %v258_v61 = vrot.slane %v13625_v2, %v13545_v23  ;;  %v1591_v2 = vld [vmem:[#allocation8 + $0x1820] sm:$0xff] }
 0x28e   :  { %v11436_v27 = vcombine.high %v1308_v21, %v1312_v22  ;;  %v11435_v38 = vcombine.low %v1308_v21, %v1312_v22 }
 0x28f   :  { %7223 = vmatpush1.bf16.msra.mxu0 %v11633_v36  ;;  %v1559_v36 = vld [vmem:[#allocation8 + $0x1720] sm:$0xff]  ;;  %v699_v21 = vadd.f32 %v13570_v60, %v258_v61 }
 0x290   :  { %7473 = vmatpush1.bf16.msra.mxu1 %v11395_v31  ;;  %7224 = vmatprep.subr.bf16.mxu0 %v11642_v32  ;;  %v1316_v31 = vld [vmem:[#allocation8 + $0xf88] sm:$0xff]  ;;  %v11682_v39 = vcombine.high %v1555_v29, %v1559_v36 }
 0x291   :  { %7474 = vmatprep.subr.bf16.mxu1 %v11404_v34  ;;  %v1320_v32 = vld [vmem:[#allocation8 + $0xfa8] sm:$0xff]  ;;  %v11673_v34 = vcombine.low %v1547_v17, %v1551_v20 }
 0x292   :  { %v11444_v41 = vcombine.high %v1316_v31, %v1320_v32  ;;  %v11443_v49 = vcombine.low %v1316_v31, %v1320_v32  ;;  %v1344_v17 = vld [vmem:[#allocation8 + $0x1068] sm:$0xff]  ;;  %v797_v32 = vmax.f32 %v699_v21, 0.0 }
 0x293   :  { %7225 = vmatpush1.bf16.msra.mxu0 %v11641_v43  ;;  %v1567_v43 = vld [vmem:[#allocation8 + $0x1760] sm:$0xff] }
 0x294   :  { %7475 = vmatpush1.bf16.msra.mxu1 %v11403_v51  ;;  %7226 = vmatprep.subr.bf16.mxu0 %v11650_v46  ;;  %v1324_v51 = vld [vmem:[#allocation8 + $0xfc8] sm:$0xff]  ;;  %v11690_v50 = vcombine.high %v1563_v42, %v1567_v43 }
 0x295   :  { %7476 = vmatprep.subr.bf16.mxu1 %v11412_v48  ;;  %v1328_v46 = vld [vmem:[#allocation8 + $0xfe8] sm:$0xff]  ;;  %v11681_v48 = vcombine.low %v1555_v29, %v1559_v36 }
 0x296   :  { %v11452_v55 = vcombine.high %v1324_v51, %v1328_v46  ;;  %v11451_v6 = vcombine.low %v1324_v51, %v1328_v46  ;;  %v1348_v29 = vld [vmem:[#allocation8 + $0x1088] sm:$0xff]  ;;  %v13665_v46 = vpack.c.bf16 %v797_v32, %v797_v32  ;;  %v1631_v32 = vld [vmem:[#allocation8 + $0x1960] sm:$0xff] }
 0x297   :  { %7227 = vmatpush1.bf16.msra.mxu0 %v11649_v0  ;;  %v1575_v0 = vld [vmem:[#allocation8 + $0x17a0] sm:$0xff]  ;;  %v1352_v36 = vld [vmem:[#allocation8 + $0x10a8] sm:$0xff] }
 0x298   :  { %7477 = vmatpush1.bf16.msra.mxu1 %v11411_v59  ;;  %7228 = vmatprep.subr.bf16.mxu0 %v11658_v19  ;;  %v1332_v59 = vld [vmem:[#allocation8 + $0x1008] sm:$0xff]  ;;  %v11698_v3 = vcombine.high %v1571_v56, %v1575_v0  ;;  %v11697_v20 = vcombine.low %v1571_v56, %v1575_v0  ;;  %v1603_v56 = vld [vmem:[#allocation8 + $0x1880] sm:$0xff] }
 0x299   :  { %7478 = vmatprep.subr.bf16.mxu1 %v11420_v13  ;;  %v1336_v19 = vld [vmem:[#allocation8 + $0x1028] sm:$0xff]  ;;  %v11689_v13 = vcombine.low %v1563_v42, %v1567_v43  ;;  %v1607_v0 = vld [vmem:[#allocation8 + $0x18a0] sm:$0xff] }
 0x29a   :  { %v11459_v22 = vcombine.low %v1332_v59, %v1336_v19  ;;  %v1356_v42 = vld [vmem:[#allocation8 + $0x10c8] sm:$0xff] }
 0x29b   :  { %7229 = vmatpush1.bf16.msra.mxu0 %v11657_v5  ;;  %v11460_v5 = vcombine.high %v1332_v59, %v1336_v19  ;;  %v1360_v43 = vld [vmem:[#allocation8 + $0x10e8] sm:$0xff] }
 0x29c   :  { %7479 = vmatpush1.bf16.msra.mxu1 %v11419_v7  ;;  %7230 = vmatprep.subr.bf16.mxu0 %v11666_v37  ;;  %v1579_v7 = vld [vmem:[#allocation8 + $0x17c0] sm:$0xff]  ;;  %v1364_v59 = vld [vmem:[#allocation8 + $0x1108] sm:$0xff]  ;;  %v11483_v61 = vcombine.low %v1356_v42, %v1360_v43 }
 0x29d   :  { %7480 = vmatprep.subr.bf16.mxu1 %v11428_v15  ;;  %v1583_v37 = vld [vmem:[#allocation8 + $0x17e0] sm:$0xff]  ;;  %v1340_v15 = vld [vmem:[#allocation8 + $0x1048] sm:$0xff] }
 0x29e   :  { %v11705_v31 = vcombine.low %v1579_v7, %v1583_v37  ;;  %v11467_v60 = vcombine.low %v1340_v15, %v1344_v17  ;;  %v1368_v19 = vld [vmem:[#allocation8 + $0x1128] sm:$0xff] }
 0x29f   :  { %7231 = vmatpush1.bf16.msra.mxu0 %v11665_v24  ;;  %v742_v24 = vadd.f32 %v13618_v62, %v270_v4  ;;  %v11476_v62 = vcombine.high %v1348_v29, %v1352_v36  ;;  %v1611_v4 = vld [vmem:[#allocation8 + $0x18c0] sm:$0xff] }
 0x2a0   :  { %7481 = vmatpush1.bf16.msra.mxu1 %v11427_v8  ;;  %7232 = vmatprep.subr.bf16.mxu0 %v11674_v9  ;;  %v11706_v8 = vcombine.high %v1579_v7, %v1583_v37  ;;  %v11468_v9 = vcombine.high %v1340_v15, %v1344_v17  ;;  %v1372_v7 = vld [vmem:[#allocation8 + $0x1148] sm:$0xff]  ;;  %v11729_v15 = vcombine.low %v1603_v56, %v1607_v0 }
 0x2a1   :  { %7482 = vmatprep.subr.bf16.mxu1 %v11436_v27  ;;  %v1587_v27 = vld [vmem:[#allocation8 + $0x1800] sm:$0xff]  ;;  %v1376_v37 = vld [vmem:[#allocation8 + $0x1168] sm:$0xff]  ;;  %v11491_v17 = vcombine.low %v1364_v59, %v1368_v19 }
 0x2a2   :  { %v11713_v51 = vcombine.low %v1587_v27, %v1591_v2  ;;  %v11500_v21 = vcombine.high %v1372_v7, %v1376_v37 }
 0x2a3   :  { %7233 = vmatpush1.bf16.msra.mxu0 %v11673_v34  ;;  %v11714_v34 = vcombine.high %v1587_v27, %v1591_v2  ;;  %v11499_v2 = vcombine.low %v1372_v7, %v1376_v37  ;;  %v1651_v7 = vld [vmem:[#allocation8 + $0x1a00] sm:$0xff] }
 0x2a4   :  { %7483 = vmatpush1.bf16.msra.mxu1 %v11435_v38  ;;  %7234 = vmatprep.subr.bf16.mxu0 %v11682_v39  ;;  %v800_v38 = vmax.f32 %v742_v24, 0.0  ;;  %v1595_v39 = vld [vmem:[#allocation8 + $0x1840] sm:$0xff] }
 0x2a5   :  { %7484 = vmatprep.subr.bf16.mxu1 %v11444_v41  ;;  %v1599_v41 = vld [vmem:[#allocation8 + $0x1860] sm:$0xff] }
 0x2a6   :  { %v1623_v24 = vld [vmem:[#allocation8 + $0x1920] sm:$0xff] }
 0x2a7   :  { %7235 = vmatpush1.bf16.msra.mxu0 %v11681_v48  ;;  %v11475_v48 = vcombine.low %v1348_v29, %v1352_v36  ;;  %v1655_v37 = vld [vmem:[#allocation8 + $0x1a20] sm:$0xff] }
 0x2a8   :  { %7485 = vmatpush1.bf16.msra.mxu1 %v11443_v49  ;;  %7236 = vmatprep.subr.bf16.mxu0 %v11690_v50  ;;  %v11722_v49 = vcombine.high %v1595_v39, %v1599_v41  ;;  %v13667_v50 = vpack.c.bf16 %v800_v38, %v800_v38 }
 0x2a9   :  { %7486 = vmatprep.subr.bf16.mxu1 %v11452_v55  ;;  %v11484_v55 = vcombine.high %v1356_v42, %v1360_v43  ;;  %v1635_v42 = vld [vmem:[#allocation8 + $0x1980] sm:$0xff] }
 0x2aa   :  { %v1639_v43 = vld [vmem:[#allocation8 + $0x19a0] sm:$0xff] }
 0x2ab   :  { %7237 = vmatpush1.bf16.msra.mxu0 %v11689_v13  ;;  %v11721_v13 = vcombine.low %v1595_v39, %v1599_v41 }
 0x2ac   :  { %7487 = vmatpush1.bf16.msra.mxu1 %v11451_v6  ;;  %7238 = vmatprep.subr.bf16.mxu0 %v11698_v3  ;;  %v11730_v6 = vcombine.high %v1603_v56, %v1607_v0  ;;  %v11492_v3 = vcombine.high %v1364_v59, %v1368_v19  ;;  %v11762_v56 = vcombine.high %v1635_v42, %v1639_v43  ;;  %v1643_v59 = vld [vmem:[#allocation8 + $0x19c0] sm:$0xff] }
 0x2ad   :  { %7497 = vmatprep.subr.bf16.mxu1 %v11460_v5  ;;  %v1615_v5 = vld [vmem:[#allocation8 + $0x18e0] sm:$0xff] }
 0x2ae   :  { %v11737_v27 = vcombine.low %v1611_v4, %v1615_v5  ;;  %v1647_v19 = vld [vmem:[#allocation8 + $0x19e0] sm:$0xff] }
 0x2af   :  { %7489 = vmatmul.mubr.bf16.vlgmr.msra.gmra.mrb[12].mxu1 %v13633_v44  ;;  %7239 = vmatpush1.bf16.msra.mxu0 %v11697_v20  ;;  %v11738_v20 = vcombine.high %v1611_v4, %v1615_v5  ;;  %v11770_v4 = vcombine.high %v1643_v59, %v1647_v19 }
 0x2b0   :  { %7498 = vmatpush1.bf16.msra.mxu1 %v11459_v22  ;;  %7529 = vmatprep.mubr.bf16.mxu1 %v13635_v57  ;;  %v1619_v22 = vld [vmem:[#allocation8 + $0x1900] sm:$0xff] }
 0x2b1   :  { %7240 = vmatprep.subr.bf16.mxu0 %v11706_v8  ;;  %7499 = vmatprep.subr.bf16.mxu1 %v11468_v9  ;;  %v1380_v8 = vld [vmem:[#allocation8 + $0x1188] sm:$0xff]  ;;  %v11746_v29 = vcombine.high %v1619_v22, %v1623_v24  ;;  %v11745_v38 = vcombine.low %v1619_v22, %v1623_v24  ;;  %v11778_v22 = vcombine.high %v1651_v7, %v1655_v37 }
 0x2b2   :  { %v1384_v9 = vld [vmem:[#allocation8 + $0x11a8] sm:$0xff] }
 0x2b3   :  { %7241 = vmatpush1.bf16.msra.mxu0 %v11705_v31  ;;  %v11508_v36 = vcombine.high %v1380_v8, %v1384_v9  ;;  %v1627_v31 = vld [vmem:[#allocation8 + $0x1940] sm:$0xff] }
 0x2b4   :  { %7500 = vmatpush1.bf16.msra.mxu1 %v11467_v60  ;;  %7251 = vmatprep.subr.bf16.mxu0 %v11714_v34  ;;  %v1388_v60 = vld [vmem:[#allocation8 + $0x11c8] sm:$0xff]  ;;  %v11754_v39 = vcombine.high %v1627_v31, %v1631_v32 }
 0x2b5   :  { %7501 = vmatprep.subr.bf16.mxu1 %v11476_v62  ;;  %v1392_v34 = vld [vmem:[#allocation8 + $0x11e8] sm:$0xff]  ;;  %v11507_v62 = vcombine.low %v1380_v8, %v1384_v9  ;;  %v1659_v8 = vld [vmem:[#allocation8 + $0x1a40] sm:$0xff] }
 0x2b6   :  { %7243 = vmatmul.mubr.bf16.vlgmr.msra.gmra.mrb[24].mxu0 %v13665_v46  ;;  %v11516_v41 = vcombine.high %v1388_v60, %v1392_v34  ;;  %v1663_v9 = vld [vmem:[#allocation8 + $0x1a60] sm:$0xff] }
 0x2b7   :  { %7252 = vmatpush1.bf16.msra.mxu0 %v11713_v51  ;;  %7283 = vmatprep.mubr.bf16.mxu0 %v13667_v50  ;;  %v1396_v51 = vld [vmem:[#allocation8 + $0x1208] sm:$0xff] }
 0x2b8   :  { %7502 = vmatpush1.bf16.msra.mxu1 %v11475_v48  ;;  %7253 = vmatprep.subr.bf16.mxu0 %v11722_v49  ;;  %v1400_v48 = vld [vmem:[#allocation8 + $0x1228] sm:$0xff]  ;;  %v11753_v49 = vcombine.low %v1627_v31, %v1631_v32  ;;  %v11786_v31 = vcombine.high %v1659_v8, %v1663_v9 }
 0x2b9   :  { %7503 = vmatprep.subr.bf16.mxu1 %v11484_v55  ;;  %v11515_v55 = vcombine.low %v1388_v60, %v1392_v34  ;;  %v11524_v0 = vcombine.high %v1396_v51, %v1400_v48  ;;  %v1667_v60 = vld [vmem:[#allocation8 + $0x1a80] sm:$0xff] }
 0x2ba   :  { %v1671_v34 = vld [vmem:[#allocation8 + $0x1aa0] sm:$0xff] }
 0x2bb   :  { %7254 = vmatpush1.bf16.msra.mxu0 %v11721_v13  ;;  %v1404_v13 = vld [vmem:[#allocation8 + $0x1248] sm:$0xff] }
 0x2bc   :  { %7504 = vmatpush1.bf16.msra.mxu1 %v11483_v61  ;;  %7255 = vmatprep.subr.bf16.mxu0 %v11730_v6  ;;  %v1408_v61 = vld [vmem:[#allocation8 + $0x1268] sm:$0xff]  ;;  %v11761_v6 = vcombine.low %v1635_v42, %v1639_v43  ;;  %v11794_v42 = vcombine.high %v1667_v60, %v1671_v34 }
 0x2bd   :  { %7505 = vmatprep.subr.bf16.mxu1 %v11492_v3  ;;  %v11523_v3 = vcombine.low %v1396_v51, %v1400_v48  ;;  %v11532_v5 = vcombine.high %v1404_v13, %v1408_v61  ;;  %v1675_v51 = vld [vmem:[#allocation8 + $0x1ac0] sm:$0xff] }
 0x2be   :  { %v1679_v48 = vld [vmem:[#allocation8 + $0x1ae0] sm:$0xff] }
 0x2bf   :  { %7256 = vmatpush1.bf16.msra.mxu0 %v11729_v15  ;;  %v1412_v15 = vld [vmem:[#allocation8 + $0x1288] sm:$0xff] }
 0x2c0   :  { %7506 = vmatpush1.bf16.msra.mxu1 %v11491_v17  ;;  %7257 = vmatprep.subr.bf16.mxu0 %v11738_v20  ;;  %v1416_v17 = vld [vmem:[#allocation8 + $0x12a8] sm:$0xff]  ;;  %v11769_v20 = vcombine.low %v1643_v59, %v1647_v19  ;;  %v11802_v59 = vcombine.high %v1675_v51, %v1679_v48 }
 0x2c1   :  { %7507 = vmatprep.subr.bf16.mxu1 %v11500_v21  ;;  %v11531_v21 = vcombine.low %v1404_v13, %v1408_v61  ;;  %v11540_v24 = vcombine.high %v1412_v15, %v1416_v17  ;;  %v1683_v13 = vld [vmem:[#allocation8 + $0x1b00] sm:$0xff] }
 0x2c2   :  { %v1687_v61 = vld [vmem:[#allocation8 + $0x1b20] sm:$0xff] }
 0x2c3   :  { %7258 = vmatpush1.bf16.msra.mxu0 %v11737_v27  ;;  %v1420_v27 = vld [vmem:[#allocation8 + $0x12c8] sm:$0xff] }
 0x2c4   :  { %7508 = vmatpush1.bf16.msra.mxu1 %v11499_v2  ;;  %7259 = vmatprep.subr.bf16.mxu0 %v11746_v29  ;;  %v1424_v2 = vld [vmem:[#allocation8 + $0x12e8] sm:$0xff]  ;;  %v11777_v29 = vcombine.low %v1651_v7, %v1655_v37  ;;  %v11810_v7 = vcombine.high %v1683_v13, %v1687_v61 }
 0x2c5   :  { %7509 = vmatprep.subr.bf16.mxu1 %v11508_v36  ;;  %v11539_v36 = vcombine.low %v1412_v15, %v1416_v17  ;;  %v11548_v32 = vcombine.high %v1420_v27, %v1424_v2  ;;  %v1691_v15 = vld [vmem:[#allocation8 + $0x1b40] sm:$0xff] }
 0x2c6   :  { %v1695_v17 = vld [vmem:[#allocation8 + $0x1b60] sm:$0xff] }
 0x2c7   :  { %7260 = vmatpush1.bf16.msra.mxu0 %v11745_v38  ;;  %v1428_v38 = vld [vmem:[#allocation8 + $0x1308] sm:$0xff] }
 0x2c8   :  { %7510 = vmatpush1.bf16.msra.mxu1 %v11507_v62  ;;  %7261 = vmatprep.subr.bf16.mxu0 %v11754_v39  ;;  %v1432_v62 = vld [vmem:[#allocation8 + $0x1328] sm:$0xff]  ;;  %v11785_v39 = vcombine.low %v1659_v8, %v1663_v9  ;;  %v11818_v8 = vcombine.high %v1691_v15, %v1695_v17 }
 0x2c9   :  { %7511 = vmatprep.subr.bf16.mxu1 %v11516_v41  ;;  %v11547_v41 = vcombine.low %v1420_v27, %v1424_v2  ;;  %v11556_v43 = vcombine.high %v1428_v38, %v1432_v62  ;;  %v1699_v27 = vld [vmem:[#allocation8 + $0x1b80] sm:$0xff] }
 0x2ca   :  { %v1703_v2 = vld [vmem:[#allocation8 + $0x1ba0] sm:$0xff] }
 0x2cb   :  { %7262 = vmatpush1.bf16.msra.mxu0 %v11753_v49  ;;  %v1436_v49 = vld [vmem:[#allocation8 + $0x1348] sm:$0xff] }
 0x2cc   :  { %7512 = vmatpush1.bf16.msra.mxu1 %v11515_v55  ;;  %7263 = vmatprep.subr.bf16.mxu0 %v11762_v56  ;;  %v1440_v55 = vld [vmem:[#allocation8 + $0x1368] sm:$0xff]  ;;  %v11793_v56 = vcombine.low %v1667_v60, %v1671_v34 }
 0x2cd   :  { %7513 = vmatprep.subr.bf16.mxu1 %v11524_v0  ;;  %v11555_v0 = vcombine.low %v1428_v38, %v1432_v62  ;;  %v11564_v19 = vcombine.high %v1436_v49, %v1440_v55  ;;  %v11826_v38 = vcombine.high %v1699_v27, %v1703_v2 }
 0x2cf   :  { %7264 = vmatpush1.bf16.msra.mxu0 %v11761_v6  ;;  %v1444_v6 = vld [vmem:[#allocation8 + $0x1388] sm:$0xff] }
 0x2d0   :  { %7514 = vmatpush1.bf16.msra.mxu1 %v11523_v3  ;;  %7265 = vmatprep.subr.bf16.mxu0 %v11770_v4  ;;  %v1448_v3 = vld [vmem:[#allocation8 + $0x13a8] sm:$0xff]  ;;  %v11801_v4 = vcombine.low %v1675_v51, %v1679_v48  ;;  %v11825_v48 = vcombine.low %v1699_v27, %v1703_v2  ;;  %v1731_v2 = vld [vmem:[#allocation8 + $0x1c80] sm:$0xff] }
 0x2d1   :  { %7515 = vmatprep.subr.bf16.mxu1 %v11532_v5  ;;  %v11563_v5 = vcombine.low %v1436_v49, %v1440_v55  ;;  %v11572_v37 = vcombine.high %v1444_v6, %v1448_v3  ;;  %v1472_v51 = vld [vmem:[#allocation8 + $0x1468] sm:$0xff] }
 0x2d3   :  { %7266 = vmatpush1.bf16.msra.mxu0 %v11769_v20  ;;  %v1452_v20 = vld [vmem:[#allocation8 + $0x13c8] sm:$0xff] }
 0x2d4   :  { %7516 = vmatpush1.bf16.msra.mxu1 %v11531_v21  ;;  %7267 = vmatprep.subr.bf16.mxu0 %v11778_v22  ;;  %v1456_v21 = vld [vmem:[#allocation8 + $0x13e8] sm:$0xff]  ;;  %v11809_v22 = vcombine.low %v1683_v13, %v1687_v61  ;;  %v1719_v13 = vld [vmem:[#allocation8 + $0x1c20] sm:$0xff] }
 0x2d5   :  { %7517 = vmatprep.subr.bf16.mxu1 %v11540_v24  ;;  %v11571_v24 = vcombine.low %v1444_v6, %v1448_v3  ;;  %v11580_v9 = vcombine.high %v1452_v20, %v1456_v21  ;;  %v11579_v34 = vcombine.low %v1452_v20, %v1456_v21  ;;  %v1476_v61 = vld [vmem:[#allocation8 + $0x1488] sm:$0xff] }
 0x2d6   :  { %v1480_v6 = vld [vmem:[#allocation8 + $0x14a8] sm:$0xff] }
 0x2d7   :  { %7268 = vmatpush1.bf16.msra.mxu0 %v11777_v29  ;;  %v1460_v29 = vld [vmem:[#allocation8 + $0x1408] sm:$0xff] }
 0x2d8   :  { %7518 = vmatpush1.bf16.msra.mxu1 %v11539_v36  ;;  %7269 = vmatprep.subr.bf16.mxu0 %v11786_v31  ;;  %v1464_v36 = vld [vmem:[#allocation8 + $0x1428] sm:$0xff]  ;;  %v11817_v31 = vcombine.low %v1691_v15, %v1695_v17  ;;  %v1727_v15 = vld [vmem:[#allocation8 + $0x1c60] sm:$0xff] }
 0x2d9   :  { %7519 = vmatprep.subr.bf16.mxu1 %v11548_v32  ;;  %v13671_v32 = vld [vmem:[#allocation7 + $0x8] sm:$0xff]  ;;  %v11587_v55 = vcombine.low %v1460_v29, %v1464_v36  ;;  %v1484_v17 = vld [vmem:[#allocation8 + $0x14c8] sm:$0xff] }
 0x2da   :  { %v266_v60 = vrot.slane %v13671_v32, %v13593_v18  ;;  %v278_v62 = vrot.slane %v13671_v32, %v13596_v28  ;;  %v1488_v20 = vld [vmem:[#allocation8 + $0x14e8] sm:$0xff] }
 0x2db   :  { %7270 = vmatpush1.bf16.msra.mxu0 %v11785_v39  ;;  %v11588_v39 = vcombine.high %v1460_v29, %v1464_v36  ;;  %v11612_v27 = vcombine.high %v1484_v17, %v1488_v20  ;;  %v1735_v29 = vld [vmem:[#allocation8 + $0x1ca0] sm:$0xff]  ;;  %v1492_v36 = vld [vmem:[#allocation8 + $0x1508] sm:$0xff] }
 0x2dc   :  { %7520 = vmatpush1.bf16.msra.mxu1 %v11547_v41  ;;  %7271 = vmatprep.subr.bf16.mxu0 %v11794_v42  ;;  %v1707_v41 = vld [vmem:[#allocation8 + $0x1bc0] sm:$0xff]  ;;  %v740_v49 = vadd.f32 %v13616_v58, %v266_v60 }
 0x2dd   :  { %7521 = vmatprep.subr.bf16.mxu1 %v11556_v43  ;;  %v1711_v42 = vld [vmem:[#allocation8 + $0x1be0] sm:$0xff]  ;;  %v1468_v43 = vld [vmem:[#allocation8 + $0x1448] sm:$0xff] }
 0x2de   :  { %v11833_v3 = vcombine.low %v1707_v41, %v1711_v42  ;;  %v11595_v58 = vcombine.low %v1468_v43, %v1472_v51 }
 0x2df   :  { %7272 = vmatpush1.bf16.msra.mxu0 %v11793_v56  ;;  %v783_v56 = vadd.f32 %v13590_v40, %v278_v62  ;;  %v11604_v40 = vcombine.high %v1476_v61, %v1480_v6 }
 0x2e0   :  { %7522 = vmatpush1.bf16.msra.mxu1 %v11555_v0  ;;  %7273 = vmatprep.subr.bf16.mxu0 %v11802_v59  ;;  %v11834_v0 = vcombine.high %v1707_v41, %v1711_v42  ;;  %v11596_v59 = vcombine.high %v1468_v43, %v1472_v51  ;;  %v1743_v41 = vld [vmem:[#allocation8 + $0x1ce0] sm:$0xff]  ;;  %v1500_v42 = vld [vmem:[#allocation8 + $0x1548] sm:$0xff]  ;;  %v11857_v51 = vcombine.low %v1731_v2, %v1735_v29 }
 0x2e1   :  { %7523 = vmatprep.subr.bf16.mxu1 %v11564_v19  ;;  %v1715_v19 = vld [vmem:[#allocation8 + $0x1c00] sm:$0xff]  ;;  %v1504_v43 = vld [vmem:[#allocation8 + $0x1568] sm:$0xff] }
 0x2e2   :  { %v11841_v21 = vcombine.low %v1715_v19, %v1719_v13 }
 0x2e3   :  { %7274 = vmatpush1.bf16.msra.mxu0 %v11801_v4  ;;  %v799_v4 = vmax.f32 %v740_v49, 0.0 }
 0x2e4   :  { %7524 = vmatpush1.bf16.msra.mxu1 %v11563_v5  ;;  %7275 = vmatprep.subr.bf16.mxu0 %v11810_v7  ;;  %v11842_v5 = vcombine.high %v1715_v19, %v1719_v13  ;;  %v802_v7 = vmax.f32 %v783_v56, 0.0  ;;  %v1747_v56 = vld [vmem:[#allocation8 + $0x1d00] sm:$0xff]  ;;  %v1512_v19 = vld [vmem:[#allocation8 + $0x15a8] sm:$0xff] }
 0x2e5   :  { %7525 = vmatprep.subr.bf16.mxu1 %v11572_v37  ;;  %v1723_v37 = vld [vmem:[#allocation8 + $0x1c40] sm:$0xff] }
 0x2e6   :  { %v11849_v60 = vcombine.low %v1723_v37, %v1727_v15 }
 0x2e7   :  { %7276 = vmatpush1.bf16.msra.mxu0 %v11809_v22  ;;  %v13681_v22 = vpack.c.bf16 %v799_v4, %v799_v4  ;;  %v1755_v4 = vld [vmem:[#allocation8 + $0x1d40] sm:$0xff] }
 0x2e8   :  { %7526 = vmatpush1.bf16.msra.mxu1 %v11571_v24  ;;  %7277 = vmatprep.subr.bf16.mxu0 %v11818_v8  ;;  %v11603_v24 = vcombine.low %v1476_v61, %v1480_v6  ;;  %v11850_v8 = vcombine.high %v1723_v37, %v1727_v15  ;;  %v11627_v61 = vcombine.low %v1500_v42, %v1504_v43 }
 0x2e9   :  { %7527 = vmatprep.subr.bf16.mxu1 %v11580_v9  ;;  %v13683_v9 = vpack.c.bf16 %v802_v7, %v802_v7  ;;  %v1520_v7 = vld [vmem:[#allocation8 + $0x15e8] sm:$0xff] }
 0x2eb   :  { %7278 = vmatpush1.bf16.msra.mxu0 %v11817_v31  ;;  %v1496_v31 = vld [vmem:[#allocation8 + $0x1528] sm:$0xff] }
 0x2ec   :  { %7528 = vmatpush1.bf16.msra.mxu1 %v11579_v34  ;;  %7279 = vmatprep.subr.bf16.mxu0 %v11826_v38  ;;  %v11611_v34 = vcombine.low %v1484_v17, %v1488_v20  ;;  %v11858_v38 = vcombine.high %v1731_v2, %v1735_v29  ;;  %v11620_v62 = vcombine.high %v1492_v36, %v1496_v31  ;;  %v1763_v20 = vld [vmem:[#allocation8 + $0x1d80] sm:$0xff] }
 0x2ed   :  { %7538 = vmatprep.subr.bf16.mxu1 %v11588_v39  ;;  %v1739_v39 = vld [vmem:[#allocation8 + $0x1cc0] sm:$0xff] }
 0x2ee   :  { %v11866_v49 = vcombine.high %v1739_v39, %v1743_v41  ;;  %v11865_v13 = vcombine.low %v1739_v39, %v1743_v41 }
 0x2ef   :  { %7530 = vmatmul.mubr.bf16.vlgmr.msra.gmra.mrb[12].mxu1 %v13647_v1  ;;  %7280 = vmatpush1.bf16.msra.mxu0 %v11825_v48  ;;  %v11619_v48 = vcombine.low %v1492_v36, %v1496_v31  ;;  %v1771_v31 = vld [vmem:[#allocation8 + $0x1dc0] sm:$0xff] }
 0x2f0   :  { %7539 = vmatpush1.bf16.msra.mxu1 %v11587_v55  ;;  %7570 = vmatprep.mubr.bf16.mxu1 %v13649_v12  ;;  %v11628_v55 = vcombine.high %v1500_v42, %v1504_v43  ;;  %v1779_v43 = vld [vmem:[#allocation8 + $0x1e00] sm:$0xff] }
 0x2f1   :  { %7281 = vmatprep.subr.bf16.mxu0 %v11834_v0  ;;  %7540 = vmatprep.subr.bf16.mxu1 %v11596_v59  ;;  %v1751_v0 = vld [vmem:[#allocation8 + $0x1d20] sm:$0xff]  ;;  %v1508_v59 = vld [vmem:[#allocation8 + $0x1588] sm:$0xff] }
 0x2f2   :  { %v11874_v6 = vcombine.high %v1747_v56, %v1751_v0  ;;  %v11635_v37 = vcombine.low %v1508_v59, %v1512_v19 }
 0x2f3   :  { %7282 = vmatpush1.bf16.msra.mxu0 %v11833_v3  ;;  %v11636_v3 = vcombine.high %v1508_v59, %v1512_v19  ;;  %v1787_v19 = vld [vmem:[#allocation8 + $0x1e40] sm:$0xff] }
 0x2f4   :  { %7541 = vmatpush1.bf16.msra.mxu1 %v11595_v58  ;;  %7292 = vmatprep.subr.bf16.mxu0 %v11842_v5  ;;  %v1759_v58 = vld [vmem:[#allocation8 + $0x1d60] sm:$0xff]  ;;  %v1516_v5 = vld [vmem:[#allocation8 + $0x15c8] sm:$0xff] }
 0x2f5   :  { %7542 = vmatprep.subr.bf16.mxu1 %v11604_v40  ;;  %v11873_v40 = vcombine.low %v1747_v56, %v1751_v0  ;;  %v11882_v15 = vcombine.high %v1755_v4, %v1759_v58  ;;  %v11644_v17 = vcombine.high %v1516_v5, %v1520_v7  ;;  %v11643_v2 = vcombine.low %v1516_v5, %v1520_v7  ;;  %v1795_v7 = vld [vmem:[#allocation8 + $0x1e80] sm:$0xff] }
 0x2f6   :  { %7284 = vmatmul.mubr.bf16.vlgmr.msra.gmra.mrb[24].mxu0 %v13681_v22 }
 0x2f7   :  { %7293 = vmatpush1.bf16.msra.mxu0 %v11841_v21  ;;  %7324 = vmatprep.mubr.bf16.mxu0 %v13683_v9  ;;  %v1767_v21 = vld [vmem:[#allocation8 + $0x1da0] sm:$0xff] }
 0x2f8   :  { %7543 = vmatpush1.bf16.msra.mxu1 %v11603_v24  ;;  %7294 = vmatprep.subr.bf16.mxu0 %v11850_v8  ;;  %v1524_v24 = vld [vmem:[#allocation8 + $0x1608] sm:$0xff]  ;;  %v11890_v29 = vcombine.high %v1763_v20, %v1767_v21 }
 0x2f9   :  { %7544 = vmatprep.subr.bf16.mxu1 %v11612_v27  ;;  %v1528_v8 = vld [vmem:[#allocation8 + $0x1628] sm:$0xff]  ;;  %v11881_v27 = vcombine.low %v1755_v4, %v1759_v58 }
 0x2fa   :  { %v11652_v36 = vcombine.high %v1524_v24, %v1528_v8  ;;  %v11651_v39 = vcombine.low %v1524_v24, %v1528_v8  ;;  %v1803_v8 = vld [vmem:[#allocation8 + $0x1ec0] sm:$0xff] }
 0x2fb   :  { %7295 = vmatpush1.bf16.msra.mxu0 %v11849_v60  ;;  %v1775_v60 = vld [vmem:[#allocation8 + $0x1de0] sm:$0xff] }
 0x2fc   :  { %7545 = vmatpush1.bf16.msra.mxu1 %v11611_v34  ;;  %7296 = vmatprep.subr.bf16.mxu0 %v11858_v38  ;;  %v1532_v34 = vld [vmem:[#allocation8 + $0x1648] sm:$0xff]  ;;  %v11898_v41 = vcombine.high %v1771_v31, %v1775_v60 }
 0x2fd   :  { %7546 = vmatprep.subr.bf16.mxu1 %v11620_v62  ;;  %v1536_v38 = vld [vmem:[#allocation8 + $0x1668] sm:$0xff]  ;;  %v11889_v62 = vcombine.low %v1763_v20, %v1767_v21 }
 0x2fe   :  { %v11660_v42 = vcombine.high %v1532_v34, %v1536_v38  ;;  %v11659_v56 = vcombine.low %v1532_v34, %v1536_v38  ;;  %v1811_v38 = vld [vmem:[#allocation8 + $0x1f00] sm:$0xff] }
 0x2ff   :  { %7297 = vmatpush1.bf16.msra.mxu0 %v11857_v51  ;;  %v1783_v51 = vld [vmem:[#allocation8 + $0x1e20] sm:$0xff] }
 0x300   :  { %7547 = vmatpush1.bf16.msra.mxu1 %v11619_v48  ;;  %7298 = vmatprep.subr.bf16.mxu0 %v11866_v49  ;;  %v1540_v48 = vld [vmem:[#allocation8 + $0x1688] sm:$0xff]  ;;  %v11906_v0 = vcombine.high %v1779_v43, %v1783_v51 }
 0x301   :  { %7548 = vmatprep.subr.bf16.mxu1 %v11628_v55  ;;  %v1544_v49 = vld [vmem:[#allocation8 + $0x16a8] sm:$0xff]  ;;  %v11897_v55 = vcombine.low %v1771_v31, %v1775_v60 }
 0x302   :  { %v11668_v59 = vcombine.high %v1540_v48, %v1544_v49  ;;  %v11667_v4 = vcombine.low %v1540_v48, %v1544_v49  ;;  %v1819_v49 = vld [vmem:[#allocation8 + $0x1f40] sm:$0xff] }
 0x303   :  { %7299 = vmatpush1.bf16.msra.mxu0 %v11865_v13  ;;  %v1791_v13 = vld [vmem:[#allocation8 + $0x1e60] sm:$0xff] }
 0x304   :  { %7549 = vmatpush1.bf16.msra.mxu1 %v11627_v61  ;;  %7300 = vmatprep.subr.bf16.mxu0 %v11874_v6  ;;  %v1548_v61 = vld [vmem:[#allocation8 + $0x16c8] sm:$0xff]  ;;  %v11914_v58 = vcombine.high %v1787_v19, %v1791_v13 }
 0x305   :  { %7550 = vmatprep.subr.bf16.mxu1 %v11636_v3  ;;  %v1552_v6 = vld [vmem:[#allocation8 + $0x16e8] sm:$0xff]  ;;  %v11905_v3 = vcombine.low %v1779_v43, %v1783_v51 }
 0x306   :  { %v11676_v5 = vcombine.high %v1548_v61, %v1552_v6  ;;  %v11675_v20 = vcombine.low %v1548_v61, %v1552_v6  ;;  %v1827_v6 = vld [vmem:[#allocation8 + $0x1f80] sm:$0xff] }
 0x307   :  { %7301 = vmatpush1.bf16.msra.mxu0 %v11873_v40  ;;  %v1799_v40 = vld [vmem:[#allocation8 + $0x1ea0] sm:$0xff] }
 0x308   :  { %7551 = vmatpush1.bf16.msra.mxu1 %v11635_v37  ;;  %7302 = vmatprep.subr.bf16.mxu0 %v11882_v15  ;;  %v1556_v37 = vld [vmem:[#allocation8 + $0x1708] sm:$0xff]  ;;  %v11922_v21 = vcombine.high %v1795_v7, %v1799_v40 }
 0x309   :  { %7552 = vmatprep.subr.bf16.mxu1 %v11644_v17  ;;  %v1560_v15 = vld [vmem:[#allocation8 + $0x1728] sm:$0xff]  ;;  %v11913_v17 = vcombine.low %v1787_v19, %v1791_v13 }
 0x30a   :  { %v11684_v24 = vcombine.high %v1556_v37, %v1560_v15  ;;  %v11683_v31 = vcombine.low %v1556_v37, %v1560_v15 }
 0x30b   :  { %7303 = vmatpush1.bf16.msra.mxu0 %v11881_v27  ;;  %v1807_v27 = vld [vmem:[#allocation8 + $0x1ee0] sm:$0xff] }
 0x30c   :  { %7553 = vmatpush1.bf16.msra.mxu1 %v11643_v2  ;;  %7304 = vmatprep.subr.bf16.mxu0 %v11890_v29  ;;  %v1564_v2 = vld [vmem:[#allocation8 + $0x1748] sm:$0xff]  ;;  %v11930_v60 = vcombine.high %v1803_v8, %v1807_v27 }
 0x30d   :  { %7554 = vmatprep.subr.bf16.mxu1 %v11652_v36  ;;  %v1568_v29 = vld [vmem:[#allocation8 + $0x1768] sm:$0xff]  ;;  %v11921_v36 = vcombine.low %v1795_v7, %v1799_v40  ;;  %v274_v7 = vrot.slane %v13671_v32, %v13621_v47 }
 0x30e   :  { %v11692_v34 = vcombine.high %v1564_v2, %v1568_v29  ;;  %v11691_v43 = vcombine.low %v1564_v2, %v1568_v29 }
 0x30f   :  { %7305 = vmatpush1.bf16.msra.mxu0 %v11889_v62  ;;  %v1815_v62 = vld [vmem:[#allocation8 + $0x1f20] sm:$0xff] }
 0x310   :  { %7555 = vmatpush1.bf16.msra.mxu1 %v11651_v39  ;;  %7306 = vmatprep.subr.bf16.mxu0 %v11898_v41  ;;  %v1572_v39 = vld [vmem:[#allocation8 + $0x1788] sm:$0xff]  ;;  %v11938_v51 = vcombine.high %v1811_v38, %v1815_v62 }
 0x311   :  { %7556 = vmatprep.subr.bf16.mxu1 %v11660_v42  ;;  %v1576_v41 = vld [vmem:[#allocation8 + $0x17a8] sm:$0xff]  ;;  %v11929_v42 = vcombine.low %v1803_v8, %v1807_v27  ;;  %v781_v27 = vadd.f32 %v13583_v30, %v274_v7  ;;  %v845_v7 = vld [vmem:[#allocation8 + $0xd0] sm:$0xff] }
 0x312   :  { %v11700_v48 = vcombine.high %v1572_v39, %v1576_v41  ;;  %v11699_v19 = vcombine.low %v1572_v39, %v1576_v41 }
 0x313   :  { %7307 = vmatpush1.bf16.msra.mxu0 %v11897_v55  ;;  %v1823_v55 = vld [vmem:[#allocation8 + $0x1f60] sm:$0xff] }
 0x314   :  { %7557 = vmatpush1.bf16.msra.mxu1 %v11659_v56  ;;  %7308 = vmatprep.subr.bf16.mxu0 %v11906_v0  ;;  %v1580_v56 = vld [vmem:[#allocation8 + $0x17c8] sm:$0xff]  ;;  %v11946_v13 = vcombine.high %v1819_v49, %v1823_v55 }
 0x315   :  { %7558 = vmatprep.subr.bf16.mxu1 %v11668_v59  ;;  %v1584_v0 = vld [vmem:[#allocation8 + $0x17e8] sm:$0xff]  ;;  %v11937_v59 = vcombine.low %v1811_v38, %v1815_v62  ;;  %v801_v62 = vmax.f32 %v781_v27, 0.0  ;;  %v857_v27 = vld [vmem:[#allocation8 + $0x130] sm:$0xff] }
 0x316   :  { %v11708_v61 = vcombine.high %v1580_v56, %v1584_v0  ;;  %v11707_v40 = vcombine.low %v1580_v56, %v1584_v0 }
 0x317   :  { %7309 = vmatpush1.bf16.msra.mxu0 %v11905_v3  ;;  %v1831_v3 = vld [vmem:[#allocation8 + $0x1fa0] sm:$0xff] }
 0x318   :  { %7559 = vmatpush1.bf16.msra.mxu1 %v11667_v4  ;;  %7310 = vmatprep.subr.bf16.mxu0 %v11914_v58  ;;  %v1588_v4 = vld [vmem:[#allocation8 + $0x1808] sm:$0xff]  ;;  %v11954_v37 = vcombine.high %v1827_v6, %v1831_v3  ;;  %v11953_v8 = vcombine.low %v1827_v6, %v1831_v3 }
 0x319   :  { %7560 = vmatprep.subr.bf16.mxu1 %v11676_v5  ;;  %v1592_v58 = vld [vmem:[#allocation8 + $0x1828] sm:$0xff]  ;;  %v11945_v5 = vcombine.low %v1819_v49, %v1823_v55  ;;  %v13692_v55 = vpack.c.bf16 %v801_v62, %v801_v62 }
 0x31a   :  { %v11716_v15 = vcombine.high %v1588_v4, %v1592_v58  ;;  %v11715_v2 = vcombine.low %v1588_v4, %v1592_v58  ;;  %v1624_v6 = vld [vmem:[#allocation8 + $0x1928] sm:$0xff] }
 0x31b   :  { %7311 = vmatpush1.bf16.msra.mxu0 %v11913_v17  ;;  %v1835_v17 = vld [vmem:[#allocation8 + $0x1fc0] sm:$0xff]  ;;  %v1644_v62 = vld [vmem:[#allocation8 + $0x19c8] sm:$0xff] }
 0x31c   :  { %7561 = vmatpush1.bf16.msra.mxu1 %v11675_v20  ;;  %7312 = vmatprep.subr.bf16.mxu0 %v11922_v21  ;;  %v1839_v20 = vld [vmem:[#allocation8 + $0x1fe0] sm:$0xff]  ;;  %v1596_v21 = vld [vmem:[#allocation8 + $0x1848] sm:$0xff] }
 0x31d   :  { %7562 = vmatprep.subr.bf16.mxu1 %v11684_v24  ;;  %v1600_v24 = vld [vmem:[#allocation8 + $0x1868] sm:$0xff]  ;;  %v11962_v29 = vcombine.high %v1835_v17, %v1839_v20  ;;  %v11961_v38 = vcombine.low %v1835_v17, %v1839_v20 }
 0x31e   :  { %v11724_v32 = vcombine.high %v1596_v21, %v1600_v24  ;;  %v11723_v39 = vcombine.low %v1596_v21, %v1600_v24 }
 0x31f   :  { %7313 = vmatpush1.bf16.msra.mxu0 %v11921_v36  ;;  %v821_v36 = vld [vmem:[#allocation8 + $0x10] sm:$0xff] }
 0x320   :  { %7563 = vmatpush1.bf16.msra.mxu1 %v11683_v31  ;;  %7314 = vmatprep.subr.bf16.mxu0 %v11930_v60  ;;  %v825_v31 = vld [vmem:[#allocation8 + $0x30] sm:$0xff]  ;;  %v1604_v60 = vld [vmem:[#allocation8 + $0x1888] sm:$0xff] }
 0x321   :  { %7564 = vmatprep.subr.bf16.mxu1 %v11692_v34  ;;  %v1608_v34 = vld [vmem:[#allocation8 + $0x18a8] sm:$0xff]  ;;  %v10950_v30 = vcombine.high %v821_v36, %v825_v31  ;;  %v10949_v49 = vcombine.low %v821_v36, %v825_v31 }
 0x322   :  { %v11732_v41 = vcombine.high %v1604_v60, %v1608_v34  ;;  %v11731_v56 = vcombine.low %v1604_v60, %v1608_v34  ;;  %v861_v34 = vld [vmem:[#allocation8 + $0x150] sm:$0xff] }
 0x323   :  { %7315 = vmatpush1.bf16.msra.mxu0 %v11929_v42  ;;  %v829_v42 = vld [vmem:[#allocation8 + $0x50] sm:$0xff] }
 0x324   :  { %7565 = vmatpush1.bf16.msra.mxu1 %v11691_v43  ;;  %7316 = vmatprep.subr.bf16.mxu0 %v11938_v51  ;;  %v833_v43 = vld [vmem:[#allocation8 + $0x70] sm:$0xff]  ;;  %v1612_v51 = vld [vmem:[#allocation8 + $0x18c8] sm:$0xff] }
 0x325   :  { %7566 = vmatprep.subr.bf16.mxu1 %v11700_v48  ;;  %v1616_v48 = vld [vmem:[#allocation8 + $0x18e8] sm:$0xff]  ;;  %v10958_v0 = vcombine.high %v829_v42, %v833_v43  ;;  %v10957_v3 = vcombine.low %v829_v42, %v833_v43 }
 0x326   :  { %v11739_v4 = vcombine.low %v1612_v51, %v1616_v48 }
 0x327   :  { %7317 = vmatpush1.bf16.msra.mxu0 %v11937_v59  ;;  %v11740_v59 = vcombine.high %v1612_v51, %v1616_v48  ;;  %v869_v51 = vld [vmem:[#allocation8 + $0x190] sm:$0xff] }
 0x328   :  { %7567 = vmatpush1.bf16.msra.mxu1 %v11699_v19  ;;  %7318 = vmatprep.subr.bf16.mxu0 %v11946_v13  ;;  %v837_v19 = vld [vmem:[#allocation8 + $0x90] sm:$0xff] }
 0x329   :  { %7568 = vmatprep.subr.bf16.mxu1 %v11708_v61  ;;  %v841_v13 = vld [vmem:[#allocation8 + $0xb0] sm:$0xff]  ;;  %v1620_v61 = vld [vmem:[#allocation8 + $0x1908] sm:$0xff] }
 0x32a   :  { %v10966_v58 = vcombine.high %v837_v19, %v841_v13  ;;  %v10965_v17 = vcombine.low %v837_v19, %v841_v13  ;;  %v11747_v20 = vcombine.low %v1620_v61, %v1624_v6  ;;  %v873_v48 = vld [vmem:[#allocation8 + $0x1b0] sm:$0xff] }
 0x32b   :  { %7319 = vmatpush1.bf16.msra.mxu0 %v11945_v5  ;;  %v11748_v5 = vcombine.high %v1620_v61, %v1624_v6  ;;  %v10998_v19 = vcombine.high %v869_v51, %v873_v48  ;;  %v877_v61 = vld [vmem:[#allocation8 + $0x1d0] sm:$0xff] }
 0x32c   :  { %7569 = vmatpush1.bf16.msra.mxu1 %v11707_v40  ;;  %7320 = vmatprep.subr.bf16.mxu0 %v11954_v37  ;;  %v849_v40 = vld [vmem:[#allocation8 + $0xf0] sm:$0xff]  ;;  %v1628_v37 = vld [vmem:[#allocation8 + $0x1948] sm:$0xff] }
 0x32d   :  { %7579 = vmatprep.subr.bf16.mxu1 %v11716_v15  ;;  %v1632_v15 = vld [vmem:[#allocation8 + $0x1968] sm:$0xff]  ;;  %v10974_v21 = vcombine.high %v845_v7, %v849_v40  ;;  %v881_v6 = vld [vmem:[#allocation8 + $0x1f0] sm:$0xff] }
 0x32e   :  { %v11756_v24 = vcombine.high %v1628_v37, %v1632_v15  ;;  %v11755_v36 = vcombine.low %v1628_v37, %v1632_v15  ;;  %v885_v37 = vld [vmem:[#allocation8 + $0x210] sm:$0xff] }
 0x32f   :  { %7571 = vmatmul.mubr.bf16.vlgmr.msra.gmra.mrb[12].mxu1 %v13665_v46  ;;  %7321 = vmatpush1.bf16.msra.mxu0 %v11953_v8  ;;  %v853_v8 = vld [vmem:[#allocation8 + $0x110] sm:$0xff] }
 0x330   :  { %7580 = vmatpush1.bf16.msra.mxu1 %v11715_v2  ;;  %7611 = vmatprep.mubr.bf16.mxu1 %v13667_v50  ;;  %v1636_v2 = vld [vmem:[#allocation8 + $0x1988] sm:$0xff]  ;;  %v10982_v31 = vcombine.high %v853_v8, %v857_v27  ;;  %v889_v15 = vld [vmem:[#allocation8 + $0x230] sm:$0xff] }
 0x331   :  { %7322 = vmatprep.subr.bf16.mxu0 %v11962_v29  ;;  %7581 = vmatprep.subr.bf16.mxu1 %v11724_v32  ;;  %v1640_v29 = vld [vmem:[#allocation8 + $0x19a8] sm:$0xff]  ;;  %v10973_v32 = vcombine.low %v845_v7, %v849_v40  ;;  %v11006_v7 = vcombine.high %v877_v61, %v881_v6 }
 0x332   :  { %v11764_v60 = vcombine.high %v1636_v2, %v1640_v29 }
 0x333   :  { %7323 = vmatpush1.bf16.msra.mxu0 %v11961_v38  ;;  %v865_v38 = vld [vmem:[#allocation8 + $0x170] sm:$0xff] }
 0x334   :  { %7582 = vmatpush1.bf16.msra.mxu1 %v11723_v39  ;;  %7661 = vmatprep.subr.bf16.mxu0 %v10950_v30  ;;  %v1648_v39 = vld [vmem:[#allocation8 + $0x19e8] sm:$0xff]  ;;  %v10981_v30 = vcombine.low %v853_v8, %v857_v27  ;;  %v10990_v42 = vcombine.high %v861_v34, %v865_v38  ;;  %v11014_v8 = vcombine.high %v885_v37, %v889_v15 }
 0x335   :  { %7583 = vmatprep.subr.bf16.mxu1 %v11732_v41  ;;  %v11763_v41 = vcombine.low %v1636_v2, %v1640_v29  ;;  %v11772_v43 = vcombine.high %v1644_v62, %v1648_v39  ;;  %v893_v2 = vld [vmem:[#allocation8 + $0x250] sm:$0xff] }
 0x336   :  { %7325 = vmatmul.mubr.bf16.vlgmr.msra.gmra.mrb[24].mxu0 %v13692_v55  ;;  %v897_v29 = vld [vmem:[#allocation8 + $0x270] sm:$0xff] }
 0x337   :  { %7662 = vmatpush1.bf16.msra.mxu0 %v10949_v49  ;;  %7693 = vmatprep.mubr.bf16.mxu0 %v13552_v33  ;;  %v1652_v49 = vld [vmem:[#allocation8 + $0x1a08] sm:$0xff] }
 0x338   :  { %7584 = vmatpush1.bf16.msra.mxu1 %v11731_v56  ;;  %7663 = vmatprep.subr.bf16.mxu0 %v10958_v0  ;;  %v1656_v56 = vld [vmem:[#allocation8 + $0x1a28] sm:$0xff]  ;;  %v10989_v0 = vcombine.low %v861_v34, %v865_v38  ;;  %v11022_v34 = vcombine.high %v893_v2, %v897_v29 }
 0x339   :  { %7585 = vmatprep.subr.bf16.mxu1 %v11740_v59  ;;  %v11771_v59 = vcombine.low %v1644_v62, %v1648_v39  ;;  %v11780_v13 = vcombine.high %v1652_v49, %v1656_v56  ;;  %v901_v62 = vld [vmem:[#allocation8 + $0x290] sm:$0xff] }
 0x33a   :  { %v905_v39 = vld [vmem:[#allocation8 + $0x2b0] sm:$0xff] }
 0x33b   :  { %7664 = vmatpush1.bf16.msra.mxu0 %v10957_v3  ;;  %v1660_v3 = vld [vmem:[#allocation8 + $0x1a48] sm:$0xff] }
 0x33c   :  { %7586 = vmatpush1.bf16.msra.mxu1 %v11739_v4  ;;  %7665 = vmatprep.subr.bf16.mxu0 %v10966_v58  ;;  %v1664_v4 = vld [vmem:[#allocation8 + $0x1a68] sm:$0xff]  ;;  %v10997_v58 = vcombine.low %v869_v51, %v873_v48  ;;  %v11030_v51 = vcombine.high %v901_v62, %v905_v39 }
 0x33d   :  { %7587 = vmatprep.subr.bf16.mxu1 %v11748_v5  ;;  %v11779_v5 = vcombine.low %v1652_v49, %v1656_v56  ;;  %v11788_v40 = vcombine.high %v1660_v3, %v1664_v4  ;;  %v909_v49 = vld [vmem:[#allocation8 + $0x2d0] sm:$0xff] }
 0x33e   :  { %v913_v56 = vld [vmem:[#allocation8 + $0x2f0] sm:$0xff] }
 0x33f   :  { %7666 = vmatpush1.bf16.msra.mxu0 %v10965_v17  ;;  %v1668_v17 = vld [vmem:[#allocation8 + $0x1a88] sm:$0xff] }
 0x340   :  { %7588 = vmatpush1.bf16.msra.mxu1 %v11747_v20  ;;  %7667 = vmatprep.subr.bf16.mxu0 %v10974_v21  ;;  %v1672_v20 = vld [vmem:[#allocation8 + $0x1aa8] sm:$0xff]  ;;  %v11005_v21 = vcombine.low %v877_v61, %v881_v6  ;;  %v11038_v61 = vcombine.high %v909_v49, %v913_v56 }
 0x341   :  { %7589 = vmatprep.subr.bf16.mxu1 %v11756_v24  ;;  %v11787_v24 = vcombine.low %v1660_v3, %v1664_v4  ;;  %v11796_v27 = vcombine.high %v1668_v17, %v1672_v20  ;;  %v917_v3 = vld [vmem:[#allocation8 + $0x310] sm:$0xff] }
 0x342   :  { %v921_v4 = vld [vmem:[#allocation8 + $0x330] sm:$0xff] }
 0x343   :  { %7668 = vmatpush1.bf16.msra.mxu0 %v10973_v32  ;;  %v1676_v32 = vld [vmem:[#allocation8 + $0x1ac8] sm:$0xff] }
 0x344   :  { %7590 = vmatpush1.bf16.msra.mxu1 %v11755_v36  ;;  %7669 = vmatprep.subr.bf16.mxu0 %v10982_v31  ;;  %v1680_v36 = vld [vmem:[#allocation8 + $0x1ae8] sm:$0xff]  ;;  %v11013_v31 = vcombine.low %v885_v37, %v889_v15  ;;  %v11046_v37 = vcombine.high %v917_v3, %v921_v4 }
 0x345   :  { %7591 = vmatprep.subr.bf16.mxu1 %v11764_v60  ;;  %v11795_v60 = vcombine.low %v1668_v17, %v1672_v20  ;;  %v11804_v38 = vcombine.high %v1676_v32, %v1680_v36  ;;  %v925_v17 = vld [vmem:[#allocation8 + $0x350] sm:$0xff] }
 0x346   :  { %v929_v20 = vld [vmem:[#allocation8 + $0x370] sm:$0xff] }
 0x347   :  { %7670 = vmatpush1.bf16.msra.mxu0 %v10981_v30  ;;  %v1684_v30 = vld [vmem:[#allocation8 + $0x1b08] sm:$0xff] }
 0x348   :  { %7592 = vmatpush1.bf16.msra.mxu1 %v11763_v41  ;;  %7671 = vmatprep.subr.bf16.mxu0 %v10990_v42  ;;  %v1688_v41 = vld [vmem:[#allocation8 + $0x1b28] sm:$0xff]  ;;  %v11021_v42 = vcombine.low %v893_v2, %v897_v29  ;;  %v11054_v2 = vcombine.high %v925_v17, %v929_v20 }
 0x349   :  { %7593 = vmatprep.subr.bf16.mxu1 %v11772_v43  ;;  %v11803_v43 = vcombine.low %v1676_v32, %v1680_v36  ;;  %v11812_v48 = vcombine.high %v1684_v30, %v1688_v41  ;;  %v933_v32 = vld [vmem:[#allocation8 + $0x390] sm:$0xff] }
 0x34a   :  { %v937_v36 = vld [vmem:[#allocation8 + $0x3b0] sm:$0xff] }
 0x34b   :  { %7672 = vmatpush1.bf16.msra.mxu0 %v10989_v0  ;;  %v1692_v0 = vld [vmem:[#allocation8 + $0x1b48] sm:$0xff] }
 0x34c   :  { %7594 = vmatpush1.bf16.msra.mxu1 %v11771_v59  ;;  %7673 = vmatprep.subr.bf16.mxu0 %v10998_v19  ;;  %v1696_v59 = vld [vmem:[#allocation8 + $0x1b68] sm:$0xff]  ;;  %v11029_v19 = vcombine.low %v901_v62, %v905_v39  ;;  %v11062_v62 = vcombine.high %v933_v32, %v937_v36 }
 0x34d   :  { %7595 = vmatprep.subr.bf16.mxu1 %v11780_v13  ;;  %v11811_v13 = vcombine.low %v1684_v30, %v1688_v41  ;;  %v11820_v6 = vcombine.high %v1692_v0, %v1696_v59  ;;  %v1724_v30 = vld [vmem:[#allocation8 + $0x1c48] sm:$0xff] }
 0x34e   :  { %v1728_v41 = vld [vmem:[#allocation8 + $0x1c68] sm:$0xff] }
 0x34f   :  { %7674 = vmatpush1.bf16.msra.mxu0 %v10997_v58  ;;  %v1700_v58 = vld [vmem:[#allocation8 + $0x1b88] sm:$0xff] }
 0x350   :  { %7596 = vmatpush1.bf16.msra.mxu1 %v11779_v5  ;;  %7675 = vmatprep.subr.bf16.mxu0 %v11006_v7  ;;  %v1704_v5 = vld [vmem:[#allocation8 + $0x1ba8] sm:$0xff]  ;;  %v11037_v7 = vcombine.low %v909_v49, %v913_v56  ;;  %v11852_v49 = vcombine.high %v1724_v30, %v1728_v41 }
 0x351   :  { %7597 = vmatprep.subr.bf16.mxu1 %v11788_v40  ;;  %v11819_v40 = vcombine.low %v1692_v0, %v1696_v59  ;;  %v11828_v15 = vcombine.high %v1700_v58, %v1704_v5  ;;  %v949_v0 = vld [vmem:[#allocation8 + $0x410] sm:$0xff] }
 0x352   :  { %v953_v59 = vld [vmem:[#allocation8 + $0x430] sm:$0xff] }
 0x353   :  { %7676 = vmatpush1.bf16.msra.mxu0 %v11005_v21  ;;  %v1708_v21 = vld [vmem:[#allocation8 + $0x1bc8] sm:$0xff] }
 0x354   :  { %7598 = vmatpush1.bf16.msra.mxu1 %v11787_v24  ;;  %7677 = vmatprep.subr.bf16.mxu0 %v11014_v8  ;;  %v1712_v24 = vld [vmem:[#allocation8 + $0x1be8] sm:$0xff]  ;;  %v11045_v8 = vcombine.low %v917_v3, %v921_v4  ;;  %v11078_v3 = vcombine.high %v949_v0, %v953_v59 }
 0x355   :  { %7599 = vmatprep.subr.bf16.mxu1 %v11796_v27  ;;  %v11827_v27 = vcombine.low %v1700_v58, %v1704_v5  ;;  %v11836_v29 = vcombine.high %v1708_v21, %v1712_v24  ;;  %v957_v58 = vld [vmem:[#allocation8 + $0x450] sm:$0xff] }
 0x356   :  { %v961_v5 = vld [vmem:[#allocation8 + $0x470] sm:$0xff] }
 0x357   :  { %7678 = vmatpush1.bf16.msra.mxu0 %v11013_v31  ;;  %v1716_v31 = vld [vmem:[#allocation8 + $0x1c08] sm:$0xff] }
 0x358   :  { %7600 = vmatpush1.bf16.msra.mxu1 %v11795_v60  ;;  %7679 = vmatprep.subr.bf16.mxu0 %v11022_v34  ;;  %v1720_v60 = vld [vmem:[#allocation8 + $0x1c28] sm:$0xff]  ;;  %v11053_v34 = vcombine.low %v925_v17, %v929_v20  ;;  %v11086_v17 = vcombine.high %v957_v58, %v961_v5 }
 0x359   :  { %7601 = vmatprep.subr.bf16.mxu1 %v11804_v38  ;;  %v11835_v38 = vcombine.low %v1708_v21, %v1712_v24  ;;  %v11844_v39 = vcombine.high %v1716_v31, %v1720_v60  ;;  %v965_v21 = vld [vmem:[#allocation8 + $0x490] sm:$0xff] }
 0x35a   :  { %v969_v24 = vld [vmem:[#allocation8 + $0x4b0] sm:$0xff] }
 0x35b   :  { %7680 = vmatpush1.bf16.msra.mxu0 %v11021_v42  ;;  %v941_v42 = vld [vmem:[#allocation8 + $0x3d0] sm:$0xff] }
 0x35c   :  { %7602 = vmatpush1.bf16.msra.mxu1 %v11803_v43  ;;  %7681 = vmatprep.subr.bf16.mxu0 %v11030_v51  ;;  %v945_v43 = vld [vmem:[#allocation8 + $0x3f0] sm:$0xff]  ;;  %v11061_v51 = vcombine.low %v933_v32, %v937_v36  ;;  %v11094_v32 = vcombine.high %v965_v21, %v969_v24 }
 0x35d   :  { %7603 = vmatprep.subr.bf16.mxu1 %v11812_v48  ;;  %v11843_v48 = vcombine.low %v1716_v31, %v1720_v60  ;;  %v11070_v56 = vcombine.high %v941_v42, %v945_v43  ;;  %v973_v31 = vld [vmem:[#allocation8 + $0x4d0] sm:$0xff] }
 0x35e   :  { %v977_v60 = vld [vmem:[#allocation8 + $0x4f0] sm:$0xff] }
 0x35f   :  { %7682 = vmatpush1.bf16.msra.mxu0 %v11029_v19  ;;  %v1732_v19 = vld [vmem:[#allocation8 + $0x1c88] sm:$0xff] }
 0x360   :  { %7604 = vmatpush1.bf16.msra.mxu1 %v11811_v13  ;;  %7683 = vmatprep.subr.bf16.mxu0 %v11038_v61  ;;  %v1736_v13 = vld [vmem:[#allocation8 + $0x1ca8] sm:$0xff]  ;;  %v11069_v61 = vcombine.low %v941_v42, %v945_v43  ;;  %v981_v42 = vld [vmem:[#allocation8 + $0x510] sm:$0xff] }
 0x361   :  { %7605 = vmatprep.subr.bf16.mxu1 %v11820_v6  ;;  %v11851_v6 = vcombine.low %v1724_v30, %v1728_v41  ;;  %v11860_v4 = vcombine.high %v1732_v19, %v1736_v13  ;;  %v11102_v30 = vcombine.high %v973_v31, %v977_v60  ;;  %v985_v43 = vld [vmem:[#allocation8 + $0x530] sm:$0xff] }
 0x363   :  { %7684 = vmatpush1.bf16.msra.mxu0 %v11037_v7  ;;  %v1740_v7 = vld [vmem:[#allocation8 + $0x1cc8] sm:$0xff] }
 0x364   :  { %7606 = vmatpush1.bf16.msra.mxu1 %v11819_v40  ;;  %7685 = vmatprep.subr.bf16.mxu0 %v11046_v37  ;;  %v1744_v40 = vld [vmem:[#allocation8 + $0x1ce8] sm:$0xff]  ;;  %v11077_v37 = vcombine.low %v949_v0, %v953_v59  ;;  %v11110_v0 = vcombine.high %v981_v42, %v985_v43 }
 0x365   :  { %7607 = vmatprep.subr.bf16.mxu1 %v11828_v15  ;;  %v11859_v15 = vcombine.low %v1732_v19, %v1736_v13  ;;  %v11868_v20 = vcombine.high %v1740_v7, %v1744_v40  ;;  %v989_v19 = vld [vmem:[#allocation8 + $0x550] sm:$0xff] }
 0x366   :  { %v993_v13 = vld [vmem:[#allocation8 + $0x570] sm:$0xff] }
 0x367   :  { %7686 = vmatpush1.bf16.msra.mxu0 %v11045_v8  ;;  %v1748_v8 = vld [vmem:[#allocation8 + $0x1d08] sm:$0xff] }
 0x368   :  { %7608 = vmatpush1.bf16.msra.mxu1 %v11827_v27  ;;  %7687 = vmatprep.subr.bf16.mxu0 %v11054_v2  ;;  %v1752_v27 = vld [vmem:[#allocation8 + $0x1d28] sm:$0xff]  ;;  %v11085_v2 = vcombine.low %v957_v58, %v961_v5  ;;  %v11118_v58 = vcombine.high %v989_v19, %v993_v13 }
 0x369   :  { %7609 = vmatprep.subr.bf16.mxu1 %v11836_v29  ;;  %v11867_v29 = vcombine.low %v1740_v7, %v1744_v40  ;;  %v11876_v36 = vcombine.high %v1748_v8, %v1752_v27  ;;  %v997_v7 = vld [vmem:[#allocation8 + $0x590] sm:$0xff] }
 0x36a   :  { %v1001_v40 = vld [vmem:[#allocation8 + $0x5b0] sm:$0xff] }
 0x36b   :  { %7688 = vmatpush1.bf16.msra.mxu0 %v11053_v34  ;;  %v1756_v34 = vld [vmem:[#allocation8 + $0x1d48] sm:$0xff] }
 0x36c   :  { %7610 = vmatpush1.bf16.msra.mxu1 %v11835_v38  ;;  %7689 = vmatprep.subr.bf16.mxu0 %v11062_v62  ;;  %v1760_v38 = vld [vmem:[#allocation8 + $0x1d68] sm:$0xff]  ;;  %v11093_v62 = vcombine.low %v965_v21, %v969_v24  ;;  %v11126_v21 = vcombine.high %v997_v7, %v1001_v40 }
 0x36d   :  { %7620 = vmatprep.subr.bf16.mxu1 %v11844_v39  ;;  %v11875_v39 = vcombine.low %v1748_v8, %v1752_v27  ;;  %v11884_v41 = vcombine.high %v1756_v34, %v1760_v38  ;;  %v1005_v8 = vld [vmem:[#allocation8 + $0x5d0] sm:$0xff] }
 0x36e   :  { %v1009_v27 = vld [vmem:[#allocation8 + $0x5f0] sm:$0xff] }
 0x36f   :  { %7612 = vmatmul.mubr.bf16.vlgmr.msra.gmra.mrb[12].mxu1 %v13681_v22  ;;  %7690 = vmatpush1.bf16.msra.mxu0 %v11061_v51  ;;  %v1764_v51 = vld [vmem:[#allocation8 + $0x1d88] sm:$0xff] }
 0x370   :  { %7621 = vmatpush1.bf16.msra.mxu1 %v11843_v48  ;;  %7652 = vmatprep.mubr.bf16.mxu1 %v13683_v9  ;;  %v1768_v48 = vld [vmem:[#allocation8 + $0x1da8] sm:$0xff] }
 0x371   :  { %7622 = vmatprep.subr.bf16.mxu1 %v11852_v49  ;;  %7691 = vmatprep.subr.bf16.mxu0 %v11070_v56  ;;  %v11101_v49 = vcombine.low %v973_v31, %v977_v60  ;;  %v11883_v56 = vcombine.low %v1756_v34, %v1760_v38  ;;  %v11892_v59 = vcombine.high %v1764_v51, %v1768_v48  ;;  %v1013_v34 = vld [vmem:[#allocation8 + $0x610] sm:$0xff] }
 0x372   :  { %v11134_v31 = vcombine.high %v1005_v8, %v1009_v27  ;;  %v1017_v38 = vld [vmem:[#allocation8 + $0x630] sm:$0xff] }
 0x373   :  { %7692 = vmatpush1.bf16.msra.mxu0 %v11069_v61  ;;  %v1772_v61 = vld [vmem:[#allocation8 + $0x1dc8] sm:$0xff] }
 0x374   :  { %7623 = vmatpush1.bf16.msra.mxu1 %v11851_v6  ;;  %7702 = vmatprep.subr.bf16.mxu0 %v11078_v3  ;;  %v1776_v6 = vld [vmem:[#allocation8 + $0x1de8] sm:$0xff]  ;;  %v11109_v3 = vcombine.low %v981_v42, %v985_v43  ;;  %v11142_v42 = vcombine.high %v1013_v34, %v1017_v38 }
 0x375   :  { %7624 = vmatprep.subr.bf16.mxu1 %v11860_v4  ;;  %v11891_v4 = vcombine.low %v1764_v51, %v1768_v48  ;;  %v11900_v5 = vcombine.high %v1772_v61, %v1776_v6  ;;  %v1021_v51 = vld [vmem:[#allocation8 + $0x650] sm:$0xff] }
 0x376   :  { %7694 = vmatmul.mubr.bf16.vlgmr.msra.gmra.mrb[28].mxu0 %v13556_v35  ;;  %v1025_v48 = vld [vmem:[#allocation8 + $0x670] sm:$0xff] }
 0x377   :  { %7703 = vmatpush1.bf16.msra.mxu0 %v11077_v37  ;;  %7734 = vmatprep.mubr.bf16.mxu0 %v13566_v54  ;;  %v1780_v37 = vld [vmem:[#allocation8 + $0x1e08] sm:$0xff] }
 0x378   :  { %7625 = vmatpush1.bf16.msra.mxu1 %v11859_v15  ;;  %7704 = vmatprep.subr.bf16.mxu0 %v11086_v17  ;;  %v1784_v15 = vld [vmem:[#allocation8 + $0x1e28] sm:$0xff]  ;;  %v11117_v17 = vcombine.low %v989_v19, %v993_v13  ;;  %v11150_v19 = vcombine.high %v1021_v51, %v1025_v48 }
 0x379   :  { %7626 = vmatprep.subr.bf16.mxu1 %v11868_v20  ;;  %v11899_v20 = vcombine.low %v1772_v61, %v1776_v6  ;;  %v11908_v24 = vcombine.high %v1780_v37, %v1784_v15  ;;  %v1029_v61 = vld [vmem:[#allocation8 + $0x690] sm:$0xff] }
 0x37a   :  { %v1033_v6 = vld [vmem:[#allocation8 + $0x6b0] sm:$0xff] }
 0x37b   :  { %7705 = vmatpush1.bf16.msra.mxu0 %v11085_v2  ;;  %v1788_v2 = vld [vmem:[#allocation8 + $0x1e48] sm:$0xff] }
 0x37c   :  { %7627 = vmatpush1.bf16.msra.mxu1 %v11867_v29  ;;  %7706 = vmatprep.subr.bf16.mxu0 %v11094_v32  ;;  %v1792_v29 = vld [vmem:[#allocation8 + $0x1e68] sm:$0xff]  ;;  %v11125_v32 = vcombine.low %v997_v7, %v1001_v40  ;;  %v11158_v7 = vcombine.high %v1029_v61, %v1033_v6 }
 0x37d   :  { %7628 = vmatprep.subr.bf16.mxu1 %v11876_v36  ;;  %v11907_v36 = vcombine.low %v1780_v37, %v1784_v15  ;;  %v11916_v60 = vcombine.high %v1788_v2, %v1792_v29  ;;  %v1037_v37 = vld [vmem:[#allocation8 + $0x6d0] sm:$0xff] }
 0x37e   :  { %v1041_v15 = vld [vmem:[#allocation8 + $0x6f0] sm:$0xff] }
 0x37f   :  { %7707 = vmatpush1.bf16.msra.mxu0 %v11093_v62  ;;  %v1796_v62 = vld [vmem:[#allocation8 + $0x1e88] sm:$0xff] }
 0x380   :  { %7629 = vmatpush1.bf16.msra.mxu1 %v11875_v39  ;;  %7708 = vmatprep.subr.bf16.mxu0 %v11102_v30  ;;  %v1800_v39 = vld [vmem:[#allocation8 + $0x1ea8] sm:$0xff]  ;;  %v11133_v30 = vcombine.low %v1005_v8, %v1009_v27  ;;  %v11166_v8 = vcombine.high %v1037_v37, %v1041_v15 }
 0x381   :  { %7630 = vmatprep.subr.bf16.mxu1 %v11884_v41  ;;  %v11915_v41 = vcombine.low %v1788_v2, %v1792_v29  ;;  %v11924_v43 = vcombine.high %v1796_v62, %v1800_v39  ;;  %v1045_v2 = vld [vmem:[#allocation8 + $0x710] sm:$0xff] }
 0x382   :  { %v1049_v29 = vld [vmem:[#allocation8 + $0x730] sm:$0xff] }
 0x383   :  { %7709 = vmatpush1.bf16.msra.mxu0 %v11101_v49  ;;  %v1804_v49 = vld [vmem:[#allocation8 + $0x1ec8] sm:$0xff] }
 0x384   :  { %7631 = vmatpush1.bf16.msra.mxu1 %v11883_v56  ;;  %7710 = vmatprep.subr.bf16.mxu0 %v11110_v0  ;;  %v1808_v56 = vld [vmem:[#allocation8 + $0x1ee8] sm:$0xff]  ;;  %v11141_v0 = vcombine.low %v1013_v34, %v1017_v38  ;;  %v11174_v34 = vcombine.high %v1045_v2, %v1049_v29 }
 0x385   :  { %7632 = vmatprep.subr.bf16.mxu1 %v11892_v59  ;;  %v11923_v59 = vcombine.low %v1796_v62, %v1800_v39  ;;  %v11932_v13 = vcombine.high %v1804_v49, %v1808_v56  ;;  %v1053_v62 = vld [vmem:[#allocation8 + $0x750] sm:$0xff] }
 0x386   :  { %v1057_v39 = vld [vmem:[#allocation8 + $0x770] sm:$0xff] }
 0x387   :  { %7711 = vmatpush1.bf16.msra.mxu0 %v11109_v3  ;;  %v1812_v3 = vld [vmem:[#allocation8 + $0x1f08] sm:$0xff] }
 0x388   :  { %7633 = vmatpush1.bf16.msra.mxu1 %v11891_v4  ;;  %7712 = vmatprep.subr.bf16.mxu0 %v11118_v58  ;;  %v1816_v4 = vld [vmem:[#allocation8 + $0x1f28] sm:$0xff]  ;;  %v11149_v58 = vcombine.low %v1021_v51, %v1025_v48  ;;  %v11182_v51 = vcombine.high %v1053_v62, %v1057_v39 }
 0x389   :  { %7634 = vmatprep.subr.bf16.mxu1 %v11900_v5  ;;  %v11931_v5 = vcombine.low %v1804_v49, %v1808_v56  ;;  %v11940_v40 = vcombine.high %v1812_v3, %v1816_v4  ;;  %v1061_v49 = vld [vmem:[#allocation8 + $0x790] sm:$0xff] }
 0x38a   :  { %v1065_v56 = vld [vmem:[#allocation8 + $0x7b0] sm:$0xff] }
 0x38b   :  { %7713 = vmatpush1.bf16.msra.mxu0 %v11117_v17  ;;  %v1820_v17 = vld [vmem:[#allocation8 + $0x1f48] sm:$0xff] }
 0x38c   :  { %7635 = vmatpush1.bf16.msra.mxu1 %v11899_v20  ;;  %7714 = vmatprep.subr.bf16.mxu0 %v11126_v21  ;;  %v1824_v20 = vld [vmem:[#allocation8 + $0x1f68] sm:$0xff]  ;;  %v11157_v21 = vcombine.low %v1029_v61, %v1033_v6  ;;  %v11190_v61 = vcombine.high %v1061_v49, %v1065_v56 }
 0x38d   :  { %7636 = vmatprep.subr.bf16.mxu1 %v11908_v24  ;;  %v11939_v24 = vcombine.low %v1812_v3, %v1816_v4  ;;  %v11948_v27 = vcombine.high %v1820_v17, %v1824_v20  ;;  %v1069_v3 = vld [vmem:[#allocation8 + $0x7d0] sm:$0xff] }
 0x38e   :  { %v1073_v4 = vld [vmem:[#allocation8 + $0x7f0] sm:$0xff] }
 0x38f   :  { %7715 = vmatpush1.bf16.msra.mxu0 %v11125_v32  ;;  %v1828_v32 = vld [vmem:[#allocation8 + $0x1f88] sm:$0xff] }
 0x390   :  { %7637 = vmatpush1.bf16.msra.mxu1 %v11907_v36  ;;  %7716 = vmatprep.subr.bf16.mxu0 %v11134_v31  ;;  %v1832_v36 = vld [vmem:[#allocation8 + $0x1fa8] sm:$0xff]  ;;  %v11165_v31 = vcombine.low %v1037_v37, %v1041_v15  ;;  %v11198_v37 = vcombine.high %v1069_v3, %v1073_v4 }
 0x391   :  { %7638 = vmatprep.subr.bf16.mxu1 %v11916_v60  ;;  %v11947_v60 = vcombine.low %v1820_v17, %v1824_v20  ;;  %v11956_v38 = vcombine.high %v1828_v32, %v1832_v36  ;;  %v1077_v17 = vld [vmem:[#allocation8 + $0x810] sm:$0xff] }
 0x392   :  { %v1081_v20 = vld [vmem:[#allocation8 + $0x830] sm:$0xff] }
 0x393   :  { %7717 = vmatpush1.bf16.msra.mxu0 %v11133_v30  ;;  %v1836_v30 = vld [vmem:[#allocation8 + $0x1fc8] sm:$0xff] }
 0x394   :  { %7639 = vmatpush1.bf16.msra.mxu1 %v11915_v41  ;;  %7718 = vmatprep.subr.bf16.mxu0 %v11142_v42  ;;  %v1840_v41 = vld [vmem:[#allocation8 + $0x1fe8] sm:$0xff]  ;;  %v11173_v42 = vcombine.low %v1045_v2, %v1049_v29  ;;  %v11206_v2 = vcombine.high %v1077_v17, %v1081_v20 }
 0x395   :  { %7640 = vmatprep.subr.bf16.mxu1 %v11924_v43  ;;  %v11955_v43 = vcombine.low %v1828_v32, %v1832_v36  ;;  %v11964_v48 = vcombine.high %v1836_v30, %v1840_v41  ;;  %v1085_v32 = vld [vmem:[#allocation8 + $0x850] sm:$0xff] }
 0x396   :  { %v1089_v36 = vld [vmem:[#allocation8 + $0x870] sm:$0xff] }
 0x397   :  { %7719 = vmatpush1.bf16.msra.mxu0 %v11141_v0  ;;  %v822_v0 = vld [vmem:[#allocation8 + $0x18] sm:$0xff] }
 0x398   :  { %7641 = vmatpush1.bf16.msra.mxu1 %v11923_v59  ;;  %7720 = vmatprep.subr.bf16.mxu0 %v11150_v19  ;;  %v826_v59 = vld [vmem:[#allocation8 + $0x38] sm:$0xff]  ;;  %v11181_v19 = vcombine.low %v1053_v62, %v1057_v39  ;;  %v11214_v62 = vcombine.high %v1085_v32, %v1089_v36 }
 0x399   :  { %7642 = vmatprep.subr.bf16.mxu1 %v11932_v13  ;;  %v11963_v13 = vcombine.low %v1836_v30, %v1840_v41  ;;  %v10952_v6 = vcombine.high %v822_v0, %v826_v59  ;;  %v1093_v30 = vld [vmem:[#allocation8 + $0x890] sm:$0xff] }
 0x39a   :  { %v1097_v41 = vld [vmem:[#allocation8 + $0x8b0] sm:$0xff] }
 0x39b   :  { %7721 = vmatpush1.bf16.msra.mxu0 %v11149_v58  ;;  %v830_v58 = vld [vmem:[#allocation8 + $0x58] sm:$0xff] }
 0x39c   :  { %7643 = vmatpush1.bf16.msra.mxu1 %v11931_v5  ;;  %7722 = vmatprep.subr.bf16.mxu0 %v11158_v7  ;;  %v834_v5 = vld [vmem:[#allocation8 + $0x78] sm:$0xff]  ;;  %v11189_v7 = vcombine.low %v1061_v49, %v1065_v56  ;;  %v1101_v56 = vld [vmem:[#allocation8 + $0x8d0] sm:$0xff] }
 0x39d   :  { %7644 = vmatprep.subr.bf16.mxu1 %v11940_v40  ;;  %v10951_v40 = vcombine.low %v822_v0, %v826_v59  ;;  %v10960_v15 = vcombine.high %v830_v58, %v834_v5  ;;  %v1105_v0 = vld [vmem:[#allocation8 + $0x8f0] sm:$0xff]  ;;  %v862_v59 = vld [vmem:[#allocation8 + $0x158] sm:$0xff] }
 0x39f   :  { %7723 = vmatpush1.bf16.msra.mxu0 %v11157_v21  ;;  %v838_v21 = vld [vmem:[#allocation8 + $0x98] sm:$0xff] }
 0x3a0   :  { %7645 = vmatpush1.bf16.msra.mxu1 %v11939_v24  ;;  %7724 = vmatprep.subr.bf16.mxu0 %v11166_v8  ;;  %v842_v24 = vld [vmem:[#allocation8 + $0xb8] sm:$0xff]  ;;  %v11197_v8 = vcombine.low %v1069_v3, %v1073_v4  ;;  %v1109_v4 = vld [vmem:[#allocation8 + $0x910] sm:$0xff] }
 0x3a1   :  { %7646 = vmatprep.subr.bf16.mxu1 %v11948_v27  ;;  %v10959_v27 = vcombine.low %v830_v58, %v834_v5  ;;  %v10968_v29 = vcombine.high %v838_v21, %v842_v24  ;;  %v1113_v58 = vld [vmem:[#allocation8 + $0x930] sm:$0xff]  ;;  %v870_v5 = vld [vmem:[#allocation8 + $0x198] sm:$0xff] }
 0x3a3   :  { %7725 = vmatpush1.bf16.msra.mxu0 %v11165_v31  ;;  %v846_v31 = vld [vmem:[#allocation8 + $0xd8] sm:$0xff] }
 0x3a4   :  { %7647 = vmatpush1.bf16.msra.mxu1 %v11947_v60  ;;  %7726 = vmatprep.subr.bf16.mxu0 %v11174_v34  ;;  %v850_v60 = vld [vmem:[#allocation8 + $0xf8] sm:$0xff]  ;;  %v11205_v34 = vcombine.low %v1077_v17, %v1081_v20  ;;  %v1117_v20 = vld [vmem:[#allocation8 + $0x950] sm:$0xff] }
 0x3a5   :  { %7648 = vmatprep.subr.bf16.mxu1 %v11956_v38  ;;  %v10967_v38 = vcombine.low %v838_v21, %v842_v24  ;;  %v10976_v39 = vcombine.high %v846_v31, %v850_v60  ;;  %v1121_v21 = vld [vmem:[#allocation8 + $0x970] sm:$0xff]  ;;  %v878_v24 = vld [vmem:[#allocation8 + $0x1d8] sm:$0xff] }
 0x3a7   :  { %7727 = vmatpush1.bf16.msra.mxu0 %v11173_v42  ;;  %v858_v42 = vld [vmem:[#allocation8 + $0x138] sm:$0xff] }
 0x3a8   :  { %7649 = vmatpush1.bf16.msra.mxu1 %v11955_v43  ;;  %7728 = vmatprep.subr.bf16.mxu0 %v11182_v51  ;;  %v11213_v43 = vcombine.low %v1085_v32, %v1089_v36  ;;  %v10975_v51 = vcombine.low %v846_v31, %v850_v60  ;;  %v1125_v36 = vld [vmem:[#allocation8 + $0x990] sm:$0xff]  ;;  %v886_v60 = vld [vmem:[#allocation8 + $0x218] sm:$0xff] }
 0x3a9   :  { %7650 = vmatprep.subr.bf16.mxu1 %v11964_v48  ;;  %v11222_v48 = vcombine.high %v1093_v30, %v1097_v41  ;;  %v1129_v31 = vld [vmem:[#allocation8 + $0x9b0] sm:$0xff] }
 0x3ab   :  { %7729 = vmatpush1.bf16.msra.mxu0 %v11181_v19  ;;  %v866_v19 = vld [vmem:[#allocation8 + $0x178] sm:$0xff] }
 0x3ac   :  { %7651 = vmatpush1.bf16.msra.mxu1 %v11963_v13  ;;  %7730 = vmatprep.subr.bf16.mxu0 %v11190_v61  ;;  %v11221_v13 = vcombine.low %v1093_v30, %v1097_v41  ;;  %v10992_v3 = vcombine.high %v862_v59, %v866_v19  ;;  %v1133_v41 = vld [vmem:[#allocation8 + $0x9d0] sm:$0xff] }
 0x3ad   :  { %7989 = vmatprep.subr.bf16.mxu1 %v10952_v6  ;;  %v11230_v6 = vcombine.high %v1101_v56, %v1105_v0 }
 0x3af   :  { %7653 = vmatmul.mubr.bf16.vlgmr.msra.gmra.mrb[12].mxu1 %v13692_v55  ;;  %7731 = vmatpush1.bf16.msra.mxu0 %v11189_v7  ;;  %v874_v7 = vld [vmem:[#allocation8 + $0x1b8] sm:$0xff] }
 0x3b0   :  { %7990 = vmatpush1.bf16.msra.mxu1 %v10951_v40  ;;  %8021 = vmatprep.mubr.bf16.mxu1 %v13552_v33  ;;  %v854_v33 = vld [vmem:[#allocation8 + $0x118] sm:$0xff]  ;;  %v11229_v40 = vcombine.low %v1101_v56, %v1105_v0  ;;  %v11000_v17 = vcombine.high %v870_v5, %v874_v7  ;;  %v1141_v0 = vld [vmem:[#allocation8 + $0xa10] sm:$0xff] }
 0x3b1   :  { %7732 = vmatprep.subr.bf16.mxu0 %v11198_v37  ;;  %7991 = vmatprep.subr.bf16.mxu1 %v10960_v15  ;;  %v10984_v49 = vcombine.high %v854_v33, %v858_v42  ;;  %v10983_v61 = vcombine.low %v854_v33, %v858_v42  ;;  %v10991_v37 = vcombine.low %v862_v59, %v866_v19  ;;  %v1137_v33 = vld [vmem:[#allocation8 + $0x9f0] sm:$0xff]  ;;  %v894_v42 = vld [vmem:[#allocation8 + $0x258] sm:$0xff] }
 0x3b2   :  { %v11238_v15 = vcombine.high %v1109_v4, %v1113_v58  ;;  %v1145_v59 = vld [vmem:[#allocation8 + $0xa30] sm:$0xff]  ;;  %v902_v19 = vld [vmem:[#allocation8 + $0x298] sm:$0xff] }
 0x3b3   :  { %7733 = vmatpush1.bf16.msra.mxu0 %v11197_v8  ;;  %v882_v8 = vld [vmem:[#allocation8 + $0x1f8] sm:$0xff] }
 0x3b4   :  { %7992 = vmatpush1.bf16.msra.mxu1 %v10959_v27  ;;  %7743 = vmatprep.subr.bf16.mxu0 %v11206_v2  ;;  %v11237_v27 = vcombine.low %v1109_v4, %v1113_v58  ;;  %v10999_v2 = vcombine.low %v870_v5, %v874_v7  ;;  %v11008_v32 = vcombine.high %v878_v24, %v882_v8  ;;  %v1149_v58 = vld [vmem:[#allocation8 + $0xa50] sm:$0xff]  ;;  %v910_v7 = vld [vmem:[#allocation8 + $0x2d8] sm:$0xff] }
 0x3b5   :  { %7993 = vmatprep.subr.bf16.mxu1 %v10968_v29  ;;  %v11246_v29 = vcombine.high %v1117_v20, %v1121_v21  ;;  %v1153_v5 = vld [vmem:[#allocation8 + $0xa70] sm:$0xff] }
 0x3b6   :  { %7735 = vmatmul.mubr.bf16.vlgmr.msra.gmra.mrb[28].mxu0 %v13564_v53 }
 0x3b7   :  { %7744 = vmatpush1.bf16.msra.mxu0 %v11205_v34  ;;  %7775 = vmatprep.mubr.bf16.mxu0 %v13581_v25  ;;  %v890_v34 = vld [vmem:[#allocation8 + $0x238] sm:$0xff] }
 0x3b8   :  { %7994 = vmatpush1.bf16.msra.mxu1 %v10967_v38  ;;  %7745 = vmatprep.subr.bf16.mxu0 %v11214_v62  ;;  %v11245_v38 = vcombine.low %v1117_v20, %v1121_v21  ;;  %v11007_v62 = vcombine.low %v878_v24, %v882_v8  ;;  %v11016_v30 = vcombine.high %v886_v60, %v890_v34  ;;  %v1157_v21 = vld [vmem:[#allocation8 + $0xa90] sm:$0xff]  ;;  %v918_v8 = vld [vmem:[#allocation8 + $0x318] sm:$0xff] }
 0x3b9   :  { %7995 = vmatprep.subr.bf16.mxu1 %v10976_v39  ;;  %v11254_v39 = vcombine.high %v1125_v36, %v1129_v31  ;;  %v1161_v24 = vld [vmem:[#allocation8 + $0xab0] sm:$0xff] }
 0x3bb   :  { %7746 = vmatpush1.bf16.msra.mxu0 %v11213_v43  ;;  %v898_v43 = vld [vmem:[#allocation8 + $0x278] sm:$0xff] }
 0x3bc   :  { %7996 = vmatpush1.bf16.msra.mxu1 %v10975_v51  ;;  %7747 = vmatprep.subr.bf16.mxu0 %v11222_v48  ;;  %v11253_v51 = vcombine.low %v1125_v36, %v1129_v31  ;;  %v11015_v48 = vcombine.low %v886_v60, %v890_v34  ;;  %v11024_v56 = vcombine.high %v894_v42, %v898_v43  ;;  %v1165_v31 = vld [vmem:[#allocation8 + $0xad0] sm:$0xff]  ;;  %v926_v34 = vld [vmem:[#allocation8 + $0x358] sm:$0xff] }
 0x3bd   :  { %7997 = vmatprep.subr.bf16.mxu1 %v10984_v49  ;;  %v11262_v49 = vcombine.high %v1133_v41, %v1137_v33  ;;  %v1169_v60 = vld [vmem:[#allocation8 + $0xaf0] sm:$0xff] }
 0x3bf   :  { %7748 = vmatpush1.bf16.msra.mxu0 %v11221_v13  ;;  %v906_v13 = vld [vmem:[#allocation8 + $0x2b8] sm:$0xff] }
 0x3c0   :  { %7998 = vmatpush1.bf16.msra.mxu1 %v10983_v61  ;;  %7749 = vmatprep.subr.bf16.mxu0 %v11230_v6  ;;  %v11261_v61 = vcombine.low %v1133_v41, %v1137_v33  ;;  %v11023_v6 = vcombine.low %v894_v42, %v898_v43  ;;  %v11032_v4 = vcombine.high %v902_v19, %v906_v13  ;;  %v1173_v33 = vld [vmem:[#allocation8 + $0xb10] sm:$0xff]  ;;  %v934_v43 = vld [vmem:[#allocation8 + $0x398] sm:$0xff] }
 0x3c1   :  { %7999 = vmatprep.subr.bf16.mxu1 %v10992_v3  ;;  %v11270_v3 = vcombine.high %v1141_v0, %v1145_v59  ;;  %v1177_v42 = vld [vmem:[#allocation8 + $0xb30] sm:$0xff] }
 0x3c3   :  { %7750 = vmatpush1.bf16.msra.mxu0 %v11229_v40  ;;  %v914_v40 = vld [vmem:[#allocation8 + $0x2f8] sm:$0xff] }
 0x3c4   :  { %8000 = vmatpush1.bf16.msra.mxu1 %v10991_v37  ;;  %7751 = vmatprep.subr.bf16.mxu0 %v11238_v15  ;;  %v11269_v37 = vcombine.low %v1141_v0, %v1145_v59  ;;  %v11031_v15 = vcombine.low %v902_v19, %v906_v13  ;;  %v11040_v20 = vcombine.high %v910_v7, %v914_v40  ;;  %v1181_v59 = vld [vmem:[#allocation8 + $0xb50] sm:$0xff]  ;;  %v942_v13 = vld [vmem:[#allocation8 + $0x3d8] sm:$0xff] }
 0x3c5   :  { %8001 = vmatprep.subr.bf16.mxu1 %v11000_v17  ;;  %v11278_v17 = vcombine.high %v1149_v58, %v1153_v5  ;;  %v1185_v19 = vld [vmem:[#allocation8 + $0xb70] sm:$0xff] }
 0x3c7   :  { %7752 = vmatpush1.bf16.msra.mxu0 %v11237_v27  ;;  %v922_v27 = vld [vmem:[#allocation8 + $0x338] sm:$0xff] }
 0x3c8   :  { %8002 = vmatpush1.bf16.msra.mxu1 %v10999_v2  ;;  %7753 = vmatprep.subr.bf16.mxu0 %v11246_v29  ;;  %v11277_v2 = vcombine.low %v1149_v58, %v1153_v5  ;;  %v11039_v29 = vcombine.low %v910_v7, %v914_v40  ;;  %v11048_v36 = vcombine.high %v918_v8, %v922_v27  ;;  %v1189_v5 = vld [vmem:[#allocation8 + $0xb90] sm:$0xff]  ;;  %v950_v40 = vld [vmem:[#allocation8 + $0x418] sm:$0xff] }
 0x3c9   :  { %8003 = vmatprep.subr.bf16.mxu1 %v11008_v32  ;;  %v11286_v32 = vcombine.high %v1157_v21, %v1161_v24  ;;  %v1193_v7 = vld [vmem:[#allocation8 + $0xbb0] sm:$0xff] }
 0x3cb   :  { %7754 = vmatpush1.bf16.msra.mxu0 %v11245_v38  ;;  %v930_v38 = vld [vmem:[#allocation8 + $0x378] sm:$0xff] }
 0x3cc   :  { %8004 = vmatpush1.bf16.msra.mxu1 %v11007_v62  ;;  %7755 = vmatprep.subr.bf16.mxu0 %v11254_v39  ;;  %v11285_v62 = vcombine.low %v1157_v21, %v1161_v24  ;;  %v11047_v39 = vcombine.low %v918_v8, %v922_v27  ;;  %v11056_v41 = vcombine.high %v926_v34, %v930_v38  ;;  %v1197_v24 = vld [vmem:[#allocation8 + $0xbd0] sm:$0xff]  ;;  %v958_v27 = vld [vmem:[#allocation8 + $0x458] sm:$0xff] }
 0x3cd   :  { %8005 = vmatprep.subr.bf16.mxu1 %v11016_v30  ;;  %v11294_v30 = vcombine.high %v1165_v31, %v1169_v60  ;;  %v1201_v8 = vld [vmem:[#allocation8 + $0xbf0] sm:$0xff] }
 0x3cf   :  { %7756 = vmatpush1.bf16.msra.mxu0 %v11253_v51  ;;  %v938_v51 = vld [vmem:[#allocation8 + $0x3b8] sm:$0xff] }
 0x3d0   :  { %8006 = vmatpush1.bf16.msra.mxu1 %v11015_v48  ;;  %7757 = vmatprep.subr.bf16.mxu0 %v11262_v49  ;;  %v11293_v48 = vcombine.low %v1165_v31, %v1169_v60  ;;  %v11055_v49 = vcombine.low %v926_v34, %v930_v38  ;;  %v11064_v0 = vcombine.high %v934_v43, %v938_v51  ;;  %v1205_v60 = vld [vmem:[#allocation8 + $0xc10] sm:$0xff]  ;;  %v966_v38 = vld [vmem:[#allocation8 + $0x498] sm:$0xff] }
 0x3d1   :  { %8007 = vmatprep.subr.bf16.mxu1 %v11024_v56  ;;  %v11302_v56 = vcombine.high %v1173_v33, %v1177_v42  ;;  %v1209_v34 = vld [vmem:[#allocation8 + $0xc30] sm:$0xff] }
 0x3d3   :  { %7758 = vmatpush1.bf16.msra.mxu0 %v11261_v61  ;;  %v946_v61 = vld [vmem:[#allocation8 + $0x3f8] sm:$0xff] }
 0x3d4   :  { %8008 = vmatpush1.bf16.msra.mxu1 %v11023_v6  ;;  %7759 = vmatprep.subr.bf16.mxu0 %v11270_v3  ;;  %v11301_v6 = vcombine.low %v1173_v33, %v1177_v42  ;;  %v11063_v3 = vcombine.low %v934_v43, %v938_v51  ;;  %v11072_v58 = vcombine.high %v942_v13, %v946_v61  ;;  %v1213_v42 = vld [vmem:[#allocation8 + $0xc50] sm:$0xff]  ;;  %v974_v51 = vld [vmem:[#allocation8 + $0x4d8] sm:$0xff] }
 0x3d5   :  { %8009 = vmatprep.subr.bf16.mxu1 %v11032_v4  ;;  %v11310_v4 = vcombine.high %v1181_v59, %v1185_v19  ;;  %v1217_v43 = vld [vmem:[#allocation8 + $0xc70] sm:$0xff] }
 0x3d7   :  { %7760 = vmatpush1.bf16.msra.mxu0 %v11269_v37  ;;  %v954_v37 = vld [vmem:[#allocation8 + $0x438] sm:$0xff] }
 0x3d8   :  { %8010 = vmatpush1.bf16.msra.mxu1 %v11031_v15  ;;  %7761 = vmatprep.subr.bf16.mxu0 %v11278_v17  ;;  %v11309_v15 = vcombine.low %v1181_v59, %v1185_v19  ;;  %v11071_v17 = vcombine.low %v942_v13, %v946_v61  ;;  %v11080_v21 = vcombine.high %v950_v40, %v954_v37  ;;  %v1221_v59 = vld [vmem:[#allocation8 + $0xc90] sm:$0xff]  ;;  %v986_v13 = vld [vmem:[#allocation8 + $0x538] sm:$0xff] }
 0x3d9   :  { %8011 = vmatprep.subr.bf16.mxu1 %v11040_v20  ;;  %v11318_v20 = vcombine.high %v1189_v5, %v1193_v7  ;;  %v1225_v19 = vld [vmem:[#allocation8 + $0xcb0] sm:$0xff]  ;;  %v11341_v61 = vcombine.low %v1213_v42, %v1217_v43 }
 0x3db   :  { %7762 = vmatpush1.bf16.msra.mxu0 %v11277_v2  ;;  %v962_v2 = vld [vmem:[#allocation8 + $0x478] sm:$0xff] }
 0x3dc   :  { %8012 = vmatpush1.bf16.msra.mxu1 %v11039_v29  ;;  %7763 = vmatprep.subr.bf16.mxu0 %v11286_v32  ;;  %v11317_v29 = vcombine.low %v1189_v5, %v1193_v7  ;;  %v11079_v32 = vcombine.low %v950_v40, %v954_v37  ;;  %v11088_v31 = vcombine.high %v958_v27, %v962_v2  ;;  %v1233_v5 = vld [vmem:[#allocation8 + $0xcf0] sm:$0xff]  ;;  %v990_v7 = vld [vmem:[#allocation8 + $0x558] sm:$0xff] }
 0x3dd   :  { %8013 = vmatprep.subr.bf16.mxu1 %v11048_v36  ;;  %v11326_v36 = vcombine.high %v1197_v24, %v1201_v8  ;;  %v994_v40 = vld [vmem:[#allocation8 + $0x578] sm:$0xff]  ;;  %v11349_v37 = vcombine.low %v1221_v59, %v1225_v19 }
 0x3df   :  { %7764 = vmatpush1.bf16.msra.mxu0 %v11285_v62  ;;  %v970_v62 = vld [vmem:[#allocation8 + $0x4b8] sm:$0xff] }
 0x3e0   :  { %8014 = vmatpush1.bf16.msra.mxu1 %v11047_v39  ;;  %7765 = vmatprep.subr.bf16.mxu0 %v11294_v30  ;;  %v11325_v39 = vcombine.low %v1197_v24, %v1201_v8  ;;  %v11087_v30 = vcombine.low %v958_v27, %v962_v2  ;;  %v11096_v33 = vcombine.high %v966_v38, %v970_v62  ;;  %v1241_v24 = vld [vmem:[#allocation8 + $0xd30] sm:$0xff]  ;;  %v998_v8 = vld [vmem:[#allocation8 + $0x598] sm:$0xff] }
 0x3e1   :  { %8015 = vmatprep.subr.bf16.mxu1 %v11056_v41  ;;  %v11334_v41 = vcombine.high %v1205_v60, %v1209_v34  ;;  %v1002_v27 = vld [vmem:[#allocation8 + $0x5b8] sm:$0xff] }
 0x3e3   :  { %7766 = vmatpush1.bf16.msra.mxu0 %v11293_v48  ;;  %v978_v48 = vld [vmem:[#allocation8 + $0x4f8] sm:$0xff] }
 0x3e4   :  { %8016 = vmatpush1.bf16.msra.mxu1 %v11055_v49  ;;  %7767 = vmatprep.subr.bf16.mxu0 %v11302_v56  ;;  %v11333_v49 = vcombine.low %v1205_v60, %v1209_v34  ;;  %v11095_v56 = vcombine.low %v966_v38, %v970_v62  ;;  %v1245_v60 = vld [vmem:[#allocation8 + $0xd50] sm:$0xff]  ;;  %v1006_v38 = vld [vmem:[#allocation8 + $0x5d8] sm:$0xff] }
 0x3e5   :  { %8017 = vmatprep.subr.bf16.mxu1 %v11064_v0  ;;  %v11104_v0 = vcombine.high %v974_v51, %v978_v48  ;;  %v1249_v34 = vld [vmem:[#allocation8 + $0xd70] sm:$0xff]  ;;  %v1010_v62 = vld [vmem:[#allocation8 + $0x5f8] sm:$0xff] }
 0x3e7   :  { %7768 = vmatpush1.bf16.msra.mxu0 %v11301_v6  ;;  %v11103_v6 = vcombine.low %v974_v51, %v978_v48  ;;  %v1253_v51 = vld [vmem:[#allocation8 + $0xd90] sm:$0xff] }
 0x3e8   :  { %8018 = vmatpush1.bf16.msra.mxu1 %v11063_v3  ;;  %7769 = vmatprep.subr.bf16.mxu0 %v11310_v4  ;;  %v11350_v3 = vcombine.high %v1221_v59, %v1225_v19  ;;  %v1257_v48 = vld [vmem:[#allocation8 + $0xdb0] sm:$0xff]  ;;  %v11135_v59 = vcombine.low %v1006_v38, %v1010_v62 }
 0x3e9   :  { %8019 = vmatprep.subr.bf16.mxu1 %v11072_v58  ;;  %v1229_v58 = vld [vmem:[#allocation8 + $0xcd0] sm:$0xff]  ;;  %v11382_v19 = vcombine.high %v1253_v51, %v1257_v48 }
 0x3ea   :  { %v11357_v2 = vcombine.low %v1229_v58, %v1233_v5 }
 0x3eb   :  { %7770 = vmatpush1.bf16.msra.mxu0 %v11309_v15 }
 0x3ec   :  { %8020 = vmatpush1.bf16.msra.mxu1 %v11071_v17  ;;  %7771 = vmatprep.subr.bf16.mxu0 %v11318_v20  ;;  %v11358_v17 = vcombine.high %v1229_v58, %v1233_v5  ;;  %v11120_v20 = vcombine.high %v990_v7, %v994_v40  ;;  %v1022_v5 = vld [vmem:[#allocation8 + $0x658] sm:$0xff] }
 0x3ed   :  { %8030 = vmatprep.subr.bf16.mxu1 %v11080_v21  ;;  %v1237_v21 = vld [vmem:[#allocation8 + $0xd10] sm:$0xff] }
 0x3ef   :  { %8022 = vmatmul.mubr.bf16.vlgmr.msra.gmra.mrb[16].mxu1 %v13556_v35  ;;  %7772 = vmatpush1.bf16.msra.mxu0 %v11317_v29  ;;  %v11342_v35 = vcombine.high %v1213_v42, %v1217_v43  ;;  %v11119_v29 = vcombine.low %v990_v7, %v994_v40  ;;  %v11136_v43 = vcombine.high %v1006_v38, %v1010_v62  ;;  %v1026_v7 = vld [vmem:[#allocation8 + $0x678] sm:$0xff] }
 0x3f0   :  { %8031 = vmatpush1.bf16.msra.mxu1 %v11079_v32  ;;  %8062 = vmatprep.mubr.bf16.mxu1 %v13566_v54  ;;  %v982_v54 = vld [vmem:[#allocation8 + $0x518] sm:$0xff]  ;;  %v11366_v32 = vcombine.high %v1237_v21, %v1241_v24 }
 0x3f1   :  { %7773 = vmatprep.subr.bf16.mxu0 %v11326_v36  ;;  %8032 = vmatprep.subr.bf16.mxu1 %v11088_v31  ;;  %v11112_v4 = vcombine.high %v982_v54, %v986_v13  ;;  %v11111_v15 = vcombine.low %v982_v54, %v986_v13  ;;  %v1843_v36 = vld [vmem:[#allocation10] sm:$0xff]  ;;  %v11128_v31 = vcombine.high %v998_v8, %v1002_v27  ;;  %v1042_v38 = vld [vmem:[#allocation8 + $0x6f8] sm:$0xff] }
 0x3f2   :  { %v1852_v42 = vrot.slane %v1843_v36, %v13538_v16 }
 0x3f3   :  { %7774 = vmatpush1.bf16.msra.mxu0 %v11325_v39  ;;  %v11365_v39 = vcombine.low %v1237_v21, %v1241_v24  ;;  %v1269_v21 = vld [vmem:[#allocation8 + $0xe10] sm:$0xff] }
 0x3f4   :  { %8033 = vmatpush1.bf16.msra.mxu1 %v11087_v30  ;;  %7784 = vmatprep.subr.bf16.mxu0 %v11334_v41  ;;  %v1848_v30 = vrot.slane %v1843_v36, %v13533_v14  ;;  %v11127_v41 = vcombine.low %v998_v8, %v1002_v27  ;;  %v7042_v54 = vadd.f32 %v13655_v63, %v1852_v42  ;;  %v1273_v24 = vld [vmem:[#allocation8 + $0xe30] sm:$0xff]  ;;  %v1030_v8 = vld [vmem:[#allocation8 + $0x698] sm:$0xff] }
 0x3f5   :  { %8034 = vmatprep.subr.bf16.mxu1 %v11096_v33  ;;  %v11374_v33 = vcombine.high %v1245_v60, %v1249_v34  ;;  %v1034_v27 = vld [vmem:[#allocation8 + $0x6b8] sm:$0xff]  ;;  %v11397_v62 = vcombine.low %v1269_v21, %v1273_v24  ;;  %v1289_v42 = vld [vmem:[#allocation8 + $0xeb0] sm:$0xff] }
 0x3f6   :  { %7776 = vmatmul.mubr.bf16.vlgmr.msra.gmra.mrb[28].mxu0 %v13610_v10  ;;  %v11160_v36 = vcombine.high %v1030_v8, %v1034_v27 }
 0x3f7   :  { %7785 = vmatpush1.bf16.msra.mxu0 %v11333_v49  ;;  %7816 = vmatprep.mubr.bf16.mxu0 %v13612_v11  ;;  %v1014_v49 = vld [vmem:[#allocation8 + $0x618] sm:$0xff] }
 0x3f8   :  { %8035 = vmatpush1.bf16.msra.mxu1 %v11095_v56  ;;  %7786 = vmatprep.subr.bf16.mxu0 %v11342_v35  ;;  %v1018_v56 = vld [vmem:[#allocation8 + $0x638] sm:$0xff]  ;;  %v11373_v35 = vcombine.low %v1245_v60, %v1249_v34  ;;  %v1281_v60 = vld [vmem:[#allocation8 + $0xe70] sm:$0xff] }
 0x3f9   :  { %8036 = vmatprep.subr.bf16.mxu1 %v11104_v0  ;;  %v7040_v0 = vadd.f32 %v13653_v52, %v1848_v30  ;;  %v11381_v52 = vcombine.low %v1253_v51, %v1257_v48  ;;  %v1038_v34 = vld [vmem:[#allocation8 + $0x6d8] sm:$0xff] }
 0x3fa   :  { %v1050_v51 = vld [vmem:[#allocation8 + $0x738] sm:$0xff] }
 0x3fb   :  { %7787 = vmatpush1.bf16.msra.mxu0 %v11341_v61  ;;  %v11144_v61 = vcombine.high %v1014_v49, %v1018_v56 }
 0x3fc   :  { %8037 = vmatpush1.bf16.msra.mxu1 %v11103_v6  ;;  %7788 = vmatprep.subr.bf16.mxu0 %v11350_v3  ;;  %v1261_v6 = vld [vmem:[#allocation8 + $0xdd0] sm:$0xff] }
 0x3fd   :  { %8038 = vmatprep.subr.bf16.mxu1 %v11112_v4  ;;  %v1265_v3 = vld [vmem:[#allocation8 + $0xdf0] sm:$0xff] }
 0x3fe   :  { %v11390_v63 = vcombine.high %v1261_v6, %v1265_v3 }
 0x3ff   :  { %7789 = vmatpush1.bf16.msra.mxu0 %v11349_v37 }
 0x400   :  { %8039 = vmatpush1.bf16.msra.mxu1 %v11111_v15  ;;  %7790 = vmatprep.subr.bf16.mxu0 %v11358_v17  ;;  %v11143_v17 = vcombine.low %v1014_v49, %v1018_v56  ;;  %v11167_v49 = vcombine.low %v1038_v34, %v1042_v38 }
 0x401   :  { %8040 = vmatprep.subr.bf16.mxu1 %v11120_v20  ;;  %v11152_v20 = vcombine.high %v1022_v5, %v1026_v7 }
 0x403   :  { %7791 = vmatpush1.bf16.msra.mxu0 %v11357_v2  ;;  %v11389_v2 = vcombine.low %v1261_v6, %v1265_v3 }
 0x404   :  { %8041 = vmatpush1.bf16.msra.mxu1 %v11119_v29  ;;  %7792 = vmatprep.subr.bf16.mxu0 %v11366_v32  ;;  %v11151_v29 = vcombine.low %v1022_v5, %v1026_v7  ;;  %v11398_v32 = vcombine.high %v1269_v21, %v1273_v24  ;;  %v1305_v5 = vld [vmem:[#allocation8 + $0xf30] sm:$0xff]  ;;  %v1062_v7 = vld [vmem:[#allocation8 + $0x798] sm:$0xff] }
 0x405   :  { %8042 = vmatprep.subr.bf16.mxu1 %v11128_v31  ;;  %v1277_v31 = vld [vmem:[#allocation8 + $0xe50] sm:$0xff]  ;;  %v1070_v24 = vld [vmem:[#allocation8 + $0x7d8] sm:$0xff] }
 0x406   :  { %v11406_v30 = vcombine.high %v1277_v31, %v1281_v60  ;;  %v11405_v48 = vcombine.low %v1277_v31, %v1281_v60  ;;  %v1313_v21 = vld [vmem:[#allocation8 + $0xf70] sm:$0xff]  ;;  %v1078_v60 = vld [vmem:[#allocation8 + $0x818] sm:$0xff] }
 0x407   :  { %7793 = vmatpush1.bf16.msra.mxu0 %v11365_v39  ;;  %v11159_v39 = vcombine.low %v1030_v8, %v1034_v27  ;;  %v1074_v8 = vld [vmem:[#allocation8 + $0x7f8] sm:$0xff]  ;;  %v1321_v31 = vld [vmem:[#allocation8 + $0xfb0] sm:$0xff] }
 0x408   :  { %8043 = vmatpush1.bf16.msra.mxu1 %v11127_v41  ;;  %7794 = vmatprep.subr.bf16.mxu0 %v11374_v33  ;;  %v11168_v41 = vcombine.high %v1038_v34, %v1042_v38  ;;  %v1285_v33 = vld [vmem:[#allocation8 + $0xe90] sm:$0xff]  ;;  %v1082_v34 = vld [vmem:[#allocation8 + $0x838] sm:$0xff] }
 0x409   :  { %v7326_v13 = vpop.f32.mrb[24].mxu0  ;;  %8044 = vmatprep.subr.bf16.mxu1 %v11136_v43  ;;  %v1046_v43 = vld [vmem:[#allocation8 + $0x718] sm:$0xff]  ;;  %v11414_v56 = vcombine.high %v1285_v33, %v1289_v42 }
 0x40a   :  { %v13712_v4 = vadd.f32 %v7326_v13, %v7040_v0  ;;  %v7328_v58 = vpop.f32.mrb[25].mxu0  ;;  %v1293_v0 = vld [vmem:[#allocation8 + $0xed0] sm:$0xff]  ;;  %v11413_v13 = vcombine.low %v1285_v33, %v1289_v42  ;;  %v1086_v42 = vld [vmem:[#allocation8 + $0x858] sm:$0xff] }
 0x40b   :  { %v13714_v40 = vadd.f32 %v7328_v58, %v7042_v54  ;;  %v7330_v37 = vpop.f32.mrb[26].mxu0  ;;  %7795 = vmatpush1.bf16.msra.mxu0 %v11373_v35  ;;  %v11176_v35 = vcombine.high %v1046_v43, %v1050_v51  ;;  %v1058_v54 = vld [vmem:[#allocation8 + $0x778] sm:$0xff]  ;;  %v1301_v58 = vld [vmem:[#allocation8 + $0xf10] sm:$0xff] }
 0x40c   :  { %8045 = vmatpush1.bf16.msra.mxu1 %v11135_v59  ;;  %v7331_v15 = vpop.f32.mrb[27].mxu0  ;;  %7796 = vmatprep.subr.bf16.mxu0 %v11382_v19  ;;  %v1297_v59 = vld [vmem:[#allocation8 + $0xef0] sm:$0xff]  ;;  %v1054_v19 = vld [vmem:[#allocation8 + $0x758] sm:$0xff]  ;;  %v11429_v27 = vcombine.low %v1301_v58, %v1305_v5 }
 0x40d   :  { %8046 = vmatprep.subr.bf16.mxu1 %v11144_v61  ;;  %v11175_v61 = vcombine.low %v1046_v43, %v1050_v51  ;;  %v11422_v6 = vcombine.high %v1293_v0, %v1297_v59  ;;  %v11184_v3 = vcombine.high %v1054_v19, %v1058_v54  ;;  %v1066_v37 = vld [vmem:[#allocation8 + $0x7b8] sm:$0xff]  ;;  %v11183_v15 = vcombine.low %v1054_v19, %v1058_v54  ;;  %v1329_v33 = vld [vmem:[#allocation8 + $0xff0] sm:$0xff] }
 0x40e   :  { %v1090_v43 = vld [vmem:[#allocation8 + $0x878] sm:$0xff] }
 0x40f   :  { %7797 = vmatpush1.bf16.msra.mxu0 %v11381_v52  ;;  %v11421_v52 = vcombine.low %v1293_v0, %v1297_v59  ;;  %v1337_v0 = vld [vmem:[#allocation8 + $0x1030] sm:$0xff]  ;;  %v1094_v59 = vld [vmem:[#allocation8 + $0x898] sm:$0xff] }
 0x410   :  { %8047 = vmatpush1.bf16.msra.mxu1 %v11143_v17  ;;  %7798 = vmatprep.subr.bf16.mxu0 %v11390_v63  ;;  %v11430_v17 = vcombine.high %v1301_v58, %v1305_v5  ;;  %v11192_v63 = vcombine.high %v1062_v7, %v1066_v37  ;;  %v1098_v19 = vld [vmem:[#allocation8 + $0x8b8] sm:$0xff]  ;;  %v1345_v58 = vld [vmem:[#allocation8 + $0x1070] sm:$0xff] }
 0x411   :  { %8048 = vmatprep.subr.bf16.mxu1 %v11152_v20  ;;  %v1309_v20 = vld [vmem:[#allocation8 + $0xf50] sm:$0xff]  ;;  %v1102_v5 = vld [vmem:[#allocation8 + $0x8d8] sm:$0xff] }
 0x412   :  { %v11437_v38 = vcombine.low %v1309_v20, %v1313_v21 }
 0x413   :  { %7799 = vmatpush1.bf16.msra.mxu0 %v11389_v2  ;;  %v11191_v2 = vcombine.low %v1062_v7, %v1066_v37  ;;  %v1106_v7 = vld [vmem:[#allocation8 + $0x8f8] sm:$0xff] }
 0x414   :  { %8049 = vmatpush1.bf16.msra.mxu1 %v11151_v29  ;;  %7800 = vmatprep.subr.bf16.mxu0 %v11398_v32  ;;  %v11438_v29 = vcombine.high %v1309_v20, %v1313_v21  ;;  %v11200_v32 = vcombine.high %v1070_v24, %v1074_v8  ;;  %v1114_v20 = vld [vmem:[#allocation8 + $0x938] sm:$0xff] }
 0x415   :  { %8050 = vmatprep.subr.bf16.mxu1 %v11160_v36  ;;  %v1317_v36 = vld [vmem:[#allocation8 + $0xf90] sm:$0xff] }
 0x416   :  { %v11445_v51 = vcombine.low %v1317_v36, %v1321_v31 }
 0x417   :  { %7801 = vmatpush1.bf16.msra.mxu0 %v11397_v62  ;;  %v11199_v62 = vcombine.low %v1070_v24, %v1074_v8  ;;  %v11231_v24 = vcombine.low %v1102_v5, %v1106_v7 }
 0x418   :  { %8051 = vmatpush1.bf16.msra.mxu1 %v11159_v39  ;;  %7802 = vmatprep.subr.bf16.mxu0 %v11406_v30  ;;  %v11446_v39 = vcombine.high %v1317_v36, %v1321_v31  ;;  %v11208_v30 = vcombine.high %v1078_v60, %v1082_v34  ;;  %v1122_v36 = vld [vmem:[#allocation8 + $0x978] sm:$0xff] }
 0x419   :  { %8052 = vmatprep.subr.bf16.mxu1 %v11168_v41  ;;  %v1325_v41 = vld [vmem:[#allocation8 + $0xfd0] sm:$0xff] }
 0x41a   :  { %v11453_v54 = vcombine.low %v1325_v41, %v1329_v33 }
 0x41b   :  { %7803 = vmatpush1.bf16.msra.mxu0 %v11405_v48  ;;  %v11207_v48 = vcombine.low %v1078_v60, %v1082_v34 }
 0x41c   :  { %8053 = vmatpush1.bf16.msra.mxu1 %v11167_v49  ;;  %7804 = vmatprep.subr.bf16.mxu0 %v11414_v56  ;;  %v11454_v49 = vcombine.high %v1325_v41, %v1329_v33  ;;  %v11216_v56 = vcombine.high %v1086_v42, %v1090_v43  ;;  %v1130_v41 = vld [vmem:[#allocation8 + $0x9b8] sm:$0xff] }
 0x41d   :  { %8054 = vmatprep.subr.bf16.mxu1 %v11176_v35  ;;  %v1333_v35 = vld [vmem:[#allocation8 + $0x1010] sm:$0xff] }
 0x41e   :  { %v11461_v37 = vcombine.low %v1333_v35, %v1337_v0 }
 0x41f   :  { %7805 = vmatpush1.bf16.msra.mxu0 %v11413_v13  ;;  %v11215_v13 = vcombine.low %v1086_v42, %v1090_v43 }
 0x420   :  { %8055 = vmatpush1.bf16.msra.mxu1 %v11175_v61  ;;  %7806 = vmatprep.subr.bf16.mxu0 %v11422_v6  ;;  %v11462_v61 = vcombine.high %v1333_v35, %v1337_v0  ;;  %v11224_v6 = vcombine.high %v1094_v59, %v1098_v19  ;;  %v1138_v35 = vld [vmem:[#allocation8 + $0x9f8] sm:$0xff] }
 0x421   :  { %8056 = vmatprep.subr.bf16.mxu1 %v11184_v3  ;;  %v1341_v3 = vld [vmem:[#allocation8 + $0x1050] sm:$0xff] }
 0x422   :  { %v11469_v21 = vcombine.low %v1341_v3, %v1345_v58 }
 0x423   :  { %7807 = vmatpush1.bf16.msra.mxu0 %v11421_v52  ;;  %v11223_v52 = vcombine.low %v1094_v59, %v1098_v19 }
 0x424   :  { %8057 = vmatpush1.bf16.msra.mxu1 %v11183_v15  ;;  %7808 = vmatprep.subr.bf16.mxu0 %v11430_v17  ;;  %v11232_v15 = vcombine.high %v1102_v5, %v1106_v7  ;;  %v1349_v17 = vld [vmem:[#allocation8 + $0x1090] sm:$0xff] }
 0x425   :  { %8058 = vmatprep.subr.bf16.mxu1 %v11192_v63  ;;  %v1353_v63 = vld [vmem:[#allocation8 + $0x10b0] sm:$0xff] }
 0x426   :  { %v11478_v8 = vcombine.high %v1349_v17, %v1353_v63  ;;  %v11477_v31 = vcombine.low %v1349_v17, %v1353_v63  ;;  %v1154_v17 = vld [vmem:[#allocation8 + $0xa78] sm:$0xff] }
 0x427   :  { %7809 = vmatpush1.bf16.msra.mxu0 %v11429_v27 }
 0x428   :  { %8059 = vmatpush1.bf16.msra.mxu1 %v11191_v2  ;;  %7810 = vmatprep.subr.bf16.mxu0 %v11438_v29  ;;  %v1357_v2 = vld [vmem:[#allocation8 + $0x10d0] sm:$0xff] }
 0x429   :  { %8060 = vmatprep.subr.bf16.mxu1 %v11200_v32  ;;  %v1361_v29 = vld [vmem:[#allocation8 + $0x10f0] sm:$0xff]  ;;  %v1118_v32 = vld [vmem:[#allocation8 + $0x958] sm:$0xff] }
 0x42a   :  { %v11486_v34 = vcombine.high %v1357_v2, %v1361_v29  ;;  %v11485_v33 = vcombine.low %v1357_v2, %v1361_v29  ;;  %v11247_v42 = vcombine.low %v1118_v32, %v1122_v36  ;;  %v1162_v2 = vld [vmem:[#allocation8 + $0xab8] sm:$0xff] }
 0x42b   :  { %7811 = vmatpush1.bf16.msra.mxu0 %v11437_v38  ;;  %v11248_v38 = vcombine.high %v1118_v32, %v1122_v36 }
 0x42c   :  { %8061 = vmatpush1.bf16.msra.mxu1 %v11199_v62  ;;  %7812 = vmatprep.subr.bf16.mxu0 %v11446_v39  ;;  %v1365_v62 = vld [vmem:[#allocation8 + $0x1110] sm:$0xff] }
 0x42d   :  { %8071 = vmatprep.subr.bf16.mxu1 %v11208_v30  ;;  %v1369_v39 = vld [vmem:[#allocation8 + $0x1130] sm:$0xff]  ;;  %v1126_v30 = vld [vmem:[#allocation8 + $0x998] sm:$0xff] }
 0x42e   :  { %v11494_v43 = vcombine.high %v1365_v62, %v1369_v39  ;;  %v11493_v0 = vcombine.low %v1365_v62, %v1369_v39  ;;  %v11255_v59 = vcombine.low %v1126_v30, %v1130_v41  ;;  %v1170_v62 = vld [vmem:[#allocation8 + $0xaf8] sm:$0xff] }
 0x42f   :  { %8063 = vmatmul.mubr.bf16.vlgmr.msra.gmra.mrb[16].mxu1 %v13564_v53  ;;  %7813 = vmatpush1.bf16.msra.mxu0 %v11445_v51  ;;  %v11470_v53 = vcombine.high %v1341_v3, %v1345_v58  ;;  %v11256_v51 = vcombine.high %v1126_v30, %v1130_v41  ;;  %v1146_v3 = vld [vmem:[#allocation8 + $0xa38] sm:$0xff] }
 0x430   :  { %8072 = vmatpush1.bf16.msra.mxu1 %v11207_v48  ;;  %8103 = vmatprep.mubr.bf16.mxu1 %v13581_v25  ;;  %v1110_v25 = vld [vmem:[#allocation8 + $0x918] sm:$0xff]  ;;  %v1373_v48 = vld [vmem:[#allocation8 + $0x1150] sm:$0xff] }
 0x431   :  { %7814 = vmatprep.subr.bf16.mxu0 %v11454_v49  ;;  %8073 = vmatprep.subr.bf16.mxu1 %v11216_v56  ;;  %v11240_v27 = vcombine.high %v1110_v25, %v1114_v20  ;;  %v11239_v60 = vcombine.low %v1110_v25, %v1114_v20  ;;  %v1377_v49 = vld [vmem:[#allocation8 + $0x1170] sm:$0xff]  ;;  %v1134_v56 = vld [vmem:[#allocation8 + $0x9d8] sm:$0xff] }
 0x432   :  { %v11502_v19 = vcombine.high %v1373_v48, %v1377_v49  ;;  %v11501_v58 = vcombine.low %v1373_v48, %v1377_v49  ;;  %v11263_v5 = vcombine.low %v1134_v56, %v1138_v35  ;;  %v1178_v48 = vld [vmem:[#allocation8 + $0xb38] sm:$0xff] }
 0x433   :  { %7815 = vmatpush1.bf16.msra.mxu0 %v11453_v54  ;;  %v11264_v54 = vcombine.high %v1134_v56, %v1138_v35 }
 0x434   :  { %8074 = vmatpush1.bf16.msra.mxu1 %v11215_v13  ;;  %7825 = vmatprep.subr.bf16.mxu0 %v11462_v61  ;;  %v1381_v13 = vld [vmem:[#allocation8 + $0x1190] sm:$0xff] }
 0x435   :  { %8075 = vmatprep.subr.bf16.mxu1 %v11224_v6  ;;  %v1385_v61 = vld [vmem:[#allocation8 + $0x11b0] sm:$0xff]  ;;  %v1142_v6 = vld [vmem:[#allocation8 + $0xa18] sm:$0xff] }
 0x436   :  { %7817 = vmatmul.mubr.bf16.vlgmr.msra.gmra.mrb[28].mxu0 %v13633_v44  ;;  %v11510_v7 = vcombine.high %v1381_v13, %v1385_v61  ;;  %v11509_v63 = vcombine.low %v1381_v13, %v1385_v61  ;;  %v11271_v25 = vcombine.low %v1142_v6, %v1146_v3  ;;  %v1186_v13 = vld [vmem:[#allocation8 + $0xb78] sm:$0xff] }
 0x437   :  { %7826 = vmatpush1.bf16.msra.mxu0 %v11461_v37  ;;  %7857 = vmatprep.mubr.bf16.mxu0 %v13635_v57  ;;  %v11272_v37 = vcombine.high %v1142_v6, %v1146_v3 }
 0x438   :  { %8076 = vmatpush1.bf16.msra.mxu1 %v11223_v52  ;;  %7827 = vmatprep.subr.bf16.mxu0 %v11470_v53  ;;  %v1389_v52 = vld [vmem:[#allocation8 + $0x11d0] sm:$0xff] }
 0x439   :  { %8077 = vmatprep.subr.bf16.mxu1 %v11232_v15  ;;  %v1393_v53 = vld [vmem:[#allocation8 + $0x11f0] sm:$0xff]  ;;  %v1150_v15 = vld [vmem:[#allocation8 + $0xa58] sm:$0xff] }
 0x43a   :  { %v11518_v20 = vcombine.high %v1389_v52, %v1393_v53  ;;  %v11517_v29 = vcombine.low %v1389_v52, %v1393_v53  ;;  %v11279_v32 = vcombine.low %v1150_v15, %v1154_v17  ;;  %v1194_v52 = vld [vmem:[#allocation8 + $0xbb8] sm:$0xff] }
 0x43b   :  { %7828 = vmatpush1.bf16.msra.mxu0 %v11469_v21  ;;  %v11280_v21 = vcombine.high %v1150_v15, %v1154_v17 }
 0x43c   :  { %8078 = vmatpush1.bf16.msra.mxu1 %v11231_v24  ;;  %7829 = vmatprep.subr.bf16.mxu0 %v11478_v8  ;;  %v1397_v24 = vld [vmem:[#allocation8 + $0x1210] sm:$0xff] }
 0x43d   :  { %8079 = vmatprep.subr.bf16.mxu1 %v11240_v27  ;;  %v1401_v8 = vld [vmem:[#allocation8 + $0x1230] sm:$0xff]  ;;  %v1158_v27 = vld [vmem:[#allocation8 + $0xa98] sm:$0xff] }
 0x43e   :  { %v11526_v36 = vcombine.high %v1397_v24, %v1401_v8  ;;  %v11525_v39 = vcombine.low %v1397_v24, %v1401_v8  ;;  %v11287_v30 = vcombine.low %v1158_v27, %v1162_v2  ;;  %v1202_v24 = vld [vmem:[#allocation8 + $0xbf8] sm:$0xff] }
 0x43f   :  { %7830 = vmatpush1.bf16.msra.mxu0 %v11477_v31  ;;  %v11288_v31 = vcombine.high %v1158_v27, %v1162_v2 }
 0x440   :  { %8080 = vmatpush1.bf16.msra.mxu1 %v11239_v60  ;;  %7831 = vmatprep.subr.bf16.mxu0 %v11486_v34  ;;  %v1405_v60 = vld [vmem:[#allocation8 + $0x1250] sm:$0xff] }
 0x441   :  { %8081 = vmatprep.subr.bf16.mxu1 %v11248_v38  ;;  %v1409_v34 = vld [vmem:[#allocation8 + $0x1270] sm:$0xff]  ;;  %v1166_v38 = vld [vmem:[#allocation8 + $0xad8] sm:$0xff] }
 0x442   :  { %v11534_v41 = vcombine.high %v1405_v60, %v1409_v34  ;;  %v11533_v49 = vcombine.low %v1405_v60, %v1409_v34  ;;  %v11295_v56 = vcombine.low %v1166_v38, %v1170_v62  ;;  %v1210_v60 = vld [vmem:[#allocation8 + $0xc38] sm:$0xff] }
 0x443   :  { %7832 = vmatpush1.bf16.msra.mxu0 %v11485_v33  ;;  %v11296_v33 = vcombine.high %v1166_v38, %v1170_v62 }
 0x444   :  { %8082 = vmatpush1.bf16.msra.mxu1 %v11247_v42  ;;  %7833 = vmatprep.subr.bf16.mxu0 %v11494_v43  ;;  %v1413_v42 = vld [vmem:[#allocation8 + $0x1290] sm:$0xff] }
 0x445   :  { %8083 = vmatprep.subr.bf16.mxu1 %v11256_v51  ;;  %v1417_v43 = vld [vmem:[#allocation8 + $0x12b0] sm:$0xff]  ;;  %v1174_v51 = vld [vmem:[#allocation8 + $0xb18] sm:$0xff] }
 0x446   :  { %v11542_v35 = vcombine.high %v1413_v42, %v1417_v43  ;;  %v11541_v61 = vcombine.low %v1413_v42, %v1417_v43  ;;  %v11303_v6 = vcombine.low %v1174_v51, %v1178_v48  ;;  %v1218_v42 = vld [vmem:[#allocation8 + $0xc78] sm:$0xff] }
 0x447   :  { %7834 = vmatpush1.bf16.msra.mxu0 %v11493_v0  ;;  %v11304_v0 = vcombine.high %v1174_v51, %v1178_v48 }
 0x448   :  { %8084 = vmatpush1.bf16.msra.mxu1 %v11255_v59  ;;  %7835 = vmatprep.subr.bf16.mxu0 %v11502_v19  ;;  %v1421_v59 = vld [vmem:[#allocation8 + $0x12d0] sm:$0xff] }
 0x449   :  { %8085 = vmatprep.subr.bf16.mxu1 %v11264_v54  ;;  %v1425_v19 = vld [vmem:[#allocation8 + $0x12f0] sm:$0xff]  ;;  %v1182_v54 = vld [vmem:[#allocation8 + $0xb58] sm:$0xff] }
 0x44a   :  { %v11550_v3 = vcombine.high %v1421_v59, %v1425_v19  ;;  %v11549_v53 = vcombine.low %v1421_v59, %v1425_v19  ;;  %v11311_v15 = vcombine.low %v1182_v54, %v1186_v13  ;;  %v1226_v59 = vld [vmem:[#allocation8 + $0xcb8] sm:$0xff] }
 0x44b   :  { %7836 = vmatpush1.bf16.msra.mxu0 %v11501_v58  ;;  %v11312_v58 = vcombine.high %v1182_v54, %v1186_v13 }
 0x44c   :  { %8086 = vmatpush1.bf16.msra.mxu1 %v11263_v5  ;;  %7837 = vmatprep.subr.bf16.mxu0 %v11510_v7  ;;  %v1429_v5 = vld [vmem:[#allocation8 + $0x1310] sm:$0xff] }
 0x44d   :  { %8087 = vmatprep.subr.bf16.mxu1 %v11272_v37  ;;  %v1433_v7 = vld [vmem:[#allocation8 + $0x1330] sm:$0xff]  ;;  %v1190_v37 = vld [vmem:[#allocation8 + $0xb98] sm:$0xff] }
 0x44e   :  { %v11558_v17 = vcombine.high %v1429_v5, %v1433_v7  ;;  %v11557_v8 = vcombine.low %v1429_v5, %v1433_v7  ;;  %v11319_v27 = vcombine.low %v1190_v37, %v1194_v52  ;;  %v1234_v5 = vld [vmem:[#allocation8 + $0xcf8] sm:$0xff] }
 0x44f   :  { %7838 = vmatpush1.bf16.msra.mxu0 %v11509_v63  ;;  %v11320_v63 = vcombine.high %v1190_v37, %v1194_v52 }
 0x450   :  { %8088 = vmatpush1.bf16.msra.mxu1 %v11271_v25  ;;  %7839 = vmatprep.subr.bf16.mxu0 %v11518_v20  ;;  %v1437_v25 = vld [vmem:[#allocation8 + $0x1350] sm:$0xff] }
 0x451   :  { %8089 = vmatprep.subr.bf16.mxu1 %v11280_v21  ;;  %v1441_v20 = vld [vmem:[#allocation8 + $0x1370] sm:$0xff]  ;;  %v1198_v21 = vld [vmem:[#allocation8 + $0xbd8] sm:$0xff] }
 0x452   :  { %v11566_v2 = vcombine.high %v1437_v25, %v1441_v20  ;;  %v11565_v34 = vcombine.low %v1437_v25, %v1441_v20  ;;  %v11327_v38 = vcombine.low %v1198_v21, %v1202_v24 }
 0x453   :  { %7840 = vmatpush1.bf16.msra.mxu0 %v11517_v29  ;;  %v11328_v29 = vcombine.high %v1198_v21, %v1202_v24  ;;  %v1485_v24 = vld [vmem:[#allocation8 + $0x14d0] sm:$0xff] }
 0x454   :  { %8090 = vmatpush1.bf16.msra.mxu1 %v11279_v32  ;;  %7841 = vmatprep.subr.bf16.mxu0 %v11526_v36  ;;  %v1445_v32 = vld [vmem:[#allocation8 + $0x1390] sm:$0xff] }
 0x455   :  { %8091 = vmatprep.subr.bf16.mxu1 %v11288_v31  ;;  %v1449_v36 = vld [vmem:[#allocation8 + $0x13b0] sm:$0xff]  ;;  %v1206_v31 = vld [vmem:[#allocation8 + $0xc18] sm:$0xff] }
 0x456   :  { %v11574_v62 = vcombine.high %v1445_v32, %v1449_v36  ;;  %v11573_v43 = vcombine.low %v1445_v32, %v1449_v36  ;;  %v11335_v51 = vcombine.low %v1206_v31, %v1210_v60 }
 0x457   :  { %7842 = vmatpush1.bf16.msra.mxu0 %v11525_v39  ;;  %v11336_v39 = vcombine.high %v1206_v31, %v1210_v60  ;;  %v1493_v60 = vld [vmem:[#allocation8 + $0x1510] sm:$0xff] }
 0x458   :  { %8092 = vmatpush1.bf16.msra.mxu1 %v11287_v30  ;;  %7843 = vmatprep.subr.bf16.mxu0 %v11534_v41  ;;  %v1453_v30 = vld [vmem:[#allocation8 + $0x13d0] sm:$0xff] }
 0x459   :  { %8093 = vmatprep.subr.bf16.mxu1 %v11296_v33  ;;  %v1457_v41 = vld [vmem:[#allocation8 + $0x13f0] sm:$0xff]  ;;  %v1214_v33 = vld [vmem:[#allocation8 + $0xc58] sm:$0xff] }
 0x45a   :  { %v11582_v48 = vcombine.high %v1453_v30, %v1457_v41  ;;  %v11581_v19 = vcombine.low %v1453_v30, %v1457_v41  ;;  %v11343_v54 = vcombine.low %v1214_v33, %v1218_v42 }
 0x45b   :  { %7844 = vmatpush1.bf16.msra.mxu0 %v11533_v49  ;;  %v11344_v49 = vcombine.high %v1214_v33, %v1218_v42  ;;  %v1501_v42 = vld [vmem:[#allocation8 + $0x1550] sm:$0xff] }
 0x45c   :  { %8094 = vmatpush1.bf16.msra.mxu1 %v11295_v56  ;;  %7845 = vmatprep.subr.bf16.mxu0 %v11542_v35  ;;  %v1461_v56 = vld [vmem:[#allocation8 + $0x1410] sm:$0xff] }
 0x45d   :  { %8095 = vmatprep.subr.bf16.mxu1 %v11304_v0  ;;  %v1465_v35 = vld [vmem:[#allocation8 + $0x1430] sm:$0xff]  ;;  %v1222_v0 = vld [vmem:[#allocation8 + $0xc98] sm:$0xff] }
 0x45e   :  { %v11590_v13 = vcombine.high %v1461_v56, %v1465_v35  ;;  %v11589_v7 = vcombine.low %v1461_v56, %v1465_v35  ;;  %v11351_v37 = vcombine.low %v1222_v0, %v1226_v59 }
 0x45f   :  { %7846 = vmatpush1.bf16.msra.mxu0 %v11541_v61  ;;  %v11352_v61 = vcombine.high %v1222_v0, %v1226_v59 }
 0x460   :  { %8096 = vmatpush1.bf16.msra.mxu1 %v11303_v6  ;;  %7847 = vmatprep.subr.bf16.mxu0 %v11550_v3  ;;  %v1469_v6 = vld [vmem:[#allocation8 + $0x1450] sm:$0xff] }
 0x461   :  { %8097 = vmatprep.subr.bf16.mxu1 %v11312_v58  ;;  %v1473_v3 = vld [vmem:[#allocation8 + $0x1470] sm:$0xff]  ;;  %v1230_v58 = vld [vmem:[#allocation8 + $0xcd8] sm:$0xff] }
 0x462   :  { %v11360_v52 = vcombine.high %v1230_v58, %v1234_v5  ;;  %v11359_v25 = vcombine.low %v1230_v58, %v1234_v5  ;;  %v1274_v58 = vld [vmem:[#allocation8 + $0xe38] sm:$0xff] }
 0x463   :  { %7848 = vmatpush1.bf16.msra.mxu0 %v11549_v53  ;;  %v1477_v53 = vld [vmem:[#allocation8 + $0x1490] sm:$0xff] }
 0x464   :  { %8098 = vmatpush1.bf16.msra.mxu1 %v11311_v15  ;;  %7849 = vmatprep.subr.bf16.mxu0 %v11558_v17  ;;  %v1481_v15 = vld [vmem:[#allocation8 + $0x14b0] sm:$0xff]  ;;  %v1242_v17 = vld [vmem:[#allocation8 + $0xd38] sm:$0xff] }
 0x465   :  { %8099 = vmatprep.subr.bf16.mxu1 %v11320_v63  ;;  %v11597_v63 = vcombine.low %v1469_v6, %v1473_v3  ;;  %v11606_v20 = vcombine.high %v1477_v53, %v1481_v15 }
 0x467   :  { %7850 = vmatpush1.bf16.msra.mxu0 %v11557_v8  ;;  %v1489_v8 = vld [vmem:[#allocation8 + $0x14f0] sm:$0xff] }
 0x468   :  { %8100 = vmatpush1.bf16.msra.mxu1 %v11319_v27  ;;  %7851 = vmatprep.subr.bf16.mxu0 %v11566_v2  ;;  %v1246_v27 = vld [vmem:[#allocation8 + $0xd58] sm:$0xff]  ;;  %v11614_v36 = vcombine.high %v1485_v24, %v1489_v8 }
 0x469   :  { %8101 = vmatprep.subr.bf16.mxu1 %v11328_v29  ;;  %v1250_v2 = vld [vmem:[#allocation8 + $0xd78] sm:$0xff]  ;;  %v11605_v29 = vcombine.low %v1477_v53, %v1481_v15  ;;  %v1521_v53 = vld [vmem:[#allocation8 + $0x15f0] sm:$0xff] }
 0x46a   :  { %v11376_v31 = vcombine.high %v1246_v27, %v1250_v2  ;;  %v11375_v30 = vcombine.low %v1246_v27, %v1250_v2  ;;  %v1278_v15 = vld [vmem:[#allocation8 + $0xe58] sm:$0xff] }
 0x46b   :  { %7852 = vmatpush1.bf16.msra.mxu0 %v11565_v34  ;;  %v1497_v34 = vld [vmem:[#allocation8 + $0x1530] sm:$0xff]  ;;  %v1290_v27 = vld [vmem:[#allocation8 + $0xeb8] sm:$0xff] }
 0x46c   :  { %8102 = vmatpush1.bf16.msra.mxu1 %v11327_v38  ;;  %7853 = vmatprep.subr.bf16.mxu0 %v11574_v62  ;;  %v1254_v38 = vld [vmem:[#allocation8 + $0xd98] sm:$0xff]  ;;  %v11622_v41 = vcombine.high %v1493_v60, %v1497_v34  ;;  %v11621_v35 = vcombine.low %v1493_v60, %v1497_v34  ;;  %v1537_v60 = vld [vmem:[#allocation8 + $0x1670] sm:$0xff] }
 0x46d   :  { %8112 = vmatprep.subr.bf16.mxu1 %v11336_v39  ;;  %v1258_v62 = vld [vmem:[#allocation8 + $0xdb8] sm:$0xff]  ;;  %v11613_v39 = vcombine.low %v1485_v24, %v1489_v8  ;;  %v1529_v24 = vld [vmem:[#allocation8 + $0x1630] sm:$0xff] }
 0x46e   :  { %v11384_v33 = vcombine.high %v1254_v38, %v1258_v62  ;;  %v11383_v59 = vcombine.low %v1254_v38, %v1258_v62  ;;  %v1286_v8 = vld [vmem:[#allocation8 + $0xe98] sm:$0xff] }
 0x46f   :  { %8104 = vmatmul.mubr.bf16.vlgmr.msra.gmra.mrb[16].mxu1 %v13610_v10  ;;  %7854 = vmatpush1.bf16.msra.mxu0 %v11573_v43  ;;  %v11598_v10 = vcombine.high %v1469_v6, %v1473_v3  ;;  %v1505_v43 = vld [vmem:[#allocation8 + $0x1570] sm:$0xff]  ;;  %v1270_v3 = vld [vmem:[#allocation8 + $0xe18] sm:$0xff] }
 0x470   :  { %8113 = vmatpush1.bf16.msra.mxu1 %v11335_v51  ;;  %8144 = vmatprep.mubr.bf16.mxu1 %v13612_v11  ;;  %v1238_v11 = vld [vmem:[#allocation8 + $0xd18] sm:$0xff]  ;;  %v1513_v6 = vld [vmem:[#allocation8 + $0x15b0] sm:$0xff]  ;;  %v11629_v5 = vcombine.low %v1501_v42, %v1505_v43 }
 0x471   :  { %7855 = vmatprep.subr.bf16.mxu0 %v11582_v48  ;;  %8114 = vmatprep.subr.bf16.mxu1 %v11344_v49  ;;  %v11368_v21 = vcombine.high %v1238_v11, %v1242_v17  ;;  %v11367_v32 = vcombine.low %v1238_v11, %v1242_v17  ;;  %v1262_v48 = vld [vmem:[#allocation8 + $0xdd8] sm:$0xff] }
 0x472   :  { %v1266_v49 = vld [vmem:[#allocation8 + $0xdf8] sm:$0xff] }
 0x473   :  { %7856 = vmatpush1.bf16.msra.mxu0 %v11581_v19  ;;  %v11630_v19 = vcombine.high %v1501_v42, %v1505_v43  ;;  %v1282_v11 = vld [vmem:[#allocation8 + $0xe78] sm:$0xff]  ;;  %v1545_v42 = vld [vmem:[#allocation8 + $0x16b0] sm:$0xff] }
 0x474   :  { %8115 = vmatpush1.bf16.msra.mxu1 %v11343_v54  ;;  %7866 = vmatprep.subr.bf16.mxu0 %v11590_v13  ;;  %v11392_v13 = vcombine.high %v1262_v48, %v1266_v49  ;;  %v1294_v34 = vld [vmem:[#allocation8 + $0xed8] sm:$0xff] }
 0x475   :  { %8116 = vmatprep.subr.bf16.mxu1 %v11352_v61  ;;  %v1509_v61 = vld [vmem:[#allocation8 + $0x1590] sm:$0xff]  ;;  %v1298_v38 = vld [vmem:[#allocation8 + $0xef8] sm:$0xff] }
 0x476   :  { %7858 = vmatmul.mubr.bf16.vlgmr.msra.gmra.mrb[28].mxu0 %v13647_v1  ;;  %v11637_v17 = vcombine.low %v1509_v61, %v1513_v6  ;;  %v1302_v43 = vld [vmem:[#allocation8 + $0xf18] sm:$0xff] }
 0x477   :  { %7867 = vmatpush1.bf16.msra.mxu0 %v11589_v7  ;;  %7898 = vmatprep.mubr.bf16.mxu0 %v13649_v12  ;;  %v11391_v7 = vcombine.low %v1262_v48, %v1266_v49  ;;  %v1306_v48 = vld [vmem:[#allocation8 + $0xf38] sm:$0xff] }
 0x478   :  { %8117 = vmatpush1.bf16.msra.mxu1 %v11351_v37  ;;  %7868 = vmatprep.subr.bf16.mxu0 %v11598_v10  ;;  %v11638_v37 = vcombine.high %v1509_v61, %v1513_v6  ;;  %v11400_v10 = vcombine.high %v1270_v3, %v1274_v58  ;;  %v1314_v61 = vld [vmem:[#allocation8 + $0xf78] sm:$0xff] }
 0x479   :  { %8118 = vmatprep.subr.bf16.mxu1 %v11360_v52  ;;  %v1517_v52 = vld [vmem:[#allocation8 + $0x15d0] sm:$0xff] }
 0x47a   :  { %v11645_v2 = vcombine.low %v1517_v52, %v1521_v53 }
 0x47b   :  { %7869 = vmatpush1.bf16.msra.mxu0 %v11597_v63  ;;  %v11399_v63 = vcombine.low %v1270_v3, %v1274_v58  ;;  %v11431_v3 = vcombine.low %v1302_v43, %v1306_v48 }
 0x47c   :  { %8119 = vmatpush1.bf16.msra.mxu1 %v11359_v25  ;;  %7870 = vmatprep.subr.bf16.mxu0 %v11606_v20  ;;  %v11646_v25 = vcombine.high %v1517_v52, %v1521_v53  ;;  %v11408_v20 = vcombine.high %v1278_v15, %v1282_v11  ;;  %v1322_v52 = vld [vmem:[#allocation8 + $0xfb8] sm:$0xff] }
 0x47d   :  { %8120 = vmatprep.subr.bf16.mxu1 %v11368_v21  ;;  %v1525_v21 = vld [vmem:[#allocation8 + $0x1610] sm:$0xff] }
 0x47e   :  { %v11653_v62 = vcombine.low %v1525_v21, %v1529_v24 }
 0x47f   :  { %7871 = vmatpush1.bf16.msra.mxu0 %v11605_v29  ;;  %v11407_v29 = vcombine.low %v1278_v15, %v1282_v11 }
 0x480   :  { %8121 = vmatpush1.bf16.msra.mxu1 %v11367_v32  ;;  %7872 = vmatprep.subr.bf16.mxu0 %v11614_v36  ;;  %v11654_v32 = vcombine.high %v1525_v21, %v1529_v24  ;;  %v11416_v36 = vcombine.high %v1286_v8, %v1290_v27  ;;  %v1330_v21 = vld [vmem:[#allocation8 + $0xff8] sm:$0xff] }
 0x481   :  { %8122 = vmatprep.subr.bf16.mxu1 %v11376_v31  ;;  %v1533_v31 = vld [vmem:[#allocation8 + $0x1650] sm:$0xff] }
 0x482   :  { %v13724_v51 = vpop.f32.mrb[12].mxu1  ;;  %v11661_v49 = vcombine.low %v1533_v31, %v1537_v60 }
 0x483   :  { %v13726_v56 = vpop.f32.mrb[13].mxu1  ;;  %7873 = vmatpush1.bf16.msra.mxu0 %v11613_v39  ;;  %v11415_v39 = vcombine.low %v1286_v8, %v1290_v27 }
 0x484   :  { %v7658_v0 = vpop.f32.mrb[14].mxu1  ;;  %8123 = vmatpush1.bf16.msra.mxu1 %v11375_v30  ;;  %7874 = vmatprep.subr.bf16.mxu0 %v11622_v41  ;;  %v11662_v30 = vcombine.high %v1533_v31, %v1537_v60  ;;  %v11424_v41 = vcombine.high %v1294_v34, %v1298_v38  ;;  %v1338_v31 = vld [vmem:[#allocation8 + $0x1038] sm:$0xff] }
 0x485   :  { %v7659_v54 = vpop.f32.mrb[15].mxu1  ;;  %8124 = vmatprep.subr.bf16.mxu1 %v11384_v33  ;;  %v1541_v33 = vld [vmem:[#allocation8 + $0x1690] sm:$0xff] }
 0x486   :  { %v11670_v0 = vcombine.high %v1541_v33, %v1545_v42  ;;  %v1553_v54 = vld [vmem:[#allocation8 + $0x16f0] sm:$0xff]  ;;  %v11669_v6 = vcombine.low %v1541_v33, %v1545_v42  ;;  %v1346_v33 = vld [vmem:[#allocation8 + $0x1078] sm:$0xff] }
 0x487   :  { %7875 = vmatpush1.bf16.msra.mxu0 %v11621_v35  ;;  %v11423_v35 = vcombine.low %v1294_v34, %v1298_v38 }
 0x488   :  { %8125 = vmatpush1.bf16.msra.mxu1 %v11383_v59  ;;  %7876 = vmatprep.subr.bf16.mxu0 %v11630_v19  ;;  %v11432_v59 = vcombine.high %v1302_v43, %v1306_v48  ;;  %v1549_v19 = vld [vmem:[#allocation8 + $0x16d0] sm:$0xff] }
 0x489   :  { %8126 = vmatprep.subr.bf16.mxu1 %v11392_v13  ;;  %v1310_v13 = vld [vmem:[#allocation8 + $0xf58] sm:$0xff]  ;;  %v11678_v58 = vcombine.high %v1549_v19, %v1553_v54  ;;  %v11677_v53 = vcombine.low %v1549_v19, %v1553_v54 }
 0x48a   :  { %v11439_v15 = vcombine.low %v1310_v13, %v1314_v61  ;;  %v1354_v19 = vld [vmem:[#allocation8 + $0x10b8] sm:$0xff] }
 0x48b   :  { %7877 = vmatpush1.bf16.msra.mxu0 %v11629_v5  ;;  %v11440_v5 = vcombine.high %v1310_v13, %v1314_v61 }
 0x48c   :  { %8127 = vmatpush1.bf16.msra.mxu1 %v11391_v7  ;;  %7878 = vmatprep.subr.bf16.mxu0 %v11638_v37  ;;  %v1557_v7 = vld [vmem:[#allocation8 + $0x1710] sm:$0xff] }
 0x48d   :  { %8128 = vmatprep.subr.bf16.mxu1 %v11400_v10  ;;  %v1561_v37 = vld [vmem:[#allocation8 + $0x1730] sm:$0xff]  ;;  %v1318_v10 = vld [vmem:[#allocation8 + $0xf98] sm:$0xff] }
 0x48e   :  { %v11686_v11 = vcombine.high %v1557_v7, %v1561_v37  ;;  %v11685_v24 = vcombine.low %v1557_v7, %v1561_v37  ;;  %v11447_v8 = vcombine.low %v1318_v10, %v1322_v52  ;;  %v1362_v7 = vld [vmem:[#allocation8 + $0x10f8] sm:$0xff] }
 0x48f   :  { %7879 = vmatpush1.bf16.msra.mxu0 %v11637_v17  ;;  %v11448_v17 = vcombine.high %v1318_v10, %v1322_v52 }
 0x490   :  { %8129 = vmatpush1.bf16.msra.mxu1 %v11399_v63  ;;  %7880 = vmatprep.subr.bf16.mxu0 %v11646_v25  ;;  %v1565_v63 = vld [vmem:[#allocation8 + $0x1750] sm:$0xff] }
 0x491   :  { %8130 = vmatprep.subr.bf16.mxu1 %v11408_v20  ;;  %v1569_v25 = vld [vmem:[#allocation8 + $0x1770] sm:$0xff]  ;;  %v1326_v20 = vld [vmem:[#allocation8 + $0xfd8] sm:$0xff] }
 0x492   :  { %v11694_v27 = vcombine.high %v1565_v63, %v1569_v25  ;;  %v11693_v60 = vcombine.low %v1565_v63, %v1569_v25  ;;  %v11455_v34 = vcombine.low %v1326_v20, %v1330_v21 }
 0x493   :  { %7881 = vmatpush1.bf16.msra.mxu0 %v11645_v2  ;;  %v11456_v2 = vcombine.high %v1326_v20, %v1330_v21  ;;  %v1613_v21 = vld [vmem:[#allocation8 + $0x18d0] sm:$0xff] }
 0x494   :  { %8131 = vmatpush1.bf16.msra.mxu1 %v11407_v29  ;;  %7882 = vmatprep.subr.bf16.mxu0 %v11654_v32  ;;  %v1573_v29 = vld [vmem:[#allocation8 + $0x1790] sm:$0xff] }
 0x495   :  { %8132 = vmatprep.subr.bf16.mxu1 %v11416_v36  ;;  %v1577_v32 = vld [vmem:[#allocation8 + $0x17b0] sm:$0xff]  ;;  %v1334_v36 = vld [vmem:[#allocation8 + $0x1018] sm:$0xff] }
 0x496   :  { %v11702_v38 = vcombine.high %v1573_v29, %v1577_v32  ;;  %v11701_v42 = vcombine.low %v1573_v29, %v1577_v32  ;;  %v11463_v43 = vcombine.low %v1334_v36, %v1338_v31 }
 0x497   :  { %7883 = vmatpush1.bf16.msra.mxu0 %v11653_v62  ;;  %v11464_v62 = vcombine.high %v1334_v36, %v1338_v31  ;;  %v1621_v31 = vld [vmem:[#allocation8 + $0x1910] sm:$0xff] }
 0x498   :  { %8133 = vmatpush1.bf16.msra.mxu1 %v11415_v39  ;;  %7884 = vmatprep.subr.bf16.mxu0 %v11662_v30  ;;  %v1581_v39 = vld [vmem:[#allocation8 + $0x17d0] sm:$0xff] }
 0x499   :  { %8134 = vmatprep.subr.bf16.mxu1 %v11424_v41  ;;  %v1585_v30 = vld [vmem:[#allocation8 + $0x17f0] sm:$0xff]  ;;  %v1342_v41 = vld [vmem:[#allocation8 + $0x1058] sm:$0xff] }
 0x49a   :  { %v11710_v48 = vcombine.high %v1581_v39, %v1585_v30  ;;  %v11709_v54 = vcombine.low %v1581_v39, %v1585_v30  ;;  %v11471_v13 = vcombine.low %v1342_v41, %v1346_v33 }
 0x49b   :  { %7885 = vmatpush1.bf16.msra.mxu0 %v11661_v49  ;;  %v11472_v49 = vcombine.high %v1342_v41, %v1346_v33  ;;  %v1629_v33 = vld [vmem:[#allocation8 + $0x1950] sm:$0xff] }
 0x49c   :  { %8135 = vmatpush1.bf16.msra.mxu1 %v11423_v35  ;;  %7886 = vmatprep.subr.bf16.mxu0 %v11670_v0  ;;  %v1589_v35 = vld [vmem:[#allocation8 + $0x1810] sm:$0xff] }
 0x49d   :  { %8136 = vmatprep.subr.bf16.mxu1 %v11432_v59  ;;  %v1593_v0 = vld [vmem:[#allocation8 + $0x1830] sm:$0xff]  ;;  %v1350_v59 = vld [vmem:[#allocation8 + $0x1098] sm:$0xff] }
 0x49e   :  { %v11718_v61 = vcombine.high %v1589_v35, %v1593_v0  ;;  %v11717_v37 = vcombine.low %v1589_v35, %v1593_v0  ;;  %v11479_v10 = vcombine.low %v1350_v59, %v1354_v19 }
 0x49f   :  { %7887 = vmatpush1.bf16.msra.mxu0 %v11669_v6  ;;  %v11480_v6 = vcombine.high %v1350_v59, %v1354_v19  ;;  %v1637_v19 = vld [vmem:[#allocation8 + $0x1990] sm:$0xff] }
 0x4a0   :  { %8137 = vmatpush1.bf16.msra.mxu1 %v11431_v3  ;;  %7888 = vmatprep.subr.bf16.mxu0 %v11678_v58  ;;  %v1597_v3 = vld [vmem:[#allocation8 + $0x1850] sm:$0xff] }
 0x4a1   :  { %8138 = vmatprep.subr.bf16.mxu1 %v11440_v5  ;;  %v1601_v58 = vld [vmem:[#allocation8 + $0x1870] sm:$0xff]  ;;  %v1358_v5 = vld [vmem:[#allocation8 + $0x10d8] sm:$0xff] }
 0x4a2   :  { %v11488_v52 = vcombine.high %v1358_v5, %v1362_v7  ;;  %v11487_v63 = vcombine.low %v1358_v5, %v1362_v7  ;;  %v1645_v7 = vld [vmem:[#allocation8 + $0x19d0] sm:$0xff] }
 0x4a3   :  { %7889 = vmatpush1.bf16.msra.mxu0 %v11677_v53  ;;  %v1605_v53 = vld [vmem:[#allocation8 + $0x1890] sm:$0xff] }
 0x4a4   :  { %8139 = vmatpush1.bf16.msra.mxu1 %v11439_v15  ;;  %7890 = vmatprep.subr.bf16.mxu0 %v11686_v11  ;;  %v1609_v15 = vld [vmem:[#allocation8 + $0x18b0] sm:$0xff]  ;;  %v1370_v11 = vld [vmem:[#allocation8 + $0x1138] sm:$0xff] }
 0x4a5   :  { %8140 = vmatprep.subr.bf16.mxu1 %v11448_v17  ;;  %v11725_v17 = vcombine.low %v1597_v3, %v1601_v58  ;;  %v11734_v25 = vcombine.high %v1605_v53, %v1609_v15 }
 0x4a7   :  { %7891 = vmatpush1.bf16.msra.mxu0 %v11685_v24  ;;  %v1617_v24 = vld [vmem:[#allocation8 + $0x18f0] sm:$0xff] }
 0x4a8   :  { %8141 = vmatpush1.bf16.msra.mxu1 %v11447_v8  ;;  %7892 = vmatprep.subr.bf16.mxu0 %v11694_v27  ;;  %v1374_v8 = vld [vmem:[#allocation8 + $0x1158] sm:$0xff]  ;;  %v11742_v32 = vcombine.high %v1613_v21, %v1617_v24 }
 0x4a9   :  { %8142 = vmatprep.subr.bf16.mxu1 %v11456_v2  ;;  %v1378_v27 = vld [vmem:[#allocation8 + $0x1178] sm:$0xff]  ;;  %v11733_v2 = vcombine.low %v1605_v53, %v1609_v15 }
 0x4aa   :  { %v11504_v36 = vcombine.high %v1374_v8, %v1378_v27  ;;  %v11503_v39 = vcombine.low %v1374_v8, %v1378_v27  ;;  %v1661_v27 = vld [vmem:[#allocation8 + $0x1a50] sm:$0xff] }
 0x4ab   :  { %7893 = vmatpush1.bf16.msra.mxu0 %v11693_v60  ;;  %v1625_v60 = vld [vmem:[#allocation8 + $0x1930] sm:$0xff] }
 0x4ac   :  { %8143 = vmatpush1.bf16.msra.mxu1 %v11455_v34  ;;  %7894 = vmatprep.subr.bf16.mxu0 %v11702_v38  ;;  %v1382_v34 = vld [vmem:[#allocation8 + $0x1198] sm:$0xff]  ;;  %v11750_v30 = vcombine.high %v1621_v31, %v1625_v60 }
 0x4ad   :  { %8153 = vmatprep.subr.bf16.mxu1 %v11464_v62  ;;  %v1386_v38 = vld [vmem:[#allocation8 + $0x11b8] sm:$0xff]  ;;  %v11741_v62 = vcombine.low %v1613_v21, %v1617_v24 }
 0x4ae   :  { %v11512_v41 = vcombine.high %v1382_v34, %v1386_v38  ;;  %v11511_v35 = vcombine.low %v1382_v34, %v1386_v38  ;;  %v1669_v38 = vld [vmem:[#allocation8 + $0x1a90] sm:$0xff] }
 0x4af   :  { %8145 = vmatmul.mubr.bf16.vlgmr.msra.gmra.mrb[16].mxu1 %v13633_v44  ;;  %7895 = vmatpush1.bf16.msra.mxu0 %v11701_v42  ;;  %v11726_v44 = vcombine.high %v1597_v3, %v1601_v58  ;;  %v1633_v42 = vld [vmem:[#allocation8 + $0x1970] sm:$0xff] }
 0x4b0   :  { %8154 = vmatpush1.bf16.msra.mxu1 %v11463_v43  ;;  %8185 = vmatprep.mubr.bf16.mxu1 %v13635_v57  ;;  %v1366_v57 = vld [vmem:[#allocation8 + $0x1118] sm:$0xff]  ;;  %v11758_v0 = vcombine.high %v1629_v33, %v1633_v42 }
 0x4b1   :  { %7896 = vmatprep.subr.bf16.mxu0 %v11710_v48  ;;  %8155 = vmatprep.subr.bf16.mxu1 %v11472_v49  ;;  %v11496_v20 = vcombine.high %v1366_v57, %v1370_v11  ;;  %v11495_v29 = vcombine.low %v1366_v57, %v1370_v11  ;;  %v1390_v43 = vld [vmem:[#allocation8 + $0x11d8] sm:$0xff]  ;;  %v11749_v49 = vcombine.low %v1621_v31, %v1625_v60  ;;  %v1653_v11 = vld [vmem:[#allocation8 + $0x1a10] sm:$0xff] }
 0x4b2   :  { %v1394_v48 = vld [vmem:[#allocation8 + $0x11f8] sm:$0xff] }
 0x4b3   :  { %7897 = vmatpush1.bf16.msra.mxu0 %v11709_v54  ;;  %v11520_v59 = vcombine.high %v1390_v43, %v1394_v48  ;;  %v1641_v54 = vld [vmem:[#allocation8 + $0x19b0] sm:$0xff]  ;;  %v11519_v3 = vcombine.low %v1390_v43, %v1394_v48 }
 0x4b4   :  { %8156 = vmatpush1.bf16.msra.mxu1 %v11471_v13  ;;  %7907 = vmatprep.subr.bf16.mxu0 %v11718_v61  ;;  %v1398_v13 = vld [vmem:[#allocation8 + $0x1218] sm:$0xff]  ;;  %v11766_v58 = vcombine.high %v1637_v19, %v1641_v54  ;;  %v1677_v48 = vld [vmem:[#allocation8 + $0x1ad0] sm:$0xff] }
 0x4b5   :  { %8157 = vmatprep.subr.bf16.mxu1 %v11480_v6  ;;  %v1402_v61 = vld [vmem:[#allocation8 + $0x1238] sm:$0xff]  ;;  %v11757_v6 = vcombine.low %v1629_v33, %v1633_v42 }
 0x4b6   :  { %7899 = vmatmul.mubr.bf16.vlgmr.msra.gmra.mrb[28].mxu0 %v13665_v46  ;;  %v11528_v5 = vcombine.high %v1398_v13, %v1402_v61  ;;  %v11527_v53 = vcombine.low %v1398_v13, %v1402_v61  ;;  %v1685_v61 = vld [vmem:[#allocation8 + $0x1b10] sm:$0xff] }
 0x4b7   :  { %7908 = vmatpush1.bf16.msra.mxu0 %v11717_v37  ;;  %7939 = vmatprep.mubr.bf16.mxu0 %v13667_v50  ;;  %v1649_v37 = vld [vmem:[#allocation8 + $0x19f0] sm:$0xff] }
 0x4b8   :  { %8158 = vmatpush1.bf16.msra.mxu1 %v11479_v10  ;;  %7909 = vmatprep.subr.bf16.mxu0 %v11726_v44  ;;  %v1406_v10 = vld [vmem:[#allocation8 + $0x1258] sm:$0xff]  ;;  %v11774_v15 = vcombine.high %v1645_v7, %v1649_v37 }
 0x4b9   :  { %8159 = vmatprep.subr.bf16.mxu1 %v11488_v52  ;;  %v1410_v44 = vld [vmem:[#allocation8 + $0x1278] sm:$0xff]  ;;  %v11765_v52 = vcombine.low %v1637_v19, %v1641_v54 }
 0x4ba   :  { %v11536_v57 = vcombine.high %v1406_v10, %v1410_v44  ;;  %v11535_v21 = vcombine.low %v1406_v10, %v1410_v44  ;;  %v1693_v44 = vld [vmem:[#allocation8 + $0x1b50] sm:$0xff] }
 0x4bb   :  { %7910 = vmatpush1.bf16.msra.mxu0 %v11725_v17  ;;  %v1657_v17 = vld [vmem:[#allocation8 + $0x1a30] sm:$0xff] }
 0x4bc   :  { %8160 = vmatpush1.bf16.msra.mxu1 %v11487_v63  ;;  %7911 = vmatprep.subr.bf16.mxu0 %v11734_v25  ;;  %v1414_v63 = vld [vmem:[#allocation8 + $0x1298] sm:$0xff]  ;;  %v11782_v24 = vcombine.high %v1653_v11, %v1657_v17 }
 0x4bd   :  { %8161 = vmatprep.subr.bf16.mxu1 %v11496_v20  ;;  %v1418_v25 = vld [vmem:[#allocation8 + $0x12b8] sm:$0xff]  ;;  %v11773_v20 = vcombine.low %v1645_v7, %v1649_v37 }
 0x4be   :  { %v11544_v8 = vcombine.high %v1414_v63, %v1418_v25  ;;  %v11543_v31 = vcombine.low %v1414_v63, %v1418_v25  ;;  %v1701_v25 = vld [vmem:[#allocation8 + $0x1b90] sm:$0xff] }
 0x4bf   :  { %7912 = vmatpush1.bf16.msra.mxu0 %v11733_v2  ;;  %v1665_v2 = vld [vmem:[#allocation8 + $0x1a70] sm:$0xff] }
 0x4c0   :  { %8162 = vmatpush1.bf16.msra.mxu1 %v11495_v29  ;;  %7913 = vmatprep.subr.bf16.mxu0 %v11742_v32  ;;  %v1422_v29 = vld [vmem:[#allocation8 + $0x12d8] sm:$0xff]  ;;  %v11790_v60 = vcombine.high %v1661_v27, %v1665_v2 }
 0x4c1   :  { %8163 = vmatprep.subr.bf16.mxu1 %v11504_v36  ;;  %v1426_v32 = vld [vmem:[#allocation8 + $0x12f8] sm:$0xff]  ;;  %v11781_v36 = vcombine.low %v1653_v11, %v1657_v17 }
 0x4c2   :  { %v11552_v34 = vcombine.high %v1422_v29, %v1426_v32  ;;  %v11551_v33 = vcombine.low %v1422_v29, %v1426_v32  ;;  %v1709_v32 = vld [vmem:[#allocation8 + $0x1bd0] sm:$0xff] }
 0x4c3   :  { %7914 = vmatpush1.bf16.msra.mxu0 %v11741_v62  ;;  %v1673_v62 = vld [vmem:[#allocation8 + $0x1ab0] sm:$0xff] }
 0x4c4   :  { %8164 = vmatpush1.bf16.msra.mxu1 %v11503_v39  ;;  %7915 = vmatprep.subr.bf16.mxu0 %v11750_v30  ;;  %v1430_v39 = vld [vmem:[#allocation8 + $0x1318] sm:$0xff]  ;;  %v11798_v42 = vcombine.high %v1669_v38, %v1673_v62 }
 0x4c5   :  { %8165 = vmatprep.subr.bf16.mxu1 %v11512_v41  ;;  %v1434_v30 = vld [vmem:[#allocation8 + $0x1338] sm:$0xff]  ;;  %v11789_v41 = vcombine.low %v1661_v27, %v1665_v2 }
 0x4c6   :  { %v11560_v43 = vcombine.high %v1430_v39, %v1434_v30  ;;  %v11559_v19 = vcombine.low %v1430_v39, %v1434_v30  ;;  %v1717_v30 = vld [vmem:[#allocation8 + $0x1c10] sm:$0xff] }
 0x4c7   :  { %7916 = vmatpush1.bf16.msra.mxu0 %v11749_v49  ;;  %v1681_v49 = vld [vmem:[#allocation8 + $0x1af0] sm:$0xff] }
 0x4c8   :  { %8166 = vmatpush1.bf16.msra.mxu1 %v11511_v35  ;;  %7917 = vmatprep.subr.bf16.mxu0 %v11758_v0  ;;  %v1438_v35 = vld [vmem:[#allocation8 + $0x1358] sm:$0xff]  ;;  %v11806_v54 = vcombine.high %v1677_v48, %v1681_v49 }
 0x4c9   :  { %8167 = vmatprep.subr.bf16.mxu1 %v11520_v59  ;;  %v1442_v0 = vld [vmem:[#allocation8 + $0x1378] sm:$0xff]  ;;  %v11797_v59 = vcombine.low %v1669_v38, %v1673_v62 }
 0x4ca   :  { %v11568_v13 = vcombine.high %v1438_v35, %v1442_v0  ;;  %v11567_v7 = vcombine.low %v1438_v35, %v1442_v0  ;;  %v1725_v0 = vld [vmem:[#allocation8 + $0x1c50] sm:$0xff] }
 0x4cb   :  { %7918 = vmatpush1.bf16.msra.mxu0 %v11757_v6  ;;  %v1689_v6 = vld [vmem:[#allocation8 + $0x1b30] sm:$0xff] }
 0x4cc   :  { %8168 = vmatpush1.bf16.msra.mxu1 %v11519_v3  ;;  %7919 = vmatprep.subr.bf16.mxu0 %v11766_v58  ;;  %v1446_v3 = vld [vmem:[#allocation8 + $0x1398] sm:$0xff]  ;;  %v11814_v37 = vcombine.high %v1685_v61, %v1689_v6 }
 0x4cd   :  { %8169 = vmatprep.subr.bf16.mxu1 %v11528_v5  ;;  %v1450_v58 = vld [vmem:[#allocation8 + $0x13b8] sm:$0xff]  ;;  %v11805_v5 = vcombine.low %v1677_v48, %v1681_v49 }
 0x4ce   :  { %v11576_v10 = vcombine.high %v1446_v3, %v1450_v58  ;;  %v11575_v11 = vcombine.low %v1446_v3, %v1450_v58  ;;  %v1733_v3 = vld [vmem:[#allocation8 + $0x1c90] sm:$0xff] }
 0x4cf   :  { %7920 = vmatpush1.bf16.msra.mxu0 %v11765_v52  ;;  %v1697_v52 = vld [vmem:[#allocation8 + $0x1b70] sm:$0xff] }
 0x4d0   :  { %8170 = vmatpush1.bf16.msra.mxu1 %v11527_v53  ;;  %7921 = vmatprep.subr.bf16.mxu0 %v11774_v15  ;;  %v1454_v53 = vld [vmem:[#allocation8 + $0x13d8] sm:$0xff]  ;;  %v11822_v17 = vcombine.high %v1693_v44, %v1697_v52  ;;  %v1737_v58 = vld [vmem:[#allocation8 + $0x1cb0] sm:$0xff] }
 0x4d1   :  { %8171 = vmatprep.subr.bf16.mxu1 %v11536_v57  ;;  %v1458_v15 = vld [vmem:[#allocation8 + $0x13f8] sm:$0xff]  ;;  %v11813_v57 = vcombine.low %v1685_v61, %v1689_v6 }
 0x4d2   :  { %v11584_v63 = vcombine.high %v1454_v53, %v1458_v15  ;;  %v11583_v27 = vcombine.low %v1454_v53, %v1458_v15  ;;  %v1745_v53 = vld [vmem:[#allocation8 + $0x1cf0] sm:$0xff]  ;;  %v1502_v15 = vld [vmem:[#allocation8 + $0x1558] sm:$0xff] }
 0x4d3   :  { %7922 = vmatpush1.bf16.msra.mxu0 %v11773_v20  ;;  %v1705_v20 = vld [vmem:[#allocation8 + $0x1bb0] sm:$0xff] }
 0x4d4   :  { %8172 = vmatpush1.bf16.msra.mxu1 %v11535_v21  ;;  %7923 = vmatprep.subr.bf16.mxu0 %v11782_v24  ;;  %v1462_v21 = vld [vmem:[#allocation8 + $0x1418] sm:$0xff]  ;;  %v11830_v2 = vcombine.high %v1701_v25, %v1705_v20 }
 0x4d5   :  { %8173 = vmatprep.subr.bf16.mxu1 %v11544_v8  ;;  %v1466_v24 = vld [vmem:[#allocation8 + $0x1438] sm:$0xff]  ;;  %v11821_v8 = vcombine.low %v1693_v44, %v1697_v52  ;;  %v1741_v52 = vld [vmem:[#allocation8 + $0x1cd0] sm:$0xff] }
 0x4d6   :  { %v11592_v29 = vcombine.high %v1462_v21, %v1466_v24  ;;  %v11591_v38 = vcombine.low %v1462_v21, %v1466_v24  ;;  %v1753_v21 = vld [vmem:[#allocation8 + $0x1d30] sm:$0xff]  ;;  %v1510_v24 = vld [vmem:[#allocation8 + $0x1598] sm:$0xff] }
 0x4d7   :  { %7924 = vmatpush1.bf16.msra.mxu0 %v11781_v36  ;;  %v1713_v36 = vld [vmem:[#allocation8 + $0x1bf0] sm:$0xff] }
 0x4d8   :  { %8174 = vmatpush1.bf16.msra.mxu1 %v11543_v31  ;;  %7925 = vmatprep.subr.bf16.mxu0 %v11790_v60  ;;  %v1470_v31 = vld [vmem:[#allocation8 + $0x1458] sm:$0xff]  ;;  %v11838_v62 = vcombine.high %v1709_v32, %v1713_v36 }
 0x4d9   :  { %8175 = vmatprep.subr.bf16.mxu1 %v11552_v34  ;;  %v1474_v60 = vld [vmem:[#allocation8 + $0x1478] sm:$0xff]  ;;  %v11829_v34 = vcombine.low %v1701_v25, %v1705_v20  ;;  %v1749_v20 = vld [vmem:[#allocation8 + $0x1d10] sm:$0xff] }
 0x4da   :  { %v11600_v39 = vcombine.high %v1470_v31, %v1474_v60  ;;  %v11599_v48 = vcombine.low %v1470_v31, %v1474_v60  ;;  %v1761_v31 = vld [vmem:[#allocation8 + $0x1d70] sm:$0xff]  ;;  %v1518_v60 = vld [vmem:[#allocation8 + $0x15d8] sm:$0xff] }
 0x4db   :  { %7926 = vmatpush1.bf16.msra.mxu0 %v11789_v41  ;;  %v1721_v41 = vld [vmem:[#allocation8 + $0x1c30] sm:$0xff] }
 0x4dc   :  { %8176 = vmatpush1.bf16.msra.mxu1 %v11551_v33  ;;  %7927 = vmatprep.subr.bf16.mxu0 %v11798_v42  ;;  %v1478_v33 = vld [vmem:[#allocation8 + $0x1498] sm:$0xff]  ;;  %v11846_v49 = vcombine.high %v1717_v30, %v1721_v41 }
 0x4dd   :  { %8177 = vmatprep.subr.bf16.mxu1 %v11560_v43  ;;  %v1482_v42 = vld [vmem:[#allocation8 + $0x14b8] sm:$0xff]  ;;  %v11837_v43 = vcombine.low %v1709_v32, %v1713_v36  ;;  %v1757_v36 = vld [vmem:[#allocation8 + $0x1d50] sm:$0xff] }
 0x4de   :  { %v11608_v35 = vcombine.high %v1478_v33, %v1482_v42  ;;  %v11607_v61 = vcombine.low %v1478_v33, %v1482_v42  ;;  %v1769_v33 = vld [vmem:[#allocation8 + $0x1db0] sm:$0xff]  ;;  %v1526_v42 = vld [vmem:[#allocation8 + $0x1618] sm:$0xff] }
 0x4df   :  { %7928 = vmatpush1.bf16.msra.mxu0 %v11797_v59  ;;  %v1729_v59 = vld [vmem:[#allocation8 + $0x1c70] sm:$0xff] }
 0x4e0   :  { %8178 = vmatpush1.bf16.msra.mxu1 %v11559_v19  ;;  %7929 = vmatprep.subr.bf16.mxu0 %v11806_v54  ;;  %v1486_v19 = vld [vmem:[#allocation8 + $0x14d8] sm:$0xff] }
 0x4e1   :  { %8179 = vmatprep.subr.bf16.mxu1 %v11568_v13  ;;  %v1490_v54 = vld [vmem:[#allocation8 + $0x14f8] sm:$0xff]  ;;  %v11845_v13 = vcombine.low %v1717_v30, %v1721_v41  ;;  %v1765_v41 = vld [vmem:[#allocation8 + $0x1d90] sm:$0xff] }
 0x4e2   :  { %v11616_v6 = vcombine.high %v1486_v19, %v1490_v54 }
 0x4e3   :  { %7930 = vmatpush1.bf16.msra.mxu0 %v11805_v5  ;;  %v1498_v5 = vld [vmem:[#allocation8 + $0x1538] sm:$0xff] }
 0x4e4   :  { %8180 = vmatpush1.bf16.msra.mxu1 %v11567_v7  ;;  %7931 = vmatprep.subr.bf16.mxu0 %v11814_v37  ;;  %v11853_v7 = vcombine.low %v1725_v0, %v1729_v59  ;;  %v11615_v37 = vcombine.low %v1486_v19, %v1490_v54  ;;  %v1777_v19 = vld [vmem:[#allocation8 + $0x1df0] sm:$0xff]  ;;  %v1534_v54 = vld [vmem:[#allocation8 + $0x1658] sm:$0xff] }
 0x4e5   :  { %8181 = vmatprep.subr.bf16.mxu1 %v11576_v10  ;;  %v11862_v10 = vcombine.high %v1733_v3, %v1737_v58 }
 0x4e7   :  { %7932 = vmatpush1.bf16.msra.mxu0 %v11813_v57  ;;  %v1506_v57 = vld [vmem:[#allocation8 + $0x1578] sm:$0xff] }
 0x4e8   :  { %8182 = vmatpush1.bf16.msra.mxu1 %v11575_v11  ;;  %7933 = vmatprep.subr.bf16.mxu0 %v11822_v17  ;;  %v11861_v11 = vcombine.low %v1733_v3, %v1737_v58  ;;  %v11632_v25 = vcombine.high %v1502_v15, %v1506_v57  ;;  %v1781_v58 = vld [vmem:[#allocation8 + $0x1e10] sm:$0xff] }
 0x4e9   :  { %8183 = vmatprep.subr.bf16.mxu1 %v11584_v63  ;;  %v11870_v63 = vcombine.high %v1741_v52, %v1745_v53 }
 0x4eb   :  { %7934 = vmatpush1.bf16.msra.mxu0 %v11821_v8  ;;  %v1514_v8 = vld [vmem:[#allocation8 + $0x15b8] sm:$0xff] }
 0x4ec   :  { %8184 = vmatpush1.bf16.msra.mxu1 %v11583_v27  ;;  %7935 = vmatprep.subr.bf16.mxu0 %v11830_v2  ;;  %v11869_v27 = vcombine.low %v1741_v52, %v1745_v53  ;;  %v11631_v2 = vcombine.low %v1502_v15, %v1506_v57  ;;  %v11640_v32 = vcombine.high %v1510_v24, %v1514_v8  ;;  %v1789_v53 = vld [vmem:[#allocation8 + $0x1e50] sm:$0xff]  ;;  %v1550_v57 = vld [vmem:[#allocation8 + $0x16d8] sm:$0xff] }
 0x4ed   :  { %8194 = vmatprep.subr.bf16.mxu1 %v11592_v29  ;;  %v11878_v29 = vcombine.high %v1749_v20, %v1753_v21  ;;  %v1793_v15 = vld [vmem:[#allocation8 + $0x1e70] sm:$0xff] }
 0x4ef   :  { %8186 = vmatmul.mubr.bf16.vlgmr.msra.gmra.mrb[16].mxu1 %v13647_v1  ;;  %7936 = vmatpush1.bf16.msra.mxu0 %v11829_v34  ;;  %v11854_v1 = vcombine.high %v1725_v0, %v1729_v59  ;;  %v1522_v34 = vld [vmem:[#allocation8 + $0x15f8] sm:$0xff]  ;;  %v1773_v59 = vld [vmem:[#allocation8 + $0x1dd0] sm:$0xff] }
 0x4f0   :  { %8195 = vmatpush1.bf16.msra.mxu1 %v11591_v38  ;;  %8226 = vmatprep.mubr.bf16.mxu1 %v13649_v12  ;;  %v1494_v12 = vld [vmem:[#allocation8 + $0x1518] sm:$0xff]  ;;  %v11877_v38 = vcombine.low %v1749_v20, %v1753_v21  ;;  %v11648_v30 = vcombine.high %v1518_v60, %v1522_v34  ;;  %v1797_v21 = vld [vmem:[#allocation8 + $0x1e90] sm:$0xff] }
 0x4f1   :  { %7937 = vmatprep.subr.bf16.mxu0 %v11838_v62  ;;  %8196 = vmatprep.subr.bf16.mxu1 %v11600_v39  ;;  %v11624_v44 = vcombine.high %v1494_v12, %v1498_v5  ;;  %v11623_v17 = vcombine.low %v1494_v12, %v1498_v5  ;;  %v11639_v62 = vcombine.low %v1510_v24, %v1514_v8  ;;  %v1785_v12 = vld [vmem:[#allocation8 + $0x1e30] sm:$0xff]  ;;  %v1542_v5 = vld [vmem:[#allocation8 + $0x1698] sm:$0xff] }
 0x4f2   :  { %v11886_v39 = vcombine.high %v1757_v36, %v1761_v31  ;;  %v1801_v24 = vld [vmem:[#allocation8 + $0x1eb0] sm:$0xff]  ;;  %v1558_v8 = vld [vmem:[#allocation8 + $0x1718] sm:$0xff] }
 0x4f3   :  { %7938 = vmatpush1.bf16.msra.mxu0 %v11837_v43  ;;  %v1530_v43 = vld [vmem:[#allocation8 + $0x1638] sm:$0xff] }
 0x4f4   :  { %8197 = vmatpush1.bf16.msra.mxu1 %v11599_v48  ;;  %7948 = vmatprep.subr.bf16.mxu0 %v11846_v49  ;;  %v11885_v48 = vcombine.low %v1757_v36, %v1761_v31  ;;  %v11647_v49 = vcombine.low %v1518_v60, %v1522_v34  ;;  %v11656_v0 = vcombine.high %v1526_v42, %v1530_v43  ;;  %v1805_v31 = vld [vmem:[#allocation8 + $0x1ed0] sm:$0xff]  ;;  %v1566_v34 = vld [vmem:[#allocation8 + $0x1758] sm:$0xff] }
 0x4f5   :  { %8198 = vmatprep.subr.bf16.mxu1 %v11608_v35  ;;  %v11894_v35 = vcombine.high %v1765_v41, %v1769_v33  ;;  %v1809_v60 = vld [vmem:[#allocation8 + $0x1ef0] sm:$0xff] }
 0x4f6   :  { %7940 = vmatmul.mubr.bf16.vlgmr.msra.gmra.mrb[28].mxu0 %v13681_v22 }
 0x4f7   :  { %7949 = vmatpush1.bf16.msra.mxu0 %v11845_v13  ;;  %7980 = vmatprep.mubr.bf16.mxu0 %v13683_v9  ;;  %v1538_v13 = vld [vmem:[#allocation8 + $0x1678] sm:$0xff] }
 0x4f8   :  { %8199 = vmatpush1.bf16.msra.mxu1 %v11607_v61  ;;  %7950 = vmatprep.subr.bf16.mxu0 %v11854_v1  ;;  %v11893_v61 = vcombine.low %v1765_v41, %v1769_v33  ;;  %v11655_v1 = vcombine.low %v1526_v42, %v1530_v43  ;;  %v11664_v3 = vcombine.high %v1534_v54, %v1538_v13  ;;  %v1813_v33 = vld [vmem:[#allocation8 + $0x1f10] sm:$0xff]  ;;  %v1574_v43 = vld [vmem:[#allocation8 + $0x1798] sm:$0xff] }
 0x4f9   :  { %8200 = vmatprep.subr.bf16.mxu1 %v11616_v6  ;;  %v11902_v6 = vcombine.high %v1773_v59, %v1777_v19  ;;  %v1817_v42 = vld [vmem:[#allocation8 + $0x1f30] sm:$0xff] }
 0x4fb   :  { %7951 = vmatpush1.bf16.msra.mxu0 %v11853_v7  ;;  %v1546_v7 = vld [vmem:[#allocation8 + $0x16b8] sm:$0xff] }
 0x4fc   :  { %8201 = vmatpush1.bf16.msra.mxu1 %v11615_v37  ;;  %7952 = vmatprep.subr.bf16.mxu0 %v11862_v10  ;;  %v11901_v37 = vcombine.low %v1773_v59, %v1777_v19  ;;  %v11663_v10 = vcombine.low %v1534_v54, %v1538_v13  ;;  %v11672_v52 = vcombine.high %v1542_v5, %v1546_v7  ;;  %v1821_v19 = vld [vmem:[#allocation8 + $0x1f50] sm:$0xff]  ;;  %v1582_v13 = vld [vmem:[#allocation8 + $0x17d8] sm:$0xff] }
 0x4fd   :  { %8202 = vmatprep.subr.bf16.mxu1 %v11624_v44  ;;  %v11910_v44 = vcombine.high %v1781_v58, %v1785_v12  ;;  %v1825_v54 = vld [vmem:[#allocation8 + $0x1f70] sm:$0xff] }
 0x4ff   :  { %7953 = vmatpush1.bf16.msra.mxu0 %v11861_v11  ;;  %v1554_v11 = vld [vmem:[#allocation8 + $0x16f8] sm:$0xff] }
 0x500   :  { %8203 = vmatpush1.bf16.msra.mxu1 %v11623_v17  ;;  %7954 = vmatprep.subr.bf16.mxu0 %v11870_v63  ;;  %v11909_v17 = vcombine.low %v1781_v58, %v1785_v12  ;;  %v11671_v63 = vcombine.low %v1542_v5, %v1546_v7  ;;  %v11680_v20 = vcombine.high %v1550_v57, %v1554_v11  ;;  %v1829_v12 = vld [vmem:[#allocation8 + $0x1f90] sm:$0xff]  ;;  %v1590_v7 = vld [vmem:[#allocation8 + $0x1818] sm:$0xff] }
 0x501   :  { %8204 = vmatprep.subr.bf16.mxu1 %v11632_v25  ;;  %v11918_v25 = vcombine.high %v1789_v53, %v1793_v15  ;;  %v1833_v5 = vld [vmem:[#allocation8 + $0x1fb0] sm:$0xff] }
 0x503   :  { %7955 = vmatpush1.bf16.msra.mxu0 %v11869_v27  ;;  %v1562_v27 = vld [vmem:[#allocation8 + $0x1738] sm:$0xff] }
 0x504   :  { %8205 = vmatpush1.bf16.msra.mxu1 %v11631_v2  ;;  %7956 = vmatprep.subr.bf16.mxu0 %v11878_v29  ;;  %v11917_v2 = vcombine.low %v1789_v53, %v1793_v15  ;;  %v11679_v29 = vcombine.low %v1550_v57, %v1554_v11  ;;  %v11688_v36 = vcombine.high %v1558_v8, %v1562_v27  ;;  %v1837_v15 = vld [vmem:[#allocation8 + $0x1fd0] sm:$0xff]  ;;  %v1598_v11 = vld [vmem:[#allocation8 + $0x1858] sm:$0xff] }
 0x505   :  { %8206 = vmatprep.subr.bf16.mxu1 %v11640_v32  ;;  %v11926_v32 = vcombine.high %v1797_v21, %v1801_v24  ;;  %v1841_v57 = vld [vmem:[#allocation8 + $0x1ff0] sm:$0xff] }
 0x507   :  { %7957 = vmatpush1.bf16.msra.mxu0 %v11877_v38  ;;  %v1570_v38 = vld [vmem:[#allocation8 + $0x1778] sm:$0xff] }
 0x508   :  { %8207 = vmatpush1.bf16.msra.mxu1 %v11639_v62  ;;  %7958 = vmatprep.subr.bf16.mxu0 %v11886_v39  ;;  %v11925_v62 = vcombine.low %v1797_v21, %v1801_v24  ;;  %v11687_v39 = vcombine.low %v1558_v8, %v1562_v27  ;;  %v11696_v41 = vcombine.high %v1566_v34, %v1570_v38  ;;  %v1606_v24 = vld [vmem:[#allocation8 + $0x1898] sm:$0xff] }
 0x509   :  { %8208 = vmatprep.subr.bf16.mxu1 %v11648_v30  ;;  %v11934_v30 = vcombine.high %v1805_v31, %v1809_v60  ;;  %v1610_v8 = vld [vmem:[#allocation8 + $0x18b8] sm:$0xff]  ;;  %v11965_v27 = vcombine.low %v1837_v15, %v1841_v57 }
 0x50b   :  { %7959 = vmatpush1.bf16.msra.mxu0 %v11885_v48  ;;  %v1578_v48 = vld [vmem:[#allocation8 + $0x17b8] sm:$0xff] }
 0x50c   :  { %8209 = vmatpush1.bf16.msra.mxu1 %v11647_v49  ;;  %7960 = vmatprep.subr.bf16.mxu0 %v11894_v35  ;;  %v11933_v49 = vcombine.low %v1805_v31, %v1809_v60  ;;  %v11695_v35 = vcombine.low %v1566_v34, %v1570_v38  ;;  %v11704_v59 = vcombine.high %v1574_v43, %v1578_v48  ;;  %v1614_v31 = vld [vmem:[#allocation8 + $0x18d8] sm:$0xff] }
 0x50d   :  { %8210 = vmatprep.subr.bf16.mxu1 %v11656_v0  ;;  %v11942_v0 = vcombine.high %v1813_v33, %v1817_v42  ;;  %v1618_v60 = vld [vmem:[#allocation8 + $0x18f8] sm:$0xff]  ;;  %v11735_v38 = vcombine.low %v1606_v24, %v1610_v8 }
 0x50e   :  { %v12502_v34 = vld [vmem:[#allocation11] ss:$16 sps:$4 sm:$0xff]  }
 0x50f   :  { %7961 = vmatpush1.bf16.msra.mxu0 %v11893_v61  ;;  %v1586_v61 = vld [vmem:[#allocation8 + $0x17f8] sm:$0xff] }
 0x510   :  { %8211 = vmatpush1.bf16.msra.mxu1 %v11655_v1  ;;  %7962 = vmatprep.subr.bf16.mxu0 %v11902_v6  ;;  %v11941_v1 = vcombine.low %v1813_v33, %v1817_v42  ;;  %v11703_v6 = vcombine.low %v1574_v43, %v1578_v48  ;;  %v11712_v58 = vcombine.high %v1582_v13, %v1586_v61  ;;  %v12510_v33 = vld [vmem:[#allocation11 + $0x44] ss:$16 sps:$4 sm:$0xff]  }
 0x511   :  { %8212 = vmatprep.subr.bf16.mxu1 %v11664_v3  ;;  %v11950_v3 = vcombine.high %v1821_v19, %v1825_v54  ;;  %v1630_v43 = vld [vmem:[#allocation8 + $0x1958] sm:$0xff] }
 0x512   :  { %v1634_v48 = vld [vmem:[#allocation8 + $0x1978] sm:$0xff] }
 0x513   :  { %7963 = vmatpush1.bf16.msra.mxu0 %v11901_v37  ;;  %v1594_v37 = vld [vmem:[#allocation8 + $0x1838] sm:$0xff] }
 0x514   :  { %8213 = vmatpush1.bf16.msra.mxu1 %v11663_v10  ;;  %7964 = vmatprep.subr.bf16.mxu0 %v11910_v44  ;;  %v11949_v10 = vcombine.low %v1821_v19, %v1825_v54  ;;  %v11711_v44 = vcombine.low %v1582_v13, %v1586_v61  ;;  %v11720_v53 = vcombine.high %v1590_v7, %v1594_v37  ;;  %v1638_v19 = vld [vmem:[#allocation8 + $0x1998] sm:$0xff] }
 0x515   :  { %8214 = vmatprep.subr.bf16.mxu1 %v11672_v52  ;;  %v11958_v52 = vcombine.high %v1829_v12, %v1833_v5  ;;  %v1642_v54 = vld [vmem:[#allocation8 + $0x19b8] sm:$0xff]  ;;  %v11759_v61 = vcombine.low %v1630_v43, %v1634_v48 }
 0x516   :  { %v12511_v13 = vld [vmem:[#allocation11 + $0x60] ss:$16 sps:$4 sm:$0xff]  }
 0x517   :  { %7965 = vmatpush1.bf16.msra.mxu0 %v11909_v17  ;;  %v1602_v17 = vld [vmem:[#allocation8 + $0x1878] sm:$0xff] }
 0x518   :  { %8215 = vmatpush1.bf16.msra.mxu1 %v11671_v63  ;;  %7966 = vmatprep.subr.bf16.mxu0 %v11918_v25  ;;  %v11957_v63 = vcombine.low %v1829_v12, %v1833_v5  ;;  %v11719_v25 = vcombine.low %v1590_v7, %v1594_v37  ;;  %v11728_v21 = vcombine.high %v1598_v11, %v1602_v17  ;;  %v12514_v12 = vld [vmem:[#allocation11 + $0x80] ss:$16 sps:$4 sm:$0xff]   ;;  %v12519_v7 = vld [vmem:[#allocation11 + $0xa4] ss:$16 sps:$4 sm:$0xff]  }
 0x519   :  { %8216 = vmatprep.subr.bf16.mxu1 %v11680_v20  ;;  %v11966_v20 = vcombine.high %v1837_v15, %v1841_v57  ;;  %v11767_v5 = vcombine.low %v1638_v19, %v1642_v54  ;;  %v12522_v15 = vld [vmem:[#allocation11 + $0xc4] ss:$16 sps:$4 sm:$0xff]  }
 0x51b   :  { %7967 = vmatpush1.bf16.msra.mxu0 %v11917_v2  ;;  %v11727_v2 = vcombine.low %v1598_v11, %v1602_v17  ;;  %v1662_v11 = vld [vmem:[#allocation8 + $0x1a58] sm:$0xff] }
 0x51c   :  { %8217 = vmatpush1.bf16.msra.mxu1 %v11679_v29  ;;  %7968 = vmatprep.subr.bf16.mxu0 %v11926_v32  ;;  %v12504_v29 = vld [vmem:[#allocation11 + $0x4] ss:$16 sps:$4 sm:$0xff]   ;;  %v8318_v32 = vmax.f32 %v13714_v40, 0.0  ;;  %v12505_v40 = vld [vmem:[#allocation11 + $0x20] ss:$16 sps:$4 sm:$0xff]  }
 0x51d   :  { %8218 = vmatprep.subr.bf16.mxu1 %v11688_v36  ;;  %v11736_v36 = vcombine.high %v1606_v24, %v1610_v8  ;;  %v1666_v17 = vld [vmem:[#allocation8 + $0x1a78] sm:$0xff] }
 0x51e   :  { %v1670_v24 = vld [vmem:[#allocation8 + $0x1a98] sm:$0xff] }
 0x51f   :  { %7969 = vmatpush1.bf16.msra.mxu0 %v11925_v62  ;;  %v13739_v62 = vpack.c.bf16 %v8318_v32, %v8318_v32  ;;  %v1674_v8 = vld [vmem:[#allocation8 + $0x1ab8] sm:$0xff] }
 0x520   :  { %8219 = vmatpush1.bf16.msra.mxu1 %v11687_v39  ;;  %7970 = vmatprep.subr.bf16.mxu0 %v11934_v30  ;;  %v11744_v39 = vcombine.high %v1614_v31, %v1618_v60  ;;  %v1626_v30 = vld [vmem:[#allocation8 + $0x1938] sm:$0xff]  ;;  %v11800_v32 = vcombine.high %v1670_v24, %v1674_v8 }
 0x521   :  { %8220 = vmatprep.subr.bf16.mxu1 %v11696_v41  ;;  %v11743_v41 = vcombine.low %v1614_v31, %v1618_v60  ;;  %v1682_v31 = vld [vmem:[#allocation8 + $0x1af8] sm:$0xff] }
 0x522   :  { %v12526_v60 = vld [vmem:[#allocation11 + $0x100] ss:$16 sps:$4 sm:$0xff]  }
 0x523   :  { %7971 = vmatpush1.bf16.msra.mxu0 %v11933_v49  ;;  %v12508_v49 = vld [vmem:[#allocation11 + $0x40] ss:$16 sps:$4 sm:$0xff]  }
 0x524   :  { %8221 = vmatpush1.bf16.msra.mxu1 %v11695_v35  ;;  %7972 = vmatprep.subr.bf16.mxu0 %v11942_v0  ;;  %v12513_v0 = vld [vmem:[#allocation11 + $0x64] ss:$16 sps:$4 sm:$0xff]  }
 0x525   :  { %8222 = vmatprep.subr.bf16.mxu1 %v11704_v59  ;;  %v11760_v59 = vcombine.high %v1630_v43, %v1634_v48  ;;  %v1698_v43 = vld [vmem:[#allocation8 + $0x1b78] sm:$0xff] }
 0x526   :  { %v12532_v48 = vld [vmem:[#allocation11 + $0x140] ss:$16 sps:$4 sm:$0xff]  }
 0x527   :  { %7973 = vmatpush1.bf16.msra.mxu0 %v11941_v1  ;;  %v12516_v1 = vld [vmem:[#allocation11 + $0x84] ss:$16 sps:$4 sm:$0xff]  }
 0x528   :  { %8223 = vmatpush1.bf16.msra.mxu1 %v11703_v6  ;;  %7974 = vmatprep.subr.bf16.mxu0 %v11950_v3  ;;  %v11768_v6 = vcombine.high %v1638_v19, %v1642_v54  ;;  %v1646_v3 = vld [vmem:[#allocation8 + $0x19d8] sm:$0xff] }
 0x529   :  { %8224 = vmatprep.subr.bf16.mxu1 %v11712_v58  ;;  %v1650_v58 = vld [vmem:[#allocation8 + $0x19f8] sm:$0xff] }
 0x52a   :  { %v11776_v37 = vcombine.high %v1646_v3, %v1650_v58  ;;  %v1706_v19 = vld [vmem:[#allocation8 + $0x1bb8] sm:$0xff] }
 0x52b   :  { %7975 = vmatpush1.bf16.msra.mxu0 %v11949_v10  ;;  %v1654_v10 = vld [vmem:[#allocation8 + $0x1a18] sm:$0xff] }
 0x52c   :  { %8225 = vmatpush1.bf16.msra.mxu1 %v11711_v44  ;;  %7976 = vmatprep.subr.bf16.mxu0 %v11958_v52  ;;  %v1658_v44 = vld [vmem:[#allocation8 + $0x1a38] sm:$0xff] }
 0x52d   :  { %8235 = vmatprep.subr.bf16.mxu1 %v11720_v53  ;;  %v12517_v52 = vld [vmem:[#allocation11 + $0xa0] ss:$16 sps:$4 sm:$0xff]   ;;  %v11775_v53 = vcombine.low %v1646_v3, %v1650_v58  ;;  %v11784_v57 = vcombine.high %v1654_v10, %v1658_v44 }
 0x52e   :  { %v12535_v54 = vld [vmem:[#allocation11 + $0x160] ss:$16 sps:$4 sm:$0xff]  }
 0x52f   :  { %8227 = vmatmul.mubr.bf16.vlgmr.msra.gmra.mrb[16].mxu1 %v13665_v46  ;;  %7977 = vmatpush1.bf16.msra.mxu0 %v11957_v63  ;;  %v12507_v46 = vld [vmem:[#allocation11 + $0x24] ss:$16 sps:$4 sm:$0xff]   ;;  %v12520_v63 = vld [vmem:[#allocation11 + $0xc0] ss:$16 sps:$4 sm:$0xff]  }
 0x530   :  { %8236 = vmatpush1.bf16.msra.mxu1 %v11719_v25  ;;  %8267 = vmatprep.mubr.bf16.mxu1 %v13667_v50  ;;  %v1622_v50 = vld [vmem:[#allocation8 + $0x1918] sm:$0xff]  ;;  %v11783_v25 = vcombine.low %v1654_v10, %v1658_v44 }
 0x531   :  { %7978 = vmatprep.subr.bf16.mxu0 %v11966_v20  ;;  %8237 = vmatprep.subr.bf16.mxu1 %v11728_v21  ;;  %v11752_v42 = vcombine.high %v1622_v50, %v1626_v30  ;;  %v11751_v35 = vcombine.low %v1622_v50, %v1626_v30  ;;  %v12525_v20 = vld [vmem:[#allocation11 + $0xe4] ss:$16 sps:$4 sm:$0xff]   ;;  %v11792_v21 = vcombine.high %v1662_v11, %v1666_v17  ;;  %v12529_v30 = vld [vmem:[#allocation11 + $0x120] ss:$16 sps:$4 sm:$0xff]  }
 0x532   :  { %v1690_v50 = vld [vmem:[#allocation8 + $0x1b38] sm:$0xff] }
 0x533   :  { %7979 = vmatpush1.bf16.msra.mxu0 %v11965_v27  ;;  %v12523_v27 = vld [vmem:[#allocation11 + $0xe0] ss:$16 sps:$4 sm:$0xff]  }
 0x534   :  { %8238 = vmatpush1.bf16.msra.mxu1 %v11727_v2  ;;  %9891 = vmatprep.subr.bf16.mxu0 %v12504_v29  ;;  %v11791_v2 = vcombine.low %v1662_v11, %v1666_v17  ;;  %v12528_v29 = vld [vmem:[#allocation11 + $0x104] ss:$16 sps:$4 sm:$0xff]   ;;  %v12538_v58 = vld [vmem:[#allocation11 + $0x180] ss:$16 sps:$4 sm:$0xff]  }
 0x535   :  { %8239 = vmatprep.subr.bf16.mxu1 %v11736_v36  ;;  %v1678_v36 = vld [vmem:[#allocation8 + $0x1ad8] sm:$0xff] }
 0x536   :  { %7981 = vmatmul.mubr.bf16.vlgmr.msra.gmra.mrb[28].mxu0 %v13692_v55  ;;  %v1714_v3 = vld [vmem:[#allocation8 + $0x1bf8] sm:$0xff] }
 0x537   :  { %9892 = vmatpush1.bf16.msra.mxu0 %v12502_v34  ;;  %9923 = vmatprep.mubr.bf16.mxu0 %v13739_v62  ;;  %v11799_v34 = vcombine.low %v1670_v24, %v1674_v8  ;;  %v1722_v10 = vld [vmem:[#allocation8 + $0x1c38] sm:$0xff] }
 0x538   :  { %8240 = vmatpush1.bf16.msra.mxu1 %v11735_v38  ;;  %9893 = vmatprep.subr.bf16.mxu0 %v12507_v46  ;;  %v12531_v38 = vld [vmem:[#allocation11 + $0x124] ss:$16 sps:$4 sm:$0xff]   ;;  %v11808_v46 = vcombine.high %v1678_v36, %v1682_v31  ;;  %v12541_v44 = vld [vmem:[#allocation11 + $0x1a0] ss:$16 sps:$4 sm:$0xff]  }
 0x539   :  { %8241 = vmatprep.subr.bf16.mxu1 %v11744_v39  ;;  %v1686_v39 = vld [vmem:[#allocation8 + $0x1b18] sm:$0xff] }
 0x53a   :  { %v1726_v17 = vld [vmem:[#allocation8 + $0x1c58] sm:$0xff] }
 0x53b   :  { %9894 = vmatpush1.bf16.msra.mxu0 %v12505_v40  ;;  %v11807_v40 = vcombine.low %v1678_v36, %v1682_v31  ;;  %v12549_v8 = vld [vmem:[#allocation11 + $0x1e4] ss:$16 sps:$4 sm:$0xff]  }
 0x53c   :  { %8242 = vmatpush1.bf16.msra.mxu1 %v11743_v41  ;;  %9895 = vmatprep.subr.bf16.mxu0 %v12510_v33  ;;  %v12534_v41 = vld [vmem:[#allocation11 + $0x144] ss:$16 sps:$4 sm:$0xff]   ;;  %v11816_v33 = vcombine.high %v1686_v39, %v1690_v50 }
 0x53d   :  { %8243 = vmatprep.subr.bf16.mxu1 %v11752_v42  ;;  %v1694_v42 = vld [vmem:[#allocation8 + $0x1b58] sm:$0xff] }
 0x53e   :  { %v12552_v31 = vld [vmem:[#allocation11 + $0x204] ss:$16 sps:$4 sm:$0xff]  }
 0x53f   :  { %9896 = vmatpush1.bf16.msra.mxu0 %v12508_v49  ;;  %v11815_v49 = vcombine.low %v1686_v39, %v1690_v50  ;;  %v12555_v50 = vld [vmem:[#allocation11 + $0x224] ss:$16 sps:$4 sm:$0xff]  }
 0x540   :  { %8244 = vmatpush1.bf16.msra.mxu1 %v11751_v35  ;;  %9897 = vmatprep.subr.bf16.mxu0 %v12513_v0  ;;  %v12537_v35 = vld [vmem:[#allocation11 + $0x164] ss:$16 sps:$4 sm:$0xff]   ;;  %v11824_v0 = vcombine.high %v1694_v42, %v1698_v43 }
 0x541   :  { %8245 = vmatprep.subr.bf16.mxu1 %v11760_v59  ;;  %v1702_v59 = vld [vmem:[#allocation8 + $0x1b98] sm:$0xff] }
 0x543   :  { %9898 = vmatpush1.bf16.msra.mxu0 %v12511_v13  ;;  %v11823_v13 = vcombine.low %v1694_v42, %v1698_v43  ;;  %v12558_v42 = vld [vmem:[#allocation11 + $0x244] ss:$16 sps:$4 sm:$0xff]  }
 0x544   :  { %8246 = vmatpush1.bf16.msra.mxu1 %v11759_v61  ;;  %9899 = vmatprep.subr.bf16.mxu0 %v12516_v1  ;;  %v12540_v61 = vld [vmem:[#allocation11 + $0x184] ss:$16 sps:$4 sm:$0xff]   ;;  %v11832_v1 = vcombine.high %v1702_v59, %v1706_v19 }
 0x545   :  { %8247 = vmatprep.subr.bf16.mxu1 %v11768_v6  ;;  %v1710_v6 = vld [vmem:[#allocation8 + $0x1bd8] sm:$0xff] }
 0x547   :  { %9900 = vmatpush1.bf16.msra.mxu0 %v12514_v12  ;;  %v11831_v12 = vcombine.low %v1702_v59, %v1706_v19  ;;  %v12561_v59 = vld [vmem:[#allocation11 + $0x264] ss:$16 sps:$4 sm:$0xff]  }
 0x548   :  { %8248 = vmatpush1.bf16.msra.mxu1 %v11767_v5  ;;  %9901 = vmatprep.subr.bf16.mxu0 %v12519_v7  ;;  %v12543_v5 = vld [vmem:[#allocation11 + $0x1a4] ss:$16 sps:$4 sm:$0xff]   ;;  %v11840_v7 = vcombine.high %v1710_v6, %v1714_v3 }
 0x549   :  { %8249 = vmatprep.subr.bf16.mxu1 %v11776_v37  ;;  %v1718_v37 = vld [vmem:[#allocation8 + $0x1c18] sm:$0xff] }
 0x54a   :  { %v11848_v11 = vcombine.high %v1718_v37, %v1722_v10 }
 0x54b   :  { %9902 = vmatpush1.bf16.msra.mxu0 %v12517_v52  ;;  %v11839_v52 = vcombine.low %v1710_v6, %v1714_v3  ;;  %v12564_v6 = vld [vmem:[#allocation11 + $0x284] ss:$16 sps:$4 sm:$0xff]  }
 0x54c   :  { %8250 = vmatpush1.bf16.msra.mxu1 %v11775_v53  ;;  %9903 = vmatprep.subr.bf16.mxu0 %v12522_v15  ;;  %v12546_v53 = vld [vmem:[#allocation11 + $0x1c4] ss:$16 sps:$4 sm:$0xff]   ;;  %v13743_v15 = vld [vmem:[#allocation10] sm:$0xff] }
 0x54d   :  { %8251 = vmatprep.subr.bf16.mxu1 %v11784_v57  ;;  %v1860_v57 = vrot.slane %v13743_v15, %v13548_v26 }
 0x54f   :  { %9904 = vmatpush1.bf16.msra.mxu0 %v12520_v63  ;;  %v1730_v63 = vld [vmem:[#allocation8 + $0x1c78] sm:$0xff] }
 0x550   :  { %8252 = vmatpush1.bf16.msra.mxu1 %v11783_v25  ;;  %9905 = vmatprep.subr.bf16.mxu0 %v12525_v20  ;;  %v12544_v25 = vld [vmem:[#allocation11 + $0x1c0] ss:$16 sps:$4 sm:$0xff]   ;;  %v11847_v20 = vcombine.low %v1718_v37, %v1722_v10  ;;  %v11856_v24 = vcombine.high %v1726_v17, %v1730_v63  ;;  %v11855_v36 = vcombine.low %v1726_v17, %v1730_v63  ;;  %v12567_v37 = vld [vmem:[#allocation11 + $0x2a4] ss:$16 sps:$4 sm:$0xff]  }
 0x551   :  { %8253 = vmatprep.subr.bf16.mxu1 %v11792_v21  ;;  %v12333_v21 = vadd.f32 %v13726_v56, %v1860_v57  ;;  %v1790_v63 = vld [vmem:[#allocation8 + $0x1e58] sm:$0xff] }
 0x553   :  { %9906 = vmatpush1.bf16.msra.mxu0 %v12523_v27  ;;  %v1734_v27 = vld [vmem:[#allocation8 + $0x1c98] sm:$0xff] }
 0x554   :  { %8254 = vmatpush1.bf16.msra.mxu1 %v11791_v2  ;;  %9907 = vmatprep.subr.bf16.mxu0 %v12528_v29  ;;  %v1738_v2 = vld [vmem:[#allocation8 + $0x1cb8] sm:$0xff] }
 0x555   :  { %8255 = vmatprep.subr.bf16.mxu1 %v11800_v32  ;;  %v12547_v29 = vld [vmem:[#allocation11 + $0x1e0] ss:$16 sps:$4 sm:$0xff]   ;;  %v8317_v32 = vmax.f32 %v13712_v4, 0.0  ;;  %v11864_v56 = vcombine.high %v1734_v27, %v1738_v2 }
 0x557   :  { %9908 = vmatpush1.bf16.msra.mxu0 %v12526_v60  ;;  %v8320_v60 = vmax.f32 %v12333_v21, 0.0  ;;  %v13751_v39 = vpack.c.bf16 %v8317_v32, %v8317_v32 }
 0x558   :  { %8256 = vmatpush1.bf16.msra.mxu1 %v11799_v34  ;;  %9909 = vmatprep.subr.bf16.mxu0 %v12531_v38  ;;  %v1742_v34 = vld [vmem:[#allocation8 + $0x1cd8] sm:$0xff] }
 0x559   :  { %8257 = vmatprep.subr.bf16.mxu1 %v11808_v46  ;;  %v1746_v38 = vld [vmem:[#allocation8 + $0x1cf8] sm:$0xff]  ;;  %v13753_v4 = vpack.c.bf16 %v8320_v60, %v8320_v60 }
 0x55a   :  { %v12550_v46 = vld [vmem:[#allocation11 + $0x200] ss:$16 sps:$4 sm:$0xff]  }
 0x55b   :  { %9910 = vmatpush1.bf16.msra.mxu0 %v12529_v30  ;;  %v1750_v30 = vld [vmem:[#allocation8 + $0x1d18] sm:$0xff] }
 0x55c   :  { %8258 = vmatpush1.bf16.msra.mxu1 %v11807_v40  ;;  %9911 = vmatprep.subr.bf16.mxu0 %v12534_v41  ;;  %v1754_v40 = vld [vmem:[#allocation8 + $0x1d38] sm:$0xff] }
 0x55d   :  { %8259 = vmatprep.subr.bf16.mxu1 %v11816_v33  ;;  %v12553_v41 = vld [vmem:[#allocation11 + $0x220] ss:$16 sps:$4 sm:$0xff]   ;;  %v11871_v33 = vcombine.low %v1742_v34, %v1746_v38  ;;  %v11880_v43 = vcombine.high %v1750_v30, %v1754_v40 }
 0x55e   :  { %v1806_v60 = vld [vmem:[#allocation8 + $0x1ed8] sm:$0xff] }
 0x55f   :  { %9912 = vmatpush1.bf16.msra.mxu0 %v12532_v48  ;;  %v1758_v48 = vld [vmem:[#allocation8 + $0x1d58] sm:$0xff] }
 0x560   :  { %8260 = vmatpush1.bf16.msra.mxu1 %v11815_v49  ;;  %9913 = vmatprep.subr.bf16.mxu0 %v12537_v35  ;;  %v1762_v49 = vld [vmem:[#allocation8 + $0x1d78] sm:$0xff] }
 0x561   :  { %8261 = vmatprep.subr.bf16.mxu1 %v11824_v0  ;;  %v12556_v35 = vld [vmem:[#allocation11 + $0x240] ss:$16 sps:$4 sm:$0xff]   ;;  %v11879_v0 = vcombine.low %v1750_v30, %v1754_v40  ;;  %v11888_v19 = vcombine.high %v1758_v48, %v1762_v49 }
 0x562   :  { %v12577_v30 = vld [vmem:[#allocation11 + $0x320] ss:$16 sps:$4 sm:$0xff]  }
 0x563   :  { %9914 = vmatpush1.bf16.msra.mxu0 %v12535_v54  ;;  %v1766_v54 = vld [vmem:[#allocation8 + $0x1d98] sm:$0xff] }
 0x564   :  { %8262 = vmatpush1.bf16.msra.mxu1 %v11823_v13  ;;  %9915 = vmatprep.subr.bf16.mxu0 %v12540_v61  ;;  %v1770_v13 = vld [vmem:[#allocation8 + $0x1db8] sm:$0xff] }
 0x565   :  { %8263 = vmatprep.subr.bf16.mxu1 %v11832_v1  ;;  %v12559_v61 = vld [vmem:[#allocation11 + $0x260] ss:$16 sps:$4 sm:$0xff]   ;;  %v11887_v1 = vcombine.low %v1758_v48, %v1762_v49  ;;  %v11896_v3 = vcombine.high %v1766_v54, %v1770_v13 }
 0x566   :  { %v12580_v48 = vld [vmem:[#allocation11 + $0x340] ss:$16 sps:$4 sm:$0xff]  }
 0x567   :  { %9916 = vmatpush1.bf16.msra.mxu0 %v12538_v58  ;;  %v1774_v58 = vld [vmem:[#allocation8 + $0x1dd8] sm:$0xff] }
 0x568   :  { %8264 = vmatpush1.bf16.msra.mxu1 %v11831_v12  ;;  %9917 = vmatprep.subr.bf16.mxu0 %v12543_v5  ;;  %v1778_v12 = vld [vmem:[#allocation8 + $0x1df8] sm:$0xff] }
 0x569   :  { %8265 = vmatprep.subr.bf16.mxu1 %v11840_v7  ;;  %v12562_v5 = vld [vmem:[#allocation11 + $0x280] ss:$16 sps:$4 sm:$0xff]   ;;  %v11895_v7 = vcombine.low %v1766_v54, %v1770_v13  ;;  %v11904_v10 = vcombine.high %v1774_v58, %v1778_v12  ;;  %v11903_v57 = vcombine.low %v1774_v58, %v1778_v12 }
 0x56a   :  { %v12583_v54 = vld [vmem:[#allocation11 + $0x360] ss:$16 sps:$4 sm:$0xff]  }
 0x56b   :  { %9918 = vmatpush1.bf16.msra.mxu0 %v12541_v44  ;;  %v1782_v44 = vld [vmem:[#allocation8 + $0x1e18] sm:$0xff] }
 0x56c   :  { %8266 = vmatpush1.bf16.msra.mxu1 %v11839_v52  ;;  %9919 = vmatprep.subr.bf16.mxu0 %v12546_v53  ;;  %v1786_v52 = vld [vmem:[#allocation8 + $0x1e38] sm:$0xff] }
 0x56d   :  { %8276 = vmatprep.subr.bf16.mxu1 %v11848_v11  ;;  %v12565_v53 = vld [vmem:[#allocation11 + $0x2a0] ss:$16 sps:$4 sm:$0xff]   ;;  %v12570_v11 = vld [vmem:[#allocation11 + $0x2c4] ss:$16 sps:$4 sm:$0xff]   ;;  %v11912_v17 = vcombine.high %v1782_v44, %v1786_v52  ;;  %v11911_v21 = vcombine.low %v1782_v44, %v1786_v52 }
 0x56e   :  { %v12586_v58 = vld [vmem:[#allocation11 + $0x380] ss:$16 sps:$4 sm:$0xff]   ;;  %v12594_v52 = vld [vmem:[#allocation11 + $0x3c4] ss:$16 sps:$4 sm:$0xff]  }
 0x56f   :  { %8268 = vmatmul.mubr.bf16.vlgmr.msra.gmra.mrb[16].mxu1 %v13681_v22  ;;  %9920 = vmatpush1.bf16.msra.mxu0 %v12544_v25  ;;  %v11863_v22 = vcombine.low %v1734_v27, %v1738_v2  ;;  %v1794_v25 = vld [vmem:[#allocation8 + $0x1e78] sm:$0xff] }
 0x570   :  { %8277 = vmatpush1.bf16.msra.mxu1 %v11847_v20  ;;  %8308 = vmatprep.mubr.bf16.mxu1 %v13683_v9  ;;  %v11872_v9 = vcombine.high %v1742_v34, %v1746_v38  ;;  %v12568_v20 = vld [vmem:[#allocation11 + $0x2c0] ss:$16 sps:$4 sm:$0xff]   ;;  %v11919_v32 = vcombine.low %v1790_v63, %v1794_v25 }
 0x571   :  { %8278 = vmatprep.subr.bf16.mxu1 %v11856_v24  ;;  %9921 = vmatprep.subr.bf16.mxu0 %v12549_v8  ;;  %v12573_v24 = vld [vmem:[#allocation11 + $0x2e4] ss:$16 sps:$4 sm:$0xff]   ;;  %v11920_v8 = vcombine.high %v1790_v63, %v1794_v25  ;;  %v12574_v34 = vld [vmem:[#allocation11 + $0x300] ss:$16 sps:$4 sm:$0xff]   ;;  %v12603_v25 = vld [vmem:[#allocation11 + $0x2c] ss:$16 sps:$4 sm:$0xff]  }
 0x572   :  { %v1798_v27 = vld [vmem:[#allocation8 + $0x1e98] sm:$0xff] }
 0x573   :  { %9922 = vmatpush1.bf16.msra.mxu0 %v12547_v29  ;;  %v1802_v2 = vld [vmem:[#allocation8 + $0x1eb8] sm:$0xff] }
 0x574   :  { %8279 = vmatpush1.bf16.msra.mxu1 %v11855_v36  ;;  %9932 = vmatprep.subr.bf16.mxu0 %v12552_v31  ;;  %v12571_v29 = vld [vmem:[#allocation11 + $0x2e0] ss:$16 sps:$4 sm:$0xff]   ;;  %v12576_v36 = vld [vmem:[#allocation11 + $0x304] ss:$16 sps:$4 sm:$0xff]   ;;  %v11928_v31 = vcombine.high %v1798_v27, %v1802_v2  ;;  %v11927_v38 = vcombine.low %v1798_v27, %v1802_v2  ;;  %v12606_v27 = vld [vmem:[#allocation11 + $0x4c] ss:$16 sps:$4 sm:$0xff]  }
 0x575   :  { %8280 = vmatprep.subr.bf16.mxu1 %v11864_v56  ;;  %v1810_v56 = vld [vmem:[#allocation8 + $0x1ef8] sm:$0xff] }
 0x576   :  { %9924 = vmatmul.mubr.bf16.vlgmr.msra.gmra.mrb[32].mxu0 %v13751_v39  ;;  %v11935_v40 = vcombine.low %v1806_v60, %v1810_v56  ;;  %v12600_v63 = vld [vmem:[#allocation11 + $0x3e4] ss:$16 sps:$4 sm:$0xff]  }
 0x577   :  { %9933 = vmatpush1.bf16.msra.mxu0 %v12550_v46  ;;  %9964 = vmatprep.mubr.bf16.mxu0 %v13753_v4  ;;  %v12579_v46 = vld [vmem:[#allocation11 + $0x324] ss:$16 sps:$4 sm:$0xff]  }
 0x578   :  { %8281 = vmatpush1.bf16.msra.mxu1 %v11863_v22  ;;  %9934 = vmatprep.subr.bf16.mxu0 %v12555_v50  ;;  %v11936_v22 = vcombine.high %v1806_v60, %v1810_v56  ;;  %v1814_v50 = vld [vmem:[#allocation8 + $0x1f18] sm:$0xff]  ;;  %v12612_v60 = vld [vmem:[#allocation11 + $0x8c] ss:$16 sps:$4 sm:$0xff]  }
 0x579   :  { %8282 = vmatprep.subr.bf16.mxu1 %v11872_v9  ;;  %v1818_v9 = vld [vmem:[#allocation8 + $0x1f38] sm:$0xff] }
 0x57a   :  { %v11943_v49 = vcombine.low %v1814_v50, %v1818_v9  ;;  %v12637_v56 = vld [vmem:[#allocation11 + $0x440] ss:$16 sps:$4 sm:$0xff]  }
 0x57b   :  { %9935 = vmatpush1.bf16.msra.mxu0 %v12553_v41  ;;  %v12582_v41 = vld [vmem:[#allocation11 + $0x344] ss:$16 sps:$4 sm:$0xff]  }
 0x57c   :  { %8283 = vmatpush1.bf16.msra.mxu1 %v11871_v33  ;;  %9936 = vmatprep.subr.bf16.mxu0 %v12558_v42  ;;  %v11944_v33 = vcombine.high %v1814_v50, %v1818_v9  ;;  %v1822_v42 = vld [vmem:[#allocation8 + $0x1f58] sm:$0xff]  ;;  %v12613_v50 = vld [vmem:[#allocation11 + $0xa8] ss:$16 sps:$4 sm:$0xff]  }
 0x57d   :  { %8284 = vmatprep.subr.bf16.mxu1 %v11880_v43  ;;  %v1826_v43 = vld [vmem:[#allocation8 + $0x1f78] sm:$0xff] }
 0x57e   :  { %v11951_v13 = vcombine.low %v1822_v42, %v1826_v43  ;;  %v12651_v9 = vld [vmem:[#allocation11 + $0x484] ss:$16 sps:$4 sm:$0xff]  }
 0x57f   :  { %9937 = vmatpush1.bf16.msra.mxu0 %v12556_v35  ;;  %v12585_v35 = vld [vmem:[#allocation11 + $0x364] ss:$16 sps:$4 sm:$0xff]  }
 0x580   :  { %8285 = vmatpush1.bf16.msra.mxu1 %v11879_v0  ;;  %9938 = vmatprep.subr.bf16.mxu0 %v12561_v59  ;;  %v11952_v0 = vcombine.high %v1822_v42, %v1826_v43  ;;  %v1830_v59 = vld [vmem:[#allocation8 + $0x1f98] sm:$0xff]  ;;  %v12621_v42 = vld [vmem:[#allocation11 + $0xec] ss:$16 sps:$4 sm:$0xff]  }
 0x581   :  { %8286 = vmatprep.subr.bf16.mxu1 %v11888_v19  ;;  %v1834_v19 = vld [vmem:[#allocation8 + $0x1fb8] sm:$0xff] }
 0x582   :  { %v11959_v12 = vcombine.low %v1830_v59, %v1834_v19  ;;  %v12655_v43 = vld [vmem:[#allocation11 + $0x4a0] ss:$16 sps:$4 sm:$0xff]  }
 0x583   :  { %9939 = vmatpush1.bf16.msra.mxu0 %v12559_v61  ;;  %v12588_v61 = vld [vmem:[#allocation11 + $0x384] ss:$16 sps:$4 sm:$0xff]  }
 0x584   :  { %8287 = vmatpush1.bf16.msra.mxu1 %v11887_v1  ;;  %9940 = vmatprep.subr.bf16.mxu0 %v12564_v6  ;;  %v11960_v1 = vcombine.high %v1830_v59, %v1834_v19  ;;  %v1838_v6 = vld [vmem:[#allocation8 + $0x1fd8] sm:$0xff]  ;;  %v12622_v59 = vld [vmem:[#allocation11 + $0x108] ss:$16 sps:$4 sm:$0xff]  }
 0x585   :  { %8288 = vmatprep.subr.bf16.mxu1 %v11896_v3  ;;  %v1842_v3 = vld [vmem:[#allocation8 + $0x1ff8] sm:$0xff] }
 0x586   :  { %v11967_v44 = vcombine.low %v1838_v6, %v1842_v3  ;;  %v12669_v19 = vld [vmem:[#allocation11 + $0x4e4] ss:$16 sps:$4 sm:$0xff]  }
 0x587   :  { %9941 = vmatpush1.bf16.msra.mxu0 %v12562_v5  ;;  %v12591_v5 = vld [vmem:[#allocation11 + $0x3a4] ss:$16 sps:$4 sm:$0xff]  }
 0x588   :  { %8289 = vmatpush1.bf16.msra.mxu1 %v11895_v7  ;;  %9942 = vmatprep.subr.bf16.mxu0 %v12567_v37  ;;  %v11968_v7 = vcombine.high %v1838_v6, %v1842_v3  ;;  %v12589_v37 = vld [vmem:[#allocation11 + $0x3a0] ss:$16 sps:$4 sm:$0xff]   ;;  %v12636_v6 = vld [vmem:[#allocation11 + $0x14c] ss:$16 sps:$4 sm:$0xff]  }
 0x589   :  { %8290 = vmatprep.subr.bf16.mxu1 %v11904_v10  ;;  %v1856_v10 = vrot.slane %v13743_v15, %v13545_v23  ;;  %v12673_v3 = vld [vmem:[#allocation11 + $0x500] ss:$16 sps:$4 sm:$0xff]  }
 0x58b   :  { %9943 = vmatpush1.bf16.msra.mxu0 %v12565_v53  ;;  %v12597_v53 = vld [vmem:[#allocation11 + $0xc] ss:$16 sps:$4 sm:$0xff]  }
 0x58c   :  { %8291 = vmatpush1.bf16.msra.mxu1 %v11903_v57  ;;  %9944 = vmatprep.subr.bf16.mxu0 %v12570_v11  ;;  %v12592_v57 = vld [vmem:[#allocation11 + $0x3c0] ss:$16 sps:$4 sm:$0xff]   ;;  %v12332_v11 = vadd.f32 %v13724_v51, %v1856_v10  ;;  %v12687_v10 = vld [vmem:[#allocation11 + $0x544] ss:$16 sps:$4 sm:$0xff]  }
 0x58d   :  { %8292 = vmatprep.subr.bf16.mxu1 %v11912_v17  ;;  %v12595_v17 = vld [vmem:[#allocation11 + $0x8] ss:$16 sps:$4 sm:$0xff]   ;;  %v12625_v51 = vld [vmem:[#allocation11 + $0x400] ss:$16 sps:$4 sm:$0xff]  }
 0x58f   :  { %9945 = vmatpush1.bf16.msra.mxu0 %v12568_v20  ;;  %v12598_v20 = vld [vmem:[#allocation11 + $0x3e0] ss:$16 sps:$4 sm:$0xff]  }
 0x590   :  { %8293 = vmatpush1.bf16.msra.mxu1 %v11911_v21  ;;  %9946 = vmatprep.subr.bf16.mxu0 %v12573_v24  ;;  %v8319_v21 = vmax.f32 %v12332_v11, 0.0  ;;  %v12601_v24 = vld [vmem:[#allocation11 + $0x28] ss:$16 sps:$4 sm:$0xff]   ;;  %v12654_v11 = vld [vmem:[#allocation11 + $0x1ac] ss:$16 sps:$4 sm:$0xff]  }
 0x591   :  { %8294 = vmatprep.subr.bf16.mxu1 %v11920_v8  ;;  %v12627_v8 = vld [vmem:[#allocation11 + $0x404] ss:$16 sps:$4 sm:$0xff]  }
 0x592   :  { %v13762_v2 = vpack.c.bf16 %v8319_v21, %v8319_v21  ;;  %v12697_v21 = vld [vmem:[#allocation11 + $0x580] ss:$16 sps:$4 sm:$0xff]  }
 0x593   :  { %9947 = vmatpush1.bf16.msra.mxu0 %v12571_v29  ;;  %v12604_v29 = vld [vmem:[#allocation11 + $0x48] ss:$16 sps:$4 sm:$0xff]  }
 0x594   :  { %8295 = vmatpush1.bf16.msra.mxu1 %v11919_v32  ;;  %9948 = vmatprep.subr.bf16.mxu0 %v12576_v36  ;;  %v12633_v32 = vld [vmem:[#allocation11 + $0x424] ss:$16 sps:$4 sm:$0xff]   ;;  %v12631_v36 = vld [vmem:[#allocation11 + $0x420] ss:$16 sps:$4 sm:$0xff]  }
 0x595   :  { %8296 = vmatprep.subr.bf16.mxu1 %v11928_v31  ;;  %v12639_v31 = vld [vmem:[#allocation11 + $0x444] ss:$16 sps:$4 sm:$0xff]  }
 0x597   :  { %9949 = vmatpush1.bf16.msra.mxu0 %v12574_v34  ;;  %v12610_v34 = vld [vmem:[#allocation11 + $0x88] ss:$16 sps:$4 sm:$0xff]  }
 0x598   :  { %8297 = vmatpush1.bf16.msra.mxu1 %v11927_v38  ;;  %9950 = vmatprep.subr.bf16.mxu0 %v12579_v46  ;;  %v12645_v38 = vld [vmem:[#allocation11 + $0x464] ss:$16 sps:$4 sm:$0xff]   ;;  %v12615_v46 = vld [vmem:[#allocation11 + $0xac] ss:$16 sps:$4 sm:$0xff]  }
 0x599   :  { %8298 = vmatprep.subr.bf16.mxu1 %v11936_v22  ;;  %v12643_v22 = vld [vmem:[#allocation11 + $0x460] ss:$16 sps:$4 sm:$0xff]  }
 0x59b   :  { %9951 = vmatpush1.bf16.msra.mxu0 %v12577_v30  ;;  %v12618_v30 = vld [vmem:[#allocation11 + $0xcc] ss:$16 sps:$4 sm:$0xff]  }
 0x59c   :  { %8299 = vmatpush1.bf16.msra.mxu1 %v11935_v40  ;;  %9952 = vmatprep.subr.bf16.mxu0 %v12582_v41  ;;  %v12649_v40 = vld [vmem:[#allocation11 + $0x480] ss:$16 sps:$4 sm:$0xff]   ;;  %v12616_v41 = vld [vmem:[#allocation11 + $0xc8] ss:$16 sps:$4 sm:$0xff]  }
 0x59d   :  { %8300 = vmatprep.subr.bf16.mxu1 %v11944_v33  ;;  %v12657_v33 = vld [vmem:[#allocation11 + $0x4a4] ss:$16 sps:$4 sm:$0xff]  }
 0x59f   :  { %9953 = vmatpush1.bf16.msra.mxu0 %v12580_v48  ;;  %v12619_v48 = vld [vmem:[#allocation11 + $0xe8] ss:$16 sps:$4 sm:$0xff]  }
 0x5a0   :  { %8301 = vmatpush1.bf16.msra.mxu1 %v11943_v49  ;;  %9954 = vmatprep.subr.bf16.mxu0 %v12585_v35  ;;  %v12663_v49 = vld [vmem:[#allocation11 + $0x4c4] ss:$16 sps:$4 sm:$0xff]   ;;  %v12624_v35 = vld [vmem:[#allocation11 + $0x10c] ss:$16 sps:$4 sm:$0xff]  }
 0x5a1   :  { %8302 = vmatprep.subr.bf16.mxu1 %v11952_v0  ;;  %v12661_v0 = vld [vmem:[#allocation11 + $0x4c0] ss:$16 sps:$4 sm:$0xff]  }
 0x5a3   :  { %9955 = vmatpush1.bf16.msra.mxu0 %v12583_v54  ;;  %v12630_v54 = vld [vmem:[#allocation11 + $0x12c] ss:$16 sps:$4 sm:$0xff]  }
 0x5a4   :  { %8303 = vmatpush1.bf16.msra.mxu1 %v11951_v13  ;;  %9956 = vmatprep.subr.bf16.mxu0 %v12588_v61  ;;  %v12667_v13 = vld [vmem:[#allocation11 + $0x4e0] ss:$16 sps:$4 sm:$0xff]   ;;  %v12628_v61 = vld [vmem:[#allocation11 + $0x128] ss:$16 sps:$4 sm:$0xff]  }
 0x5a5   :  { %8304 = vmatprep.subr.bf16.mxu1 %v11960_v1  ;;  %v12675_v1 = vld [vmem:[#allocation11 + $0x504] ss:$16 sps:$4 sm:$0xff]  }
 0x5a7   :  { %9957 = vmatpush1.bf16.msra.mxu0 %v12586_v58  ;;  %v12634_v58 = vld [vmem:[#allocation11 + $0x148] ss:$16 sps:$4 sm:$0xff]  }
 0x5a8   :  { %8305 = vmatpush1.bf16.msra.mxu1 %v11959_v12  ;;  %9958 = vmatprep.subr.bf16.mxu0 %v12591_v5  ;;  %v12681_v12 = vld [vmem:[#allocation11 + $0x524] ss:$16 sps:$4 sm:$0xff]   ;;  %v12642_v5 = vld [vmem:[#allocation11 + $0x16c] ss:$16 sps:$4 sm:$0xff]  }
 0x5a9   :  { %8306 = vmatprep.subr.bf16.mxu1 %v11968_v7  ;;  %v12679_v7 = vld [vmem:[#allocation11 + $0x520] ss:$16 sps:$4 sm:$0xff]  }
 0x5ab   :  { %9959 = vmatpush1.bf16.msra.mxu0 %v12589_v37  ;;  %v12640_v37 = vld [vmem:[#allocation11 + $0x168] ss:$16 sps:$4 sm:$0xff]  }
 0x5ac   :  { %8307 = vmatpush1.bf16.msra.mxu1 %v11967_v44  ;;  %9960 = vmatprep.subr.bf16.mxu0 %v12594_v52  ;;  %v12648_v44 = vld [vmem:[#allocation11 + $0x18c] ss:$16 sps:$4 sm:$0xff]   ;;  %v12685_v52 = vld [vmem:[#allocation11 + $0x540] ss:$16 sps:$4 sm:$0xff]  }
 0x5ad   :  { %10055 = vmatprep.subr.bf16.mxu1 %v12597_v53  ;;  %v12646_v53 = vld [vmem:[#allocation11 + $0x188] ss:$16 sps:$4 sm:$0xff]  }
 0x5af   :  { %8309 = vmatmul.mubr.bf16.vlgmr.msra.gmra.mrb[16].mxu1 %v13692_v55  ;;  %9961 = vmatpush1.bf16.msra.mxu0 %v12592_v57  ;;  %v12609_v55 = vld [vmem:[#allocation11 + $0x6c] ss:$16 sps:$4 sm:$0xff]   ;;  %v12693_v57 = vld [vmem:[#allocation11 + $0x564] ss:$16 sps:$4 sm:$0xff]  }
 0x5b0   :  { %10056 = vmatpush1.bf16.msra.mxu1 %v12595_v17  ;;  %10087 = vmatprep.mubr.bf16.mxu1 %v13739_v62  ;;  %v12607_v62 = vld [vmem:[#allocation11 + $0x68] ss:$16 sps:$4 sm:$0xff]   ;;  %v12691_v17 = vld [vmem:[#allocation11 + $0x560] ss:$16 sps:$4 sm:$0xff]  }
 0x5b1   :  { %9962 = vmatprep.subr.bf16.mxu0 %v12600_v63  ;;  %10057 = vmatprep.subr.bf16.mxu1 %v12603_v25  ;;  %v12652_v63 = vld [vmem:[#allocation11 + $0x1a8] ss:$16 sps:$4 sm:$0xff]   ;;  %v12699_v25 = vld [vmem:[#allocation11 + $0x584] ss:$16 sps:$4 sm:$0xff]  }
 0x5b3   :  { %9963 = vmatpush1.bf16.msra.mxu0 %v12598_v20  ;;  %v12660_v20 = vld [vmem:[#allocation11 + $0x1cc] ss:$16 sps:$4 sm:$0xff]  }
 0x5b4   :  { %10058 = vmatpush1.bf16.msra.mxu1 %v12601_v24  ;;  %9973 = vmatprep.subr.bf16.mxu0 %v12627_v8  ;;  %v12658_v24 = vld [vmem:[#allocation11 + $0x1c8] ss:$16 sps:$4 sm:$0xff]   ;;  %v12705_v8 = vld [vmem:[#allocation11 + $0x5a4] ss:$16 sps:$4 sm:$0xff]  }
 0x5b5   :  { %10059 = vmatprep.subr.bf16.mxu1 %v12606_v27  ;;  %v12666_v27 = vld [vmem:[#allocation11 + $0x1ec] ss:$16 sps:$4 sm:$0xff]  }
 0x5b6   :  { %9965 = vmatmul.mubr.bf16.vlgmr.msra.gmra.mrb[32].mxu0 %v13762_v2 }
 0x5b7   :  { %9974 = vmatpush1.bf16.msra.mxu0 %v12625_v51  ;;  %v12703_v51 = vld [vmem:[#allocation11 + $0x5a0] ss:$16 sps:$4 sm:$0xff]  }
 0x5b8   :  { %10060 = vmatpush1.bf16.msra.mxu1 %v12604_v29  ;;  %9975 = vmatprep.subr.bf16.mxu0 %v12633_v32  ;;  %v12664_v29 = vld [vmem:[#allocation11 + $0x1e8] ss:$16 sps:$4 sm:$0xff]   ;;  %v12711_v32 = vld [vmem:[#allocation11 + $0x5c4] ss:$16 sps:$4 sm:$0xff]  }
 0x5b9   :  { %10061 = vmatprep.subr.bf16.mxu1 %v12609_v55  ;;  %v12672_v55 = vld [vmem:[#allocation11 + $0x20c] ss:$16 sps:$4 sm:$0xff]  }
 0x5bb   :  { %9976 = vmatpush1.bf16.msra.mxu0 %v12631_v36  ;;  %v12709_v36 = vld [vmem:[#allocation11 + $0x5c0] ss:$16 sps:$4 sm:$0xff]  }
 0x5bc   :  { %10062 = vmatpush1.bf16.msra.mxu1 %v12607_v62  ;;  %9977 = vmatprep.subr.bf16.mxu0 %v12639_v31  ;;  %v12670_v62 = vld [vmem:[#allocation11 + $0x208] ss:$16 sps:$4 sm:$0xff]   ;;  %v12678_v31 = vld [vmem:[#allocation11 + $0x22c] ss:$16 sps:$4 sm:$0xff]  }
 0x5bd   :  { %10063 = vmatprep.subr.bf16.mxu1 %v12612_v60  ;;  %v12717_v60 = vld [vmem:[#allocation11 + $0x5e4] ss:$16 sps:$4 sm:$0xff]  }
 0x5bf   :  { %9978 = vmatpush1.bf16.msra.mxu0 %v12637_v56  ;;  %v12715_v56 = vld [vmem:[#allocation11 + $0x5e0] ss:$16 sps:$4 sm:$0xff]  }
 0x5c0   :  { %10064 = vmatpush1.bf16.msra.mxu1 %v12610_v34  ;;  %9979 = vmatprep.subr.bf16.mxu0 %v12645_v38  ;;  %v12676_v34 = vld [vmem:[#allocation11 + $0x228] ss:$16 sps:$4 sm:$0xff]   ;;  %v12765_v38 = vld [vmem:[#allocation11 + $0x604] ss:$16 sps:$4 sm:$0xff]  }
 0x5c1   :  { %10065 = vmatprep.subr.bf16.mxu1 %v12615_v46  ;;  %v12684_v46 = vld [vmem:[#allocation11 + $0x24c] ss:$16 sps:$4 sm:$0xff]  }
 0x5c3   :  { %9980 = vmatpush1.bf16.msra.mxu0 %v12643_v22  ;;  %v12682_v22 = vld [vmem:[#allocation11 + $0x248] ss:$16 sps:$4 sm:$0xff]  }
 0x5c4   :  { %10066 = vmatpush1.bf16.msra.mxu1 %v12613_v50  ;;  %9981 = vmatprep.subr.bf16.mxu0 %v12651_v9  ;;  %v12690_v50 = vld [vmem:[#allocation11 + $0x26c] ss:$16 sps:$4 sm:$0xff]   ;;  %v12688_v9 = vld [vmem:[#allocation11 + $0x268] ss:$16 sps:$4 sm:$0xff]  }
 0x5c5   :  { %10067 = vmatprep.subr.bf16.mxu1 %v12618_v30  ;;  %v12694_v30 = vld [vmem:[#allocation11 + $0x288] ss:$16 sps:$4 sm:$0xff]  }
 0x5c7   :  { %9982 = vmatpush1.bf16.msra.mxu0 %v12649_v40  ;;  %v12702_v40 = vld [vmem:[#allocation11 + $0x2ac] ss:$16 sps:$4 sm:$0xff]  }
 0x5c8   :  { %10068 = vmatpush1.bf16.msra.mxu1 %v12616_v41  ;;  %9983 = vmatprep.subr.bf16.mxu0 %v12657_v33  ;;  %v12708_v41 = vld [vmem:[#allocation11 + $0x2cc] ss:$16 sps:$4 sm:$0xff]   ;;  %v12706_v33 = vld [vmem:[#allocation11 + $0x2c8] ss:$16 sps:$4 sm:$0xff]  }
 0x5c9   :  { %10069 = vmatprep.subr.bf16.mxu1 %v12621_v42  ;;  %v12714_v42 = vld [vmem:[#allocation11 + $0x2ec] ss:$16 sps:$4 sm:$0xff]  }
 0x5cb   :  { %9984 = vmatpush1.bf16.msra.mxu0 %v12655_v43  ;;  %v1864_v43 = vrot.slane %v13743_v15, %v13593_v18 }
 0x5cc   :  { %10070 = vmatpush1.bf16.msra.mxu1 %v12619_v48  ;;  %9985 = vmatprep.subr.bf16.mxu0 %v12663_v49  ;;  %v1868_v48 = vrot.slane %v13743_v15, %v13562_v45  ;;  %v12712_v49 = vld [vmem:[#allocation11 + $0x2e8] ss:$16 sps:$4 sm:$0xff]  }
 0x5cd   :  { %10071 = vmatprep.subr.bf16.mxu1 %v12624_v35  ;;  %v12721_v15 = vld [vmem:[#allocation11 + $0x328] ss:$16 sps:$4 sm:$0xff]  }
 0x5cf   :  { %9986 = vmatpush1.bf16.msra.mxu0 %v12661_v0  ;;  %v12720_v0 = vld [vmem:[#allocation11 + $0x30c] ss:$16 sps:$4 sm:$0xff]  }
 0x5d0   :  { %10072 = vmatpush1.bf16.msra.mxu1 %v12622_v59  ;;  %9987 = vmatprep.subr.bf16.mxu0 %v12669_v19 }
 0x5d1   :  { %10073 = vmatprep.subr.bf16.mxu1 %v12630_v54 }
 0x5d3   :  { %9988 = vmatpush1.bf16.msra.mxu0 %v12667_v13 }
 0x5d4   :  { %10074 = vmatpush1.bf16.msra.mxu1 %v12628_v61  ;;  %9989 = vmatprep.subr.bf16.mxu0 %v12675_v1 }
 0x5d5   :  { %10075 = vmatprep.subr.bf16.mxu1 %v12636_v6  ;;  %v12718_v6 = vld [vmem:[#allocation11 + $0x308] ss:$16 sps:$4 sm:$0xff]  }
 0x5d7   :  { %9990 = vmatpush1.bf16.msra.mxu0 %v12673_v3 }
 0x5d8   :  { %10076 = vmatpush1.bf16.msra.mxu1 %v12634_v58  ;;  %9991 = vmatprep.subr.bf16.mxu0 %v12681_v12  ;;  %v12723_v58 = vld [vmem:[#allocation11 + $0x32c] ss:$16 sps:$4 sm:$0xff]   ;;  %v12763_v12 = vld [vmem:[#allocation11 + $0x600] ss:$16 sps:$4 sm:$0xff]  }
 0x5d9   :  { %10077 = vmatprep.subr.bf16.mxu1 %v12642_v5  ;;  %v12771_v5 = vld [vmem:[#allocation11 + $0x624] ss:$16 sps:$4 sm:$0xff]  }
 0x5db   :  { %9992 = vmatpush1.bf16.msra.mxu0 %v12679_v7  ;;  %v12726_v7 = vld [vmem:[#allocation11 + $0x34c] ss:$16 sps:$4 sm:$0xff]  }
 0x5dc   :  { %10078 = vmatpush1.bf16.msra.mxu1 %v12640_v37  ;;  %9993 = vmatprep.subr.bf16.mxu0 %v12687_v10  ;;  %v12769_v37 = vld [vmem:[#allocation11 + $0x620] ss:$16 sps:$4 sm:$0xff]   ;;  %v12724_v10 = vld [vmem:[#allocation11 + $0x348] ss:$16 sps:$4 sm:$0xff]  }
 0x5dd   :  { %10079 = vmatprep.subr.bf16.mxu1 %v12648_v44  ;;  %v12777_v44 = vld [vmem:[#allocation11 + $0x644] ss:$16 sps:$4 sm:$0xff]  }
 0x5df   :  { %9994 = vmatpush1.bf16.msra.mxu0 %v12685_v52  ;;  %v12729_v52 = vld [vmem:[#allocation11 + $0x36c] ss:$16 sps:$4 sm:$0xff]  }
 0x5e0   :  { %10080 = vmatpush1.bf16.msra.mxu1 %v12646_v53  ;;  %9995 = vmatprep.subr.bf16.mxu0 %v12693_v57  ;;  %v12775_v53 = vld [vmem:[#allocation11 + $0x640] ss:$16 sps:$4 sm:$0xff]   ;;  %v12727_v57 = vld [vmem:[#allocation11 + $0x368] ss:$16 sps:$4 sm:$0xff]  }
 0x5e1   :  { %10081 = vmatprep.subr.bf16.mxu1 %v12654_v11  ;;  %v12783_v11 = vld [vmem:[#allocation11 + $0x664] ss:$16 sps:$4 sm:$0xff]  }
 0x5e3   :  { %9996 = vmatpush1.bf16.msra.mxu0 %v12691_v17  ;;  %v12732_v17 = vld [vmem:[#allocation11 + $0x38c] ss:$16 sps:$4 sm:$0xff]  }
 0x5e4   :  { %10082 = vmatpush1.bf16.msra.mxu1 %v12652_v63  ;;  %9997 = vmatprep.subr.bf16.mxu0 %v12699_v25  ;;  %v12781_v63 = vld [vmem:[#allocation11 + $0x660] ss:$16 sps:$4 sm:$0xff]   ;;  %v12730_v25 = vld [vmem:[#allocation11 + $0x388] ss:$16 sps:$4 sm:$0xff]  }
 0x5e5   :  { %10083 = vmatprep.subr.bf16.mxu1 %v12660_v20  ;;  %v12789_v20 = vld [vmem:[#allocation11 + $0x684] ss:$16 sps:$4 sm:$0xff]  }
 0x5e7   :  { %9998 = vmatpush1.bf16.msra.mxu0 %v12697_v21  ;;  %v12735_v21 = vld [vmem:[#allocation11 + $0x3ac] ss:$16 sps:$4 sm:$0xff]  }
 0x5e8   :  { %10084 = vmatpush1.bf16.msra.mxu1 %v12658_v24  ;;  %9999 = vmatprep.subr.bf16.mxu0 %v12705_v8  ;;  %v12787_v24 = vld [vmem:[#allocation11 + $0x680] ss:$16 sps:$4 sm:$0xff]   ;;  %v12733_v8 = vld [vmem:[#allocation11 + $0x3a8] ss:$16 sps:$4 sm:$0xff]  }
 0x5e9   :  { %10085 = vmatprep.subr.bf16.mxu1 %v12666_v27  ;;  %v12795_v27 = vld [vmem:[#allocation11 + $0x6a4] ss:$16 sps:$4 sm:$0xff]  }
 0x5eb   :  { %10000 = vmatpush1.bf16.msra.mxu0 %v12703_v51  ;;  %v12738_v51 = vld [vmem:[#allocation11 + $0x3cc] ss:$16 sps:$4 sm:$0xff]  }
 0x5ec   :  { %10086 = vmatpush1.bf16.msra.mxu1 %v12664_v29  ;;  %10001 = vmatprep.subr.bf16.mxu0 %v12711_v32  ;;  %v12793_v29 = vld [vmem:[#allocation11 + $0x6a0] ss:$16 sps:$4 sm:$0xff]   ;;  %v12736_v32 = vld [vmem:[#allocation11 + $0x3c8] ss:$16 sps:$4 sm:$0xff]  }
 0x5ed   :  { %10096 = vmatprep.subr.bf16.mxu1 %v12672_v55  ;;  %v12801_v55 = vld [vmem:[#allocation11 + $0x6c4] ss:$16 sps:$4 sm:$0xff]  }
 0x5ef   :  { %10088 = vmatmul.mubr.bf16.vlgmr.msra.gmra.mrb[20].mxu1 %v13751_v39  ;;  %10002 = vmatpush1.bf16.msra.mxu0 %v12709_v36  ;;  %v12696_v39 = vld [vmem:[#allocation11 + $0x28c] ss:$16 sps:$4 sm:$0xff]  }
 0x5f0   :  { %10097 = vmatpush1.bf16.msra.mxu1 %v12670_v62  ;;  %10128 = vmatprep.mubr.bf16.mxu1 %v13753_v4  ;;  %v12700_v4 = vld [vmem:[#allocation11 + $0x2a8] ss:$16 sps:$4 sm:$0xff]   ;;  %v12741_v36 = vld [vmem:[#allocation11 + $0x3ec] ss:$16 sps:$4 sm:$0xff]   ;;  %v12799_v62 = vld [vmem:[#allocation11 + $0x6c0] ss:$16 sps:$4 sm:$0xff]  }
 0x5f1   :  { %10098 = vmatprep.subr.bf16.mxu1 %v12678_v31  ;;  %10003 = vmatprep.subr.bf16.mxu0 %v12717_v60  ;;  %v12739_v31 = vld [vmem:[#allocation11 + $0x3e8] ss:$16 sps:$4 sm:$0xff]   ;;  %v12807_v60 = vld [vmem:[#allocation11 + $0x6e4] ss:$16 sps:$4 sm:$0xff]  }
 0x5f3   :  { %10004 = vmatpush1.bf16.msra.mxu0 %v12715_v56  ;;  %v12744_v56 = vld [vmem:[#allocation11 + $0x40c] ss:$16 sps:$4 sm:$0xff]  }
 0x5f4   :  { %10099 = vmatpush1.bf16.msra.mxu1 %v12676_v34  ;;  %10014 = vmatprep.subr.bf16.mxu0 %v12765_v38  ;;  %v12805_v34 = vld [vmem:[#allocation11 + $0x6e0] ss:$16 sps:$4 sm:$0xff]   ;;  %v12742_v38 = vld [vmem:[#allocation11 + $0x408] ss:$16 sps:$4 sm:$0xff]  }
 0x5f5   :  { %10100 = vmatprep.subr.bf16.mxu1 %v12684_v46  ;;  %v12747_v46 = vld [vmem:[#allocation11 + $0x42c] ss:$16 sps:$4 sm:$0xff]  }
 0x5f8   :  { %10101 = vmatpush1.bf16.msra.mxu1 %v12682_v22  ;;  %v12813_v22 = vld [vmem:[#allocation11 + $0x704] ss:$16 sps:$4 sm:$0xff]  }
 0x5f9   :  { %10102 = vmatprep.subr.bf16.mxu1 %v12690_v50  ;;  %v12811_v50 = vld [vmem:[#allocation11 + $0x700] ss:$16 sps:$4 sm:$0xff]  }
 0x5fc   :  { %10103 = vmatpush1.bf16.msra.mxu1 %v12688_v9  ;;  %v12745_v9 = vld [vmem:[#allocation11 + $0x428] ss:$16 sps:$4 sm:$0xff]  }
 0x5fd   :  { %10104 = vmatprep.subr.bf16.mxu1 %v12696_v39  ;;  %v12819_v39 = vld [vmem:[#allocation11 + $0x724] ss:$16 sps:$4 sm:$0xff]  }
 0x600   :  { %10105 = vmatpush1.bf16.msra.mxu1 %v12694_v30  ;;  %v12750_v30 = vld [vmem:[#allocation11 + $0x44c] ss:$16 sps:$4 sm:$0xff]  }
 0x601   :  { %10106 = vmatprep.subr.bf16.mxu1 %v12702_v40  ;;  %v12817_v40 = vld [vmem:[#allocation11 + $0x720] ss:$16 sps:$4 sm:$0xff]  }
 0x604   :  { %10107 = vmatpush1.bf16.msra.mxu1 %v12700_v4  ;;  %v12748_v4 = vld [vmem:[#allocation11 + $0x448] ss:$16 sps:$4 sm:$0xff]  }
 0x605   :  { %10108 = vmatprep.subr.bf16.mxu1 %v12708_v41  ;;  %v12825_v41 = vld [vmem:[#allocation11 + $0x744] ss:$16 sps:$4 sm:$0xff]  }
 0x608   :  { %10109 = vmatpush1.bf16.msra.mxu1 %v12706_v33  ;;  %v12753_v33 = vld [vmem:[#allocation11 + $0x46c] ss:$16 sps:$4 sm:$0xff]  }
 0x609   :  { %v7982_v35 = vpop.f32.mrb[28].mxu0  ;;  %10110 = vmatprep.subr.bf16.mxu1 %v12714_v42  ;;  %v12751_v42 = vld [vmem:[#allocation11 + $0x468] ss:$16 sps:$4 sm:$0xff]  }
 0x60a   :  { %v12334_v59 = vadd.f32 %v7982_v35, %v1864_v43  ;;  %v7984_v19 = vpop.f32.mrb[29].mxu0  ;;  %v12831_v43 = vld [vmem:[#allocation11 + $0x764] ss:$16 sps:$4 sm:$0xff]   ;;  %v12754_v35 = vld [vmem:[#allocation11 + $0x488] ss:$16 sps:$4 sm:$0xff]  }
 0x60b   :  { %v12335_v54 = vadd.f32 %v7984_v19, %v1868_v48  ;;  %v7986_v13 = vpop.f32.mrb[30].mxu0  ;;  %v12756_v48 = vld [vmem:[#allocation11 + $0x48c] ss:$16 sps:$4 sm:$0xff]   ;;  %v12835_v19 = vld [vmem:[#allocation11 + $0x780] ss:$16 sps:$4 sm:$0xff]  }
 0x60c   :  { %v8321_v61 = vmax.f32 %v12334_v59, 0.0  ;;  %10111 = vmatpush1.bf16.msra.mxu1 %v12712_v49  ;;  %v7987_v1 = vpop.f32.mrb[31].mxu0  ;;  %v12829_v49 = vld [vmem:[#allocation11 + $0x760] ss:$16 sps:$4 sm:$0xff]   ;;  %v12759_v59 = vld [vmem:[#allocation11 + $0x4ac] ss:$16 sps:$4 sm:$0xff]  }
 0x60d   :  { %v8322_v3 = vmax.f32 %v12335_v54, 0.0  ;;  %10112 = vmatprep.subr.bf16.mxu1 %v12720_v0  ;;  %v12837_v0 = vld [vmem:[#allocation11 + $0x784] ss:$16 sps:$4 sm:$0xff]   ;;  %v12757_v54 = vld [vmem:[#allocation11 + $0x4a8] ss:$16 sps:$4 sm:$0xff]  }
 0x60e   :  { %v13773_v45 = vpack.c.bf16 %v8321_v61, %v8321_v61  ;;  %v12843_v13 = vld [vmem:[#allocation11 + $0x7a4] ss:$16 sps:$4 sm:$0xff]   ;;  %v12762_v61 = vld [vmem:[#allocation11 + $0x4cc] ss:$16 sps:$4 sm:$0xff]   ;;  %v12841_v1 = vld [vmem:[#allocation11 + $0x7a0] ss:$16 sps:$4 sm:$0xff]  }
 0x60f   :  { %v13771_v18 = vpack.c.bf16 %v8322_v3, %v8322_v3  ;;  %v12849_v3 = vld [vmem:[#allocation11 + $0x7c4] ss:$16 sps:$4 sm:$0xff]  }
 0x610   :  { %10113 = vmatpush1.bf16.msra.mxu1 %v12718_v6  ;;  %v12760_v6 = vld [vmem:[#allocation11 + $0x4c8] ss:$16 sps:$4 sm:$0xff]  }
 0x611   :  { %10005 = vmatprep.mubr.bf16.mxu0 %v13771_v18  ;;  %10114 = vmatprep.subr.bf16.mxu1 %v12723_v58  ;;  %v12768_v58 = vld [vmem:[#allocation11 + $0x4ec] ss:$16 sps:$4 sm:$0xff]  }
 0x612   :  { %10006 = vmatmul.mubr.bf16.vlgmr.msra.gmra.mrb[32].mxu0 %v13773_v45 }
 0x613   :  { %10015 = vmatpush1.bf16.msra.mxu0 %v12763_v12  ;;  %v12766_v12 = vld [vmem:[#allocation11 + $0x4e8] ss:$16 sps:$4 sm:$0xff]  }
 0x614   :  { %10115 = vmatpush1.bf16.msra.mxu1 %v12721_v15  ;;  %10016 = vmatprep.subr.bf16.mxu0 %v12771_v5  ;;  %v12855_v15 = vld [vmem:[#allocation11 + $0x7e4] ss:$16 sps:$4 sm:$0xff]   ;;  %v12774_v5 = vld [vmem:[#allocation11 + $0x50c] ss:$16 sps:$4 sm:$0xff]  }
 0x615   :  { %10116 = vmatprep.subr.bf16.mxu1 %v12726_v7  ;;  %v12853_v7 = vld [vmem:[#allocation11 + $0x7e0] ss:$16 sps:$4 sm:$0xff]  }
 0x617   :  { %10017 = vmatpush1.bf16.msra.mxu0 %v12769_v37  ;;  %v12772_v37 = vld [vmem:[#allocation11 + $0x508] ss:$16 sps:$4 sm:$0xff]  }
 0x618   :  { %10117 = vmatpush1.bf16.msra.mxu1 %v12724_v10  ;;  %10018 = vmatprep.subr.bf16.mxu0 %v12777_v44  ;;  %v12888_v10 = vld [vmem:[#allocation14 + $0x4] ss:$8 sps:$4 sm:$0xff]   ;;  %v12780_v44 = vld [vmem:[#allocation11 + $0x52c] ss:$16 sps:$4 sm:$0xff]  }
 0x619   :  { %10118 = vmatprep.subr.bf16.mxu1 %v12729_v52  ;;  %v12778_v52 = vld [vmem:[#allocation11 + $0x528] ss:$16 sps:$4 sm:$0xff]  }
 0x61b   :  { %10019 = vmatpush1.bf16.msra.mxu0 %v12775_v53  ;;  %v12786_v53 = vld [vmem:[#allocation11 + $0x54c] ss:$16 sps:$4 sm:$0xff]  }
 0x61c   :  { %10119 = vmatpush1.bf16.msra.mxu1 %v12727_v57  ;;  %10020 = vmatprep.subr.bf16.mxu0 %v12783_v11  ;;  %v12784_v57 = vld [vmem:[#allocation11 + $0x548] ss:$16 sps:$4 sm:$0xff]   ;;  %v12792_v11 = vld [vmem:[#allocation11 + $0x56c] ss:$16 sps:$4 sm:$0xff]  }
 0x61d   :  { %10120 = vmatprep.subr.bf16.mxu1 %v12732_v17  ;;  %v12790_v17 = vld [vmem:[#allocation11 + $0x568] ss:$16 sps:$4 sm:$0xff]  }
 0x61f   :  { %10021 = vmatpush1.bf16.msra.mxu0 %v12781_v63  ;;  %v12798_v63 = vld [vmem:[#allocation11 + $0x58c] ss:$16 sps:$4 sm:$0xff]  }
 0x620   :  { %10121 = vmatpush1.bf16.msra.mxu1 %v12730_v25  ;;  %10022 = vmatprep.subr.bf16.mxu0 %v12789_v20  ;;  %v12796_v25 = vld [vmem:[#allocation11 + $0x588] ss:$16 sps:$4 sm:$0xff]   ;;  %v12804_v20 = vld [vmem:[#allocation11 + $0x5ac] ss:$16 sps:$4 sm:$0xff]  }
 0x621   :  { %10122 = vmatprep.subr.bf16.mxu1 %v12735_v21  ;;  %v12802_v21 = vld [vmem:[#allocation11 + $0x5a8] ss:$16 sps:$4 sm:$0xff]  }
 0x623   :  { %10023 = vmatpush1.bf16.msra.mxu0 %v12787_v24  ;;  %v12810_v24 = vld [vmem:[#allocation11 + $0x5cc] ss:$16 sps:$4 sm:$0xff]  }
 0x624   :  { %10123 = vmatpush1.bf16.msra.mxu1 %v12733_v8  ;;  %10024 = vmatprep.subr.bf16.mxu0 %v12795_v27  ;;  %v12808_v8 = vld [vmem:[#allocation11 + $0x5c8] ss:$16 sps:$4 sm:$0xff]   ;;  %v12816_v27 = vld [vmem:[#allocation11 + $0x5ec] ss:$16 sps:$4 sm:$0xff]  }
 0x625   :  { %10124 = vmatprep.subr.bf16.mxu1 %v12738_v51  ;;  %v12814_v51 = vld [vmem:[#allocation11 + $0x5e8] ss:$16 sps:$4 sm:$0xff]  }
 0x627   :  { %10025 = vmatpush1.bf16.msra.mxu0 %v12793_v29  ;;  %v12822_v29 = vld [vmem:[#allocation11 + $0x60c] ss:$16 sps:$4 sm:$0xff]  }
 0x628   :  { %10125 = vmatpush1.bf16.msra.mxu1 %v12736_v32  ;;  %10026 = vmatprep.subr.bf16.mxu0 %v12801_v55  ;;  %v12820_v32 = vld [vmem:[#allocation11 + $0x608] ss:$16 sps:$4 sm:$0xff]   ;;  %v12828_v55 = vld [vmem:[#allocation11 + $0x62c] ss:$16 sps:$4 sm:$0xff]  }
 0x629   :  { %10126 = vmatprep.subr.bf16.mxu1 %v12741_v36  ;;  %v12826_v36 = vld [vmem:[#allocation11 + $0x628] ss:$16 sps:$4 sm:$0xff]  }
 0x62b   :  { %10027 = vmatpush1.bf16.msra.mxu0 %v12799_v62  ;;  %v12834_v62 = vld [vmem:[#allocation11 + $0x64c] ss:$16 sps:$4 sm:$0xff]  }
 0x62c   :  { %10127 = vmatpush1.bf16.msra.mxu1 %v12739_v31  ;;  %10028 = vmatprep.subr.bf16.mxu0 %v12807_v60  ;;  %v12832_v31 = vld [vmem:[#allocation11 + $0x648] ss:$16 sps:$4 sm:$0xff]   ;;  %v12840_v60 = vld [vmem:[#allocation11 + $0x66c] ss:$16 sps:$4 sm:$0xff]  }
 0x62d   :  { %10137 = vmatprep.subr.bf16.mxu1 %v12744_v56  ;;  %v12838_v56 = vld [vmem:[#allocation11 + $0x668] ss:$16 sps:$4 sm:$0xff]  }
 0x62f   :  { %10129 = vmatmul.mubr.bf16.vlgmr.msra.gmra.mrb[20].mxu1 %v13762_v2  ;;  %10029 = vmatpush1.bf16.msra.mxu0 %v12805_v34  ;;  %v12823_v2 = vld [vmem:[#allocation11 + $0x740] ss:$16 sps:$4 sm:$0xff]   ;;  %v12846_v34 = vld [vmem:[#allocation11 + $0x68c] ss:$16 sps:$4 sm:$0xff]  }
 0x630   :  { %10138 = vmatpush1.bf16.msra.mxu1 %v12742_v38  ;;  %10169 = vmatprep.mubr.bf16.mxu1 %v13771_v18  ;;  %v12847_v18 = vld [vmem:[#allocation11 + $0x7c0] ss:$16 sps:$4 sm:$0xff]   ;;  %v12844_v38 = vld [vmem:[#allocation11 + $0x688] ss:$16 sps:$4 sm:$0xff]  }
 0x631   :  { %10139 = vmatprep.subr.bf16.mxu1 %v12747_v46  ;;  %10030 = vmatprep.subr.bf16.mxu0 %v12813_v22  ;;  %v12852_v46 = vld [vmem:[#allocation11 + $0x6ac] ss:$16 sps:$4 sm:$0xff]  }
 0x632   :  { %v13000_v22 = vld [vmem:[#allocation10] sm:$0xff] }
 0x633   :  { %10031 = vmatpush1.bf16.msra.mxu0 %v12811_v50  ;;  %v1872_v50 = vrot.slane %v13000_v22, %v13621_v47  ;;  %v12859_v47 = vld [vmem:[#allocation11 + $0x6e8] ss:$16 sps:$4 sm:$0xff]  }
 0x634   :  { %10140 = vmatpush1.bf16.msra.mxu1 %v12745_v9  ;;  %10032 = vmatprep.subr.bf16.mxu0 %v12819_v39  ;;  %v12850_v9 = vld [vmem:[#allocation11 + $0x6a8] ss:$16 sps:$4 sm:$0xff]   ;;  %v12858_v39 = vld [vmem:[#allocation11 + $0x6cc] ss:$16 sps:$4 sm:$0xff]  }
 0x635   :  { %10141 = vmatprep.subr.bf16.mxu1 %v12750_v30 }
 0x637   :  { %10033 = vmatpush1.bf16.msra.mxu0 %v12817_v40 }
 0x638   :  { %10142 = vmatpush1.bf16.msra.mxu1 %v12748_v4  ;;  %10034 = vmatprep.subr.bf16.mxu0 %v12825_v41 }
 0x639   :  { %10143 = vmatprep.subr.bf16.mxu1 %v12753_v33 }
 0x63b   :  { %10035 = vmatpush1.bf16.msra.mxu0 %v12823_v2  ;;  %v12856_v2 = vld [vmem:[#allocation11 + $0x6c8] ss:$16 sps:$4 sm:$0xff]  }
 0x63c   :  { %10144 = vmatpush1.bf16.msra.mxu1 %v12751_v42  ;;  %10036 = vmatprep.subr.bf16.mxu0 %v12831_v43 }
 0x63d   :  { %10145 = vmatprep.subr.bf16.mxu1 %v12756_v48  ;;  %v12861_v48 = vld [vmem:[#allocation11 + $0x6ec] ss:$16 sps:$4 sm:$0xff]  }
 0x63f   :  { %10037 = vmatpush1.bf16.msra.mxu0 %v12829_v49 }
 0x640   :  { %10146 = vmatpush1.bf16.msra.mxu1 %v12754_v35  ;;  %10038 = vmatprep.subr.bf16.mxu0 %v12837_v0  ;;  %v12886_v0 = vld [vmem:[#allocation14] ss:$8 sps:$4 sm:$0xff]  }
 0x641   :  { %10147 = vmatprep.subr.bf16.mxu1 %v12759_v59  ;;  %v12864_v59 = vld [vmem:[#allocation11 + $0x70c] ss:$16 sps:$4 sm:$0xff]  }
 0x643   :  { %10039 = vmatpush1.bf16.msra.mxu0 %v12835_v19  ;;  %v12891_v19 = vld [vmem:[#allocation14 + $0x14] ss:$8 sps:$4 sm:$0xff]  }
 0x644   :  { %10148 = vmatpush1.bf16.msra.mxu1 %v12757_v54  ;;  %10040 = vmatprep.subr.bf16.mxu0 %v12843_v13  ;;  %v12862_v54 = vld [vmem:[#allocation11 + $0x708] ss:$16 sps:$4 sm:$0xff]   ;;  %v12889_v13 = vld [vmem:[#allocation14 + $0x10] ss:$8 sps:$4 sm:$0xff]  }
 0x645   :  { %10149 = vmatprep.subr.bf16.mxu1 %v12762_v61  ;;  %v12867_v61 = vld [vmem:[#allocation11 + $0x72c] ss:$16 sps:$4 sm:$0xff]  }
 0x647   :  { %10041 = vmatpush1.bf16.msra.mxu0 %v12841_v1  ;;  %v12894_v1 = vld [vmem:[#allocation14 + $0x24] ss:$8 sps:$4 sm:$0xff]  }
 0x648   :  { %10150 = vmatpush1.bf16.msra.mxu1 %v12760_v6  ;;  %10042 = vmatprep.subr.bf16.mxu0 %v12849_v3  ;;  %v12865_v6 = vld [vmem:[#allocation11 + $0x728] ss:$16 sps:$4 sm:$0xff]   ;;  %v12892_v3 = vld [vmem:[#allocation14 + $0x20] ss:$8 sps:$4 sm:$0xff]  }
 0x649   :  { %10151 = vmatprep.subr.bf16.mxu1 %v12768_v58  ;;  %v12870_v58 = vld [vmem:[#allocation11 + $0x74c] ss:$16 sps:$4 sm:$0xff]  }
 0x64b   :  { %10043 = vmatpush1.bf16.msra.mxu0 %v12847_v18  ;;  %v12897_v18 = vld [vmem:[#allocation14 + $0x34] ss:$8 sps:$4 sm:$0xff]  }
 0x64c   :  { %10152 = vmatpush1.bf16.msra.mxu1 %v12766_v12  ;;  %10044 = vmatprep.subr.bf16.mxu0 %v12855_v15  ;;  %v12868_v12 = vld [vmem:[#allocation11 + $0x748] ss:$16 sps:$4 sm:$0xff]   ;;  %v12895_v15 = vld [vmem:[#allocation14 + $0x30] ss:$8 sps:$4 sm:$0xff]  }
 0x64d   :  { %10153 = vmatprep.subr.bf16.mxu1 %v12774_v5  ;;  %v12873_v5 = vld [vmem:[#allocation11 + $0x76c] ss:$16 sps:$4 sm:$0xff]  }
 0x64f   :  { %10045 = vmatpush1.bf16.msra.mxu0 %v12853_v7  ;;  %v12900_v7 = vld [vmem:[#allocation14 + $0x44] ss:$8 sps:$4 sm:$0xff]  }
 0x650   :  { %10154 = vmatpush1.bf16.msra.mxu1 %v12772_v37  ;;  %10623 = vmatprep.subr.bf16.mxu0 %v12888_v10  ;;  %v12871_v37 = vld [vmem:[#allocation11 + $0x768] ss:$16 sps:$4 sm:$0xff]   ;;  %v12898_v10 = vld [vmem:[#allocation14 + $0x40] ss:$8 sps:$4 sm:$0xff]  }
 0x651   :  { %10155 = vmatprep.subr.bf16.mxu1 %v12780_v44  ;;  %v12876_v44 = vld [vmem:[#allocation11 + $0x78c] ss:$16 sps:$4 sm:$0xff]  }
 0x654   :  { %10156 = vmatpush1.bf16.msra.mxu1 %v12778_v52  ;;  %v12903_v52 = vld [vmem:[#allocation14 + $0x54] ss:$8 sps:$4 sm:$0xff]  }
 0x655   :  { %10157 = vmatprep.subr.bf16.mxu1 %v12786_v53  ;;  %v12874_v53 = vld [vmem:[#allocation11 + $0x788] ss:$16 sps:$4 sm:$0xff]  }
 0x658   :  { %10158 = vmatpush1.bf16.msra.mxu1 %v12784_v57  ;;  %v12901_v57 = vld [vmem:[#allocation14 + $0x50] ss:$8 sps:$4 sm:$0xff]  }
 0x659   :  { %10159 = vmatprep.subr.bf16.mxu1 %v12792_v11  ;;  %v12879_v11 = vld [vmem:[#allocation11 + $0x7ac] ss:$16 sps:$4 sm:$0xff]  }
 0x65c   :  { %10160 = vmatpush1.bf16.msra.mxu1 %v12790_v17  ;;  %v12906_v17 = vld [vmem:[#allocation14 + $0x64] ss:$8 sps:$4 sm:$0xff]  }
 0x65d   :  { %10161 = vmatprep.subr.bf16.mxu1 %v12798_v63  ;;  %v12877_v63 = vld [vmem:[#allocation11 + $0x7a8] ss:$16 sps:$4 sm:$0xff]  }
 0x660   :  { %10162 = vmatpush1.bf16.msra.mxu1 %v12796_v25  ;;  %v12904_v25 = vld [vmem:[#allocation14 + $0x60] ss:$8 sps:$4 sm:$0xff]  }
 0x661   :  { %10163 = vmatprep.subr.bf16.mxu1 %v12804_v20  ;;  %v12882_v20 = vld [vmem:[#allocation11 + $0x7cc] ss:$16 sps:$4 sm:$0xff]  }
 0x664   :  { %10164 = vmatpush1.bf16.msra.mxu1 %v12802_v21  ;;  %v12909_v21 = vld [vmem:[#allocation14 + $0x74] ss:$8 sps:$4 sm:$0xff]  }
 0x665   :  { %10165 = vmatprep.subr.bf16.mxu1 %v12810_v24  ;;  %v12880_v24 = vld [vmem:[#allocation11 + $0x7c8] ss:$16 sps:$4 sm:$0xff]  }
 0x668   :  { %10166 = vmatpush1.bf16.msra.mxu1 %v12808_v8  ;;  %v12907_v8 = vld [vmem:[#allocation14 + $0x70] ss:$8 sps:$4 sm:$0xff]  }
 0x669   :  { %10167 = vmatprep.subr.bf16.mxu1 %v12816_v27  ;;  %v12885_v27 = vld [vmem:[#allocation11 + $0x7ec] ss:$16 sps:$4 sm:$0xff]  }
 0x66c   :  { %10168 = vmatpush1.bf16.msra.mxu1 %v12814_v51  ;;  %v12912_v51 = vld [vmem:[#allocation14 + $0x84] ss:$8 sps:$4 sm:$0xff]  }
 0x66d   :  { %10178 = vmatprep.subr.bf16.mxu1 %v12822_v29  ;;  %v12883_v29 = vld [vmem:[#allocation11 + $0x7e8] ss:$16 sps:$4 sm:$0xff]  }
 0x66f   :  { %10170 = vmatmul.mubr.bf16.vlgmr.msra.gmra.mrb[20].mxu1 %v13773_v45  ;;  %v1876_v45 = vrot.slane %v13000_v22, %v13596_v28  ;;  %v12925_v22 = vld [vmem:[#allocation14 + $0xd0] ss:$8 sps:$4 sm:$0xff]  }
 0x670   :  { %10179 = vmatpush1.bf16.msra.mxu1 %v12820_v32  ;;  %v12910_v32 = vld [vmem:[#allocation14 + $0x80] ss:$8 sps:$4 sm:$0xff]  }
 0x671   :  { %10180 = vmatprep.subr.bf16.mxu1 %v12828_v55  ;;  %v12915_v55 = vld [vmem:[#allocation14 + $0x94] ss:$8 sps:$4 sm:$0xff]  }
 0x674   :  { %10181 = vmatpush1.bf16.msra.mxu1 %v12826_v36  ;;  %v12913_v36 = vld [vmem:[#allocation14 + $0x90] ss:$8 sps:$4 sm:$0xff]  }
 0x675   :  { %10182 = vmatprep.subr.bf16.mxu1 %v12834_v62  ;;  %v12918_v62 = vld [vmem:[#allocation14 + $0xa4] ss:$8 sps:$4 sm:$0xff]  }
 0x678   :  { %10183 = vmatpush1.bf16.msra.mxu1 %v12832_v31  ;;  %v12916_v31 = vld [vmem:[#allocation14 + $0xa0] ss:$8 sps:$4 sm:$0xff]  }
 0x679   :  { %10184 = vmatprep.subr.bf16.mxu1 %v12840_v60  ;;  %v12921_v60 = vld [vmem:[#allocation14 + $0xb4] ss:$8 sps:$4 sm:$0xff]  }
 0x67c   :  { %10185 = vmatpush1.bf16.msra.mxu1 %v12838_v56  ;;  %v12919_v56 = vld [vmem:[#allocation14 + $0xb0] ss:$8 sps:$4 sm:$0xff]  }
 0x67d   :  { %10186 = vmatprep.subr.bf16.mxu1 %v12846_v34  ;;  %v12924_v34 = vld [vmem:[#allocation14 + $0xc4] ss:$8 sps:$4 sm:$0xff]  }
 0x680   :  { %10187 = vmatpush1.bf16.msra.mxu1 %v12844_v38  ;;  %v12922_v38 = vld [vmem:[#allocation14 + $0xc0] ss:$8 sps:$4 sm:$0xff]  }
 0x681   :  { %10188 = vmatprep.subr.bf16.mxu1 %v12852_v46  ;;  %v12927_v46 = vld [vmem:[#allocation14 + $0xd4] ss:$8 sps:$4 sm:$0xff]  }
 0x682   :  { %v8310_v30 = vpop.f32.mrb[16].mxu1 }
 0x683   :  { %v12336_v40 = vadd.f32 %v8310_v30, %v1872_v50  ;;  %v8312_v4 = vpop.f32.mrb[17].mxu1  ;;  %v12930_v50 = vld [vmem:[#allocation14 + $0xe4] ss:$8 sps:$4 sm:$0xff]  }
 0x684   :  { %v12337_v41 = vadd.f32 %v8312_v4, %v1876_v45  ;;  %v8314_v33 = vpop.f32.mrb[18].mxu1  ;;  %10189 = vmatpush1.bf16.msra.mxu1 %v12850_v9  ;;  %v12928_v45 = vld [vmem:[#allocation14 + $0xe0] ss:$8 sps:$4 sm:$0xff]   ;;  %v12933_v9 = vld [vmem:[#allocation14 + $0xf4] ss:$8 sps:$4 sm:$0xff]  }
 0x685   :  { %v8323_v42 = vmax.f32 %v12336_v40, 0.0  ;;  %v8315_v43 = vpop.f32.mrb[19].mxu1  ;;  %10190 = vmatprep.subr.bf16.mxu1 %v12858_v39  ;;  %v12931_v39 = vld [vmem:[#allocation14 + $0xf0] ss:$8 sps:$4 sm:$0xff]   ;;  %v12936_v30 = vld [vmem:[#allocation14 + $0x104] ss:$8 sps:$4 sm:$0xff]  }
 0x686   :  { %v8324_v49 = vmax.f32 %v12337_v41, 0.0  ;;  %v12982_v40 = vld [vmem:[#allocation17 + $0x40] sm:$0xff]   ;;  %v12984_v41 = vld [vmem:[#allocation17 + $0x48] sm:$0xff]   ;;  %v12988_v43 = vld [vmem:[#allocation17 + $0x58] sm:$0xff]  }
 0x687   :  { %v13782_v28 = vpack.c.bf16 %v8323_v42, %v8323_v42  ;;  %v12983_v4 = vld [vmem:[#allocation17] sm:$0xff]   ;;  %v12985_v33 = vld [vmem:[#allocation17 + $0x8] sm:$0xff]   ;;  %v12987_v42 = vld [vmem:[#allocation17 + $0x10] sm:$0xff]  }
 0x688   :  { %v8332_v35 = vpack.c.bf16 %v8324_v49, %v8324_v49  ;;  %10191 = vmatpush1.bf16.msra.mxu1 %v12856_v2  ;;  %v12986_v2 = vld [vmem:[#allocation17 + $0x50] sm:$0xff]   ;;  %v12990_v49 = vld [vmem:[#allocation17 + $0x60] sm:$0xff]  }
 0x689   :  { %10192 = vmatprep.subr.bf16.mxu1 %v12861_v48  ;;  %v12989_v48 = vld [vmem:[#allocation17 + $0x18] sm:$0xff]  }
 0x68a   :  { %10046 = vmatprep.mubr.bf16.mxu0 %v8332_v35  ;;  %10210 = vmatprep.mubr.bf16.mxu1 %v8332_v35  ;;  %v12991_v35 = vld [vmem:[#allocation17 + $0x20] sm:$0xff]  }
 0x68b   :  { %10047 = vmatmul.mubr.bf16.vlgmr.msra.gmra.mrb[32].mxu0 %v13782_v28 }
 0x68c   :  { %10193 = vmatpush1.bf16.msra.mxu1 %v12859_v47  ;;  %10624 = vmatpush1.bf16.msra.mxu0 %v12886_v0  ;;  %v12992_v47 = vld [vmem:[#allocation17 + $0x68] sm:$0xff]  }
 0x68d   :  { %10194 = vmatprep.subr.bf16.mxu1 %v12864_v59  ;;  %10625 = vmatprep.subr.bf16.mxu0 %v12891_v19  ;;  %v12993_v0 = vld [vmem:[#allocation17 + $0x28] sm:$0xff]  }
 0x690   :  { %10195 = vmatpush1.bf16.msra.mxu1 %v12862_v54  ;;  %10626 = vmatpush1.bf16.msra.mxu0 %v12889_v13 }
 0x691   :  { %10196 = vmatprep.subr.bf16.mxu1 %v12867_v61  ;;  %10627 = vmatprep.subr.bf16.mxu0 %v12894_v1 }
 0x694   :  { %10197 = vmatpush1.bf16.msra.mxu1 %v12865_v6  ;;  %10628 = vmatpush1.bf16.msra.mxu0 %v12892_v3 }
 0x695   :  { %10198 = vmatprep.subr.bf16.mxu1 %v12870_v58  ;;  %10629 = vmatprep.subr.bf16.mxu0 %v12897_v18 }
 0x698   :  { %10199 = vmatpush1.bf16.msra.mxu1 %v12868_v12  ;;  %10630 = vmatpush1.bf16.msra.mxu0 %v12895_v15  ;;  %v12934_v15 = vld [vmem:[#allocation14 + $0x100] ss:$8 sps:$4 sm:$0xff]  }
 0x699   :  { %10200 = vmatprep.subr.bf16.mxu1 %v12873_v5  ;;  %10631 = vmatprep.subr.bf16.mxu0 %v12900_v7  ;;  %v12939_v7 = vld [vmem:[#allocation14 + $0x114] ss:$8 sps:$4 sm:$0xff]  }
 0x69c   :  { %10201 = vmatpush1.bf16.msra.mxu1 %v12871_v37  ;;  %10632 = vmatpush1.bf16.msra.mxu0 %v12898_v10  ;;  %v12937_v37 = vld [vmem:[#allocation14 + $0x110] ss:$8 sps:$4 sm:$0xff]   ;;  %v12942_v10 = vld [vmem:[#allocation14 + $0x124] ss:$8 sps:$4 sm:$0xff]  }
 0x69d   :  { %10202 = vmatprep.subr.bf16.mxu1 %v12876_v44  ;;  %10633 = vmatprep.subr.bf16.mxu0 %v12903_v52  ;;  %v12940_v44 = vld [vmem:[#allocation14 + $0x120] ss:$8 sps:$4 sm:$0xff]   ;;  %v12945_v52 = vld [vmem:[#allocation14 + $0x134] ss:$8 sps:$4 sm:$0xff]  }
 0x6a0   :  { %10203 = vmatpush1.bf16.msra.mxu1 %v12874_v53  ;;  %10634 = vmatpush1.bf16.msra.mxu0 %v12901_v57  ;;  %v12943_v53 = vld [vmem:[#allocation14 + $0x130] ss:$8 sps:$4 sm:$0xff]   ;;  %v12948_v57 = vld [vmem:[#allocation14 + $0x144] ss:$8 sps:$4 sm:$0xff]  }
 0x6a1   :  { %10204 = vmatprep.subr.bf16.mxu1 %v12879_v11  ;;  %10635 = vmatprep.subr.bf16.mxu0 %v12906_v17  ;;  %v12946_v11 = vld [vmem:[#allocation14 + $0x140] ss:$8 sps:$4 sm:$0xff]   ;;  %v12951_v17 = vld [vmem:[#allocation14 + $0x154] ss:$8 sps:$4 sm:$0xff]  }
 0x6a4   :  { %10205 = vmatpush1.bf16.msra.mxu1 %v12877_v63  ;;  %10636 = vmatpush1.bf16.msra.mxu0 %v12904_v25  ;;  %v12949_v63 = vld [vmem:[#allocation14 + $0x150] ss:$8 sps:$4 sm:$0xff]   ;;  %v12954_v25 = vld [vmem:[#allocation14 + $0x164] ss:$8 sps:$4 sm:$0xff]  }
 0x6a5   :  { %10206 = vmatprep.subr.bf16.mxu1 %v12882_v20  ;;  %10637 = vmatprep.subr.bf16.mxu0 %v12909_v21  ;;  %v12952_v20 = vld [vmem:[#allocation14 + $0x160] ss:$8 sps:$4 sm:$0xff]   ;;  %v12957_v21 = vld [vmem:[#allocation14 + $0x174] ss:$8 sps:$4 sm:$0xff]  }
 0x6a8   :  { %10207 = vmatpush1.bf16.msra.mxu1 %v12880_v24  ;;  %10638 = vmatpush1.bf16.msra.mxu0 %v12907_v8  ;;  %v12955_v24 = vld [vmem:[#allocation14 + $0x170] ss:$8 sps:$4 sm:$0xff]  }
 0x6a9   :  { %10208 = vmatprep.subr.bf16.mxu1 %v12885_v27  ;;  %10639 = vmatprep.subr.bf16.mxu0 %v12912_v51  ;;  %v12960_v27 = vld [vmem:[#allocation14 + $0x184] ss:$8 sps:$4 sm:$0xff]  }
 0x6ac   :  { %10209 = vmatpush1.bf16.msra.mxu1 %v12883_v29  ;;  %10640 = vmatpush1.bf16.msra.mxu0 %v12910_v32 }
 0x6ad   :  { %10641 = vmatprep.subr.bf16.mxu0 %v12915_v55  ;;  %12306 = vmatprep.subr.bf16.mxu1 %v12982_v40  ;;  %v12978_v40 = vld [vmem:[#allocation14 + $0x1e4] ss:$8 sps:$4 sm:$0xff]  }
 0x6af   :  { %10211 = vmatmul.mubr.bf16.vlgmr.msra.gmra.mrb[20].mxu1 %v13782_v28  ;;  %v13786_v28 = vld [vmem:[#allocation13] sm:$0xf] }
 0x6b0   :  { %10642 = vmatpush1.bf16.msra.mxu0 %v12913_v36  ;;  %12307 = vmatpush3.bf16.msra.mxu1 %v12983_v4  ;;  %v8594_v59 = vrot.slane %v13786_v28, %v13533_v14  ;;  %v8598_v19 = vrot.slane %v13786_v28, %v13538_v16  ;;  %v8606_v8 = vrot.slane %v13786_v28, %v13548_v26  ;;  %v12958_v36 = vld [vmem:[#allocation14 + $0x180] ss:$8 sps:$4 sm:$0xff]  }
 0x6b1   :  { %10643 = vmatprep.subr.bf16.mxu0 %v12918_v62  ;;  %12308 = vmatprep.subr.bf16.mxu1 %v12984_v41  ;;  %v12964_v26 = vld [vmem:[#allocation14 + $0x1a0] ss:$8 sps:$4 sm:$0xff]  }
 0x6b2   :  { %v12976_v4 = vld [vmem:[#allocation14 + $0x1e0] ss:$8 sps:$4 sm:$0xff]  }
 0x6b4   :  { %10644 = vmatpush1.bf16.msra.mxu0 %v12916_v31  ;;  %12309 = vmatpush3.bf16.msra.mxu1 %v12985_v33  ;;  %v12963_v31 = vld [vmem:[#allocation14 + $0x194] ss:$8 sps:$4 sm:$0xff]  }
 0x6b5   :  { %10645 = vmatprep.subr.bf16.mxu0 %v12921_v60  ;;  %12310 = vmatprep.subr.bf16.mxu1 %v12986_v2  ;;  %v12981_v33 = vld [vmem:[#allocation14 + $0x1f4] ss:$8 sps:$4 sm:$0xff]   ;;  %v12979_v2 = vld [vmem:[#allocation14 + $0x1f0] ss:$8 sps:$4 sm:$0xff]  }
 0x6b8   :  { %10646 = vmatpush1.bf16.msra.mxu0 %v12919_v56  ;;  %12311 = vmatpush3.bf16.msra.mxu1 %v12987_v42 }
 0x6b9   :  { %10647 = vmatprep.subr.bf16.mxu0 %v12924_v34  ;;  %12312 = vmatprep.subr.bf16.mxu1 %v12988_v43  ;;  %v12961_v34 = vld [vmem:[#allocation14 + $0x190] ss:$8 sps:$4 sm:$0xff]  }
 0x6bc   :  { %10648 = vmatpush1.bf16.msra.mxu0 %v12922_v38  ;;  %12313 = vmatpush3.bf16.msra.mxu1 %v12989_v48  ;;  %v12966_v38 = vld [vmem:[#allocation14 + $0x1a4] ss:$8 sps:$4 sm:$0xff]   ;;  %v12994_v48 = vld [vmem:[#allocation17 + $0x70] sm:$0xff]  }
 0x6bd   :  { %10649 = vmatprep.subr.bf16.mxu0 %v12927_v46  ;;  %12314 = vmatprep.subr.bf16.mxu1 %v12990_v49  ;;  %v12969_v46 = vld [vmem:[#allocation14 + $0x1b4] ss:$8 sps:$4 sm:$0xff]  }
 0x6be   :  { %v12995_v49 = vld [vmem:[#allocation17 + $0x30] sm:$0xff]  }
 0x6c0   :  { %10650 = vmatpush1.bf16.msra.mxu0 %v12925_v22  ;;  %12315 = vmatpush3.bf16.msra.mxu1 %v12991_v35  ;;  %v12967_v22 = vld [vmem:[#allocation14 + $0x1b0] ss:$8 sps:$4 sm:$0xff]  }
 0x6c1   :  { %10651 = vmatprep.subr.bf16.mxu0 %v12930_v50  ;;  %12316 = vmatprep.subr.bf16.mxu1 %v12992_v47  ;;  %v12972_v50 = vld [vmem:[#allocation14 + $0x1c4] ss:$8 sps:$4 sm:$0xff]   ;;  %v12996_v35 = vld [vmem:[#allocation17 + $0x78] sm:$0xff]  }
 0x6c2   :  { %v10291_v47 = vld [vmem:[#allocation16] sm:$0x3] }
 0x6c4   :  { %10652 = vmatpush1.bf16.msra.mxu0 %v12928_v45  ;;  %12317 = vmatpush3.bf16.msra.mxu1 %v12993_v0  ;;  %v12970_v45 = vld [vmem:[#allocation14 + $0x1c0] ss:$8 sps:$4 sm:$0xff]   ;;  %v10296_v0 = vrot.slane %v10291_v47, %v13533_v14 }
 0x6c5   :  { %10653 = vmatprep.subr.bf16.mxu0 %v12933_v9  ;;  %v12975_v9 = vld [vmem:[#allocation14 + $0x1d4] ss:$8 sps:$4 sm:$0xff]   ;;  %12318 = vmatprep.subr.bf16.mxu1 %v12994_v48 }
 0x6c8   :  { %10654 = vmatpush1.bf16.msra.mxu0 %v12931_v39  ;;  %v12973_v39 = vld [vmem:[#allocation14 + $0x1d0] ss:$8 sps:$4 sm:$0xff]   ;;  %12319 = vmatpush3.bf16.msra.mxu1 %v12995_v49 }
 0x6c9   :  { %10664 = vmatprep.subr.bf16.mxu0 %v12936_v30  ;;  %v8602_v30 = vrot.slane %v13786_v28, %v13545_v23  ;;  %v12997_v23 = vld [vmem:[#allocation17 + $0x38] sm:$0xff]   ;;  %12320 = vmatprep.subr.bf16.mxu1 %v12996_v35  ;;  %v10300_v28 = vrot.slane %v10291_v47, %v13538_v16 }
 0x6cc   :  { %12321 = vmatpush3.bf16.msra.mxu1 %v12997_v23 }
 0x75e   :  { %v10048_v54 = vpop.f32.mrb[32].mxu0 }
 0x75f   :  { %v12338_v13 = vadd.f32 %v10048_v54, %v8594_v59  ;;  %v10050_v61 = vpop.f32.mrb[33].mxu0 }
 0x760   :  { %v12339_v1 = vadd.f32 %v10050_v61, %v8598_v19  ;;  %v10052_v6 = vpop.f32.mrb[34].mxu0 }
 0x761   :  { %v10219_v3 = vmax.f32 %v12338_v13, 0.0  ;;  %v10053_v58 = vpop.f32.mrb[35].mxu0 }
 0x762   :  { %v10220_v18 = vmax.f32 %v12339_v1, 0.0 }
 0x763   :  { %v10223_v5 = vpack.c.bf16 %v10219_v3, %v10219_v3 }
 0x764   :  { %v10224_v12 = vpack.c.bf16 %v10220_v18, %v10220_v18 }
 0x766   :  { %10655 = vmatprep.mubr.bf16.mxu0 %v10224_v12 }
 0x767   :  { %10656 = vmatmul.mubr.bf16.vlgmr.msra.gmra.mrb[36].mxu0 %v10223_v5 }
 0x768   :  { %10665 = vmatpush1.bf16.msra.mxu0 %v12934_v15  ;;  %v12289_v15 = vld [vmem:[#allocation19] ss:$0 sm:$0xff] }
 0x769   :  { %10666 = vmatprep.subr.bf16.mxu0 %v12939_v7 }
 0x76c   :  { %10667 = vmatpush1.bf16.msra.mxu0 %v12937_v37 }
 0x76d   :  { %10668 = vmatprep.subr.bf16.mxu0 %v12942_v10 }
 0x770   :  { %10669 = vmatpush1.bf16.msra.mxu0 %v12940_v44 }
 0x771   :  { %10670 = vmatprep.subr.bf16.mxu0 %v12945_v52 }
 0x774   :  { %10671 = vmatpush1.bf16.msra.mxu0 %v12943_v53 }
 0x775   :  { %10672 = vmatprep.subr.bf16.mxu0 %v12948_v57 }
 0x778   :  { %10673 = vmatpush1.bf16.msra.mxu0 %v12946_v11 }
 0x779   :  { %10674 = vmatprep.subr.bf16.mxu0 %v12951_v17 }
 0x77c   :  { %10675 = vmatpush1.bf16.msra.mxu0 %v12949_v63 }
 0x77d   :  { %10676 = vmatprep.subr.bf16.mxu0 %v12954_v25 }
 0x780   :  { %10677 = vmatpush1.bf16.msra.mxu0 %v12952_v20 }
 0x781   :  { %10678 = vmatprep.subr.bf16.mxu0 %v12957_v21 }
 0x782   :  { %v10212_v51 = vpop.f32.mrb[20].mxu1 }
 0x783   :  { %v10214_v29 = vpop.f32.mrb[21].mxu1  ;;  %v12340_v41 = vadd.f32 %v10212_v51, %v8602_v30 }
 0x784   :  { %v12341_v32 = vadd.f32 %v10214_v29, %v8606_v8  ;;  %10679 = vmatpush1.bf16.msra.mxu0 %v12955_v24  ;;  %v10216_v55 = vpop.f32.mrb[22].mxu1 }
 0x785   :  { %v10217_v62 = vpop.f32.mrb[23].mxu1  ;;  %10680 = vmatprep.subr.bf16.mxu0 %v12960_v27  ;;  %v10221_v42 = vmax.f32 %v12340_v41, 0.0 }
 0x786   :  { %v10222_v60 = vmax.f32 %v12341_v32, 0.0 }
 0x787   :  { %v10225_v43 = vpack.c.bf16 %v10221_v42, %v10221_v42 }
 0x788   :  { %v10226_v56 = vpack.c.bf16 %v10222_v60, %v10222_v60  ;;  %10681 = vmatpush1.bf16.msra.mxu0 %v12958_v36 }
 0x789   :  { %10682 = vmatprep.subr.bf16.mxu0 %v12963_v31 }
 0x78a   :  { %10696 = vmatprep.mubr.bf16.mxu0 %v10226_v56 }
 0x78c   :  { %10683 = vmatpush1.bf16.msra.mxu0 %v12961_v34 }
 0x78d   :  { %10684 = vmatprep.subr.bf16.mxu0 %v12966_v38 }
 0x790   :  { %10685 = vmatpush1.bf16.msra.mxu0 %v12964_v26 }
 0x791   :  { %10686 = vmatprep.subr.bf16.mxu0 %v12969_v46 }
 0x794   :  { %10687 = vmatpush1.bf16.msra.mxu0 %v12967_v22 }
 0x795   :  { %10688 = vmatprep.subr.bf16.mxu0 %v12972_v50 }
 0x798   :  { %10689 = vmatpush1.bf16.msra.mxu0 %v12970_v45 }
 0x799   :  { %10690 = vmatprep.subr.bf16.mxu0 %v12975_v9 }
 0x79c   :  { %10691 = vmatpush1.bf16.msra.mxu0 %v12973_v39 }
 0x79d   :  { %10692 = vmatprep.subr.bf16.mxu0 %v12978_v40 }
 0x7a0   :  { %10693 = vmatpush1.bf16.msra.mxu0 %v12976_v4 }
 0x7a1   :  { %10694 = vmatprep.subr.bf16.mxu0 %v12981_v33 }
 0x7a4   :  { %10695 = vmatpush1.bf16.msra.mxu0 %v12979_v2 }
 0x7a7   :  { %10697 = vmatmul.mubr.bf16.vlgmr.msra.gmra.mrb[36].mxu0 %v10225_v43 }
 0x87a   :  { %v10698_v59 = vpop.f32.mrb[36].mxu0 }
 0x87b   :  { %v12342_v19 = vadd.f32 %v10698_v59, %v10296_v0  ;;  %v10700_v54 = vpop.f32.mrb[37].mxu0 }
 0x87c   :  { %v12343_v13 = vadd.f32 %v10700_v54, %v10300_v28  ;;  %v10702_v61 = vpop.f32.mrb[38].mxu0 }
 0x87d   :  { %v10705_v1 = vmax.f32 %v12342_v19, 0.0  ;;  %v10703_v6 = vpop.f32.mrb[39].mxu0 }
 0x87e   :  { %v10706_v3 = vmax.f32 %v12343_v13, 0.0 }
 0x87f   :  { %v10707_v18 = vpack.c.bf16 %v10705_v1, %v10705_v1 }
 0x880   :  { %v10708_v58 = vpack.c.bf16 %v10706_v3, %v10706_v3 }
 0x882   :  { %10876 = vmatprep.mubr.bf16.mxu1 %v10708_v58 }
 0x883   :  { %10877 = vmatmul.mubr.bf16.vlgmr.msra.gmra.mrb[24].mxu1 %v10707_v18 }
 0x956   :  { %v12322_v12 = vpop.f32.mrb[24].mxu1 }
 0x957   :  { %v12323_v5 = vpop.f32.mrb[25].mxu1 }
 0x958   :  { %v12324_v14 = vadd.f32 %v12323_v5, %v12322_v12  ;;  %v12325_v7 = vpop.f32.mrb[26].mxu1 }
 0x959   :  { %v12326_v16 = vpop.f32.mrb[27].mxu1 }
 0x95a   :  { %v10879_v37 = vadd.f32 %v12324_v14, %v12289_v15 }
 0x95c   :  { %10884 = vst [vmem:[#allocation20] sm:$0xff] %v10879_v37 }
 0x95d   :  { %13254 = shalt.err (!%p13251_p8)
}
 0x95e   :  { %s13255_s19 = scalar_lea.hbm %s13821_s11, 128 }
 0x95f   :  { %p13256_p9 = scmp.ne.s32.totalorder %s13821_s11, %s13255_s19  ;;  %p13259_p10 = scmp.lt.u32.totalorder %s13255_s19, %s13821_s11 }
 0x961   :  { %p13261_p11 = pnand %p13259_p10, %p13256_p9 }
 0x963   :  { %13264 = shalt.err (!%p13261_p11)
}
 0x964   :  { %10894 = dma.vmem_to_hbm [thread:$0]  %s10892_s18, 128, %s13821_s11, [#allocation4]  }
 0x965   :  { %13277 = dma.done.wait [#allocation4], 128  }
 0x966   :  { %13278 = vsyncadd [#allocation4], 4294967168 }
 0x967   :  { %10898 = vsyncpa [#allocation3], 1 }
 0x968   :  { %10899 = vsyncpa [#allocation6], 1 }
 0x969   :  { %10900 = vsyncpa [#allocation9], 1 }
 0x96a   :  { %10901 = vsyncpa [#allocation12], 1 }
 0x96b   :  { %10902 = vsyncpa [#allocation15], 1 }
 0x96c   :  { %10903 = vsyncpa [#allocation18], 1 }
 0x96d   :  { %10904 = vsyncpa [#allocation4], 1 }

</bundles_post_ra>
